<compile_context>
chip_gen: v7x
topology: tpu7x:2x2x1
jax: 0.10.0
libtpu: 0.0.40
codegen_flags: <defaults>
</compile_context>

<pallas_src>
import functools

import jax
import jax.numpy as jnp
from jax import lax
from jax.experimental import pallas as pl
from jax.experimental.pallas import tpu as pltpu


# -----------------------------------------------------------------------------
# Network geometry (VALID convs): k8 s4 -> k3 s2 -> k3 s1
# -----------------------------------------------------------------------------
def _conv_dims(H, W):
    H1, W1 = (H - 8) // 4 + 1, (W - 8) // 4 + 1
    H2, W2 = (H1 - 3) // 2 + 1, (W1 - 3) // 2 + 1
    H3, W3 = H2 - 2, W2 - 2
    return H1, W1, H2, W2, H3, W3


# -----------------------------------------------------------------------------
# The single fused kernel.
#   Inputs : conv1 im2col patches (rows padded to 8, 64*Cin) bf16, all weights
#            (bf16; w4 stays in HBM and is DMA'd manually) and biases (f32,
#            shape (1, N)).
#   Scratch: f32 conv activations + im2col patch matrices, the (B,960) flatten
#            buffer, the w4 VMEM buffer and its DMA semaphore.
#   Output : (B, 128) f32 (fc5 padded to 128 lanes).
# -----------------------------------------------------------------------------
def _fused_net_kernel(p1_ref, w1_ref, b1_ref, w2_ref, b2_ref, w3_ref, b3_ref,
                      w4_hbm, b4_ref, w5_ref, b5_ref, o_ref,
                      x1_s, p2_s, x2_s, p3_s, x3_s, flat_s, w4_vmem, w4_sem,
                      *, B, H1, W1, H2, W2, H3, W3):
    f32 = jnp.float32
    bf16 = jnp.bfloat16
    C1 = w1_ref.shape[1]          # 32
    C2 = w2_ref.shape[1]          # 64
    C3 = w3_ref.shape[1]          # 64

    # ---- start the big (~1 MB) fc4-weight DMA first; it overlaps all of the
    #      conv1-conv3 compute below and is waited on right before fc4.
    w4_copy = pltpu.make_async_copy(w4_hbm, w4_vmem, w4_sem)
    w4_copy.start()

    # ---- conv1 (8x8, stride 4): one MXU matmul over the pre-built patches.
    a1 = jnp.dot(p1_ref[...], w1_ref[...], preferred_element_type=f32)
    x1_s[...] = jnp.maximum(a1 + b1_ref[...], 0.0)          # (rows_pad, 32)

    # ---- conv2 (3x3, stride 2): build the full (B*H2*W2, 9*C1) im2col patch
    #      matrix in VMEM (one stride-2 read + lane-band store per tap/row),
    #      then a single (70,288)x(288,64) matmul + bias + ReLU.
    for i in range(3):
        for j in range(3):
            band = (i * 3 + j) * C1
            for b in range(B):
                for ho in range(H2):
                    src = b * (H1 * W1) + (2 * ho + i) * W1 + j
                    dst = (b * H2 + ho) * W2
                    p2_s[pl.ds(dst, W2), pl.ds(band, C1)] = \
                        x1_s[pl.ds(src, W2, stride=2), :]
    a2 = jnp.dot(p2_s[...].astype(bf16), w2_ref[...], preferred_element_type=f32)
    x2_s[...] = jnp.maximum(a2 + b2_ref[...], 0.0)           # (B*H2*W2, 64)

    # ---- conv3 (3x3, stride 1): same scheme with contiguous reads, then one
    #      (30,576)x(576,64) matmul.
    for i in range(3):
        for j in range(3):
            band = (i * 3 + j) * C2
            for b in range(B):
                for ho in range(H3):
                    src = b * (H2 * W2) + (ho + i) * W2 + j
                    dst = (b * H3 + ho) * W3
                    p3_s[pl.ds(dst, W3), pl.ds(band, C2)] = \
                        x2_s[pl.ds(src, W3), :]
    a3 = jnp.dot(p3_s[...].astype(bf16), w3_ref[...], preferred_element_type=f32)
    x3_s[...] = jnp.maximum(a3 + b3_ref[...], 0.0)           # (B*H3*W3, 64)

    # ---- flatten to (B, 960): for each spatial position p, a stride-P read
    #      grabs that position for all batches at once and stores it at lane
    #      offset p*64.  The PyTorch NCHW flatten order is folded into w4's
    #      row permutation at init time, so (h, w, c) lane order is consumed
    #      directly - no transpose, no value concats.
    P = H3 * W3
    for p in range(P):
        flat_s[pl.ds(0, B), pl.ds(p * C3, C3)] = x3_s[pl.ds(p, B, stride=P), :]

    # ---- fc4 (wait for the overlapped weight DMA) + ReLU, then fc5
    #      (output padded to 128 lanes -> unmasked stores).
    w4_copy.wait()
    h = flat_s[...].astype(bf16)                              # (B, 960)
    h = jnp.dot(h, w4_vmem[...], preferred_element_type=f32) + b4_ref[...]
    h = jnp.maximum(h, 0.0).astype(bf16)                      # (B, 512)
    out = jnp.dot(h, w5_ref[...], preferred_element_type=f32) + b5_ref[...]
    o_ref[...] = out.astype(o_ref.dtype)                      # (B, 128)


def _full_spec(shape):
    return pl.BlockSpec(shape, lambda i: (0,) * len(shape))


def fused_net_pallas(patches1, kp, *, B, H1, W1, H2, W2, H3, W3):
    C1 = kp["w1"].shape[1]          # 32
    C2 = kp["w2"].shape[1]          # 64
    C3 = kp["w3"].shape[1]          # 64
    NP = kp["w5"].shape[1]          # 128 (padded fc5 output)
    rows_pad = patches1.shape[0]    # B*H1*W1 padded to a multiple of 8

    kernel = functools.partial(_fused_net_kernel, B=B, H1=H1, W1=W1,
                               H2=H2, W2=W2, H3=H3, W3=W3)
    args = (patches1, kp["w1"], kp["b1"], kp["w2"], kp["b2"], kp["w3"],
            kp["b3"], kp["w4"], kp["b4"], kp["w5"], kp["b5"])

    # w4 stays in HBM (pl.ANY) and is DMA'd manually inside the kernel so the
    # transfer overlaps the conv compute; everything else is a full VMEM block.
    in_specs = [_full_spec(a.shape) for a in args]
    in_specs[7] = pl.BlockSpec(memory_space=pl.ANY)

    flops = 2 * (rows_pad * patches1.shape[1] * C1
                 + B * H2 * W2 * 9 * C1 * C2
                 + B * H3 * W3 * 9 * C2 * C3
                 + B * kp["w4"].shape[0] * kp["w4"].shape[1]
                 + B * kp["w5"].shape[0] * NP)
    bytes_accessed = sum(int(a.size) * a.dtype.itemsize for a in args) + B * NP * 4

    return pl.pallas_call(
        kernel,
        out_shape=jax.ShapeDtypeStruct((B, NP), jnp.float32),
        grid=(1,),
        in_specs=in_specs,
        out_specs=_full_spec((B, NP)),
        scratch_shapes=[
            pltpu.VMEM((rows_pad, C1), jnp.float32),          # x1_s  conv1 out
            pltpu.VMEM((B * H2 * W2, 9 * C1), jnp.float32),   # p2_s  conv2 im2col
            pltpu.VMEM((B * H2 * W2, C2), jnp.float32),       # x2_s  conv2 out
            pltpu.VMEM((B * H3 * W3, 9 * C2), jnp.float32),   # p3_s  conv3 im2col
            pltpu.VMEM((B * H3 * W3, C3), jnp.float32),       # x3_s  conv3 out
            pltpu.VMEM((B, H3 * W3 * C3), jnp.float32),       # flat_s (B, 960)
            pltpu.VMEM(kp["w4"].shape, jnp.bfloat16),         # w4 VMEM buffer
            pltpu.SemaphoreType.DMA,                          # w4 DMA semaphore
        ],
        compiler_params=pltpu.CompilerParams(
            dimension_semantics=("arbitrary",)),
        cost_estimate=pl.CostEstimate(flops=int(flops), transcendentals=0,
                                      bytes_accessed=int(bytes_accessed)),
    )(*args)


# -----------------------------------------------------------------------------
# Wrapper-side glue: conv1 im2col via space-to-depth(4) (4 slices, not 64),
# rows zero-padded to a multiple of 8.  K-order of the patch columns is
# (i2, j2, di, dj, c); w1 rows are permuted to match at init time.
# -----------------------------------------------------------------------------
def _conv1_patches(x_nhwc):
    B, H, W, C = x_nhwc.shape
    assert H % 4 == 0 and W % 4 == 0
    Hb, Wb = H // 4, W // 4
    s2d = x_nhwc.reshape(B, Hb, 4, Wb, 4, C).transpose(0, 1, 3, 2, 4, 5)
    s2d = s2d.reshape(B, Hb, Wb, 16 * C)
    H1, W1 = Hb - 1, Wb - 1
    cols = [s2d[:, i:i + H1, j:j + W1, :] for i in range(2) for j in range(2)]
    patches = jnp.concatenate(cols, axis=-1)               # (B, H1, W1, 64*C)
    patches = patches.reshape(B * H1 * W1, 64 * C).astype(jnp.bfloat16)
    rows = B * H1 * W1
    rows_pad = ((rows + 7) // 8) * 8
    if rows_pad != rows:
        patches = jnp.pad(patches, ((0, rows_pad - rows), (0, 0)))
    return patches


@functools.partial(jax.jit, static_argnames=("n_out",))
def net_forward(kparams, x_nchw, n_out):
    x = jnp.transpose(x_nchw, (0, 2, 3, 1))                # NCHW -> NHWC
    B, H, W, _ = x.shape
    H1, W1, H2, W2, H3, W3 = _conv_dims(H, W)
    patches1 = _conv1_patches(x)
    out = fused_net_pallas(patches1, kparams, B=B, H1=H1, W1=W1,
                           H2=H2, W2=W2, H3=H3, W3=W3)
    return out[:, :n_out]


# -----------------------------------------------------------------------------
# Parameter init (matches PyTorch: kaiming_normal_ weights, default uniform
# biases) and one-time kernel-layout preparation.
# -----------------------------------------------------------------------------
def _kaiming_normal(key, shape, fan_in):
    return (2.0 / fan_in) ** 0.5 * jax.random.normal(key, shape, dtype=jnp.float32)


def _bias_uniform(key, shape, fan_in):
    bound = 1.0 / (fan_in ** 0.5)
    return jax.random.uniform(key, shape, jnp.float32, -bound, bound)


def init_params(key, n_channel, n_out):
    ks = jax.random.split(key, 10)
    p = {}
    p["w1"] = _kaiming_normal(ks[0], (8, 8, n_channel, 32), 8 * 8 * n_channel)
    p["b1"] = _bias_uniform(ks[1], (32,), 8 * 8 * n_channel)
    p["w2"] = _kaiming_normal(ks[2], (3, 3, 32, 64), 3 * 3 * 32)
    p["b2"] = _bias_uniform(ks[3], (64,), 3 * 3 * 32)
    p["w3"] = _kaiming_normal(ks[4], (3, 3, 64, 64), 3 * 3 * 64)
    p["b3"] = _bias_uniform(ks[5], (64,), 3 * 3 * 64)
    p["w4"] = _kaiming_normal(ks[6], (960, 512), 960)      # rows: c*H3*W3 + h*W3 + w
    p["b4"] = _bias_uniform(ks[7], (512,), 960)
    p["w5"] = _kaiming_normal(ks[8], (512, n_out), 512)
    p["b5"] = _bias_uniform(ks[9], (n_out,), 512)
    return p


def prepare_params(p, n_out, H3, W3):
    bf16 = jnp.bfloat16
    C = p["w1"].shape[2]
    # conv1 weight rows reordered to the space-to-depth patch order (i2,j2,di,dj,c).
    w1p = (p["w1"].reshape(2, 4, 2, 4, C, 32)
                  .transpose(0, 2, 1, 3, 4, 5)
                  .reshape(64 * C, 32)).astype(bf16)
    w2p = p["w2"].reshape(9 * 32, 64).astype(bf16)
    w3p = p["w3"].reshape(9 * 64, 64).astype(bf16)
    # fc4: fold NCHW-flatten row order (c*H3*W3 + hw) into a (hw*64 + c) order.
    w4p = (p["w4"].reshape(64, H3 * W3, 512)
                  .transpose(1, 0, 2)
                  .reshape(64 * H3 * W3, 512)).astype(bf16)
    # fc5: zero-pad output dim to 128 lanes.
    n_pad = 128
    w5p = jnp.zeros((512, n_pad), jnp.float32).at[:, :n_out].set(p["w5"]).astype(bf16)
    b5p = jnp.zeros((1, n_pad), jnp.float32).at[0, :n_out].set(p["b5"])
    return {
        "w1": w1p, "b1": p["b1"].reshape(1, 32),
        "w2": w2p, "b2": p["b2"].reshape(1, 64),
        "w3": w3p, "b3": p["b3"].reshape(1, 64),
        "w4": w4p, "b4": p["b4"].reshape(1, 512),
        "w5": w5p, "b5": b5p,
    }


# -----------------------------------------------------------------------------
# Pure-JAX reference of the original module (f32), for a self-check.
# -----------------------------------------------------------------------------
def reference_forward(p, x_nchw):
    x = jnp.transpose(x_nchw, (0, 2, 3, 1))

    def conv(x, w, b, s):
        y = lax.conv_general_dilated(x, w, (s, s), "VALID",
                                     dimension_numbers=("NHWC", "HWIO", "NHWC"))
        return jnp.maximum(y + b, 0.0)

    x = conv(x, p["w1"], p["b1"], 4)
    x = conv(x, p["w2"], p["b2"], 2)
    x = conv(x, p["w3"], p["b3"], 1)
    B = x.shape[0]
    x = jnp.transpose(x, (0, 3, 1, 2)).reshape(B, -1)      # NCHW flatten
    x = jnp.maximum(x @ p["w4"] + p["b4"], 0.0)
    return x @ p["w5"] + p["b5"]


if __name__ == "__main__":
    # fc4 expects 960 = 64 * 5 * 3 flattened features -> 64 x 48 spatial input.
    n_channel, n_out = 4, 8
    B, H, W = 2, 64, 48

    key = jax.random.PRNGKey(0)
    k_param, k_x = jax.random.split(key)
    params = init_params(k_param, n_channel, n_out)

    H1, W1, H2, W2, H3, W3 = _conv_dims(H, W)
    assert 64 * H3 * W3 == 960
    kparams = prepare_params(params, n_out, H3, W3)

    x = jax.random.normal(k_x, (B, n_channel, H, W), dtype=jnp.float32)

    out = net_forward(kparams, x, n_out=n_out)
    out = jax.block_until_ready(out)
    assert out.shape == (B, n_out), out.shape
    assert bool(jnp.all(jnp.isfinite(out)))

    # Correctness self-check against the f32 reference (bf16 MXU tolerance).
    ref = reference_forward(params, x)
    assert jnp.allclose(out, ref, rtol=1e-1, atol=1e-1), (
        float(jnp.max(jnp.abs(out - ref))))

    print("KERNEL_OK")
</pallas_src>

<mosaic_0001>
module attributes {stable_mosaic.version = 11 : i64} {
  func.func @_fused_net_kernel(%arg0: i32, %arg1: memref<336x256xbf16, #tpu.memory_space<vmem>>, %arg2: memref<256x32xbf16, #tpu.memory_space<vmem>>, %arg3: memref<1x32xf32, #tpu.memory_space<vmem>>, %arg4: memref<288x64xbf16, #tpu.memory_space<vmem>>, %arg5: memref<1x64xf32, #tpu.memory_space<vmem>>, %arg6: memref<576x64xbf16, #tpu.memory_space<vmem>>, %arg7: memref<1x64xf32, #tpu.memory_space<vmem>>, %arg8: memref<960x512xbf16, #tpu.memory_space<any>>, %arg9: memref<1x512xf32, #tpu.memory_space<vmem>>, %arg10: memref<512x128xbf16, #tpu.memory_space<vmem>>, %arg11: memref<1x128xf32, #tpu.memory_space<vmem>>, %arg12: memref<2x128xf32, #tpu.memory_space<vmem>>, %arg13: memref<336x32xf32, #tpu.memory_space<vmem>>, %arg14: memref<70x288xf32, #tpu.memory_space<vmem>>, %arg15: memref<70x64xf32, #tpu.memory_space<vmem>>, %arg16: memref<30x576xf32, #tpu.memory_space<vmem>>, %arg17: memref<30x64xf32, #tpu.memory_space<vmem>>, %arg18: memref<2x960xf32, #tpu.memory_space<vmem>>, %arg19: memref<960x512xbf16, #tpu.memory_space<vmem>>, %arg20: memref<!tpu.dma_semaphore, #tpu.memory_space<semaphore_mem>>) attributes {dimension_semantics = [#tpu.dimension_semantics<arbitrary>], iteration_bounds = array<i64: 1>, scalar_prefetch = 0 : i64, scratch_operands = 8 : i64, tpu.core_type = #tpu.core_type<tc>, window_params = [{pipeline_mode = #tpu.pipeline_mode<synchronous>, transform_indices = @transform_0, window_bounds = array<i64: 336, 256>}, {pipeline_mode = #tpu.pipeline_mode<synchronous>, transform_indices = @transform_1, window_bounds = array<i64: 256, 32>}, {pipeline_mode = #tpu.pipeline_mode<synchronous>, transform_indices = @transform_2, window_bounds = array<i64: 1, 32>}, {pipeline_mode = #tpu.pipeline_mode<synchronous>, transform_indices = @transform_3, window_bounds = array<i64: 288, 64>}, {pipeline_mode = #tpu.pipeline_mode<synchronous>, transform_indices = @transform_4, window_bounds = array<i64: 1, 64>}, {pipeline_mode = #tpu.pipeline_mode<synchronous>, transform_indices = @transform_5, window_bounds = array<i64: 576, 64>}, {pipeline_mode = #tpu.pipeline_mode<synchronous>, transform_indices = @transform_6, window_bounds = array<i64: 1, 64>}, {}, {pipeline_mode = #tpu.pipeline_mode<synchronous>, transform_indices = @transform_8, window_bounds = array<i64: 1, 512>}, {pipeline_mode = #tpu.pipeline_mode<synchronous>, transform_indices = @transform_9, window_bounds = array<i64: 512, 128>}, {pipeline_mode = #tpu.pipeline_mode<synchronous>, transform_indices = @transform_10, window_bounds = array<i64: 1, 128>}, {pipeline_mode = #tpu.pipeline_mode<synchronous>, transform_indices = @transform_11, window_bounds = array<i64: 2, 128>}]} {
    tpu.enqueue_dma source(%arg8 : memref<960x512xbf16, #tpu.memory_space<any>>) target(%arg19 : memref<960x512xbf16, #tpu.memory_space<vmem>>) target_semaphore(%arg20 : memref<!tpu.dma_semaphore, #tpu.memory_space<semaphore_mem>>)
    %c0 = arith.constant 0 : index
    %c0_0 = arith.constant 0 : index
    %0 = vector.load %arg1[%c0, %c0_0] : memref<336x256xbf16, #tpu.memory_space<vmem>>, vector<336x256xbf16>
    %c0_1 = arith.constant 0 : index
    %c0_2 = arith.constant 0 : index
    %1 = vector.load %arg2[%c0_1, %c0_2] : memref<256x32xbf16, #tpu.memory_space<vmem>>, vector<256x32xbf16>
    %cst = arith.constant dense<0.000000e+00> : vector<336x32xf32>
    %2 = tpu.matmul %0, %1, %cst {dimension_numbers = #tpu.dot_dimension_numbers<[1], [0], [0], [1], [0, 0, 1, 1], [], []>} : vector<336x256xbf16>, vector<256x32xbf16>, vector<336x32xf32> -> vector<336x32xf32>
    %c0_3 = arith.constant 0 : index
    %c0_4 = arith.constant 0 : index
    %3 = vector.load %arg3[%c0_3, %c0_4] : memref<1x32xf32, #tpu.memory_space<vmem>>, vector<1x32xf32>
    %4 = vector.broadcast %3 : vector<1x32xf32> to vector<336x32xf32>
    %5 = arith.addf %2, %4 : vector<336x32xf32>
    %cst_5 = arith.constant 0.000000e+00 : f32
    %6 = vector.broadcast %cst_5 : f32 to vector<336x32xf32>
    %7 = arith.maximumf %5, %6 : vector<336x32xf32>
    %c0_6 = arith.constant 0 : index
    %c0_7 = arith.constant 0 : index
    %8 = vector.load %arg13[%c0_6, %c0_7] : memref<336x32xf32, #tpu.memory_space<vmem>>, vector<336x32xf32>
    tpu.vector_store %arg13[%c0_6, %c0_7], %7 {strides = array<i32>} : memref<336x32xf32, #tpu.memory_space<vmem>>, vector<336x32xf32>,
    %c0_8 = arith.constant 0 : index
    %c0_9 = arith.constant 0 : index
    %9 = tpu.strided_load %arg13[%c0_8, %c0_9] {strides = array<i32: 2, 1>} : memref<336x32xf32, #tpu.memory_space<vmem>>, vector<5x32xf32>
    %c0_10 = arith.constant 0 : index
    %c0_11 = arith.constant 0 : index
    %10 = vector.load %arg14[%c0_10, %c0_11] : memref<70x288xf32, #tpu.memory_space<vmem>>, vector<5x32xf32>
    tpu.vector_store %arg14[%c0_10, %c0_11], %9 {strides = array<i32>} : memref<70x288xf32, #tpu.memory_space<vmem>>, vector<5x32xf32>,
    %c22 = arith.constant 22 : index
    %c0_12 = arith.constant 0 : index
    %11 = tpu.strided_load %arg13[%c22, %c0_12] {strides = array<i32: 2, 1>} : memref<336x32xf32, #tpu.memory_space<vmem>>, vector<5x32xf32>
    %c5 = arith.constant 5 : index
    %c0_13 = arith.constant 0 : index
    %12 = vector.load %arg14[%c5, %c0_13] : memref<70x288xf32, #tpu.memory_space<vmem>>, vector<5x32xf32>
    tpu.vector_store %arg14[%c5, %c0_13], %11 {strides = array<i32>} : memref<70x288xf32, #tpu.memory_space<vmem>>, vector<5x32xf32>,
    %c44 = arith.constant 44 : index
    %c0_14 = arith.constant 0 : index
    %13 = tpu.strided_load %arg13[%c44, %c0_14] {strides = array<i32: 2, 1>} : memref<336x32xf32, #tpu.memory_space<vmem>>, vector<5x32xf32>
    %c10 = arith.constant 10 : index
    %c0_15 = arith.constant 0 : index
    %14 = vector.load %arg14[%c10, %c0_15] : memref<70x288xf32, #tpu.memory_space<vmem>>, vector<5x32xf32>
    tpu.vector_store %arg14[%c10, %c0_15], %13 {strides = array<i32>} : memref<70x288xf32, #tpu.memory_space<vmem>>, vector<5x32xf32>,
    %c66 = arith.constant 66 : index
    %c0_16 = arith.constant 0 : index
    %15 = tpu.strided_load %arg13[%c66, %c0_16] {strides = array<i32: 2, 1>} : memref<336x32xf32, #tpu.memory_space<vmem>>, vector<5x32xf32>
    %c15 = arith.constant 15 : index
    %c0_17 = arith.constant 0 : index
    %16 = vector.load %arg14[%c15, %c0_17] : memref<70x288xf32, #tpu.memory_space<vmem>>, vector<5x32xf32>
    tpu.vector_store %arg14[%c15, %c0_17], %15 {strides = array<i32>} : memref<70x288xf32, #tpu.memory_space<vmem>>, vector<5x32xf32>,
    %c88 = arith.constant 88 : index
    %c0_18 = arith.constant 0 : index
    %17 = tpu.strided_load %arg13[%c88, %c0_18] {strides = array<i32: 2, 1>} : memref<336x32xf32, #tpu.memory_space<vmem>>, vector<5x32xf32>
    %c20 = arith.constant 20 : index
    %c0_19 = arith.constant 0 : index
    %18 = vector.load %arg14[%c20, %c0_19] : memref<70x288xf32, #tpu.memory_space<vmem>>, vector<5x32xf32>
    tpu.vector_store %arg14[%c20, %c0_19], %17 {strides = array<i32>} : memref<70x288xf32, #tpu.memory_space<vmem>>, vector<5x32xf32>,
    %c110 = arith.constant 110 : index
    %c0_20 = arith.constant 0 : index
    %19 = tpu.strided_load %arg13[%c110, %c0_20] {strides = array<i32: 2, 1>} : memref<336x32xf32, #tpu.memory_space<vmem>>, vector<5x32xf32>
    %c25 = arith.constant 25 : index
    %c0_21 = arith.constant 0 : index
    %20 = vector.load %arg14[%c25, %c0_21] : memref<70x288xf32, #tpu.memory_space<vmem>>, vector<5x32xf32>
    tpu.vector_store %arg14[%c25, %c0_21], %19 {strides = array<i32>} : memref<70x288xf32, #tpu.memory_space<vmem>>, vector<5x32xf32>,
    %c132 = arith.constant 132 : index
    %c0_22 = arith.constant 0 : index
    %21 = tpu.strided_load %arg13[%c132, %c0_22] {strides = array<i32: 2, 1>} : memref<336x32xf32, #tpu.memory_space<vmem>>, vector<5x32xf32>
    %c30 = arith.constant 30 : index
    %c0_23 = arith.constant 0 : index
    %22 = vector.load %arg14[%c30, %c0_23] : memref<70x288xf32, #tpu.memory_space<vmem>>, vector<5x32xf32>
    tpu.vector_store %arg14[%c30, %c0_23], %21 {strides = array<i32>} : memref<70x288xf32, #tpu.memory_space<vmem>>, vector<5x32xf32>,
    %c165 = arith.constant 165 : index
    %c0_24 = arith.constant 0 : index
    %23 = tpu.strided_load %arg13[%c165, %c0_24] {strides = array<i32: 2, 1>} : memref<336x32xf32, #tpu.memory_space<vmem>>, vector<5x32xf32>
    %c35 = arith.constant 35 : index
    %c0_25 = arith.constant 0 : index
    %24 = vector.load %arg14[%c35, %c0_25] : memref<70x288xf32, #tpu.memory_space<vmem>>, vector<5x32xf32>
    tpu.vector_store %arg14[%c35, %c0_25], %23 {strides = array<i32>} : memref<70x288xf32, #tpu.memory_space<vmem>>, vector<5x32xf32>,
    %c187 = arith.constant 187 : index
    %c0_26 = arith.constant 0 : index
    %25 = tpu.strided_load %arg13[%c187, %c0_26] {strides = array<i32: 2, 1>} : memref<336x32xf32, #tpu.memory_space<vmem>>, vector<5x32xf32>
    %c40 = arith.constant 40 : index
    %c0_27 = arith.constant 0 : index
    %26 = vector.load %arg14[%c40, %c0_27] : memref<70x288xf32, #tpu.memory_space<vmem>>, vector<5x32xf32>
    tpu.vector_store %arg14[%c40, %c0_27], %25 {strides = array<i32>} : memref<70x288xf32, #tpu.memory_space<vmem>>, vector<5x32xf32>,
    %c209 = arith.constant 209 : index
    %c0_28 = arith.constant 0 : index
    %27 = tpu.strided_load %arg13[%c209, %c0_28] {strides = array<i32: 2, 1>} : memref<336x32xf32, #tpu.memory_space<vmem>>, vector<5x32xf32>
    %c45 = arith.constant 45 : index
    %c0_29 = arith.constant 0 : index
    %28 = vector.load %arg14[%c45, %c0_29] : memref<70x288xf32, #tpu.memory_space<vmem>>, vector<5x32xf32>
    tpu.vector_store %arg14[%c45, %c0_29], %27 {strides = array<i32>} : memref<70x288xf32, #tpu.memory_space<vmem>>, vector<5x32xf32>,
    %c231 = arith.constant 231 : index
    %c0_30 = arith.constant 0 : index
    %29 = tpu.strided_load %arg13[%c231, %c0_30] {strides = array<i32: 2, 1>} : memref<336x32xf32, #tpu.memory_space<vmem>>, vector<5x32xf32>
    %c50 = arith.constant 50 : index
    %c0_31 = arith.constant 0 : index
    %30 = vector.load %arg14[%c50, %c0_31] : memref<70x288xf32, #tpu.memory_space<vmem>>, vector<5x32xf32>
    tpu.vector_store %arg14[%c50, %c0_31], %29 {strides = array<i32>} : memref<70x288xf32, #tpu.memory_space<vmem>>, vector<5x32xf32>,
    %c253 = arith.constant 253 : index
    %c0_32 = arith.constant 0 : index
    %31 = tpu.strided_load %arg13[%c253, %c0_32] {strides = array<i32: 2, 1>} : memref<336x32xf32, #tpu.memory_space<vmem>>, vector<5x32xf32>
    %c55 = arith.constant 55 : index
    %c0_33 = arith.constant 0 : index
    %32 = vector.load %arg14[%c55, %c0_33] : memref<70x288xf32, #tpu.memory_space<vmem>>, vector<5x32xf32>
    tpu.vector_store %arg14[%c55, %c0_33], %31 {strides = array<i32>} : memref<70x288xf32, #tpu.memory_space<vmem>>, vector<5x32xf32>,
    %c275 = arith.constant 275 : index
    %c0_34 = arith.constant 0 : index
    %33 = tpu.strided_load %arg13[%c275, %c0_34] {strides = array<i32: 2, 1>} : memref<336x32xf32, #tpu.memory_space<vmem>>, vector<5x32xf32>
    %c60 = arith.constant 60 : index
    %c0_35 = arith.constant 0 : index
    %34 = vector.load %arg14[%c60, %c0_35] : memref<70x288xf32, #tpu.memory_space<vmem>>, vector<5x32xf32>
    tpu.vector_store %arg14[%c60, %c0_35], %33 {strides = array<i32>} : memref<70x288xf32, #tpu.memory_space<vmem>>, vector<5x32xf32>,
    %c297 = arith.constant 297 : index
    %c0_36 = arith.constant 0 : index
    %35 = tpu.strided_load %arg13[%c297, %c0_36] {strides = array<i32: 2, 1>} : memref<336x32xf32, #tpu.memory_space<vmem>>, vector<5x32xf32>
    %c65 = arith.constant 65 : index
    %c0_37 = arith.constant 0 : index
    %36 = vector.load %arg14[%c65, %c0_37] : memref<70x288xf32, #tpu.memory_space<vmem>>, vector<5x32xf32>
    tpu.vector_store %arg14[%c65, %c0_37], %35 {strides = array<i32>} : memref<70x288xf32, #tpu.memory_space<vmem>>, vector<5x32xf32>,
    %c1 = arith.constant 1 : index
    %c0_38 = arith.constant 0 : index
    %37 = tpu.strided_load %arg13[%c1, %c0_38] {strides = array<i32: 2, 1>} : memref<336x32xf32, #tpu.memory_space<vmem>>, vector<5x32xf32>
    %c0_39 = arith.constant 0 : index
    %c32 = arith.constant 32 : index
    %38 = vector.load %arg14[%c0_39, %c32] : memref<70x288xf32, #tpu.memory_space<vmem>>, vector<5x32xf32>
    tpu.vector_store %arg14[%c0_39, %c32], %37 {strides = array<i32>} : memref<70x288xf32, #tpu.memory_space<vmem>>, vector<5x32xf32>,
    %c23 = arith.constant 23 : index
    %c0_40 = arith.constant 0 : index
    %39 = tpu.strided_load %arg13[%c23, %c0_40] {strides = array<i32: 2, 1>} : memref<336x32xf32, #tpu.memory_space<vmem>>, vector<5x32xf32>
    %c5_41 = arith.constant 5 : index
    %c32_42 = arith.constant 32 : index
    %40 = vector.load %arg14[%c5_41, %c32_42] : memref<70x288xf32, #tpu.memory_space<vmem>>, vector<5x32xf32>
    tpu.vector_store %arg14[%c5_41, %c32_42], %39 {strides = array<i32>} : memref<70x288xf32, #tpu.memory_space<vmem>>, vector<5x32xf32>,
    %c45_43 = arith.constant 45 : index
    %c0_44 = arith.constant 0 : index
    %41 = tpu.strided_load %arg13[%c45_43, %c0_44] {strides = array<i32: 2, 1>} : memref<336x32xf32, #tpu.memory_space<vmem>>, vector<5x32xf32>
    %c10_45 = arith.constant 10 : index
    %c32_46 = arith.constant 32 : index
    %42 = vector.load %arg14[%c10_45, %c32_46] : memref<70x288xf32, #tpu.memory_space<vmem>>, vector<5x32xf32>
    tpu.vector_store %arg14[%c10_45, %c32_46], %41 {strides = array<i32>} : memref<70x288xf32, #tpu.memory_space<vmem>>, vector<5x32xf32>,
    %c67 = arith.constant 67 : index
    %c0_47 = arith.constant 0 : index
    %43 = tpu.strided_load %arg13[%c67, %c0_47] {strides = array<i32: 2, 1>} : memref<336x32xf32, #tpu.memory_space<vmem>>, vector<5x32xf32>
    %c15_48 = arith.constant 15 : index
    %c32_49 = arith.constant 32 : index
    %44 = vector.load %arg14[%c15_48, %c32_49] : memref<70x288xf32, #tpu.memory_space<vmem>>, vector<5x32xf32>
    tpu.vector_store %arg14[%c15_48, %c32_49], %43 {strides = array<i32>} : memref<70x288xf32, #tpu.memory_space<vmem>>, vector<5x32xf32>,
    %c89 = arith.constant 89 : index
    %c0_50 = arith.constant 0 : index
    %45 = tpu.strided_load %arg13[%c89, %c0_50] {strides = array<i32: 2, 1>} : memref<336x32xf32, #tpu.memory_space<vmem>>, vector<5x32xf32>
    %c20_51 = arith.constant 20 : index
    %c32_52 = arith.constant 32 : index
    %46 = vector.load %arg14[%c20_51, %c32_52] : memref<70x288xf32, #tpu.memory_space<vmem>>, vector<5x32xf32>
    tpu.vector_store %arg14[%c20_51, %c32_52], %45 {strides = array<i32>} : memref<70x288xf32, #tpu.memory_space<vmem>>, vector<5x32xf32>,
    %c111 = arith.constant 111 : index
    %c0_53 = arith.constant 0 : index
    %47 = tpu.strided_load %arg13[%c111, %c0_53] {strides = array<i32: 2, 1>} : memref<336x32xf32, #tpu.memory_space<vmem>>, vector<5x32xf32>
    %c25_54 = arith.constant 25 : index
    %c32_55 = arith.constant 32 : index
    %48 = vector.load %arg14[%c25_54, %c32_55] : memref<70x288xf32, #tpu.memory_space<vmem>>, vector<5x32xf32>
    tpu.vector_store %arg14[%c25_54, %c32_55], %47 {strides = array<i32>} : memref<70x288xf32, #tpu.memory_space<vmem>>, vector<5x32xf32>,
    %c133 = arith.constant 133 : index
    %c0_56 = arith.constant 0 : index
    %49 = tpu.strided_load %arg13[%c133, %c0_56] {strides = array<i32: 2, 1>} : memref<336x32xf32, #tpu.memory_space<vmem>>, vector<5x32xf32>
    %c30_57 = arith.constant 30 : index
    %c32_58 = arith.constant 32 : index
    %50 = vector.load %arg14[%c30_57, %c32_58] : memref<70x288xf32, #tpu.memory_space<vmem>>, vector<5x32xf32>
    tpu.vector_store %arg14[%c30_57, %c32_58], %49 {strides = array<i32>} : memref<70x288xf32, #tpu.memory_space<vmem>>, vector<5x32xf32>,
    %c166 = arith.constant 166 : index
    %c0_59 = arith.constant 0 : index
    %51 = tpu.strided_load %arg13[%c166, %c0_59] {strides = array<i32: 2, 1>} : memref<336x32xf32, #tpu.memory_space<vmem>>, vector<5x32xf32>
    %c35_60 = arith.constant 35 : index
    %c32_61 = arith.constant 32 : index
    %52 = vector.load %arg14[%c35_60, %c32_61] : memref<70x288xf32, #tpu.memory_space<vmem>>, vector<5x32xf32>
    tpu.vector_store %arg14[%c35_60, %c32_61], %51 {strides = array<i32>} : memref<70x288xf32, #tpu.memory_space<vmem>>, vector<5x32xf32>,
    %c188 = arith.constant 188 : index
    %c0_62 = arith.constant 0 : index
    %53 = tpu.strided_load %arg13[%c188, %c0_62] {strides = array<i32: 2, 1>} : memref<336x32xf32, #tpu.memory_space<vmem>>, vector<5x32xf32>
    %c40_63 = arith.constant 40 : index
    %c32_64 = arith.constant 32 : index
    %54 = vector.load %arg14[%c40_63, %c32_64] : memref<70x288xf32, #tpu.memory_space<vmem>>, vector<5x32xf32>
    tpu.vector_store %arg14[%c40_63, %c32_64], %53 {strides = array<i32>} : memref<70x288xf32, #tpu.memory_space<vmem>>, vector<5x32xf32>,
    %c210 = arith.constant 210 : index
    %c0_65 = arith.constant 0 : index
    %55 = tpu.strided_load %arg13[%c210, %c0_65] {strides = array<i32: 2, 1>} : memref<336x32xf32, #tpu.memory_space<vmem>>, vector<5x32xf32>
    %c45_66 = arith.constant 45 : index
    %c32_67 = arith.constant 32 : index
    %56 = vector.load %arg14[%c45_66, %c32_67] : memref<70x288xf32, #tpu.memory_space<vmem>>, vector<5x32xf32>
    tpu.vector_store %arg14[%c45_66, %c32_67], %55 {strides = array<i32>} : memref<70x288xf32, #tpu.memory_space<vmem>>, vector<5x32xf32>,
    %c232 = arith.constant 232 : index
    %c0_68 = arith.constant 0 : index
    %57 = tpu.strided_load %arg13[%c232, %c0_68] {strides = array<i32: 2, 1>} : memref<336x32xf32, #tpu.memory_space<vmem>>, vector<5x32xf32>
    %c50_69 = arith.constant 50 : index
    %c32_70 = arith.constant 32 : index
    %58 = vector.load %arg14[%c50_69, %c32_70] : memref<70x288xf32, #tpu.memory_space<vmem>>, vector<5x32xf32>
    tpu.vector_store %arg14[%c50_69, %c32_70], %57 {strides = array<i32>} : memref<70x288xf32, #tpu.memory_space<vmem>>, vector<5x32xf32>,
    %c254 = arith.constant 254 : index
    %c0_71 = arith.constant 0 : index
    %59 = tpu.strided_load %arg13[%c254, %c0_71] {strides = array<i32: 2, 1>} : memref<336x32xf32, #tpu.memory_space<vmem>>, vector<5x32xf32>
    %c55_72 = arith.constant 55 : index
    %c32_73 = arith.constant 32 : index
    %60 = vector.load %arg14[%c55_72, %c32_73] : memref<70x288xf32, #tpu.memory_space<vmem>>, vector<5x32xf32>
    tpu.vector_store %arg14[%c55_72, %c32_73], %59 {strides = array<i32>} : memref<70x288xf32, #tpu.memory_space<vmem>>, vector<5x32xf32>,
    %c276 = arith.constant 276 : index
    %c0_74 = arith.constant 0 : index
    %61 = tpu.strided_load %arg13[%c276, %c0_74] {strides = array<i32: 2, 1>} : memref<336x32xf32, #tpu.memory_space<vmem>>, vector<5x32xf32>
    %c60_75 = arith.constant 60 : index
    %c32_76 = arith.constant 32 : index
    %62 = vector.load %arg14[%c60_75, %c32_76] : memref<70x288xf32, #tpu.memory_space<vmem>>, vector<5x32xf32>
    tpu.vector_store %arg14[%c60_75, %c32_76], %61 {strides = array<i32>} : memref<70x288xf32, #tpu.memory_space<vmem>>, vector<5x32xf32>,
    %c298 = arith.constant 298 : index
    %c0_77 = arith.constant 0 : index
    %63 = tpu.strided_load %arg13[%c298, %c0_77] {strides = array<i32: 2, 1>} : memref<336x32xf32, #tpu.memory_space<vmem>>, vector<5x32xf32>
    %c65_78 = arith.constant 65 : index
    %c32_79 = arith.constant 32 : index
    %64 = vector.load %arg14[%c65_78, %c32_79] : memref<70x288xf32, #tpu.memory_space<vmem>>, vector<5x32xf32>
    tpu.vector_store %arg14[%c65_78, %c32_79], %63 {strides = array<i32>} : memref<70x288xf32, #tpu.memory_space<vmem>>, vector<5x32xf32>,
    %c2 = arith.constant 2 : index
    %c0_80 = arith.constant 0 : index
    %65 = tpu.strided_load %arg13[%c2, %c0_80] {strides = array<i32: 2, 1>} : memref<336x32xf32, #tpu.memory_space<vmem>>, vector<5x32xf32>
    %c0_81 = arith.constant 0 : index
    %c64 = arith.constant 64 : index
    %66 = vector.load %arg14[%c0_81, %c64] : memref<70x288xf32, #tpu.memory_space<vmem>>, vector<5x32xf32>
    tpu.vector_store %arg14[%c0_81, %c64], %65 {strides = array<i32>} : memref<70x288xf32, #tpu.memory_space<vmem>>, vector<5x32xf32>,
    %c24 = arith.constant 24 : index
    %c0_82 = arith.constant 0 : index
    %67 = tpu.strided_load %arg13[%c24, %c0_82] {strides = array<i32: 2, 1>} : memref<336x32xf32, #tpu.memory_space<vmem>>, vector<5x32xf32>
    %c5_83 = arith.constant 5 : index
    %c64_84 = arith.constant 64 : index
    %68 = vector.load %arg14[%c5_83, %c64_84] : memref<70x288xf32, #tpu.memory_space<vmem>>, vector<5x32xf32>
    tpu.vector_store %arg14[%c5_83, %c64_84], %67 {strides = array<i32>} : memref<70x288xf32, #tpu.memory_space<vmem>>, vector<5x32xf32>,
    %c46 = arith.constant 46 : index
    %c0_85 = arith.constant 0 : index
    %69 = tpu.strided_load %arg13[%c46, %c0_85] {strides = array<i32: 2, 1>} : memref<336x32xf32, #tpu.memory_space<vmem>>, vector<5x32xf32>
    %c10_86 = arith.constant 10 : index
    %c64_87 = arith.constant 64 : index
    %70 = vector.load %arg14[%c10_86, %c64_87] : memref<70x288xf32, #tpu.memory_space<vmem>>, vector<5x32xf32>
    tpu.vector_store %arg14[%c10_86, %c64_87], %69 {strides = array<i32>} : memref<70x288xf32, #tpu.memory_space<vmem>>, vector<5x32xf32>,
    %c68 = arith.constant 68 : index
    %c0_88 = arith.constant 0 : index
    %71 = tpu.strided_load %arg13[%c68, %c0_88] {strides = array<i32: 2, 1>} : memref<336x32xf32, #tpu.memory_space<vmem>>, vector<5x32xf32>
    %c15_89 = arith.constant 15 : index
    %c64_90 = arith.constant 64 : index
    %72 = vector.load %arg14[%c15_89, %c64_90] : memref<70x288xf32, #tpu.memory_space<vmem>>, vector<5x32xf32>
    tpu.vector_store %arg14[%c15_89, %c64_90], %71 {strides = array<i32>} : memref<70x288xf32, #tpu.memory_space<vmem>>, vector<5x32xf32>,
    %c90 = arith.constant 90 : index
    %c0_91 = arith.constant 0 : index
    %73 = tpu.strided_load %arg13[%c90, %c0_91] {strides = array<i32: 2, 1>} : memref<336x32xf32, #tpu.memory_space<vmem>>, vector<5x32xf32>
    %c20_92 = arith.constant 20 : index
    %c64_93 = arith.constant 64 : index
    %74 = vector.load %arg14[%c20_92, %c64_93] : memref<70x288xf32, #tpu.memory_space<vmem>>, vector<5x32xf32>
    tpu.vector_store %arg14[%c20_92, %c64_93], %73 {strides = array<i32>} : memref<70x288xf32, #tpu.memory_space<vmem>>, vector<5x32xf32>,
    %c112 = arith.constant 112 : index
    %c0_94 = arith.constant 0 : index
    %75 = tpu.strided_load %arg13[%c112, %c0_94] {strides = array<i32: 2, 1>} : memref<336x32xf32, #tpu.memory_space<vmem>>, vector<5x32xf32>
    %c25_95 = arith.constant 25 : index
    %c64_96 = arith.constant 64 : index
    %76 = vector.load %arg14[%c25_95, %c64_96] : memref<70x288xf32, #tpu.memory_space<vmem>>, vector<5x32xf32>
    tpu.vector_store %arg14[%c25_95, %c64_96], %75 {strides = array<i32>} : memref<70x288xf32, #tpu.memory_space<vmem>>, vector<5x32xf32>,
    %c134 = arith.constant 134 : index
    %c0_97 = arith.constant 0 : index
    %77 = tpu.strided_load %arg13[%c134, %c0_97] {strides = array<i32: 2, 1>} : memref<336x32xf32, #tpu.memory_space<vmem>>, vector<5x32xf32>
    %c30_98 = arith.constant 30 : index
    %c64_99 = arith.constant 64 : index
    %78 = vector.load %arg14[%c30_98, %c64_99] : memref<70x288xf32, #tpu.memory_space<vmem>>, vector<5x32xf32>
    tpu.vector_store %arg14[%c30_98, %c64_99], %77 {strides = array<i32>} : memref<70x288xf32, #tpu.memory_space<vmem>>, vector<5x32xf32>,
    %c167 = arith.constant 167 : index
    %c0_100 = arith.constant 0 : index
    %79 = tpu.strided_load %arg13[%c167, %c0_100] {strides = array<i32: 2, 1>} : memref<336x32xf32, #tpu.memory_space<vmem>>, vector<5x32xf32>
    %c35_101 = arith.constant 35 : index
    %c64_102 = arith.constant 64 : index
    %80 = vector.load %arg14[%c35_101, %c64_102] : memref<70x288xf32, #tpu.memory_space<vmem>>, vector<5x32xf32>
    tpu.vector_store %arg14[%c35_101, %c64_102], %79 {strides = array<i32>} : memref<70x288xf32, #tpu.memory_space<vmem>>, vector<5x32xf32>,
    %c189 = arith.constant 189 : index
    %c0_103 = arith.constant 0 : index
    %81 = tpu.strided_load %arg13[%c189, %c0_103] {strides = array<i32: 2, 1>} : memref<336x32xf32, #tpu.memory_space<vmem>>, vector<5x32xf32>
    %c40_104 = arith.constant 40 : index
    %c64_105 = arith.constant 64 : index
    %82 = vector.load %arg14[%c40_104, %c64_105] : memref<70x288xf32, #tpu.memory_space<vmem>>, vector<5x32xf32>
    tpu.vector_store %arg14[%c40_104, %c64_105], %81 {strides = array<i32>} : memref<70x288xf32, #tpu.memory_space<vmem>>, vector<5x32xf32>,
    %c211 = arith.constant 211 : index
    %c0_106 = arith.constant 0 : index
    %83 = tpu.strided_load %arg13[%c211, %c0_106] {strides = array<i32: 2, 1>} : memref<336x32xf32, #tpu.memory_space<vmem>>, vector<5x32xf32>
    %c45_107 = arith.constant 45 : index
    %c64_108 = arith.constant 64 : index
    %84 = vector.load %arg14[%c45_107, %c64_108] : memref<70x288xf32, #tpu.memory_space<vmem>>, vector<5x32xf32>
    tpu.vector_store %arg14[%c45_107, %c64_108], %83 {strides = array<i32>} : memref<70x288xf32, #tpu.memory_space<vmem>>, vector<5x32xf32>,
    %c233 = arith.constant 233 : index
    %c0_109 = arith.constant 0 : index
    %85 = tpu.strided_load %arg13[%c233, %c0_109] {strides = array<i32: 2, 1>} : memref<336x32xf32, #tpu.memory_space<vmem>>, vector<5x32xf32>
    %c50_110 = arith.constant 50 : index
    %c64_111 = arith.constant 64 : index
    %86 = vector.load %arg14[%c50_110, %c64_111] : memref<70x288xf32, #tpu.memory_space<vmem>>, vector<5x32xf32>
    tpu.vector_store %arg14[%c50_110, %c64_111], %85 {strides = array<i32>} : memref<70x288xf32, #tpu.memory_space<vmem>>, vector<5x32xf32>,
    %c255 = arith.constant 255 : index
    %c0_112 = arith.constant 0 : index
    %87 = tpu.strided_load %arg13[%c255, %c0_112] {strides = array<i32: 2, 1>} : memref<336x32xf32, #tpu.memory_space<vmem>>, vector<5x32xf32>
    %c55_113 = arith.constant 55 : index
    %c64_114 = arith.constant 64 : index
    %88 = vector.load %arg14[%c55_113, %c64_114] : memref<70x288xf32, #tpu.memory_space<vmem>>, vector<5x32xf32>
    tpu.vector_store %arg14[%c55_113, %c64_114], %87 {strides = array<i32>} : memref<70x288xf32, #tpu.memory_space<vmem>>, vector<5x32xf32>,
    %c277 = arith.constant 277 : index
    %c0_115 = arith.constant 0 : index
    %89 = tpu.strided_load %arg13[%c277, %c0_115] {strides = array<i32: 2, 1>} : memref<336x32xf32, #tpu.memory_space<vmem>>, vector<5x32xf32>
    %c60_116 = arith.constant 60 : index
    %c64_117 = arith.constant 64 : index
    %90 = vector.load %arg14[%c60_116, %c64_117] : memref<70x288xf32, #tpu.memory_space<vmem>>, vector<5x32xf32>
    tpu.vector_store %arg14[%c60_116, %c64_117], %89 {strides = array<i32>} : memref<70x288xf32, #tpu.memory_space<vmem>>, vector<5x32xf32>,
    %c299 = arith.constant 299 : index
    %c0_118 = arith.constant 0 : index
    %91 = tpu.strided_load %arg13[%c299, %c0_118] {strides = array<i32: 2, 1>} : memref<336x32xf32, #tpu.memory_space<vmem>>, vector<5x32xf32>
    %c65_119 = arith.constant 65 : index
    %c64_120 = arith.constant 64 : index
    %92 = vector.load %arg14[%c65_119, %c64_120] : memref<70x288xf32, #tpu.memory_space<vmem>>, vector<5x32xf32>
    tpu.vector_store %arg14[%c65_119, %c64_120], %91 {strides = array<i32>} : memref<70x288xf32, #tpu.memory_space<vmem>>, vector<5x32xf32>,
    %c11 = arith.constant 11 : index
    %c0_121 = arith.constant 0 : index
    %93 = tpu.strided_load %arg13[%c11, %c0_121] {strides = array<i32: 2, 1>} : memref<336x32xf32, #tpu.memory_space<vmem>>, vector<5x32xf32>
    %c0_122 = arith.constant 0 : index
    %c96 = arith.constant 96 : index
    %94 = vector.load %arg14[%c0_122, %c96] : memref<70x288xf32, #tpu.memory_space<vmem>>, vector<5x32xf32>
    tpu.vector_store %arg14[%c0_122, %c96], %93 {strides = array<i32>} : memref<70x288xf32, #tpu.memory_space<vmem>>, vector<5x32xf32>,
    %c33 = arith.constant 33 : index
    %c0_123 = arith.constant 0 : index
    %95 = tpu.strided_load %arg13[%c33, %c0_123] {strides = array<i32: 2, 1>} : memref<336x32xf32, #tpu.memory_space<vmem>>, vector<5x32xf32>
    %c5_124 = arith.constant 5 : index
    %c96_125 = arith.constant 96 : index
    %96 = vector.load %arg14[%c5_124, %c96_125] : memref<70x288xf32, #tpu.memory_space<vmem>>, vector<5x32xf32>
    tpu.vector_store %arg14[%c5_124, %c96_125], %95 {strides = array<i32>} : memref<70x288xf32, #tpu.memory_space<vmem>>, vector<5x32xf32>,
    %c55_126 = arith.constant 55 : index
    %c0_127 = arith.constant 0 : index
    %97 = tpu.strided_load %arg13[%c55_126, %c0_127] {strides = array<i32: 2, 1>} : memref<336x32xf32, #tpu.memory_space<vmem>>, vector<5x32xf32>
    %c10_128 = arith.constant 10 : index
    %c96_129 = arith.constant 96 : index
    %98 = vector.load %arg14[%c10_128, %c96_129] : memref<70x288xf32, #tpu.memory_space<vmem>>, vector<5x32xf32>
    tpu.vector_store %arg14[%c10_128, %c96_129], %97 {strides = array<i32>} : memref<70x288xf32, #tpu.memory_space<vmem>>, vector<5x32xf32>,
    %c77 = arith.constant 77 : index
    %c0_130 = arith.constant 0 : index
    %99 = tpu.strided_load %arg13[%c77, %c0_130] {strides = array<i32: 2, 1>} : memref<336x32xf32, #tpu.memory_space<vmem>>, vector<5x32xf32>
    %c15_131 = arith.constant 15 : index
    %c96_132 = arith.constant 96 : index
    %100 = vector.load %arg14[%c15_131, %c96_132] : memref<70x288xf32, #tpu.memory_space<vmem>>, vector<5x32xf32>
    tpu.vector_store %arg14[%c15_131, %c96_132], %99 {strides = array<i32>} : memref<70x288xf32, #tpu.memory_space<vmem>>, vector<5x32xf32>,
    %c99 = arith.constant 99 : index
    %c0_133 = arith.constant 0 : index
    %101 = tpu.strided_load %arg13[%c99, %c0_133] {strides = array<i32: 2, 1>} : memref<336x32xf32, #tpu.memory_space<vmem>>, vector<5x32xf32>
    %c20_134 = arith.constant 20 : index
    %c96_135 = arith.constant 96 : index
    %102 = vector.load %arg14[%c20_134, %c96_135] : memref<70x288xf32, #tpu.memory_space<vmem>>, vector<5x32xf32>
    tpu.vector_store %arg14[%c20_134, %c96_135], %101 {strides = array<i32>} : memref<70x288xf32, #tpu.memory_space<vmem>>, vector<5x32xf32>,
    %c121 = arith.constant 121 : index
    %c0_136 = arith.constant 0 : index
    %103 = tpu.strided_load %arg13[%c121, %c0_136] {strides = array<i32: 2, 1>} : memref<336x32xf32, #tpu.memory_space<vmem>>, vector<5x32xf32>
    %c25_137 = arith.constant 25 : index
    %c96_138 = arith.constant 96 : index
    %104 = vector.load %arg14[%c25_137, %c96_138] : memref<70x288xf32, #tpu.memory_space<vmem>>, vector<5x32xf32>
    tpu.vector_store %arg14[%c25_137, %c96_138], %103 {strides = array<i32>} : memref<70x288xf32, #tpu.memory_space<vmem>>, vector<5x32xf32>,
    %c143 = arith.constant 143 : index
    %c0_139 = arith.constant 0 : index
    %105 = tpu.strided_load %arg13[%c143, %c0_139] {strides = array<i32: 2, 1>} : memref<336x32xf32, #tpu.memory_space<vmem>>, vector<5x32xf32>
    %c30_140 = arith.constant 30 : index
    %c96_141 = arith.constant 96 : index
    %106 = vector.load %arg14[%c30_140, %c96_141] : memref<70x288xf32, #tpu.memory_space<vmem>>, vector<5x32xf32>
    tpu.vector_store %arg14[%c30_140, %c96_141], %105 {strides = array<i32>} : memref<70x288xf32, #tpu.memory_space<vmem>>, vector<5x32xf32>,
    %c176 = arith.constant 176 : index
    %c0_142 = arith.constant 0 : index
    %107 = tpu.strided_load %arg13[%c176, %c0_142] {strides = array<i32: 2, 1>} : memref<336x32xf32, #tpu.memory_space<vmem>>, vector<5x32xf32>
    %c35_143 = arith.constant 35 : index
    %c96_144 = arith.constant 96 : index
    %108 = vector.load %arg14[%c35_143, %c96_144] : memref<70x288xf32, #tpu.memory_space<vmem>>, vector<5x32xf32>
    tpu.vector_store %arg14[%c35_143, %c96_144], %107 {strides = array<i32>} : memref<70x288xf32, #tpu.memory_space<vmem>>, vector<5x32xf32>,
    %c198 = arith.constant 198 : index
    %c0_145 = arith.constant 0 : index
    %109 = tpu.strided_load %arg13[%c198, %c0_145] {strides = array<i32: 2, 1>} : memref<336x32xf32, #tpu.memory_space<vmem>>, vector<5x32xf32>
    %c40_146 = arith.constant 40 : index
    %c96_147 = arith.constant 96 : index
    %110 = vector.load %arg14[%c40_146, %c96_147] : memref<70x288xf32, #tpu.memory_space<vmem>>, vector<5x32xf32>
    tpu.vector_store %arg14[%c40_146, %c96_147], %109 {strides = array<i32>} : memref<70x288xf32, #tpu.memory_space<vmem>>, vector<5x32xf32>,
    %c220 = arith.constant 220 : index
    %c0_148 = arith.constant 0 : index
    %111 = tpu.strided_load %arg13[%c220, %c0_148] {strides = array<i32: 2, 1>} : memref<336x32xf32, #tpu.memory_space<vmem>>, vector<5x32xf32>
    %c45_149 = arith.constant 45 : index
    %c96_150 = arith.constant 96 : index
    %112 = vector.load %arg14[%c45_149, %c96_150] : memref<70x288xf32, #tpu.memory_space<vmem>>, vector<5x32xf32>
    tpu.vector_store %arg14[%c45_149, %c96_150], %111 {strides = array<i32>} : memref<70x288xf32, #tpu.memory_space<vmem>>, vector<5x32xf32>,
    %c242 = arith.constant 242 : index
    %c0_151 = arith.constant 0 : index
    %113 = tpu.strided_load %arg13[%c242, %c0_151] {strides = array<i32: 2, 1>} : memref<336x32xf32, #tpu.memory_space<vmem>>, vector<5x32xf32>
    %c50_152 = arith.constant 50 : index
    %c96_153 = arith.constant 96 : index
    %114 = vector.load %arg14[%c50_152, %c96_153] : memref<70x288xf32, #tpu.memory_space<vmem>>, vector<5x32xf32>
    tpu.vector_store %arg14[%c50_152, %c96_153], %113 {strides = array<i32>} : memref<70x288xf32, #tpu.memory_space<vmem>>, vector<5x32xf32>,
    %c264 = arith.constant 264 : index
    %c0_154 = arith.constant 0 : index
    %115 = tpu.strided_load %arg13[%c264, %c0_154] {strides = array<i32: 2, 1>} : memref<336x32xf32, #tpu.memory_space<vmem>>, vector<5x32xf32>
    %c55_155 = arith.constant 55 : index
    %c96_156 = arith.constant 96 : index
    %116 = vector.load %arg14[%c55_155, %c96_156] : memref<70x288xf32, #tpu.memory_space<vmem>>, vector<5x32xf32>
    tpu.vector_store %arg14[%c55_155, %c96_156], %115 {strides = array<i32>} : memref<70x288xf32, #tpu.memory_space<vmem>>, vector<5x32xf32>,
    %c286 = arith.constant 286 : index
    %c0_157 = arith.constant 0 : index
    %117 = tpu.strided_load %arg13[%c286, %c0_157] {strides = array<i32: 2, 1>} : memref<336x32xf32, #tpu.memory_space<vmem>>, vector<5x32xf32>
    %c60_158 = arith.constant 60 : index
    %c96_159 = arith.constant 96 : index
    %118 = vector.load %arg14[%c60_158, %c96_159] : memref<70x288xf32, #tpu.memory_space<vmem>>, vector<5x32xf32>
    tpu.vector_store %arg14[%c60_158, %c96_159], %117 {strides = array<i32>} : memref<70x288xf32, #tpu.memory_space<vmem>>, vector<5x32xf32>,
    %c308 = arith.constant 308 : index
    %c0_160 = arith.constant 0 : index
    %119 = tpu.strided_load %arg13[%c308, %c0_160] {strides = array<i32: 2, 1>} : memref<336x32xf32, #tpu.memory_space<vmem>>, vector<5x32xf32>
    %c65_161 = arith.constant 65 : index
    %c96_162 = arith.constant 96 : index
    %120 = vector.load %arg14[%c65_161, %c96_162] : memref<70x288xf32, #tpu.memory_space<vmem>>, vector<5x32xf32>
    tpu.vector_store %arg14[%c65_161, %c96_162], %119 {strides = array<i32>} : memref<70x288xf32, #tpu.memory_space<vmem>>, vector<5x32xf32>,
    %c12 = arith.constant 12 : index
    %c0_163 = arith.constant 0 : index
    %121 = tpu.strided_load %arg13[%c12, %c0_163] {strides = array<i32: 2, 1>} : memref<336x32xf32, #tpu.memory_space<vmem>>, vector<5x32xf32>
    %c0_164 = arith.constant 0 : index
    %c128 = arith.constant 128 : index
    %122 = vector.load %arg14[%c0_164, %c128] : memref<70x288xf32, #tpu.memory_space<vmem>>, vector<5x32xf32>
    tpu.vector_store %arg14[%c0_164, %c128], %121 {strides = array<i32>} : memref<70x288xf32, #tpu.memory_space<vmem>>, vector<5x32xf32>,
    %c34 = arith.constant 34 : index
    %c0_165 = arith.constant 0 : index
    %123 = tpu.strided_load %arg13[%c34, %c0_165] {strides = array<i32: 2, 1>} : memref<336x32xf32, #tpu.memory_space<vmem>>, vector<5x32xf32>
    %c5_166 = arith.constant 5 : index
    %c128_167 = arith.constant 128 : index
    %124 = vector.load %arg14[%c5_166, %c128_167] : memref<70x288xf32, #tpu.memory_space<vmem>>, vector<5x32xf32>
    tpu.vector_store %arg14[%c5_166, %c128_167], %123 {strides = array<i32>} : memref<70x288xf32, #tpu.memory_space<vmem>>, vector<5x32xf32>,
    %c56 = arith.constant 56 : index
    %c0_168 = arith.constant 0 : index
    %125 = tpu.strided_load %arg13[%c56, %c0_168] {strides = array<i32: 2, 1>} : memref<336x32xf32, #tpu.memory_space<vmem>>, vector<5x32xf32>
    %c10_169 = arith.constant 10 : index
    %c128_170 = arith.constant 128 : index
    %126 = vector.load %arg14[%c10_169, %c128_170] : memref<70x288xf32, #tpu.memory_space<vmem>>, vector<5x32xf32>
    tpu.vector_store %arg14[%c10_169, %c128_170], %125 {strides = array<i32>} : memref<70x288xf32, #tpu.memory_space<vmem>>, vector<5x32xf32>,
    %c78 = arith.constant 78 : index
    %c0_171 = arith.constant 0 : index
    %127 = tpu.strided_load %arg13[%c78, %c0_171] {strides = array<i32: 2, 1>} : memref<336x32xf32, #tpu.memory_space<vmem>>, vector<5x32xf32>
    %c15_172 = arith.constant 15 : index
    %c128_173 = arith.constant 128 : index
    %128 = vector.load %arg14[%c15_172, %c128_173] : memref<70x288xf32, #tpu.memory_space<vmem>>, vector<5x32xf32>
    tpu.vector_store %arg14[%c15_172, %c128_173], %127 {strides = array<i32>} : memref<70x288xf32, #tpu.memory_space<vmem>>, vector<5x32xf32>,
    %c100 = arith.constant 100 : index
    %c0_174 = arith.constant 0 : index
    %129 = tpu.strided_load %arg13[%c100, %c0_174] {strides = array<i32: 2, 1>} : memref<336x32xf32, #tpu.memory_space<vmem>>, vector<5x32xf32>
    %c20_175 = arith.constant 20 : index
    %c128_176 = arith.constant 128 : index
    %130 = vector.load %arg14[%c20_175, %c128_176] : memref<70x288xf32, #tpu.memory_space<vmem>>, vector<5x32xf32>
    tpu.vector_store %arg14[%c20_175, %c128_176], %129 {strides = array<i32>} : memref<70x288xf32, #tpu.memory_space<vmem>>, vector<5x32xf32>,
    %c122 = arith.constant 122 : index
    %c0_177 = arith.constant 0 : index
    %131 = tpu.strided_load %arg13[%c122, %c0_177] {strides = array<i32: 2, 1>} : memref<336x32xf32, #tpu.memory_space<vmem>>, vector<5x32xf32>
    %c25_178 = arith.constant 25 : index
    %c128_179 = arith.constant 128 : index
    %132 = vector.load %arg14[%c25_178, %c128_179] : memref<70x288xf32, #tpu.memory_space<vmem>>, vector<5x32xf32>
    tpu.vector_store %arg14[%c25_178, %c128_179], %131 {strides = array<i32>} : memref<70x288xf32, #tpu.memory_space<vmem>>, vector<5x32xf32>,
    %c144 = arith.constant 144 : index
    %c0_180 = arith.constant 0 : index
    %133 = tpu.strided_load %arg13[%c144, %c0_180] {strides = array<i32: 2, 1>} : memref<336x32xf32, #tpu.memory_space<vmem>>, vector<5x32xf32>
    %c30_181 = arith.constant 30 : index
    %c128_182 = arith.constant 128 : index
    %134 = vector.load %arg14[%c30_181, %c128_182] : memref<70x288xf32, #tpu.memory_space<vmem>>, vector<5x32xf32>
    tpu.vector_store %arg14[%c30_181, %c128_182], %133 {strides = array<i32>} : memref<70x288xf32, #tpu.memory_space<vmem>>, vector<5x32xf32>,
    %c177 = arith.constant 177 : index
    %c0_183 = arith.constant 0 : index
    %135 = tpu.strided_load %arg13[%c177, %c0_183] {strides = array<i32: 2, 1>} : memref<336x32xf32, #tpu.memory_space<vmem>>, vector<5x32xf32>
    %c35_184 = arith.constant 35 : index
    %c128_185 = arith.constant 128 : index
    %136 = vector.load %arg14[%c35_184, %c128_185] : memref<70x288xf32, #tpu.memory_space<vmem>>, vector<5x32xf32>
    tpu.vector_store %arg14[%c35_184, %c128_185], %135 {strides = array<i32>} : memref<70x288xf32, #tpu.memory_space<vmem>>, vector<5x32xf32>,
    %c199 = arith.constant 199 : index
    %c0_186 = arith.constant 0 : index
    %137 = tpu.strided_load %arg13[%c199, %c0_186] {strides = array<i32: 2, 1>} : memref<336x32xf32, #tpu.memory_space<vmem>>, vector<5x32xf32>
    %c40_187 = arith.constant 40 : index
    %c128_188 = arith.constant 128 : index
    %138 = vector.load %arg14[%c40_187, %c128_188] : memref<70x288xf32, #tpu.memory_space<vmem>>, vector<5x32xf32>
    tpu.vector_store %arg14[%c40_187, %c128_188], %137 {strides = array<i32>} : memref<70x288xf32, #tpu.memory_space<vmem>>, vector<5x32xf32>,
    %c221 = arith.constant 221 : index
    %c0_189 = arith.constant 0 : index
    %139 = tpu.strided_load %arg13[%c221, %c0_189] {strides = array<i32: 2, 1>} : memref<336x32xf32, #tpu.memory_space<vmem>>, vector<5x32xf32>
    %c45_190 = arith.constant 45 : index
    %c128_191 = arith.constant 128 : index
    %140 = vector.load %arg14[%c45_190, %c128_191] : memref<70x288xf32, #tpu.memory_space<vmem>>, vector<5x32xf32>
    tpu.vector_store %arg14[%c45_190, %c128_191], %139 {strides = array<i32>} : memref<70x288xf32, #tpu.memory_space<vmem>>, vector<5x32xf32>,
    %c243 = arith.constant 243 : index
    %c0_192 = arith.constant 0 : index
    %141 = tpu.strided_load %arg13[%c243, %c0_192] {strides = array<i32: 2, 1>} : memref<336x32xf32, #tpu.memory_space<vmem>>, vector<5x32xf32>
    %c50_193 = arith.constant 50 : index
    %c128_194 = arith.constant 128 : index
    %142 = vector.load %arg14[%c50_193, %c128_194] : memref<70x288xf32, #tpu.memory_space<vmem>>, vector<5x32xf32>
    tpu.vector_store %arg14[%c50_193, %c128_194], %141 {strides = array<i32>} : memref<70x288xf32, #tpu.memory_space<vmem>>, vector<5x32xf32>,
    %c265 = arith.constant 265 : index
    %c0_195 = arith.constant 0 : index
    %143 = tpu.strided_load %arg13[%c265, %c0_195] {strides = array<i32: 2, 1>} : memref<336x32xf32, #tpu.memory_space<vmem>>, vector<5x32xf32>
    %c55_196 = arith.constant 55 : index
    %c128_197 = arith.constant 128 : index
    %144 = vector.load %arg14[%c55_196, %c128_197] : memref<70x288xf32, #tpu.memory_space<vmem>>, vector<5x32xf32>
    tpu.vector_store %arg14[%c55_196, %c128_197], %143 {strides = array<i32>} : memref<70x288xf32, #tpu.memory_space<vmem>>, vector<5x32xf32>,
    %c287 = arith.constant 287 : index
    %c0_198 = arith.constant 0 : index
    %145 = tpu.strided_load %arg13[%c287, %c0_198] {strides = array<i32: 2, 1>} : memref<336x32xf32, #tpu.memory_space<vmem>>, vector<5x32xf32>
    %c60_199 = arith.constant 60 : index
    %c128_200 = arith.constant 128 : index
    %146 = vector.load %arg14[%c60_199, %c128_200] : memref<70x288xf32, #tpu.memory_space<vmem>>, vector<5x32xf32>
    tpu.vector_store %arg14[%c60_199, %c128_200], %145 {strides = array<i32>} : memref<70x288xf32, #tpu.memory_space<vmem>>, vector<5x32xf32>,
    %c309 = arith.constant 309 : index
    %c0_201 = arith.constant 0 : index
    %147 = tpu.strided_load %arg13[%c309, %c0_201] {strides = array<i32: 2, 1>} : memref<336x32xf32, #tpu.memory_space<vmem>>, vector<5x32xf32>
    %c65_202 = arith.constant 65 : index
    %c128_203 = arith.constant 128 : index
    %148 = vector.load %arg14[%c65_202, %c128_203] : memref<70x288xf32, #tpu.memory_space<vmem>>, vector<5x32xf32>
    tpu.vector_store %arg14[%c65_202, %c128_203], %147 {strides = array<i32>} : memref<70x288xf32, #tpu.memory_space<vmem>>, vector<5x32xf32>,
    %c13 = arith.constant 13 : index
    %c0_204 = arith.constant 0 : index
    %149 = tpu.strided_load %arg13[%c13, %c0_204] {strides = array<i32: 2, 1>} : memref<336x32xf32, #tpu.memory_space<vmem>>, vector<5x32xf32>
    %c0_205 = arith.constant 0 : index
    %c160 = arith.constant 160 : index
    %150 = vector.load %arg14[%c0_205, %c160] : memref<70x288xf32, #tpu.memory_space<vmem>>, vector<5x32xf32>
    tpu.vector_store %arg14[%c0_205, %c160], %149 {strides = array<i32>} : memref<70x288xf32, #tpu.memory_space<vmem>>, vector<5x32xf32>,
    %c35_206 = arith.constant 35 : index
    %c0_207 = arith.constant 0 : index
    %151 = tpu.strided_load %arg13[%c35_206, %c0_207] {strides = array<i32: 2, 1>} : memref<336x32xf32, #tpu.memory_space<vmem>>, vector<5x32xf32>
    %c5_208 = arith.constant 5 : index
    %c160_209 = arith.constant 160 : index
    %152 = vector.load %arg14[%c5_208, %c160_209] : memref<70x288xf32, #tpu.memory_space<vmem>>, vector<5x32xf32>
    tpu.vector_store %arg14[%c5_208, %c160_209], %151 {strides = array<i32>} : memref<70x288xf32, #tpu.memory_space<vmem>>, vector<5x32xf32>,
    %c57 = arith.constant 57 : index
    %c0_210 = arith.constant 0 : index
    %153 = tpu.strided_load %arg13[%c57, %c0_210] {strides = array<i32: 2, 1>} : memref<336x32xf32, #tpu.memory_space<vmem>>, vector<5x32xf32>
    %c10_211 = arith.constant 10 : index
    %c160_212 = arith.constant 160 : index
    %154 = vector.load %arg14[%c10_211, %c160_212] : memref<70x288xf32, #tpu.memory_space<vmem>>, vector<5x32xf32>
    tpu.vector_store %arg14[%c10_211, %c160_212], %153 {strides = array<i32>} : memref<70x288xf32, #tpu.memory_space<vmem>>, vector<5x32xf32>,
    %c79 = arith.constant 79 : index
    %c0_213 = arith.constant 0 : index
    %155 = tpu.strided_load %arg13[%c79, %c0_213] {strides = array<i32: 2, 1>} : memref<336x32xf32, #tpu.memory_space<vmem>>, vector<5x32xf32>
    %c15_214 = arith.constant 15 : index
    %c160_215 = arith.constant 160 : index
    %156 = vector.load %arg14[%c15_214, %c160_215] : memref<70x288xf32, #tpu.memory_space<vmem>>, vector<5x32xf32>
    tpu.vector_store %arg14[%c15_214, %c160_215], %155 {strides = array<i32>} : memref<70x288xf32, #tpu.memory_space<vmem>>, vector<5x32xf32>,
    %c101 = arith.constant 101 : index
    %c0_216 = arith.constant 0 : index
    %157 = tpu.strided_load %arg13[%c101, %c0_216] {strides = array<i32: 2, 1>} : memref<336x32xf32, #tpu.memory_space<vmem>>, vector<5x32xf32>
    %c20_217 = arith.constant 20 : index
    %c160_218 = arith.constant 160 : index
    %158 = vector.load %arg14[%c20_217, %c160_218] : memref<70x288xf32, #tpu.memory_space<vmem>>, vector<5x32xf32>
    tpu.vector_store %arg14[%c20_217, %c160_218], %157 {strides = array<i32>} : memref<70x288xf32, #tpu.memory_space<vmem>>, vector<5x32xf32>,
    %c123 = arith.constant 123 : index
    %c0_219 = arith.constant 0 : index
    %159 = tpu.strided_load %arg13[%c123, %c0_219] {strides = array<i32: 2, 1>} : memref<336x32xf32, #tpu.memory_space<vmem>>, vector<5x32xf32>
    %c25_220 = arith.constant 25 : index
    %c160_221 = arith.constant 160 : index
    %160 = vector.load %arg14[%c25_220, %c160_221] : memref<70x288xf32, #tpu.memory_space<vmem>>, vector<5x32xf32>
    tpu.vector_store %arg14[%c25_220, %c160_221], %159 {strides = array<i32>} : memref<70x288xf32, #tpu.memory_space<vmem>>, vector<5x32xf32>,
    %c145 = arith.constant 145 : index
    %c0_222 = arith.constant 0 : index
    %161 = tpu.strided_load %arg13[%c145, %c0_222] {strides = array<i32: 2, 1>} : memref<336x32xf32, #tpu.memory_space<vmem>>, vector<5x32xf32>
    %c30_223 = arith.constant 30 : index
    %c160_224 = arith.constant 160 : index
    %162 = vector.load %arg14[%c30_223, %c160_224] : memref<70x288xf32, #tpu.memory_space<vmem>>, vector<5x32xf32>
    tpu.vector_store %arg14[%c30_223, %c160_224], %161 {strides = array<i32>} : memref<70x288xf32, #tpu.memory_space<vmem>>, vector<5x32xf32>,
    %c178 = arith.constant 178 : index
    %c0_225 = arith.constant 0 : index
    %163 = tpu.strided_load %arg13[%c178, %c0_225] {strides = array<i32: 2, 1>} : memref<336x32xf32, #tpu.memory_space<vmem>>, vector<5x32xf32>
    %c35_226 = arith.constant 35 : index
    %c160_227 = arith.constant 160 : index
    %164 = vector.load %arg14[%c35_226, %c160_227] : memref<70x288xf32, #tpu.memory_space<vmem>>, vector<5x32xf32>
    tpu.vector_store %arg14[%c35_226, %c160_227], %163 {strides = array<i32>} : memref<70x288xf32, #tpu.memory_space<vmem>>, vector<5x32xf32>,
    %c200 = arith.constant 200 : index
    %c0_228 = arith.constant 0 : index
    %165 = tpu.strided_load %arg13[%c200, %c0_228] {strides = array<i32: 2, 1>} : memref<336x32xf32, #tpu.memory_space<vmem>>, vector<5x32xf32>
    %c40_229 = arith.constant 40 : index
    %c160_230 = arith.constant 160 : index
    %166 = vector.load %arg14[%c40_229, %c160_230] : memref<70x288xf32, #tpu.memory_space<vmem>>, vector<5x32xf32>
    tpu.vector_store %arg14[%c40_229, %c160_230], %165 {strides = array<i32>} : memref<70x288xf32, #tpu.memory_space<vmem>>, vector<5x32xf32>,
    %c222 = arith.constant 222 : index
    %c0_231 = arith.constant 0 : index
    %167 = tpu.strided_load %arg13[%c222, %c0_231] {strides = array<i32: 2, 1>} : memref<336x32xf32, #tpu.memory_space<vmem>>, vector<5x32xf32>
    %c45_232 = arith.constant 45 : index
    %c160_233 = arith.constant 160 : index
    %168 = vector.load %arg14[%c45_232, %c160_233] : memref<70x288xf32, #tpu.memory_space<vmem>>, vector<5x32xf32>
    tpu.vector_store %arg14[%c45_232, %c160_233], %167 {strides = array<i32>} : memref<70x288xf32, #tpu.memory_space<vmem>>, vector<5x32xf32>,
    %c244 = arith.constant 244 : index
    %c0_234 = arith.constant 0 : index
    %169 = tpu.strided_load %arg13[%c244, %c0_234] {strides = array<i32: 2, 1>} : memref<336x32xf32, #tpu.memory_space<vmem>>, vector<5x32xf32>
    %c50_235 = arith.constant 50 : index
    %c160_236 = arith.constant 160 : index
    %170 = vector.load %arg14[%c50_235, %c160_236] : memref<70x288xf32, #tpu.memory_space<vmem>>, vector<5x32xf32>
    tpu.vector_store %arg14[%c50_235, %c160_236], %169 {strides = array<i32>} : memref<70x288xf32, #tpu.memory_space<vmem>>, vector<5x32xf32>,
    %c266 = arith.constant 266 : index
    %c0_237 = arith.constant 0 : index
    %171 = tpu.strided_load %arg13[%c266, %c0_237] {strides = array<i32: 2, 1>} : memref<336x32xf32, #tpu.memory_space<vmem>>, vector<5x32xf32>
    %c55_238 = arith.constant 55 : index
    %c160_239 = arith.constant 160 : index
    %172 = vector.load %arg14[%c55_238, %c160_239] : memref<70x288xf32, #tpu.memory_space<vmem>>, vector<5x32xf32>
    tpu.vector_store %arg14[%c55_238, %c160_239], %171 {strides = array<i32>} : memref<70x288xf32, #tpu.memory_space<vmem>>, vector<5x32xf32>,
    %c288 = arith.constant 288 : index
    %c0_240 = arith.constant 0 : index
    %173 = tpu.strided_load %arg13[%c288, %c0_240] {strides = array<i32: 2, 1>} : memref<336x32xf32, #tpu.memory_space<vmem>>, vector<5x32xf32>
    %c60_241 = arith.constant 60 : index
    %c160_242 = arith.constant 160 : index
    %174 = vector.load %arg14[%c60_241, %c160_242] : memref<70x288xf32, #tpu.memory_space<vmem>>, vector<5x32xf32>
    tpu.vector_store %arg14[%c60_241, %c160_242], %173 {strides = array<i32>} : memref<70x288xf32, #tpu.memory_space<vmem>>, vector<5x32xf32>,
    %c310 = arith.constant 310 : index
    %c0_243 = arith.constant 0 : index
    %175 = tpu.strided_load %arg13[%c310, %c0_243] {strides = array<i32: 2, 1>} : memref<336x32xf32, #tpu.memory_space<vmem>>, vector<5x32xf32>
    %c65_244 = arith.constant 65 : index
    %c160_245 = arith.constant 160 : index
    %176 = vector.load %arg14[%c65_244, %c160_245] : memref<70x288xf32, #tpu.memory_space<vmem>>, vector<5x32xf32>
    tpu.vector_store %arg14[%c65_244, %c160_245], %175 {strides = array<i32>} : memref<70x288xf32, #tpu.memory_space<vmem>>, vector<5x32xf32>,
    %c22_246 = arith.constant 22 : index
    %c0_247 = arith.constant 0 : index
    %177 = tpu.strided_load %arg13[%c22_246, %c0_247] {strides = array<i32: 2, 1>} : memref<336x32xf32, #tpu.memory_space<vmem>>, vector<5x32xf32>
    %c0_248 = arith.constant 0 : index
    %c192 = arith.constant 192 : index
    %178 = vector.load %arg14[%c0_248, %c192] : memref<70x288xf32, #tpu.memory_space<vmem>>, vector<5x32xf32>
    tpu.vector_store %arg14[%c0_248, %c192], %177 {strides = array<i32>} : memref<70x288xf32, #tpu.memory_space<vmem>>, vector<5x32xf32>,
    %c44_249 = arith.constant 44 : index
    %c0_250 = arith.constant 0 : index
    %179 = tpu.strided_load %arg13[%c44_249, %c0_250] {strides = array<i32: 2, 1>} : memref<336x32xf32, #tpu.memory_space<vmem>>, vector<5x32xf32>
    %c5_251 = arith.constant 5 : index
    %c192_252 = arith.constant 192 : index
    %180 = vector.load %arg14[%c5_251, %c192_252] : memref<70x288xf32, #tpu.memory_space<vmem>>, vector<5x32xf32>
    tpu.vector_store %arg14[%c5_251, %c192_252], %179 {strides = array<i32>} : memref<70x288xf32, #tpu.memory_space<vmem>>, vector<5x32xf32>,
    %c66_253 = arith.constant 66 : index
    %c0_254 = arith.constant 0 : index
    %181 = tpu.strided_load %arg13[%c66_253, %c0_254] {strides = array<i32: 2, 1>} : memref<336x32xf32, #tpu.memory_space<vmem>>, vector<5x32xf32>
    %c10_255 = arith.constant 10 : index
    %c192_256 = arith.constant 192 : index
    %182 = vector.load %arg14[%c10_255, %c192_256] : memref<70x288xf32, #tpu.memory_space<vmem>>, vector<5x32xf32>
    tpu.vector_store %arg14[%c10_255, %c192_256], %181 {strides = array<i32>} : memref<70x288xf32, #tpu.memory_space<vmem>>, vector<5x32xf32>,
    %c88_257 = arith.constant 88 : index
    %c0_258 = arith.constant 0 : index
    %183 = tpu.strided_load %arg13[%c88_257, %c0_258] {strides = array<i32: 2, 1>} : memref<336x32xf32, #tpu.memory_space<vmem>>, vector<5x32xf32>
    %c15_259 = arith.constant 15 : index
    %c192_260 = arith.constant 192 : index
    %184 = vector.load %arg14[%c15_259, %c192_260] : memref<70x288xf32, #tpu.memory_space<vmem>>, vector<5x32xf32>
    tpu.vector_store %arg14[%c15_259, %c192_260], %183 {strides = array<i32>} : memref<70x288xf32, #tpu.memory_space<vmem>>, vector<5x32xf32>,
    %c110_261 = arith.constant 110 : index
    %c0_262 = arith.constant 0 : index
    %185 = tpu.strided_load %arg13[%c110_261, %c0_262] {strides = array<i32: 2, 1>} : memref<336x32xf32, #tpu.memory_space<vmem>>, vector<5x32xf32>
    %c20_263 = arith.constant 20 : index
    %c192_264 = arith.constant 192 : index
    %186 = vector.load %arg14[%c20_263, %c192_264] : memref<70x288xf32, #tpu.memory_space<vmem>>, vector<5x32xf32>
    tpu.vector_store %arg14[%c20_263, %c192_264], %185 {strides = array<i32>} : memref<70x288xf32, #tpu.memory_space<vmem>>, vector<5x32xf32>,
    %c132_265 = arith.constant 132 : index
    %c0_266 = arith.constant 0 : index
    %187 = tpu.strided_load %arg13[%c132_265, %c0_266] {strides = array<i32: 2, 1>} : memref<336x32xf32, #tpu.memory_space<vmem>>, vector<5x32xf32>
    %c25_267 = arith.constant 25 : index
    %c192_268 = arith.constant 192 : index
    %188 = vector.load %arg14[%c25_267, %c192_268] : memref<70x288xf32, #tpu.memory_space<vmem>>, vector<5x32xf32>
    tpu.vector_store %arg14[%c25_267, %c192_268], %187 {strides = array<i32>} : memref<70x288xf32, #tpu.memory_space<vmem>>, vector<5x32xf32>,
    %c154 = arith.constant 154 : index
    %c0_269 = arith.constant 0 : index
    %189 = tpu.strided_load %arg13[%c154, %c0_269] {strides = array<i32: 2, 1>} : memref<336x32xf32, #tpu.memory_space<vmem>>, vector<5x32xf32>
    %c30_270 = arith.constant 30 : index
    %c192_271 = arith.constant 192 : index
    %190 = vector.load %arg14[%c30_270, %c192_271] : memref<70x288xf32, #tpu.memory_space<vmem>>, vector<5x32xf32>
    tpu.vector_store %arg14[%c30_270, %c192_271], %189 {strides = array<i32>} : memref<70x288xf32, #tpu.memory_space<vmem>>, vector<5x32xf32>,
    %c187_272 = arith.constant 187 : index
    %c0_273 = arith.constant 0 : index
    %191 = tpu.strided_load %arg13[%c187_272, %c0_273] {strides = array<i32: 2, 1>} : memref<336x32xf32, #tpu.memory_space<vmem>>, vector<5x32xf32>
    %c35_274 = arith.constant 35 : index
    %c192_275 = arith.constant 192 : index
    %192 = vector.load %arg14[%c35_274, %c192_275] : memref<70x288xf32, #tpu.memory_space<vmem>>, vector<5x32xf32>
    tpu.vector_store %arg14[%c35_274, %c192_275], %191 {strides = array<i32>} : memref<70x288xf32, #tpu.memory_space<vmem>>, vector<5x32xf32>,
    %c209_276 = arith.constant 209 : index
    %c0_277 = arith.constant 0 : index
    %193 = tpu.strided_load %arg13[%c209_276, %c0_277] {strides = array<i32: 2, 1>} : memref<336x32xf32, #tpu.memory_space<vmem>>, vector<5x32xf32>
    %c40_278 = arith.constant 40 : index
    %c192_279 = arith.constant 192 : index
    %194 = vector.load %arg14[%c40_278, %c192_279] : memref<70x288xf32, #tpu.memory_space<vmem>>, vector<5x32xf32>
    tpu.vector_store %arg14[%c40_278, %c192_279], %193 {strides = array<i32>} : memref<70x288xf32, #tpu.memory_space<vmem>>, vector<5x32xf32>,
    %c231_280 = arith.constant 231 : index
    %c0_281 = arith.constant 0 : index
    %195 = tpu.strided_load %arg13[%c231_280, %c0_281] {strides = array<i32: 2, 1>} : memref<336x32xf32, #tpu.memory_space<vmem>>, vector<5x32xf32>
    %c45_282 = arith.constant 45 : index
    %c192_283 = arith.constant 192 : index
    %196 = vector.load %arg14[%c45_282, %c192_283] : memref<70x288xf32, #tpu.memory_space<vmem>>, vector<5x32xf32>
    tpu.vector_store %arg14[%c45_282, %c192_283], %195 {strides = array<i32>} : memref<70x288xf32, #tpu.memory_space<vmem>>, vector<5x32xf32>,
    %c253_284 = arith.constant 253 : index
    %c0_285 = arith.constant 0 : index
    %197 = tpu.strided_load %arg13[%c253_284, %c0_285] {strides = array<i32: 2, 1>} : memref<336x32xf32, #tpu.memory_space<vmem>>, vector<5x32xf32>
    %c50_286 = arith.constant 50 : index
    %c192_287 = arith.constant 192 : index
    %198 = vector.load %arg14[%c50_286, %c192_287] : memref<70x288xf32, #tpu.memory_space<vmem>>, vector<5x32xf32>
    tpu.vector_store %arg14[%c50_286, %c192_287], %197 {strides = array<i32>} : memref<70x288xf32, #tpu.memory_space<vmem>>, vector<5x32xf32>,
    %c275_288 = arith.constant 275 : index
    %c0_289 = arith.constant 0 : index
    %199 = tpu.strided_load %arg13[%c275_288, %c0_289] {strides = array<i32: 2, 1>} : memref<336x32xf32, #tpu.memory_space<vmem>>, vector<5x32xf32>
    %c55_290 = arith.constant 55 : index
    %c192_291 = arith.constant 192 : index
    %200 = vector.load %arg14[%c55_290, %c192_291] : memref<70x288xf32, #tpu.memory_space<vmem>>, vector<5x32xf32>
    tpu.vector_store %arg14[%c55_290, %c192_291], %199 {strides = array<i32>} : memref<70x288xf32, #tpu.memory_space<vmem>>, vector<5x32xf32>,
    %c297_292 = arith.constant 297 : index
    %c0_293 = arith.constant 0 : index
    %201 = tpu.strided_load %arg13[%c297_292, %c0_293] {strides = array<i32: 2, 1>} : memref<336x32xf32, #tpu.memory_space<vmem>>, vector<5x32xf32>
    %c60_294 = arith.constant 60 : index
    %c192_295 = arith.constant 192 : index
    %202 = vector.load %arg14[%c60_294, %c192_295] : memref<70x288xf32, #tpu.memory_space<vmem>>, vector<5x32xf32>
    tpu.vector_store %arg14[%c60_294, %c192_295], %201 {strides = array<i32>} : memref<70x288xf32, #tpu.memory_space<vmem>>, vector<5x32xf32>,
    %c319 = arith.constant 319 : index
    %c0_296 = arith.constant 0 : index
    %203 = tpu.strided_load %arg13[%c319, %c0_296] {strides = array<i32: 2, 1>} : memref<336x32xf32, #tpu.memory_space<vmem>>, vector<5x32xf32>
    %c65_297 = arith.constant 65 : index
    %c192_298 = arith.constant 192 : index
    %204 = vector.load %arg14[%c65_297, %c192_298] : memref<70x288xf32, #tpu.memory_space<vmem>>, vector<5x32xf32>
    tpu.vector_store %arg14[%c65_297, %c192_298], %203 {strides = array<i32>} : memref<70x288xf32, #tpu.memory_space<vmem>>, vector<5x32xf32>,
    %c23_299 = arith.constant 23 : index
    %c0_300 = arith.constant 0 : index
    %205 = tpu.strided_load %arg13[%c23_299, %c0_300] {strides = array<i32: 2, 1>} : memref<336x32xf32, #tpu.memory_space<vmem>>, vector<5x32xf32>
    %c0_301 = arith.constant 0 : index
    %c224 = arith.constant 224 : index
    %206 = vector.load %arg14[%c0_301, %c224] : memref<70x288xf32, #tpu.memory_space<vmem>>, vector<5x32xf32>
    tpu.vector_store %arg14[%c0_301, %c224], %205 {strides = array<i32>} : memref<70x288xf32, #tpu.memory_space<vmem>>, vector<5x32xf32>,
    %c45_302 = arith.constant 45 : index
    %c0_303 = arith.constant 0 : index
    %207 = tpu.strided_load %arg13[%c45_302, %c0_303] {strides = array<i32: 2, 1>} : memref<336x32xf32, #tpu.memory_space<vmem>>, vector<5x32xf32>
    %c5_304 = arith.constant 5 : index
    %c224_305 = arith.constant 224 : index
    %208 = vector.load %arg14[%c5_304, %c224_305] : memref<70x288xf32, #tpu.memory_space<vmem>>, vector<5x32xf32>
    tpu.vector_store %arg14[%c5_304, %c224_305], %207 {strides = array<i32>} : memref<70x288xf32, #tpu.memory_space<vmem>>, vector<5x32xf32>,
    %c67_306 = arith.constant 67 : index
    %c0_307 = arith.constant 0 : index
    %209 = tpu.strided_load %arg13[%c67_306, %c0_307] {strides = array<i32: 2, 1>} : memref<336x32xf32, #tpu.memory_space<vmem>>, vector<5x32xf32>
    %c10_308 = arith.constant 10 : index
    %c224_309 = arith.constant 224 : index
    %210 = vector.load %arg14[%c10_308, %c224_309] : memref<70x288xf32, #tpu.memory_space<vmem>>, vector<5x32xf32>
    tpu.vector_store %arg14[%c10_308, %c224_309], %209 {strides = array<i32>} : memref<70x288xf32, #tpu.memory_space<vmem>>, vector<5x32xf32>,
    %c89_310 = arith.constant 89 : index
    %c0_311 = arith.constant 0 : index
    %211 = tpu.strided_load %arg13[%c89_310, %c0_311] {strides = array<i32: 2, 1>} : memref<336x32xf32, #tpu.memory_space<vmem>>, vector<5x32xf32>
    %c15_312 = arith.constant 15 : index
    %c224_313 = arith.constant 224 : index
    %212 = vector.load %arg14[%c15_312, %c224_313] : memref<70x288xf32, #tpu.memory_space<vmem>>, vector<5x32xf32>
    tpu.vector_store %arg14[%c15_312, %c224_313], %211 {strides = array<i32>} : memref<70x288xf32, #tpu.memory_space<vmem>>, vector<5x32xf32>,
    %c111_314 = arith.constant 111 : index
    %c0_315 = arith.constant 0 : index
    %213 = tpu.strided_load %arg13[%c111_314, %c0_315] {strides = array<i32: 2, 1>} : memref<336x32xf32, #tpu.memory_space<vmem>>, vector<5x32xf32>
    %c20_316 = arith.constant 20 : index
    %c224_317 = arith.constant 224 : index
    %214 = vector.load %arg14[%c20_316, %c224_317] : memref<70x288xf32, #tpu.memory_space<vmem>>, vector<5x32xf32>
    tpu.vector_store %arg14[%c20_316, %c224_317], %213 {strides = array<i32>} : memref<70x288xf32, #tpu.memory_space<vmem>>, vector<5x32xf32>,
    %c133_318 = arith.constant 133 : index
    %c0_319 = arith.constant 0 : index
    %215 = tpu.strided_load %arg13[%c133_318, %c0_319] {strides = array<i32: 2, 1>} : memref<336x32xf32, #tpu.memory_space<vmem>>, vector<5x32xf32>
    %c25_320 = arith.constant 25 : index
    %c224_321 = arith.constant 224 : index
    %216 = vector.load %arg14[%c25_320, %c224_321] : memref<70x288xf32, #tpu.memory_space<vmem>>, vector<5x32xf32>
    tpu.vector_store %arg14[%c25_320, %c224_321], %215 {strides = array<i32>} : memref<70x288xf32, #tpu.memory_space<vmem>>, vector<5x32xf32>,
    %c155 = arith.constant 155 : index
    %c0_322 = arith.constant 0 : index
    %217 = tpu.strided_load %arg13[%c155, %c0_322] {strides = array<i32: 2, 1>} : memref<336x32xf32, #tpu.memory_space<vmem>>, vector<5x32xf32>
    %c30_323 = arith.constant 30 : index
    %c224_324 = arith.constant 224 : index
    %218 = vector.load %arg14[%c30_323, %c224_324] : memref<70x288xf32, #tpu.memory_space<vmem>>, vector<5x32xf32>
    tpu.vector_store %arg14[%c30_323, %c224_324], %217 {strides = array<i32>} : memref<70x288xf32, #tpu.memory_space<vmem>>, vector<5x32xf32>,
    %c188_325 = arith.constant 188 : index
    %c0_326 = arith.constant 0 : index
    %219 = tpu.strided_load %arg13[%c188_325, %c0_326] {strides = array<i32: 2, 1>} : memref<336x32xf32, #tpu.memory_space<vmem>>, vector<5x32xf32>
    %c35_327 = arith.constant 35 : index
    %c224_328 = arith.constant 224 : index
    %220 = vector.load %arg14[%c35_327, %c224_328] : memref<70x288xf32, #tpu.memory_space<vmem>>, vector<5x32xf32>
    tpu.vector_store %arg14[%c35_327, %c224_328], %219 {strides = array<i32>} : memref<70x288xf32, #tpu.memory_space<vmem>>, vector<5x32xf32>,
    %c210_329 = arith.constant 210 : index
    %c0_330 = arith.constant 0 : index
    %221 = tpu.strided_load %arg13[%c210_329, %c0_330] {strides = array<i32: 2, 1>} : memref<336x32xf32, #tpu.memory_space<vmem>>, vector<5x32xf32>
    %c40_331 = arith.constant 40 : index
    %c224_332 = arith.constant 224 : index
    %222 = vector.load %arg14[%c40_331, %c224_332] : memref<70x288xf32, #tpu.memory_space<vmem>>, vector<5x32xf32>
    tpu.vector_store %arg14[%c40_331, %c224_332], %221 {strides = array<i32>} : memref<70x288xf32, #tpu.memory_space<vmem>>, vector<5x32xf32>,
    %c232_333 = arith.constant 232 : index
    %c0_334 = arith.constant 0 : index
    %223 = tpu.strided_load %arg13[%c232_333, %c0_334] {strides = array<i32: 2, 1>} : memref<336x32xf32, #tpu.memory_space<vmem>>, vector<5x32xf32>
    %c45_335 = arith.constant 45 : index
    %c224_336 = arith.constant 224 : index
    %224 = vector.load %arg14[%c45_335, %c224_336] : memref<70x288xf32, #tpu.memory_space<vmem>>, vector<5x32xf32>
    tpu.vector_store %arg14[%c45_335, %c224_336], %223 {strides = array<i32>} : memref<70x288xf32, #tpu.memory_space<vmem>>, vector<5x32xf32>,
    %c254_337 = arith.constant 254 : index
    %c0_338 = arith.constant 0 : index
    %225 = tpu.strided_load %arg13[%c254_337, %c0_338] {strides = array<i32: 2, 1>} : memref<336x32xf32, #tpu.memory_space<vmem>>, vector<5x32xf32>
    %c50_339 = arith.constant 50 : index
    %c224_340 = arith.constant 224 : index
    %226 = vector.load %arg14[%c50_339, %c224_340] : memref<70x288xf32, #tpu.memory_space<vmem>>, vector<5x32xf32>
    tpu.vector_store %arg14[%c50_339, %c224_340], %225 {strides = array<i32>} : memref<70x288xf32, #tpu.memory_space<vmem>>, vector<5x32xf32>,
    %c276_341 = arith.constant 276 : index
    %c0_342 = arith.constant 0 : index
    %227 = tpu.strided_load %arg13[%c276_341, %c0_342] {strides = array<i32: 2, 1>} : memref<336x32xf32, #tpu.memory_space<vmem>>, vector<5x32xf32>
    %c55_343 = arith.constant 55 : index
    %c224_344 = arith.constant 224 : index
    %228 = vector.load %arg14[%c55_343, %c224_344] : memref<70x288xf32, #tpu.memory_space<vmem>>, vector<5x32xf32>
    tpu.vector_store %arg14[%c55_343, %c224_344], %227 {strides = array<i32>} : memref<70x288xf32, #tpu.memory_space<vmem>>, vector<5x32xf32>,
    %c298_345 = arith.constant 298 : index
    %c0_346 = arith.constant 0 : index
    %229 = tpu.strided_load %arg13[%c298_345, %c0_346] {strides = array<i32: 2, 1>} : memref<336x32xf32, #tpu.memory_space<vmem>>, vector<5x32xf32>
    %c60_347 = arith.constant 60 : index
    %c224_348 = arith.constant 224 : index
    %230 = vector.load %arg14[%c60_347, %c224_348] : memref<70x288xf32, #tpu.memory_space<vmem>>, vector<5x32xf32>
    tpu.vector_store %arg14[%c60_347, %c224_348], %229 {strides = array<i32>} : memref<70x288xf32, #tpu.memory_space<vmem>>, vector<5x32xf32>,
    %c320 = arith.constant 320 : index
    %c0_349 = arith.constant 0 : index
    %231 = tpu.strided_load %arg13[%c320, %c0_349] {strides = array<i32: 2, 1>} : memref<336x32xf32, #tpu.memory_space<vmem>>, vector<5x32xf32>
    %c65_350 = arith.constant 65 : index
    %c224_351 = arith.constant 224 : index
    %232 = vector.load %arg14[%c65_350, %c224_351] : memref<70x288xf32, #tpu.memory_space<vmem>>, vector<5x32xf32>
    tpu.vector_store %arg14[%c65_350, %c224_351], %231 {strides = array<i32>} : memref<70x288xf32, #tpu.memory_space<vmem>>, vector<5x32xf32>,
    %c24_352 = arith.constant 24 : index
    %c0_353 = arith.constant 0 : index
    %233 = tpu.strided_load %arg13[%c24_352, %c0_353] {strides = array<i32: 2, 1>} : memref<336x32xf32, #tpu.memory_space<vmem>>, vector<5x32xf32>
    %c0_354 = arith.constant 0 : index
    %c256 = arith.constant 256 : index
    %234 = vector.load %arg14[%c0_354, %c256] : memref<70x288xf32, #tpu.memory_space<vmem>>, vector<5x32xf32>
    tpu.vector_store %arg14[%c0_354, %c256], %233 {strides = array<i32>} : memref<70x288xf32, #tpu.memory_space<vmem>>, vector<5x32xf32>,
    %c46_355 = arith.constant 46 : index
    %c0_356 = arith.constant 0 : index
    %235 = tpu.strided_load %arg13[%c46_355, %c0_356] {strides = array<i32: 2, 1>} : memref<336x32xf32, #tpu.memory_space<vmem>>, vector<5x32xf32>
    %c5_357 = arith.constant 5 : index
    %c256_358 = arith.constant 256 : index
    %236 = vector.load %arg14[%c5_357, %c256_358] : memref<70x288xf32, #tpu.memory_space<vmem>>, vector<5x32xf32>
    tpu.vector_store %arg14[%c5_357, %c256_358], %235 {strides = array<i32>} : memref<70x288xf32, #tpu.memory_space<vmem>>, vector<5x32xf32>,
    %c68_359 = arith.constant 68 : index
    %c0_360 = arith.constant 0 : index
    %237 = tpu.strided_load %arg13[%c68_359, %c0_360] {strides = array<i32: 2, 1>} : memref<336x32xf32, #tpu.memory_space<vmem>>, vector<5x32xf32>
    %c10_361 = arith.constant 10 : index
    %c256_362 = arith.constant 256 : index
    %238 = vector.load %arg14[%c10_361, %c256_362] : memref<70x288xf32, #tpu.memory_space<vmem>>, vector<5x32xf32>
    tpu.vector_store %arg14[%c10_361, %c256_362], %237 {strides = array<i32>} : memref<70x288xf32, #tpu.memory_space<vmem>>, vector<5x32xf32>,
    %c90_363 = arith.constant 90 : index
    %c0_364 = arith.constant 0 : index
    %239 = tpu.strided_load %arg13[%c90_363, %c0_364] {strides = array<i32: 2, 1>} : memref<336x32xf32, #tpu.memory_space<vmem>>, vector<5x32xf32>
    %c15_365 = arith.constant 15 : index
    %c256_366 = arith.constant 256 : index
    %240 = vector.load %arg14[%c15_365, %c256_366] : memref<70x288xf32, #tpu.memory_space<vmem>>, vector<5x32xf32>
    tpu.vector_store %arg14[%c15_365, %c256_366], %239 {strides = array<i32>} : memref<70x288xf32, #tpu.memory_space<vmem>>, vector<5x32xf32>,
    %c112_367 = arith.constant 112 : index
    %c0_368 = arith.constant 0 : index
    %241 = tpu.strided_load %arg13[%c112_367, %c0_368] {strides = array<i32: 2, 1>} : memref<336x32xf32, #tpu.memory_space<vmem>>, vector<5x32xf32>
    %c20_369 = arith.constant 20 : index
    %c256_370 = arith.constant 256 : index
    %242 = vector.load %arg14[%c20_369, %c256_370] : memref<70x288xf32, #tpu.memory_space<vmem>>, vector<5x32xf32>
    tpu.vector_store %arg14[%c20_369, %c256_370], %241 {strides = array<i32>} : memref<70x288xf32, #tpu.memory_space<vmem>>, vector<5x32xf32>,
    %c134_371 = arith.constant 134 : index
    %c0_372 = arith.constant 0 : index
    %243 = tpu.strided_load %arg13[%c134_371, %c0_372] {strides = array<i32: 2, 1>} : memref<336x32xf32, #tpu.memory_space<vmem>>, vector<5x32xf32>
    %c25_373 = arith.constant 25 : index
    %c256_374 = arith.constant 256 : index
    %244 = vector.load %arg14[%c25_373, %c256_374] : memref<70x288xf32, #tpu.memory_space<vmem>>, vector<5x32xf32>
    tpu.vector_store %arg14[%c25_373, %c256_374], %243 {strides = array<i32>} : memref<70x288xf32, #tpu.memory_space<vmem>>, vector<5x32xf32>,
    %c156 = arith.constant 156 : index
    %c0_375 = arith.constant 0 : index
    %245 = tpu.strided_load %arg13[%c156, %c0_375] {strides = array<i32: 2, 1>} : memref<336x32xf32, #tpu.memory_space<vmem>>, vector<5x32xf32>
    %c30_376 = arith.constant 30 : index
    %c256_377 = arith.constant 256 : index
    %246 = vector.load %arg14[%c30_376, %c256_377] : memref<70x288xf32, #tpu.memory_space<vmem>>, vector<5x32xf32>
    tpu.vector_store %arg14[%c30_376, %c256_377], %245 {strides = array<i32>} : memref<70x288xf32, #tpu.memory_space<vmem>>, vector<5x32xf32>,
    %c189_378 = arith.constant 189 : index
    %c0_379 = arith.constant 0 : index
    %247 = tpu.strided_load %arg13[%c189_378, %c0_379] {strides = array<i32: 2, 1>} : memref<336x32xf32, #tpu.memory_space<vmem>>, vector<5x32xf32>
    %c35_380 = arith.constant 35 : index
    %c256_381 = arith.constant 256 : index
    %248 = vector.load %arg14[%c35_380, %c256_381] : memref<70x288xf32, #tpu.memory_space<vmem>>, vector<5x32xf32>
    tpu.vector_store %arg14[%c35_380, %c256_381], %247 {strides = array<i32>} : memref<70x288xf32, #tpu.memory_space<vmem>>, vector<5x32xf32>,
    %c211_382 = arith.constant 211 : index
    %c0_383 = arith.constant 0 : index
    %249 = tpu.strided_load %arg13[%c211_382, %c0_383] {strides = array<i32: 2, 1>} : memref<336x32xf32, #tpu.memory_space<vmem>>, vector<5x32xf32>
    %c40_384 = arith.constant 40 : index
    %c256_385 = arith.constant 256 : index
    %250 = vector.load %arg14[%c40_384, %c256_385] : memref<70x288xf32, #tpu.memory_space<vmem>>, vector<5x32xf32>
    tpu.vector_store %arg14[%c40_384, %c256_385], %249 {strides = array<i32>} : memref<70x288xf32, #tpu.memory_space<vmem>>, vector<5x32xf32>,
    %c233_386 = arith.constant 233 : index
    %c0_387 = arith.constant 0 : index
    %251 = tpu.strided_load %arg13[%c233_386, %c0_387] {strides = array<i32: 2, 1>} : memref<336x32xf32, #tpu.memory_space<vmem>>, vector<5x32xf32>
    %c45_388 = arith.constant 45 : index
    %c256_389 = arith.constant 256 : index
    %252 = vector.load %arg14[%c45_388, %c256_389] : memref<70x288xf32, #tpu.memory_space<vmem>>, vector<5x32xf32>
    tpu.vector_store %arg14[%c45_388, %c256_389], %251 {strides = array<i32>} : memref<70x288xf32, #tpu.memory_space<vmem>>, vector<5x32xf32>,
    %c255_390 = arith.constant 255 : index
    %c0_391 = arith.constant 0 : index
    %253 = tpu.strided_load %arg13[%c255_390, %c0_391] {strides = array<i32: 2, 1>} : memref<336x32xf32, #tpu.memory_space<vmem>>, vector<5x32xf32>
    %c50_392 = arith.constant 50 : index
    %c256_393 = arith.constant 256 : index
    %254 = vector.load %arg14[%c50_392, %c256_393] : memref<70x288xf32, #tpu.memory_space<vmem>>, vector<5x32xf32>
    tpu.vector_store %arg14[%c50_392, %c256_393], %253 {strides = array<i32>} : memref<70x288xf32, #tpu.memory_space<vmem>>, vector<5x32xf32>,
    %c277_394 = arith.constant 277 : index
    %c0_395 = arith.constant 0 : index
    %255 = tpu.strided_load %arg13[%c277_394, %c0_395] {strides = array<i32: 2, 1>} : memref<336x32xf32, #tpu.memory_space<vmem>>, vector<5x32xf32>
    %c55_396 = arith.constant 55 : index
    %c256_397 = arith.constant 256 : index
    %256 = vector.load %arg14[%c55_396, %c256_397] : memref<70x288xf32, #tpu.memory_space<vmem>>, vector<5x32xf32>
    tpu.vector_store %arg14[%c55_396, %c256_397], %255 {strides = array<i32>} : memref<70x288xf32, #tpu.memory_space<vmem>>, vector<5x32xf32>,
    %c299_398 = arith.constant 299 : index
    %c0_399 = arith.constant 0 : index
    %257 = tpu.strided_load %arg13[%c299_398, %c0_399] {strides = array<i32: 2, 1>} : memref<336x32xf32, #tpu.memory_space<vmem>>, vector<5x32xf32>
    %c60_400 = arith.constant 60 : index
    %c256_401 = arith.constant 256 : index
    %258 = vector.load %arg14[%c60_400, %c256_401] : memref<70x288xf32, #tpu.memory_space<vmem>>, vector<5x32xf32>
    tpu.vector_store %arg14[%c60_400, %c256_401], %257 {strides = array<i32>} : memref<70x288xf32, #tpu.memory_space<vmem>>, vector<5x32xf32>,
    %c321 = arith.constant 321 : index
    %c0_402 = arith.constant 0 : index
    %259 = tpu.strided_load %arg13[%c321, %c0_402] {strides = array<i32: 2, 1>} : memref<336x32xf32, #tpu.memory_space<vmem>>, vector<5x32xf32>
    %c65_403 = arith.constant 65 : index
    %c256_404 = arith.constant 256 : index
    %260 = vector.load %arg14[%c65_403, %c256_404] : memref<70x288xf32, #tpu.memory_space<vmem>>, vector<5x32xf32>
    tpu.vector_store %arg14[%c65_403, %c256_404], %259 {strides = array<i32>} : memref<70x288xf32, #tpu.memory_space<vmem>>, vector<5x32xf32>,
    %c0_405 = arith.constant 0 : index
    %c0_406 = arith.constant 0 : index
    %261 = vector.load %arg14[%c0_405, %c0_406] : memref<70x288xf32, #tpu.memory_space<vmem>>, vector<70x288xf32>
    %262 = arith.truncf %261 : vector<70x288xf32> to vector<70x288xbf16>
    %c0_407 = arith.constant 0 : index
    %c0_408 = arith.constant 0 : index
    %263 = vector.load %arg4[%c0_407, %c0_408] : memref<288x64xbf16, #tpu.memory_space<vmem>>, vector<288x64xbf16>
    %cst_409 = arith.constant dense<0.000000e+00> : vector<70x64xf32>
    %264 = tpu.matmul %262, %263, %cst_409 {dimension_numbers = #tpu.dot_dimension_numbers<[1], [0], [0], [1], [0, 0, 1, 1], [], []>} : vector<70x288xbf16>, vector<288x64xbf16>, vector<70x64xf32> -> vector<70x64xf32>
    %c0_410 = arith.constant 0 : index
    %c0_411 = arith.constant 0 : index
    %265 = vector.load %arg5[%c0_410, %c0_411] : memref<1x64xf32, #tpu.memory_space<vmem>>, vector<1x64xf32>
    %266 = vector.broadcast %265 : vector<1x64xf32> to vector<70x64xf32>
    %267 = arith.addf %264, %266 : vector<70x64xf32>
    %cst_412 = arith.constant 0.000000e+00 : f32
    %268 = vector.broadcast %cst_412 : f32 to vector<70x64xf32>
    %269 = arith.maximumf %267, %268 : vector<70x64xf32>
    %c0_413 = arith.constant 0 : index
    %c0_414 = arith.constant 0 : index
    %270 = vector.load %arg15[%c0_413, %c0_414] : memref<70x64xf32, #tpu.memory_space<vmem>>, vector<70x64xf32>
    tpu.vector_store %arg15[%c0_413, %c0_414], %269 {strides = array<i32>} : memref<70x64xf32, #tpu.memory_space<vmem>>, vector<70x64xf32>,
    %c0_415 = arith.constant 0 : index
    %c0_416 = arith.constant 0 : index
    %271 = vector.load %arg15[%c0_415, %c0_416] : memref<70x64xf32, #tpu.memory_space<vmem>>, vector<3x64xf32>
    %c0_417 = arith.constant 0 : index
    %c0_418 = arith.constant 0 : index
    %272 = vector.load %arg16[%c0_417, %c0_418] : memref<30x576xf32, #tpu.memory_space<vmem>>, vector<3x64xf32>
    tpu.vector_store %arg16[%c0_417, %c0_418], %271 {strides = array<i32>} : memref<30x576xf32, #tpu.memory_space<vmem>>, vector<3x64xf32>,
    %c5_419 = arith.constant 5 : index
    %c0_420 = arith.constant 0 : index
    %273 = vector.load %arg15[%c5_419, %c0_420] : memref<70x64xf32, #tpu.memory_space<vmem>>, vector<3x64xf32>
    %c3 = arith.constant 3 : index
    %c0_421 = arith.constant 0 : index
    %274 = vector.load %arg16[%c3, %c0_421] : memref<30x576xf32, #tpu.memory_space<vmem>>, vector<3x64xf32>
    tpu.vector_store %arg16[%c3, %c0_421], %273 {strides = array<i32>} : memref<30x576xf32, #tpu.memory_space<vmem>>, vector<3x64xf32>,
    %c10_422 = arith.constant 10 : index
    %c0_423 = arith.constant 0 : index
    %275 = vector.load %arg15[%c10_422, %c0_423] : memref<70x64xf32, #tpu.memory_space<vmem>>, vector<3x64xf32>
    %c6 = arith.constant 6 : index
    %c0_424 = arith.constant 0 : index
    %276 = vector.load %arg16[%c6, %c0_424] : memref<30x576xf32, #tpu.memory_space<vmem>>, vector<3x64xf32>
    tpu.vector_store %arg16[%c6, %c0_424], %275 {strides = array<i32>} : memref<30x576xf32, #tpu.memory_space<vmem>>, vector<3x64xf32>,
    %c15_425 = arith.constant 15 : index
    %c0_426 = arith.constant 0 : index
    %277 = vector.load %arg15[%c15_425, %c0_426] : memref<70x64xf32, #tpu.memory_space<vmem>>, vector<3x64xf32>
    %c9 = arith.constant 9 : index
    %c0_427 = arith.constant 0 : index
    %278 = vector.load %arg16[%c9, %c0_427] : memref<30x576xf32, #tpu.memory_space<vmem>>, vector<3x64xf32>
    tpu.vector_store %arg16[%c9, %c0_427], %277 {strides = array<i32>} : memref<30x576xf32, #tpu.memory_space<vmem>>, vector<3x64xf32>,
    %c20_428 = arith.constant 20 : index
    %c0_429 = arith.constant 0 : index
    %279 = vector.load %arg15[%c20_428, %c0_429] : memref<70x64xf32, #tpu.memory_space<vmem>>, vector<3x64xf32>
    %c12_430 = arith.constant 12 : index
    %c0_431 = arith.constant 0 : index
    %280 = vector.load %arg16[%c12_430, %c0_431] : memref<30x576xf32, #tpu.memory_space<vmem>>, vector<3x64xf32>
    tpu.vector_store %arg16[%c12_430, %c0_431], %279 {strides = array<i32>} : memref<30x576xf32, #tpu.memory_space<vmem>>, vector<3x64xf32>,
    %c35_432 = arith.constant 35 : index
    %c0_433 = arith.constant 0 : index
    %281 = vector.load %arg15[%c35_432, %c0_433] : memref<70x64xf32, #tpu.memory_space<vmem>>, vector<3x64xf32>
    %c15_434 = arith.constant 15 : index
    %c0_435 = arith.constant 0 : index
    %282 = vector.load %arg16[%c15_434, %c0_435] : memref<30x576xf32, #tpu.memory_space<vmem>>, vector<3x64xf32>
    tpu.vector_store %arg16[%c15_434, %c0_435], %281 {strides = array<i32>} : memref<30x576xf32, #tpu.memory_space<vmem>>, vector<3x64xf32>,
    %c40_436 = arith.constant 40 : index
    %c0_437 = arith.constant 0 : index
    %283 = vector.load %arg15[%c40_436, %c0_437] : memref<70x64xf32, #tpu.memory_space<vmem>>, vector<3x64xf32>
    %c18 = arith.constant 18 : index
    %c0_438 = arith.constant 0 : index
    %284 = vector.load %arg16[%c18, %c0_438] : memref<30x576xf32, #tpu.memory_space<vmem>>, vector<3x64xf32>
    tpu.vector_store %arg16[%c18, %c0_438], %283 {strides = array<i32>} : memref<30x576xf32, #tpu.memory_space<vmem>>, vector<3x64xf32>,
    %c45_439 = arith.constant 45 : index
    %c0_440 = arith.constant 0 : index
    %285 = vector.load %arg15[%c45_439, %c0_440] : memref<70x64xf32, #tpu.memory_space<vmem>>, vector<3x64xf32>
    %c21 = arith.constant 21 : index
    %c0_441 = arith.constant 0 : index
    %286 = vector.load %arg16[%c21, %c0_441] : memref<30x576xf32, #tpu.memory_space<vmem>>, vector<3x64xf32>
    tpu.vector_store %arg16[%c21, %c0_441], %285 {strides = array<i32>} : memref<30x576xf32, #tpu.memory_space<vmem>>, vector<3x64xf32>,
    %c50_442 = arith.constant 50 : index
    %c0_443 = arith.constant 0 : index
    %287 = vector.load %arg15[%c50_442, %c0_443] : memref<70x64xf32, #tpu.memory_space<vmem>>, vector<3x64xf32>
    %c24_444 = arith.constant 24 : index
    %c0_445 = arith.constant 0 : index
    %288 = vector.load %arg16[%c24_444, %c0_445] : memref<30x576xf32, #tpu.memory_space<vmem>>, vector<3x64xf32>
    tpu.vector_store %arg16[%c24_444, %c0_445], %287 {strides = array<i32>} : memref<30x576xf32, #tpu.memory_space<vmem>>, vector<3x64xf32>,
    %c55_446 = arith.constant 55 : index
    %c0_447 = arith.constant 0 : index
    %289 = vector.load %arg15[%c55_446, %c0_447] : memref<70x64xf32, #tpu.memory_space<vmem>>, vector<3x64xf32>
    %c27 = arith.constant 27 : index
    %c0_448 = arith.constant 0 : index
    %290 = vector.load %arg16[%c27, %c0_448] : memref<30x576xf32, #tpu.memory_space<vmem>>, vector<3x64xf32>
    tpu.vector_store %arg16[%c27, %c0_448], %289 {strides = array<i32>} : memref<30x576xf32, #tpu.memory_space<vmem>>, vector<3x64xf32>,
    %c1_449 = arith.constant 1 : index
    %c0_450 = arith.constant 0 : index
    %291 = vector.load %arg15[%c1_449, %c0_450] : memref<70x64xf32, #tpu.memory_space<vmem>>, vector<3x64xf32>
    %c0_451 = arith.constant 0 : index
    %c64_452 = arith.constant 64 : index
    %292 = vector.load %arg16[%c0_451, %c64_452] : memref<30x576xf32, #tpu.memory_space<vmem>>, vector<3x64xf32>
    tpu.vector_store %arg16[%c0_451, %c64_452], %291 {strides = array<i32>} : memref<30x576xf32, #tpu.memory_space<vmem>>, vector<3x64xf32>,
    %c6_453 = arith.constant 6 : index
    %c0_454 = arith.constant 0 : index
    %293 = vector.load %arg15[%c6_453, %c0_454] : memref<70x64xf32, #tpu.memory_space<vmem>>, vector<3x64xf32>
    %c3_455 = arith.constant 3 : index
    %c64_456 = arith.constant 64 : index
    %294 = vector.load %arg16[%c3_455, %c64_456] : memref<30x576xf32, #tpu.memory_space<vmem>>, vector<3x64xf32>
    tpu.vector_store %arg16[%c3_455, %c64_456], %293 {strides = array<i32>} : memref<30x576xf32, #tpu.memory_space<vmem>>, vector<3x64xf32>,
    %c11_457 = arith.constant 11 : index
    %c0_458 = arith.constant 0 : index
    %295 = vector.load %arg15[%c11_457, %c0_458] : memref<70x64xf32, #tpu.memory_space<vmem>>, vector<3x64xf32>
    %c6_459 = arith.constant 6 : index
    %c64_460 = arith.constant 64 : index
    %296 = vector.load %arg16[%c6_459, %c64_460] : memref<30x576xf32, #tpu.memory_space<vmem>>, vector<3x64xf32>
    tpu.vector_store %arg16[%c6_459, %c64_460], %295 {strides = array<i32>} : memref<30x576xf32, #tpu.memory_space<vmem>>, vector<3x64xf32>,
    %c16 = arith.constant 16 : index
    %c0_461 = arith.constant 0 : index
    %297 = vector.load %arg15[%c16, %c0_461] : memref<70x64xf32, #tpu.memory_space<vmem>>, vector<3x64xf32>
    %c9_462 = arith.constant 9 : index
    %c64_463 = arith.constant 64 : index
    %298 = vector.load %arg16[%c9_462, %c64_463] : memref<30x576xf32, #tpu.memory_space<vmem>>, vector<3x64xf32>
    tpu.vector_store %arg16[%c9_462, %c64_463], %297 {strides = array<i32>} : memref<30x576xf32, #tpu.memory_space<vmem>>, vector<3x64xf32>,
    %c21_464 = arith.constant 21 : index
    %c0_465 = arith.constant 0 : index
    %299 = vector.load %arg15[%c21_464, %c0_465] : memref<70x64xf32, #tpu.memory_space<vmem>>, vector<3x64xf32>
    %c12_466 = arith.constant 12 : index
    %c64_467 = arith.constant 64 : index
    %300 = vector.load %arg16[%c12_466, %c64_467] : memref<30x576xf32, #tpu.memory_space<vmem>>, vector<3x64xf32>
    tpu.vector_store %arg16[%c12_466, %c64_467], %299 {strides = array<i32>} : memref<30x576xf32, #tpu.memory_space<vmem>>, vector<3x64xf32>,
    %c36 = arith.constant 36 : index
    %c0_468 = arith.constant 0 : index
    %301 = vector.load %arg15[%c36, %c0_468] : memref<70x64xf32, #tpu.memory_space<vmem>>, vector<3x64xf32>
    %c15_469 = arith.constant 15 : index
    %c64_470 = arith.constant 64 : index
    %302 = vector.load %arg16[%c15_469, %c64_470] : memref<30x576xf32, #tpu.memory_space<vmem>>, vector<3x64xf32>
    tpu.vector_store %arg16[%c15_469, %c64_470], %301 {strides = array<i32>} : memref<30x576xf32, #tpu.memory_space<vmem>>, vector<3x64xf32>,
    %c41 = arith.constant 41 : index
    %c0_471 = arith.constant 0 : index
    %303 = vector.load %arg15[%c41, %c0_471] : memref<70x64xf32, #tpu.memory_space<vmem>>, vector<3x64xf32>
    %c18_472 = arith.constant 18 : index
    %c64_473 = arith.constant 64 : index
    %304 = vector.load %arg16[%c18_472, %c64_473] : memref<30x576xf32, #tpu.memory_space<vmem>>, vector<3x64xf32>
    tpu.vector_store %arg16[%c18_472, %c64_473], %303 {strides = array<i32>} : memref<30x576xf32, #tpu.memory_space<vmem>>, vector<3x64xf32>,
    %c46_474 = arith.constant 46 : index
    %c0_475 = arith.constant 0 : index
    %305 = vector.load %arg15[%c46_474, %c0_475] : memref<70x64xf32, #tpu.memory_space<vmem>>, vector<3x64xf32>
    %c21_476 = arith.constant 21 : index
    %c64_477 = arith.constant 64 : index
    %306 = vector.load %arg16[%c21_476, %c64_477] : memref<30x576xf32, #tpu.memory_space<vmem>>, vector<3x64xf32>
    tpu.vector_store %arg16[%c21_476, %c64_477], %305 {strides = array<i32>} : memref<30x576xf32, #tpu.memory_space<vmem>>, vector<3x64xf32>,
    %c51 = arith.constant 51 : index
    %c0_478 = arith.constant 0 : index
    %307 = vector.load %arg15[%c51, %c0_478] : memref<70x64xf32, #tpu.memory_space<vmem>>, vector<3x64xf32>
    %c24_479 = arith.constant 24 : index
    %c64_480 = arith.constant 64 : index
    %308 = vector.load %arg16[%c24_479, %c64_480] : memref<30x576xf32, #tpu.memory_space<vmem>>, vector<3x64xf32>
    tpu.vector_store %arg16[%c24_479, %c64_480], %307 {strides = array<i32>} : memref<30x576xf32, #tpu.memory_space<vmem>>, vector<3x64xf32>,
    %c56_481 = arith.constant 56 : index
    %c0_482 = arith.constant 0 : index
    %309 = vector.load %arg15[%c56_481, %c0_482] : memref<70x64xf32, #tpu.memory_space<vmem>>, vector<3x64xf32>
    %c27_483 = arith.constant 27 : index
    %c64_484 = arith.constant 64 : index
    %310 = vector.load %arg16[%c27_483, %c64_484] : memref<30x576xf32, #tpu.memory_space<vmem>>, vector<3x64xf32>
    tpu.vector_store %arg16[%c27_483, %c64_484], %309 {strides = array<i32>} : memref<30x576xf32, #tpu.memory_space<vmem>>, vector<3x64xf32>,
    %c2_485 = arith.constant 2 : index
    %c0_486 = arith.constant 0 : index
    %311 = vector.load %arg15[%c2_485, %c0_486] : memref<70x64xf32, #tpu.memory_space<vmem>>, vector<3x64xf32>
    %c0_487 = arith.constant 0 : index
    %c128_488 = arith.constant 128 : index
    %312 = vector.load %arg16[%c0_487, %c128_488] : memref<30x576xf32, #tpu.memory_space<vmem>>, vector<3x64xf32>
    tpu.vector_store %arg16[%c0_487, %c128_488], %311 {strides = array<i32>} : memref<30x576xf32, #tpu.memory_space<vmem>>, vector<3x64xf32>,
    %c7 = arith.constant 7 : index
    %c0_489 = arith.constant 0 : index
    %313 = vector.load %arg15[%c7, %c0_489] : memref<70x64xf32, #tpu.memory_space<vmem>>, vector<3x64xf32>
    %c3_490 = arith.constant 3 : index
    %c128_491 = arith.constant 128 : index
    %314 = vector.load %arg16[%c3_490, %c128_491] : memref<30x576xf32, #tpu.memory_space<vmem>>, vector<3x64xf32>
    tpu.vector_store %arg16[%c3_490, %c128_491], %313 {strides = array<i32>} : memref<30x576xf32, #tpu.memory_space<vmem>>, vector<3x64xf32>,
    %c12_492 = arith.constant 12 : index
    %c0_493 = arith.constant 0 : index
    %315 = vector.load %arg15[%c12_492, %c0_493] : memref<70x64xf32, #tpu.memory_space<vmem>>, vector<3x64xf32>
    %c6_494 = arith.constant 6 : index
    %c128_495 = arith.constant 128 : index
    %316 = vector.load %arg16[%c6_494, %c128_495] : memref<30x576xf32, #tpu.memory_space<vmem>>, vector<3x64xf32>
    tpu.vector_store %arg16[%c6_494, %c128_495], %315 {strides = array<i32>} : memref<30x576xf32, #tpu.memory_space<vmem>>, vector<3x64xf32>,
    %c17 = arith.constant 17 : index
    %c0_496 = arith.constant 0 : index
    %317 = vector.load %arg15[%c17, %c0_496] : memref<70x64xf32, #tpu.memory_space<vmem>>, vector<3x64xf32>
    %c9_497 = arith.constant 9 : index
    %c128_498 = arith.constant 128 : index
    %318 = vector.load %arg16[%c9_497, %c128_498] : memref<30x576xf32, #tpu.memory_space<vmem>>, vector<3x64xf32>
    tpu.vector_store %arg16[%c9_497, %c128_498], %317 {strides = array<i32>} : memref<30x576xf32, #tpu.memory_space<vmem>>, vector<3x64xf32>,
    %c22_499 = arith.constant 22 : index
    %c0_500 = arith.constant 0 : index
    %319 = vector.load %arg15[%c22_499, %c0_500] : memref<70x64xf32, #tpu.memory_space<vmem>>, vector<3x64xf32>
    %c12_501 = arith.constant 12 : index
    %c128_502 = arith.constant 128 : index
    %320 = vector.load %arg16[%c12_501, %c128_502] : memref<30x576xf32, #tpu.memory_space<vmem>>, vector<3x64xf32>
    tpu.vector_store %arg16[%c12_501, %c128_502], %319 {strides = array<i32>} : memref<30x576xf32, #tpu.memory_space<vmem>>, vector<3x64xf32>,
    %c37 = arith.constant 37 : index
    %c0_503 = arith.constant 0 : index
    %321 = vector.load %arg15[%c37, %c0_503] : memref<70x64xf32, #tpu.memory_space<vmem>>, vector<3x64xf32>
    %c15_504 = arith.constant 15 : index
    %c128_505 = arith.constant 128 : index
    %322 = vector.load %arg16[%c15_504, %c128_505] : memref<30x576xf32, #tpu.memory_space<vmem>>, vector<3x64xf32>
    tpu.vector_store %arg16[%c15_504, %c128_505], %321 {strides = array<i32>} : memref<30x576xf32, #tpu.memory_space<vmem>>, vector<3x64xf32>,
    %c42 = arith.constant 42 : index
    %c0_506 = arith.constant 0 : index
    %323 = vector.load %arg15[%c42, %c0_506] : memref<70x64xf32, #tpu.memory_space<vmem>>, vector<3x64xf32>
    %c18_507 = arith.constant 18 : index
    %c128_508 = arith.constant 128 : index
    %324 = vector.load %arg16[%c18_507, %c128_508] : memref<30x576xf32, #tpu.memory_space<vmem>>, vector<3x64xf32>
    tpu.vector_store %arg16[%c18_507, %c128_508], %323 {strides = array<i32>} : memref<30x576xf32, #tpu.memory_space<vmem>>, vector<3x64xf32>,
    %c47 = arith.constant 47 : index
    %c0_509 = arith.constant 0 : index
    %325 = vector.load %arg15[%c47, %c0_509] : memref<70x64xf32, #tpu.memory_space<vmem>>, vector<3x64xf32>
    %c21_510 = arith.constant 21 : index
    %c128_511 = arith.constant 128 : index
    %326 = vector.load %arg16[%c21_510, %c128_511] : memref<30x576xf32, #tpu.memory_space<vmem>>, vector<3x64xf32>
    tpu.vector_store %arg16[%c21_510, %c128_511], %325 {strides = array<i32>} : memref<30x576xf32, #tpu.memory_space<vmem>>, vector<3x64xf32>,
    %c52 = arith.constant 52 : index
    %c0_512 = arith.constant 0 : index
    %327 = vector.load %arg15[%c52, %c0_512] : memref<70x64xf32, #tpu.memory_space<vmem>>, vector<3x64xf32>
    %c24_513 = arith.constant 24 : index
    %c128_514 = arith.constant 128 : index
    %328 = vector.load %arg16[%c24_513, %c128_514] : memref<30x576xf32, #tpu.memory_space<vmem>>, vector<3x64xf32>
    tpu.vector_store %arg16[%c24_513, %c128_514], %327 {strides = array<i32>} : memref<30x576xf32, #tpu.memory_space<vmem>>, vector<3x64xf32>,
    %c57_515 = arith.constant 57 : index
    %c0_516 = arith.constant 0 : index
    %329 = vector.load %arg15[%c57_515, %c0_516] : memref<70x64xf32, #tpu.memory_space<vmem>>, vector<3x64xf32>
    %c27_517 = arith.constant 27 : index
    %c128_518 = arith.constant 128 : index
    %330 = vector.load %arg16[%c27_517, %c128_518] : memref<30x576xf32, #tpu.memory_space<vmem>>, vector<3x64xf32>
    tpu.vector_store %arg16[%c27_517, %c128_518], %329 {strides = array<i32>} : memref<30x576xf32, #tpu.memory_space<vmem>>, vector<3x64xf32>,
    %c5_519 = arith.constant 5 : index
    %c0_520 = arith.constant 0 : index
    %331 = vector.load %arg15[%c5_519, %c0_520] : memref<70x64xf32, #tpu.memory_space<vmem>>, vector<3x64xf32>
    %c0_521 = arith.constant 0 : index
    %c192_522 = arith.constant 192 : index
    %332 = vector.load %arg16[%c0_521, %c192_522] : memref<30x576xf32, #tpu.memory_space<vmem>>, vector<3x64xf32>
    tpu.vector_store %arg16[%c0_521, %c192_522], %331 {strides = array<i32>} : memref<30x576xf32, #tpu.memory_space<vmem>>, vector<3x64xf32>,
    %c10_523 = arith.constant 10 : index
    %c0_524 = arith.constant 0 : index
    %333 = vector.load %arg15[%c10_523, %c0_524] : memref<70x64xf32, #tpu.memory_space<vmem>>, vector<3x64xf32>
    %c3_525 = arith.constant 3 : index
    %c192_526 = arith.constant 192 : index
    %334 = vector.load %arg16[%c3_525, %c192_526] : memref<30x576xf32, #tpu.memory_space<vmem>>, vector<3x64xf32>
    tpu.vector_store %arg16[%c3_525, %c192_526], %333 {strides = array<i32>} : memref<30x576xf32, #tpu.memory_space<vmem>>, vector<3x64xf32>,
    %c15_527 = arith.constant 15 : index
    %c0_528 = arith.constant 0 : index
    %335 = vector.load %arg15[%c15_527, %c0_528] : memref<70x64xf32, #tpu.memory_space<vmem>>, vector<3x64xf32>
    %c6_529 = arith.constant 6 : index
    %c192_530 = arith.constant 192 : index
    %336 = vector.load %arg16[%c6_529, %c192_530] : memref<30x576xf32, #tpu.memory_space<vmem>>, vector<3x64xf32>
    tpu.vector_store %arg16[%c6_529, %c192_530], %335 {strides = array<i32>} : memref<30x576xf32, #tpu.memory_space<vmem>>, vector<3x64xf32>,
    %c20_531 = arith.constant 20 : index
    %c0_532 = arith.constant 0 : index
    %337 = vector.load %arg15[%c20_531, %c0_532] : memref<70x64xf32, #tpu.memory_space<vmem>>, vector<3x64xf32>
    %c9_533 = arith.constant 9 : index
    %c192_534 = arith.constant 192 : index
    %338 = vector.load %arg16[%c9_533, %c192_534] : memref<30x576xf32, #tpu.memory_space<vmem>>, vector<3x64xf32>
    tpu.vector_store %arg16[%c9_533, %c192_534], %337 {strides = array<i32>} : memref<30x576xf32, #tpu.memory_space<vmem>>, vector<3x64xf32>,
    %c25_535 = arith.constant 25 : index
    %c0_536 = arith.constant 0 : index
    %339 = vector.load %arg15[%c25_535, %c0_536] : memref<70x64xf32, #tpu.memory_space<vmem>>, vector<3x64xf32>
    %c12_537 = arith.constant 12 : index
    %c192_538 = arith.constant 192 : index
    %340 = vector.load %arg16[%c12_537, %c192_538] : memref<30x576xf32, #tpu.memory_space<vmem>>, vector<3x64xf32>
    tpu.vector_store %arg16[%c12_537, %c192_538], %339 {strides = array<i32>} : memref<30x576xf32, #tpu.memory_space<vmem>>, vector<3x64xf32>,
    %c40_539 = arith.constant 40 : index
    %c0_540 = arith.constant 0 : index
    %341 = vector.load %arg15[%c40_539, %c0_540] : memref<70x64xf32, #tpu.memory_space<vmem>>, vector<3x64xf32>
    %c15_541 = arith.constant 15 : index
    %c192_542 = arith.constant 192 : index
    %342 = vector.load %arg16[%c15_541, %c192_542] : memref<30x576xf32, #tpu.memory_space<vmem>>, vector<3x64xf32>
    tpu.vector_store %arg16[%c15_541, %c192_542], %341 {strides = array<i32>} : memref<30x576xf32, #tpu.memory_space<vmem>>, vector<3x64xf32>,
    %c45_543 = arith.constant 45 : index
    %c0_544 = arith.constant 0 : index
    %343 = vector.load %arg15[%c45_543, %c0_544] : memref<70x64xf32, #tpu.memory_space<vmem>>, vector<3x64xf32>
    %c18_545 = arith.constant 18 : index
    %c192_546 = arith.constant 192 : index
    %344 = vector.load %arg16[%c18_545, %c192_546] : memref<30x576xf32, #tpu.memory_space<vmem>>, vector<3x64xf32>
    tpu.vector_store %arg16[%c18_545, %c192_546], %343 {strides = array<i32>} : memref<30x576xf32, #tpu.memory_space<vmem>>, vector<3x64xf32>,
    %c50_547 = arith.constant 50 : index
    %c0_548 = arith.constant 0 : index
    %345 = vector.load %arg15[%c50_547, %c0_548] : memref<70x64xf32, #tpu.memory_space<vmem>>, vector<3x64xf32>
    %c21_549 = arith.constant 21 : index
    %c192_550 = arith.constant 192 : index
    %346 = vector.load %arg16[%c21_549, %c192_550] : memref<30x576xf32, #tpu.memory_space<vmem>>, vector<3x64xf32>
    tpu.vector_store %arg16[%c21_549, %c192_550], %345 {strides = array<i32>} : memref<30x576xf32, #tpu.memory_space<vmem>>, vector<3x64xf32>,
    %c55_551 = arith.constant 55 : index
    %c0_552 = arith.constant 0 : index
    %347 = vector.load %arg15[%c55_551, %c0_552] : memref<70x64xf32, #tpu.memory_space<vmem>>, vector<3x64xf32>
    %c24_553 = arith.constant 24 : index
    %c192_554 = arith.constant 192 : index
    %348 = vector.load %arg16[%c24_553, %c192_554] : memref<30x576xf32, #tpu.memory_space<vmem>>, vector<3x64xf32>
    tpu.vector_store %arg16[%c24_553, %c192_554], %347 {strides = array<i32>} : memref<30x576xf32, #tpu.memory_space<vmem>>, vector<3x64xf32>,
    %c60_555 = arith.constant 60 : index
    %c0_556 = arith.constant 0 : index
    %349 = vector.load %arg15[%c60_555, %c0_556] : memref<70x64xf32, #tpu.memory_space<vmem>>, vector<3x64xf32>
    %c27_557 = arith.constant 27 : index
    %c192_558 = arith.constant 192 : index
    %350 = vector.load %arg16[%c27_557, %c192_558] : memref<30x576xf32, #tpu.memory_space<vmem>>, vector<3x64xf32>
    tpu.vector_store %arg16[%c27_557, %c192_558], %349 {strides = array<i32>} : memref<30x576xf32, #tpu.memory_space<vmem>>, vector<3x64xf32>,
    %c6_559 = arith.constant 6 : index
    %c0_560 = arith.constant 0 : index
    %351 = vector.load %arg15[%c6_559, %c0_560] : memref<70x64xf32, #tpu.memory_space<vmem>>, vector<3x64xf32>
    %c0_561 = arith.constant 0 : index
    %c256_562 = arith.constant 256 : index
    %352 = vector.load %arg16[%c0_561, %c256_562] : memref<30x576xf32, #tpu.memory_space<vmem>>, vector<3x64xf32>
    tpu.vector_store %arg16[%c0_561, %c256_562], %351 {strides = array<i32>} : memref<30x576xf32, #tpu.memory_space<vmem>>, vector<3x64xf32>,
    %c11_563 = arith.constant 11 : index
    %c0_564 = arith.constant 0 : index
    %353 = vector.load %arg15[%c11_563, %c0_564] : memref<70x64xf32, #tpu.memory_space<vmem>>, vector<3x64xf32>
    %c3_565 = arith.constant 3 : index
    %c256_566 = arith.constant 256 : index
    %354 = vector.load %arg16[%c3_565, %c256_566] : memref<30x576xf32, #tpu.memory_space<vmem>>, vector<3x64xf32>
    tpu.vector_store %arg16[%c3_565, %c256_566], %353 {strides = array<i32>} : memref<30x576xf32, #tpu.memory_space<vmem>>, vector<3x64xf32>,
    %c16_567 = arith.constant 16 : index
    %c0_568 = arith.constant 0 : index
    %355 = vector.load %arg15[%c16_567, %c0_568] : memref<70x64xf32, #tpu.memory_space<vmem>>, vector<3x64xf32>
    %c6_569 = arith.constant 6 : index
    %c256_570 = arith.constant 256 : index
    %356 = vector.load %arg16[%c6_569, %c256_570] : memref<30x576xf32, #tpu.memory_space<vmem>>, vector<3x64xf32>
    tpu.vector_store %arg16[%c6_569, %c256_570], %355 {strides = array<i32>} : memref<30x576xf32, #tpu.memory_space<vmem>>, vector<3x64xf32>,
    %c21_571 = arith.constant 21 : index
    %c0_572 = arith.constant 0 : index
    %357 = vector.load %arg15[%c21_571, %c0_572] : memref<70x64xf32, #tpu.memory_space<vmem>>, vector<3x64xf32>
    %c9_573 = arith.constant 9 : index
    %c256_574 = arith.constant 256 : index
    %358 = vector.load %arg16[%c9_573, %c256_574] : memref<30x576xf32, #tpu.memory_space<vmem>>, vector<3x64xf32>
    tpu.vector_store %arg16[%c9_573, %c256_574], %357 {strides = array<i32>} : memref<30x576xf32, #tpu.memory_space<vmem>>, vector<3x64xf32>,
    %c26 = arith.constant 26 : index
    %c0_575 = arith.constant 0 : index
    %359 = vector.load %arg15[%c26, %c0_575] : memref<70x64xf32, #tpu.memory_space<vmem>>, vector<3x64xf32>
    %c12_576 = arith.constant 12 : index
    %c256_577 = arith.constant 256 : index
    %360 = vector.load %arg16[%c12_576, %c256_577] : memref<30x576xf32, #tpu.memory_space<vmem>>, vector<3x64xf32>
    tpu.vector_store %arg16[%c12_576, %c256_577], %359 {strides = array<i32>} : memref<30x576xf32, #tpu.memory_space<vmem>>, vector<3x64xf32>,
    %c41_578 = arith.constant 41 : index
    %c0_579 = arith.constant 0 : index
    %361 = vector.load %arg15[%c41_578, %c0_579] : memref<70x64xf32, #tpu.memory_space<vmem>>, vector<3x64xf32>
    %c15_580 = arith.constant 15 : index
    %c256_581 = arith.constant 256 : index
    %362 = vector.load %arg16[%c15_580, %c256_581] : memref<30x576xf32, #tpu.memory_space<vmem>>, vector<3x64xf32>
    tpu.vector_store %arg16[%c15_580, %c256_581], %361 {strides = array<i32>} : memref<30x576xf32, #tpu.memory_space<vmem>>, vector<3x64xf32>,
    %c46_582 = arith.constant 46 : index
    %c0_583 = arith.constant 0 : index
    %363 = vector.load %arg15[%c46_582, %c0_583] : memref<70x64xf32, #tpu.memory_space<vmem>>, vector<3x64xf32>
    %c18_584 = arith.constant 18 : index
    %c256_585 = arith.constant 256 : index
    %364 = vector.load %arg16[%c18_584, %c256_585] : memref<30x576xf32, #tpu.memory_space<vmem>>, vector<3x64xf32>
    tpu.vector_store %arg16[%c18_584, %c256_585], %363 {strides = array<i32>} : memref<30x576xf32, #tpu.memory_space<vmem>>, vector<3x64xf32>,
    %c51_586 = arith.constant 51 : index
    %c0_587 = arith.constant 0 : index
    %365 = vector.load %arg15[%c51_586, %c0_587] : memref<70x64xf32, #tpu.memory_space<vmem>>, vector<3x64xf32>
    %c21_588 = arith.constant 21 : index
    %c256_589 = arith.constant 256 : index
    %366 = vector.load %arg16[%c21_588, %c256_589] : memref<30x576xf32, #tpu.memory_space<vmem>>, vector<3x64xf32>
    tpu.vector_store %arg16[%c21_588, %c256_589], %365 {strides = array<i32>} : memref<30x576xf32, #tpu.memory_space<vmem>>, vector<3x64xf32>,
    %c56_590 = arith.constant 56 : index
    %c0_591 = arith.constant 0 : index
    %367 = vector.load %arg15[%c56_590, %c0_591] : memref<70x64xf32, #tpu.memory_space<vmem>>, vector<3x64xf32>
    %c24_592 = arith.constant 24 : index
    %c256_593 = arith.constant 256 : index
    %368 = vector.load %arg16[%c24_592, %c256_593] : memref<30x576xf32, #tpu.memory_space<vmem>>, vector<3x64xf32>
    tpu.vector_store %arg16[%c24_592, %c256_593], %367 {strides = array<i32>} : memref<30x576xf32, #tpu.memory_space<vmem>>, vector<3x64xf32>,
    %c61 = arith.constant 61 : index
    %c0_594 = arith.constant 0 : index
    %369 = vector.load %arg15[%c61, %c0_594] : memref<70x64xf32, #tpu.memory_space<vmem>>, vector<3x64xf32>
    %c27_595 = arith.constant 27 : index
    %c256_596 = arith.constant 256 : index
    %370 = vector.load %arg16[%c27_595, %c256_596] : memref<30x576xf32, #tpu.memory_space<vmem>>, vector<3x64xf32>
    tpu.vector_store %arg16[%c27_595, %c256_596], %369 {strides = array<i32>} : memref<30x576xf32, #tpu.memory_space<vmem>>, vector<3x64xf32>,
    %c7_597 = arith.constant 7 : index
    %c0_598 = arith.constant 0 : index
    %371 = vector.load %arg15[%c7_597, %c0_598] : memref<70x64xf32, #tpu.memory_space<vmem>>, vector<3x64xf32>
    %c0_599 = arith.constant 0 : index
    %c320_600 = arith.constant 320 : index
    %372 = vector.load %arg16[%c0_599, %c320_600] : memref<30x576xf32, #tpu.memory_space<vmem>>, vector<3x64xf32>
    tpu.vector_store %arg16[%c0_599, %c320_600], %371 {strides = array<i32>} : memref<30x576xf32, #tpu.memory_space<vmem>>, vector<3x64xf32>,
    %c12_601 = arith.constant 12 : index
    %c0_602 = arith.constant 0 : index
    %373 = vector.load %arg15[%c12_601, %c0_602] : memref<70x64xf32, #tpu.memory_space<vmem>>, vector<3x64xf32>
    %c3_603 = arith.constant 3 : index
    %c320_604 = arith.constant 320 : index
    %374 = vector.load %arg16[%c3_603, %c320_604] : memref<30x576xf32, #tpu.memory_space<vmem>>, vector<3x64xf32>
    tpu.vector_store %arg16[%c3_603, %c320_604], %373 {strides = array<i32>} : memref<30x576xf32, #tpu.memory_space<vmem>>, vector<3x64xf32>,
    %c17_605 = arith.constant 17 : index
    %c0_606 = arith.constant 0 : index
    %375 = vector.load %arg15[%c17_605, %c0_606] : memref<70x64xf32, #tpu.memory_space<vmem>>, vector<3x64xf32>
    %c6_607 = arith.constant 6 : index
    %c320_608 = arith.constant 320 : index
    %376 = vector.load %arg16[%c6_607, %c320_608] : memref<30x576xf32, #tpu.memory_space<vmem>>, vector<3x64xf32>
    tpu.vector_store %arg16[%c6_607, %c320_608], %375 {strides = array<i32>} : memref<30x576xf32, #tpu.memory_space<vmem>>, vector<3x64xf32>,
    %c22_609 = arith.constant 22 : index
    %c0_610 = arith.constant 0 : index
    %377 = vector.load %arg15[%c22_609, %c0_610] : memref<70x64xf32, #tpu.memory_space<vmem>>, vector<3x64xf32>
    %c9_611 = arith.constant 9 : index
    %c320_612 = arith.constant 320 : index
    %378 = vector.load %arg16[%c9_611, %c320_612] : memref<30x576xf32, #tpu.memory_space<vmem>>, vector<3x64xf32>
    tpu.vector_store %arg16[%c9_611, %c320_612], %377 {strides = array<i32>} : memref<30x576xf32, #tpu.memory_space<vmem>>, vector<3x64xf32>,
    %c27_613 = arith.constant 27 : index
    %c0_614 = arith.constant 0 : index
    %379 = vector.load %arg15[%c27_613, %c0_614] : memref<70x64xf32, #tpu.memory_space<vmem>>, vector<3x64xf32>
    %c12_615 = arith.constant 12 : index
    %c320_616 = arith.constant 320 : index
    %380 = vector.load %arg16[%c12_615, %c320_616] : memref<30x576xf32, #tpu.memory_space<vmem>>, vector<3x64xf32>
    tpu.vector_store %arg16[%c12_615, %c320_616], %379 {strides = array<i32>} : memref<30x576xf32, #tpu.memory_space<vmem>>, vector<3x64xf32>,
    %c42_617 = arith.constant 42 : index
    %c0_618 = arith.constant 0 : index
    %381 = vector.load %arg15[%c42_617, %c0_618] : memref<70x64xf32, #tpu.memory_space<vmem>>, vector<3x64xf32>
    %c15_619 = arith.constant 15 : index
    %c320_620 = arith.constant 320 : index
    %382 = vector.load %arg16[%c15_619, %c320_620] : memref<30x576xf32, #tpu.memory_space<vmem>>, vector<3x64xf32>
    tpu.vector_store %arg16[%c15_619, %c320_620], %381 {strides = array<i32>} : memref<30x576xf32, #tpu.memory_space<vmem>>, vector<3x64xf32>,
    %c47_621 = arith.constant 47 : index
    %c0_622 = arith.constant 0 : index
    %383 = vector.load %arg15[%c47_621, %c0_622] : memref<70x64xf32, #tpu.memory_space<vmem>>, vector<3x64xf32>
    %c18_623 = arith.constant 18 : index
    %c320_624 = arith.constant 320 : index
    %384 = vector.load %arg16[%c18_623, %c320_624] : memref<30x576xf32, #tpu.memory_space<vmem>>, vector<3x64xf32>
    tpu.vector_store %arg16[%c18_623, %c320_624], %383 {strides = array<i32>} : memref<30x576xf32, #tpu.memory_space<vmem>>, vector<3x64xf32>,
    %c52_625 = arith.constant 52 : index
    %c0_626 = arith.constant 0 : index
    %385 = vector.load %arg15[%c52_625, %c0_626] : memref<70x64xf32, #tpu.memory_space<vmem>>, vector<3x64xf32>
    %c21_627 = arith.constant 21 : index
    %c320_628 = arith.constant 320 : index
    %386 = vector.load %arg16[%c21_627, %c320_628] : memref<30x576xf32, #tpu.memory_space<vmem>>, vector<3x64xf32>
    tpu.vector_store %arg16[%c21_627, %c320_628], %385 {strides = array<i32>} : memref<30x576xf32, #tpu.memory_space<vmem>>, vector<3x64xf32>,
    %c57_629 = arith.constant 57 : index
    %c0_630 = arith.constant 0 : index
    %387 = vector.load %arg15[%c57_629, %c0_630] : memref<70x64xf32, #tpu.memory_space<vmem>>, vector<3x64xf32>
    %c24_631 = arith.constant 24 : index
    %c320_632 = arith.constant 320 : index
    %388 = vector.load %arg16[%c24_631, %c320_632] : memref<30x576xf32, #tpu.memory_space<vmem>>, vector<3x64xf32>
    tpu.vector_store %arg16[%c24_631, %c320_632], %387 {strides = array<i32>} : memref<30x576xf32, #tpu.memory_space<vmem>>, vector<3x64xf32>,
    %c62 = arith.constant 62 : index
    %c0_633 = arith.constant 0 : index
    %389 = vector.load %arg15[%c62, %c0_633] : memref<70x64xf32, #tpu.memory_space<vmem>>, vector<3x64xf32>
    %c27_634 = arith.constant 27 : index
    %c320_635 = arith.constant 320 : index
    %390 = vector.load %arg16[%c27_634, %c320_635] : memref<30x576xf32, #tpu.memory_space<vmem>>, vector<3x64xf32>
    tpu.vector_store %arg16[%c27_634, %c320_635], %389 {strides = array<i32>} : memref<30x576xf32, #tpu.memory_space<vmem>>, vector<3x64xf32>,
    %c10_636 = arith.constant 10 : index
    %c0_637 = arith.constant 0 : index
    %391 = vector.load %arg15[%c10_636, %c0_637] : memref<70x64xf32, #tpu.memory_space<vmem>>, vector<3x64xf32>
    %c0_638 = arith.constant 0 : index
    %c384 = arith.constant 384 : index
    %392 = vector.load %arg16[%c0_638, %c384] : memref<30x576xf32, #tpu.memory_space<vmem>>, vector<3x64xf32>
    tpu.vector_store %arg16[%c0_638, %c384], %391 {strides = array<i32>} : memref<30x576xf32, #tpu.memory_space<vmem>>, vector<3x64xf32>,
    %c15_639 = arith.constant 15 : index
    %c0_640 = arith.constant 0 : index
    %393 = vector.load %arg15[%c15_639, %c0_640] : memref<70x64xf32, #tpu.memory_space<vmem>>, vector<3x64xf32>
    %c3_641 = arith.constant 3 : index
    %c384_642 = arith.constant 384 : index
    %394 = vector.load %arg16[%c3_641, %c384_642] : memref<30x576xf32, #tpu.memory_space<vmem>>, vector<3x64xf32>
    tpu.vector_store %arg16[%c3_641, %c384_642], %393 {strides = array<i32>} : memref<30x576xf32, #tpu.memory_space<vmem>>, vector<3x64xf32>,
    %c20_643 = arith.constant 20 : index
    %c0_644 = arith.constant 0 : index
    %395 = vector.load %arg15[%c20_643, %c0_644] : memref<70x64xf32, #tpu.memory_space<vmem>>, vector<3x64xf32>
    %c6_645 = arith.constant 6 : index
    %c384_646 = arith.constant 384 : index
    %396 = vector.load %arg16[%c6_645, %c384_646] : memref<30x576xf32, #tpu.memory_space<vmem>>, vector<3x64xf32>
    tpu.vector_store %arg16[%c6_645, %c384_646], %395 {strides = array<i32>} : memref<30x576xf32, #tpu.memory_space<vmem>>, vector<3x64xf32>,
    %c25_647 = arith.constant 25 : index
    %c0_648 = arith.constant 0 : index
    %397 = vector.load %arg15[%c25_647, %c0_648] : memref<70x64xf32, #tpu.memory_space<vmem>>, vector<3x64xf32>
    %c9_649 = arith.constant 9 : index
    %c384_650 = arith.constant 384 : index
    %398 = vector.load %arg16[%c9_649, %c384_650] : memref<30x576xf32, #tpu.memory_space<vmem>>, vector<3x64xf32>
    tpu.vector_store %arg16[%c9_649, %c384_650], %397 {strides = array<i32>} : memref<30x576xf32, #tpu.memory_space<vmem>>, vector<3x64xf32>,
    %c30_651 = arith.constant 30 : index
    %c0_652 = arith.constant 0 : index
    %399 = vector.load %arg15[%c30_651, %c0_652] : memref<70x64xf32, #tpu.memory_space<vmem>>, vector<3x64xf32>
    %c12_653 = arith.constant 12 : index
    %c384_654 = arith.constant 384 : index
    %400 = vector.load %arg16[%c12_653, %c384_654] : memref<30x576xf32, #tpu.memory_space<vmem>>, vector<3x64xf32>
    tpu.vector_store %arg16[%c12_653, %c384_654], %399 {strides = array<i32>} : memref<30x576xf32, #tpu.memory_space<vmem>>, vector<3x64xf32>,
    %c45_655 = arith.constant 45 : index
    %c0_656 = arith.constant 0 : index
    %401 = vector.load %arg15[%c45_655, %c0_656] : memref<70x64xf32, #tpu.memory_space<vmem>>, vector<3x64xf32>
    %c15_657 = arith.constant 15 : index
    %c384_658 = arith.constant 384 : index
    %402 = vector.load %arg16[%c15_657, %c384_658] : memref<30x576xf32, #tpu.memory_space<vmem>>, vector<3x64xf32>
    tpu.vector_store %arg16[%c15_657, %c384_658], %401 {strides = array<i32>} : memref<30x576xf32, #tpu.memory_space<vmem>>, vector<3x64xf32>,
    %c50_659 = arith.constant 50 : index
    %c0_660 = arith.constant 0 : index
    %403 = vector.load %arg15[%c50_659, %c0_660] : memref<70x64xf32, #tpu.memory_space<vmem>>, vector<3x64xf32>
    %c18_661 = arith.constant 18 : index
    %c384_662 = arith.constant 384 : index
    %404 = vector.load %arg16[%c18_661, %c384_662] : memref<30x576xf32, #tpu.memory_space<vmem>>, vector<3x64xf32>
    tpu.vector_store %arg16[%c18_661, %c384_662], %403 {strides = array<i32>} : memref<30x576xf32, #tpu.memory_space<vmem>>, vector<3x64xf32>,
    %c55_663 = arith.constant 55 : index
    %c0_664 = arith.constant 0 : index
    %405 = vector.load %arg15[%c55_663, %c0_664] : memref<70x64xf32, #tpu.memory_space<vmem>>, vector<3x64xf32>
    %c21_665 = arith.constant 21 : index
    %c384_666 = arith.constant 384 : index
    %406 = vector.load %arg16[%c21_665, %c384_666] : memref<30x576xf32, #tpu.memory_space<vmem>>, vector<3x64xf32>
    tpu.vector_store %arg16[%c21_665, %c384_666], %405 {strides = array<i32>} : memref<30x576xf32, #tpu.memory_space<vmem>>, vector<3x64xf32>,
    %c60_667 = arith.constant 60 : index
    %c0_668 = arith.constant 0 : index
    %407 = vector.load %arg15[%c60_667, %c0_668] : memref<70x64xf32, #tpu.memory_space<vmem>>, vector<3x64xf32>
    %c24_669 = arith.constant 24 : index
    %c384_670 = arith.constant 384 : index
    %408 = vector.load %arg16[%c24_669, %c384_670] : memref<30x576xf32, #tpu.memory_space<vmem>>, vector<3x64xf32>
    tpu.vector_store %arg16[%c24_669, %c384_670], %407 {strides = array<i32>} : memref<30x576xf32, #tpu.memory_space<vmem>>, vector<3x64xf32>,
    %c65_671 = arith.constant 65 : index
    %c0_672 = arith.constant 0 : index
    %409 = vector.load %arg15[%c65_671, %c0_672] : memref<70x64xf32, #tpu.memory_space<vmem>>, vector<3x64xf32>
    %c27_673 = arith.constant 27 : index
    %c384_674 = arith.constant 384 : index
    %410 = vector.load %arg16[%c27_673, %c384_674] : memref<30x576xf32, #tpu.memory_space<vmem>>, vector<3x64xf32>
    tpu.vector_store %arg16[%c27_673, %c384_674], %409 {strides = array<i32>} : memref<30x576xf32, #tpu.memory_space<vmem>>, vector<3x64xf32>,
    %c11_675 = arith.constant 11 : index
    %c0_676 = arith.constant 0 : index
    %411 = vector.load %arg15[%c11_675, %c0_676] : memref<70x64xf32, #tpu.memory_space<vmem>>, vector<3x64xf32>
    %c0_677 = arith.constant 0 : index
    %c448 = arith.constant 448 : index
    %412 = vector.load %arg16[%c0_677, %c448] : memref<30x576xf32, #tpu.memory_space<vmem>>, vector<3x64xf32>
    tpu.vector_store %arg16[%c0_677, %c448], %411 {strides = array<i32>} : memref<30x576xf32, #tpu.memory_space<vmem>>, vector<3x64xf32>,
    %c16_678 = arith.constant 16 : index
    %c0_679 = arith.constant 0 : index
    %413 = vector.load %arg15[%c16_678, %c0_679] : memref<70x64xf32, #tpu.memory_space<vmem>>, vector<3x64xf32>
    %c3_680 = arith.constant 3 : index
    %c448_681 = arith.constant 448 : index
    %414 = vector.load %arg16[%c3_680, %c448_681] : memref<30x576xf32, #tpu.memory_space<vmem>>, vector<3x64xf32>
    tpu.vector_store %arg16[%c3_680, %c448_681], %413 {strides = array<i32>} : memref<30x576xf32, #tpu.memory_space<vmem>>, vector<3x64xf32>,
    %c21_682 = arith.constant 21 : index
    %c0_683 = arith.constant 0 : index
    %415 = vector.load %arg15[%c21_682, %c0_683] : memref<70x64xf32, #tpu.memory_space<vmem>>, vector<3x64xf32>
    %c6_684 = arith.constant 6 : index
    %c448_685 = arith.constant 448 : index
    %416 = vector.load %arg16[%c6_684, %c448_685] : memref<30x576xf32, #tpu.memory_space<vmem>>, vector<3x64xf32>
    tpu.vector_store %arg16[%c6_684, %c448_685], %415 {strides = array<i32>} : memref<30x576xf32, #tpu.memory_space<vmem>>, vector<3x64xf32>,
    %c26_686 = arith.constant 26 : index
    %c0_687 = arith.constant 0 : index
    %417 = vector.load %arg15[%c26_686, %c0_687] : memref<70x64xf32, #tpu.memory_space<vmem>>, vector<3x64xf32>
    %c9_688 = arith.constant 9 : index
    %c448_689 = arith.constant 448 : index
    %418 = vector.load %arg16[%c9_688, %c448_689] : memref<30x576xf32, #tpu.memory_space<vmem>>, vector<3x64xf32>
    tpu.vector_store %arg16[%c9_688, %c448_689], %417 {strides = array<i32>} : memref<30x576xf32, #tpu.memory_space<vmem>>, vector<3x64xf32>,
    %c31 = arith.constant 31 : index
    %c0_690 = arith.constant 0 : index
    %419 = vector.load %arg15[%c31, %c0_690] : memref<70x64xf32, #tpu.memory_space<vmem>>, vector<3x64xf32>
    %c12_691 = arith.constant 12 : index
    %c448_692 = arith.constant 448 : index
    %420 = vector.load %arg16[%c12_691, %c448_692] : memref<30x576xf32, #tpu.memory_space<vmem>>, vector<3x64xf32>
    tpu.vector_store %arg16[%c12_691, %c448_692], %419 {strides = array<i32>} : memref<30x576xf32, #tpu.memory_space<vmem>>, vector<3x64xf32>,
    %c46_693 = arith.constant 46 : index
    %c0_694 = arith.constant 0 : index
    %421 = vector.load %arg15[%c46_693, %c0_694] : memref<70x64xf32, #tpu.memory_space<vmem>>, vector<3x64xf32>
    %c15_695 = arith.constant 15 : index
    %c448_696 = arith.constant 448 : index
    %422 = vector.load %arg16[%c15_695, %c448_696] : memref<30x576xf32, #tpu.memory_space<vmem>>, vector<3x64xf32>
    tpu.vector_store %arg16[%c15_695, %c448_696], %421 {strides = array<i32>} : memref<30x576xf32, #tpu.memory_space<vmem>>, vector<3x64xf32>,
    %c51_697 = arith.constant 51 : index
    %c0_698 = arith.constant 0 : index
    %423 = vector.load %arg15[%c51_697, %c0_698] : memref<70x64xf32, #tpu.memory_space<vmem>>, vector<3x64xf32>
    %c18_699 = arith.constant 18 : index
    %c448_700 = arith.constant 448 : index
    %424 = vector.load %arg16[%c18_699, %c448_700] : memref<30x576xf32, #tpu.memory_space<vmem>>, vector<3x64xf32>
    tpu.vector_store %arg16[%c18_699, %c448_700], %423 {strides = array<i32>} : memref<30x576xf32, #tpu.memory_space<vmem>>, vector<3x64xf32>,
    %c56_701 = arith.constant 56 : index
    %c0_702 = arith.constant 0 : index
    %425 = vector.load %arg15[%c56_701, %c0_702] : memref<70x64xf32, #tpu.memory_space<vmem>>, vector<3x64xf32>
    %c21_703 = arith.constant 21 : index
    %c448_704 = arith.constant 448 : index
    %426 = vector.load %arg16[%c21_703, %c448_704] : memref<30x576xf32, #tpu.memory_space<vmem>>, vector<3x64xf32>
    tpu.vector_store %arg16[%c21_703, %c448_704], %425 {strides = array<i32>} : memref<30x576xf32, #tpu.memory_space<vmem>>, vector<3x64xf32>,
    %c61_705 = arith.constant 61 : index
    %c0_706 = arith.constant 0 : index
    %427 = vector.load %arg15[%c61_705, %c0_706] : memref<70x64xf32, #tpu.memory_space<vmem>>, vector<3x64xf32>
    %c24_707 = arith.constant 24 : index
    %c448_708 = arith.constant 448 : index
    %428 = vector.load %arg16[%c24_707, %c448_708] : memref<30x576xf32, #tpu.memory_space<vmem>>, vector<3x64xf32>
    tpu.vector_store %arg16[%c24_707, %c448_708], %427 {strides = array<i32>} : memref<30x576xf32, #tpu.memory_space<vmem>>, vector<3x64xf32>,
    %c66_709 = arith.constant 66 : index
    %c0_710 = arith.constant 0 : index
    %429 = vector.load %arg15[%c66_709, %c0_710] : memref<70x64xf32, #tpu.memory_space<vmem>>, vector<3x64xf32>
    %c27_711 = arith.constant 27 : index
    %c448_712 = arith.constant 448 : index
    %430 = vector.load %arg16[%c27_711, %c448_712] : memref<30x576xf32, #tpu.memory_space<vmem>>, vector<3x64xf32>
    tpu.vector_store %arg16[%c27_711, %c448_712], %429 {strides = array<i32>} : memref<30x576xf32, #tpu.memory_space<vmem>>, vector<3x64xf32>,
    %c12_713 = arith.constant 12 : index
    %c0_714 = arith.constant 0 : index
    %431 = vector.load %arg15[%c12_713, %c0_714] : memref<70x64xf32, #tpu.memory_space<vmem>>, vector<3x64xf32>
    %c0_715 = arith.constant 0 : index
    %c512 = arith.constant 512 : index
    %432 = vector.load %arg16[%c0_715, %c512] : memref<30x576xf32, #tpu.memory_space<vmem>>, vector<3x64xf32>
    tpu.vector_store %arg16[%c0_715, %c512], %431 {strides = array<i32>} : memref<30x576xf32, #tpu.memory_space<vmem>>, vector<3x64xf32>,
    %c17_716 = arith.constant 17 : index
    %c0_717 = arith.constant 0 : index
    %433 = vector.load %arg15[%c17_716, %c0_717] : memref<70x64xf32, #tpu.memory_space<vmem>>, vector<3x64xf32>
    %c3_718 = arith.constant 3 : index
    %c512_719 = arith.constant 512 : index
    %434 = vector.load %arg16[%c3_718, %c512_719] : memref<30x576xf32, #tpu.memory_space<vmem>>, vector<3x64xf32>
    tpu.vector_store %arg16[%c3_718, %c512_719], %433 {strides = array<i32>} : memref<30x576xf32, #tpu.memory_space<vmem>>, vector<3x64xf32>,
    %c22_720 = arith.constant 22 : index
    %c0_721 = arith.constant 0 : index
    %435 = vector.load %arg15[%c22_720, %c0_721] : memref<70x64xf32, #tpu.memory_space<vmem>>, vector<3x64xf32>
    %c6_722 = arith.constant 6 : index
    %c512_723 = arith.constant 512 : index
    %436 = vector.load %arg16[%c6_722, %c512_723] : memref<30x576xf32, #tpu.memory_space<vmem>>, vector<3x64xf32>
    tpu.vector_store %arg16[%c6_722, %c512_723], %435 {strides = array<i32>} : memref<30x576xf32, #tpu.memory_space<vmem>>, vector<3x64xf32>,
    %c27_724 = arith.constant 27 : index
    %c0_725 = arith.constant 0 : index
    %437 = vector.load %arg15[%c27_724, %c0_725] : memref<70x64xf32, #tpu.memory_space<vmem>>, vector<3x64xf32>
    %c9_726 = arith.constant 9 : index
    %c512_727 = arith.constant 512 : index
    %438 = vector.load %arg16[%c9_726, %c512_727] : memref<30x576xf32, #tpu.memory_space<vmem>>, vector<3x64xf32>
    tpu.vector_store %arg16[%c9_726, %c512_727], %437 {strides = array<i32>} : memref<30x576xf32, #tpu.memory_space<vmem>>, vector<3x64xf32>,
    %c32_728 = arith.constant 32 : index
    %c0_729 = arith.constant 0 : index
    %439 = vector.load %arg15[%c32_728, %c0_729] : memref<70x64xf32, #tpu.memory_space<vmem>>, vector<3x64xf32>
    %c12_730 = arith.constant 12 : index
    %c512_731 = arith.constant 512 : index
    %440 = vector.load %arg16[%c12_730, %c512_731] : memref<30x576xf32, #tpu.memory_space<vmem>>, vector<3x64xf32>
    tpu.vector_store %arg16[%c12_730, %c512_731], %439 {strides = array<i32>} : memref<30x576xf32, #tpu.memory_space<vmem>>, vector<3x64xf32>,
    %c47_732 = arith.constant 47 : index
    %c0_733 = arith.constant 0 : index
    %441 = vector.load %arg15[%c47_732, %c0_733] : memref<70x64xf32, #tpu.memory_space<vmem>>, vector<3x64xf32>
    %c15_734 = arith.constant 15 : index
    %c512_735 = arith.constant 512 : index
    %442 = vector.load %arg16[%c15_734, %c512_735] : memref<30x576xf32, #tpu.memory_space<vmem>>, vector<3x64xf32>
    tpu.vector_store %arg16[%c15_734, %c512_735], %441 {strides = array<i32>} : memref<30x576xf32, #tpu.memory_space<vmem>>, vector<3x64xf32>,
    %c52_736 = arith.constant 52 : index
    %c0_737 = arith.constant 0 : index
    %443 = vector.load %arg15[%c52_736, %c0_737] : memref<70x64xf32, #tpu.memory_space<vmem>>, vector<3x64xf32>
    %c18_738 = arith.constant 18 : index
    %c512_739 = arith.constant 512 : index
    %444 = vector.load %arg16[%c18_738, %c512_739] : memref<30x576xf32, #tpu.memory_space<vmem>>, vector<3x64xf32>
    tpu.vector_store %arg16[%c18_738, %c512_739], %443 {strides = array<i32>} : memref<30x576xf32, #tpu.memory_space<vmem>>, vector<3x64xf32>,
    %c57_740 = arith.constant 57 : index
    %c0_741 = arith.constant 0 : index
    %445 = vector.load %arg15[%c57_740, %c0_741] : memref<70x64xf32, #tpu.memory_space<vmem>>, vector<3x64xf32>
    %c21_742 = arith.constant 21 : index
    %c512_743 = arith.constant 512 : index
    %446 = vector.load %arg16[%c21_742, %c512_743] : memref<30x576xf32, #tpu.memory_space<vmem>>, vector<3x64xf32>
    tpu.vector_store %arg16[%c21_742, %c512_743], %445 {strides = array<i32>} : memref<30x576xf32, #tpu.memory_space<vmem>>, vector<3x64xf32>,
    %c62_744 = arith.constant 62 : index
    %c0_745 = arith.constant 0 : index
    %447 = vector.load %arg15[%c62_744, %c0_745] : memref<70x64xf32, #tpu.memory_space<vmem>>, vector<3x64xf32>
    %c24_746 = arith.constant 24 : index
    %c512_747 = arith.constant 512 : index
    %448 = vector.load %arg16[%c24_746, %c512_747] : memref<30x576xf32, #tpu.memory_space<vmem>>, vector<3x64xf32>
    tpu.vector_store %arg16[%c24_746, %c512_747], %447 {strides = array<i32>} : memref<30x576xf32, #tpu.memory_space<vmem>>, vector<3x64xf32>,
    %c67_748 = arith.constant 67 : index
    %c0_749 = arith.constant 0 : index
    %449 = vector.load %arg15[%c67_748, %c0_749] : memref<70x64xf32, #tpu.memory_space<vmem>>, vector<3x64xf32>
    %c27_750 = arith.constant 27 : index
    %c512_751 = arith.constant 512 : index
    %450 = vector.load %arg16[%c27_750, %c512_751] : memref<30x576xf32, #tpu.memory_space<vmem>>, vector<3x64xf32>
    tpu.vector_store %arg16[%c27_750, %c512_751], %449 {strides = array<i32>} : memref<30x576xf32, #tpu.memory_space<vmem>>, vector<3x64xf32>,
    %c0_752 = arith.constant 0 : index
    %c0_753 = arith.constant 0 : index
    %451 = vector.load %arg16[%c0_752, %c0_753] : memref<30x576xf32, #tpu.memory_space<vmem>>, vector<30x576xf32>
    %452 = arith.truncf %451 : vector<30x576xf32> to vector<30x576xbf16>
    %c0_754 = arith.constant 0 : index
    %c0_755 = arith.constant 0 : index
    %453 = vector.load %arg6[%c0_754, %c0_755] : memref<576x64xbf16, #tpu.memory_space<vmem>>, vector<576x64xbf16>
    %cst_756 = arith.constant dense<0.000000e+00> : vector<30x64xf32>
    %454 = tpu.matmul %452, %453, %cst_756 {dimension_numbers = #tpu.dot_dimension_numbers<[1], [0], [0], [1], [0, 0, 1, 1], [], []>} : vector<30x576xbf16>, vector<576x64xbf16>, vector<30x64xf32> -> vector<30x64xf32>
    %c0_757 = arith.constant 0 : index
    %c0_758 = arith.constant 0 : index
    %455 = vector.load %arg7[%c0_757, %c0_758] : memref<1x64xf32, #tpu.memory_space<vmem>>, vector<1x64xf32>
    %456 = vector.broadcast %455 : vector<1x64xf32> to vector<30x64xf32>
    %457 = arith.addf %454, %456 : vector<30x64xf32>
    %cst_759 = arith.constant 0.000000e+00 : f32
    %458 = vector.broadcast %cst_759 : f32 to vector<30x64xf32>
    %459 = arith.maximumf %457, %458 : vector<30x64xf32>
    %c0_760 = arith.constant 0 : index
    %c0_761 = arith.constant 0 : index
    %460 = vector.load %arg17[%c0_760, %c0_761] : memref<30x64xf32, #tpu.memory_space<vmem>>, vector<30x64xf32>
    tpu.vector_store %arg17[%c0_760, %c0_761], %459 {strides = array<i32>} : memref<30x64xf32, #tpu.memory_space<vmem>>, vector<30x64xf32>,
    %c0_762 = arith.constant 0 : index
    %c0_763 = arith.constant 0 : index
    %461 = tpu.strided_load %arg17[%c0_762, %c0_763] {strides = array<i32: 15, 1>} : memref<30x64xf32, #tpu.memory_space<vmem>>, vector<2x64xf32>
    %c0_764 = arith.constant 0 : index
    %c0_765 = arith.constant 0 : index
    %462 = vector.load %arg18[%c0_764, %c0_765] : memref<2x960xf32, #tpu.memory_space<vmem>>, vector<2x64xf32>
    tpu.vector_store %arg18[%c0_764, %c0_765], %461 {strides = array<i32>} : memref<2x960xf32, #tpu.memory_space<vmem>>, vector<2x64xf32>,
    %c1_766 = arith.constant 1 : index
    %c0_767 = arith.constant 0 : index
    %463 = tpu.strided_load %arg17[%c1_766, %c0_767] {strides = array<i32: 15, 1>} : memref<30x64xf32, #tpu.memory_space<vmem>>, vector<2x64xf32>
    %c0_768 = arith.constant 0 : index
    %c64_769 = arith.constant 64 : index
    %464 = vector.load %arg18[%c0_768, %c64_769] : memref<2x960xf32, #tpu.memory_space<vmem>>, vector<2x64xf32>
    tpu.vector_store %arg18[%c0_768, %c64_769], %463 {strides = array<i32>} : memref<2x960xf32, #tpu.memory_space<vmem>>, vector<2x64xf32>,
    %c2_770 = arith.constant 2 : index
    %c0_771 = arith.constant 0 : index
    %465 = tpu.strided_load %arg17[%c2_770, %c0_771] {strides = array<i32: 15, 1>} : memref<30x64xf32, #tpu.memory_space<vmem>>, vector<2x64xf32>
    %c0_772 = arith.constant 0 : index
    %c128_773 = arith.constant 128 : index
    %466 = vector.load %arg18[%c0_772, %c128_773] : memref<2x960xf32, #tpu.memory_space<vmem>>, vector<2x64xf32>
    tpu.vector_store %arg18[%c0_772, %c128_773], %465 {strides = array<i32>} : memref<2x960xf32, #tpu.memory_space<vmem>>, vector<2x64xf32>,
    %c3_774 = arith.constant 3 : index
    %c0_775 = arith.constant 0 : index
    %467 = tpu.strided_load %arg17[%c3_774, %c0_775] {strides = array<i32: 15, 1>} : memref<30x64xf32, #tpu.memory_space<vmem>>, vector<2x64xf32>
    %c0_776 = arith.constant 0 : index
    %c192_777 = arith.constant 192 : index
    %468 = vector.load %arg18[%c0_776, %c192_777] : memref<2x960xf32, #tpu.memory_space<vmem>>, vector<2x64xf32>
    tpu.vector_store %arg18[%c0_776, %c192_777], %467 {strides = array<i32>} : memref<2x960xf32, #tpu.memory_space<vmem>>, vector<2x64xf32>,
    %c4 = arith.constant 4 : index
    %c0_778 = arith.constant 0 : index
    %469 = tpu.strided_load %arg17[%c4, %c0_778] {strides = array<i32: 15, 1>} : memref<30x64xf32, #tpu.memory_space<vmem>>, vector<2x64xf32>
    %c0_779 = arith.constant 0 : index
    %c256_780 = arith.constant 256 : index
    %470 = vector.load %arg18[%c0_779, %c256_780] : memref<2x960xf32, #tpu.memory_space<vmem>>, vector<2x64xf32>
    tpu.vector_store %arg18[%c0_779, %c256_780], %469 {strides = array<i32>} : memref<2x960xf32, #tpu.memory_space<vmem>>, vector<2x64xf32>,
    %c5_781 = arith.constant 5 : index
    %c0_782 = arith.constant 0 : index
    %471 = tpu.strided_load %arg17[%c5_781, %c0_782] {strides = array<i32: 15, 1>} : memref<30x64xf32, #tpu.memory_space<vmem>>, vector<2x64xf32>
    %c0_783 = arith.constant 0 : index
    %c320_784 = arith.constant 320 : index
    %472 = vector.load %arg18[%c0_783, %c320_784] : memref<2x960xf32, #tpu.memory_space<vmem>>, vector<2x64xf32>
    tpu.vector_store %arg18[%c0_783, %c320_784], %471 {strides = array<i32>} : memref<2x960xf32, #tpu.memory_space<vmem>>, vector<2x64xf32>,
    %c6_785 = arith.constant 6 : index
    %c0_786 = arith.constant 0 : index
    %473 = tpu.strided_load %arg17[%c6_785, %c0_786] {strides = array<i32: 15, 1>} : memref<30x64xf32, #tpu.memory_space<vmem>>, vector<2x64xf32>
    %c0_787 = arith.constant 0 : index
    %c384_788 = arith.constant 384 : index
    %474 = vector.load %arg18[%c0_787, %c384_788] : memref<2x960xf32, #tpu.memory_space<vmem>>, vector<2x64xf32>
    tpu.vector_store %arg18[%c0_787, %c384_788], %473 {strides = array<i32>} : memref<2x960xf32, #tpu.memory_space<vmem>>, vector<2x64xf32>,
    %c7_789 = arith.constant 7 : index
    %c0_790 = arith.constant 0 : index
    %475 = tpu.strided_load %arg17[%c7_789, %c0_790] {strides = array<i32: 15, 1>} : memref<30x64xf32, #tpu.memory_space<vmem>>, vector<2x64xf32>
    %c0_791 = arith.constant 0 : index
    %c448_792 = arith.constant 448 : index
    %476 = vector.load %arg18[%c0_791, %c448_792] : memref<2x960xf32, #tpu.memory_space<vmem>>, vector<2x64xf32>
    tpu.vector_store %arg18[%c0_791, %c448_792], %475 {strides = array<i32>} : memref<2x960xf32, #tpu.memory_space<vmem>>, vector<2x64xf32>,
    %c8 = arith.constant 8 : index
    %c0_793 = arith.constant 0 : index
    %477 = tpu.strided_load %arg17[%c8, %c0_793] {strides = array<i32: 15, 1>} : memref<30x64xf32, #tpu.memory_space<vmem>>, vector<2x64xf32>
    %c0_794 = arith.constant 0 : index
    %c512_795 = arith.constant 512 : index
    %478 = vector.load %arg18[%c0_794, %c512_795] : memref<2x960xf32, #tpu.memory_space<vmem>>, vector<2x64xf32>
    tpu.vector_store %arg18[%c0_794, %c512_795], %477 {strides = array<i32>} : memref<2x960xf32, #tpu.memory_space<vmem>>, vector<2x64xf32>,
    %c9_796 = arith.constant 9 : index
    %c0_797 = arith.constant 0 : index
    %479 = tpu.strided_load %arg17[%c9_796, %c0_797] {strides = array<i32: 15, 1>} : memref<30x64xf32, #tpu.memory_space<vmem>>, vector<2x64xf32>
    %c0_798 = arith.constant 0 : index
    %c576 = arith.constant 576 : index
    %480 = vector.load %arg18[%c0_798, %c576] : memref<2x960xf32, #tpu.memory_space<vmem>>, vector<2x64xf32>
    tpu.vector_store %arg18[%c0_798, %c576], %479 {strides = array<i32>} : memref<2x960xf32, #tpu.memory_space<vmem>>, vector<2x64xf32>,
    %c10_799 = arith.constant 10 : index
    %c0_800 = arith.constant 0 : index
    %481 = tpu.strided_load %arg17[%c10_799, %c0_800] {strides = array<i32: 15, 1>} : memref<30x64xf32, #tpu.memory_space<vmem>>, vector<2x64xf32>
    %c0_801 = arith.constant 0 : index
    %c640 = arith.constant 640 : index
    %482 = vector.load %arg18[%c0_801, %c640] : memref<2x960xf32, #tpu.memory_space<vmem>>, vector<2x64xf32>
    tpu.vector_store %arg18[%c0_801, %c640], %481 {strides = array<i32>} : memref<2x960xf32, #tpu.memory_space<vmem>>, vector<2x64xf32>,
    %c11_802 = arith.constant 11 : index
    %c0_803 = arith.constant 0 : index
    %483 = tpu.strided_load %arg17[%c11_802, %c0_803] {strides = array<i32: 15, 1>} : memref<30x64xf32, #tpu.memory_space<vmem>>, vector<2x64xf32>
    %c0_804 = arith.constant 0 : index
    %c704 = arith.constant 704 : index
    %484 = vector.load %arg18[%c0_804, %c704] : memref<2x960xf32, #tpu.memory_space<vmem>>, vector<2x64xf32>
    tpu.vector_store %arg18[%c0_804, %c704], %483 {strides = array<i32>} : memref<2x960xf32, #tpu.memory_space<vmem>>, vector<2x64xf32>,
    %c12_805 = arith.constant 12 : index
    %c0_806 = arith.constant 0 : index
    %485 = tpu.strided_load %arg17[%c12_805, %c0_806] {strides = array<i32: 15, 1>} : memref<30x64xf32, #tpu.memory_space<vmem>>, vector<2x64xf32>
    %c0_807 = arith.constant 0 : index
    %c768 = arith.constant 768 : index
    %486 = vector.load %arg18[%c0_807, %c768] : memref<2x960xf32, #tpu.memory_space<vmem>>, vector<2x64xf32>
    tpu.vector_store %arg18[%c0_807, %c768], %485 {strides = array<i32>} : memref<2x960xf32, #tpu.memory_space<vmem>>, vector<2x64xf32>,
    %c13_808 = arith.constant 13 : index
    %c0_809 = arith.constant 0 : index
    %487 = tpu.strided_load %arg17[%c13_808, %c0_809] {strides = array<i32: 15, 1>} : memref<30x64xf32, #tpu.memory_space<vmem>>, vector<2x64xf32>
    %c0_810 = arith.constant 0 : index
    %c832 = arith.constant 832 : index
    %488 = vector.load %arg18[%c0_810, %c832] : memref<2x960xf32, #tpu.memory_space<vmem>>, vector<2x64xf32>
    tpu.vector_store %arg18[%c0_810, %c832], %487 {strides = array<i32>} : memref<2x960xf32, #tpu.memory_space<vmem>>, vector<2x64xf32>,
    %c14 = arith.constant 14 : index
    %c0_811 = arith.constant 0 : index
    %489 = tpu.strided_load %arg17[%c14, %c0_811] {strides = array<i32: 15, 1>} : memref<30x64xf32, #tpu.memory_space<vmem>>, vector<2x64xf32>
    %c0_812 = arith.constant 0 : index
    %c896 = arith.constant 896 : index
    %490 = vector.load %arg18[%c0_812, %c896] : memref<2x960xf32, #tpu.memory_space<vmem>>, vector<2x64xf32>
    tpu.vector_store %arg18[%c0_812, %c896], %489 {strides = array<i32>} : memref<2x960xf32, #tpu.memory_space<vmem>>, vector<2x64xf32>,
    tpu.wait_dma2 semaphore(%arg20 : memref<!tpu.dma_semaphore, #tpu.memory_space<semaphore_mem>>) src(%arg8 : memref<960x512xbf16, #tpu.memory_space<any>>) dst(%arg19 : memref<960x512xbf16, #tpu.memory_space<vmem>>)
    %c0_813 = arith.constant 0 : index
    %c0_814 = arith.constant 0 : index
    %491 = vector.load %arg18[%c0_813, %c0_814] : memref<2x960xf32, #tpu.memory_space<vmem>>, vector<2x960xf32>
    %492 = arith.truncf %491 : vector<2x960xf32> to vector<2x960xbf16>
    %c0_815 = arith.constant 0 : index
    %c0_816 = arith.constant 0 : index
    %493 = vector.load %arg19[%c0_815, %c0_816] : memref<960x512xbf16, #tpu.memory_space<vmem>>, vector<960x512xbf16>
    %cst_817 = arith.constant dense<0.000000e+00> : vector<2x512xf32>
    %494 = tpu.matmul %492, %493, %cst_817 {dimension_numbers = #tpu.dot_dimension_numbers<[1], [0], [0], [1], [0, 0, 1, 1], [], []>} : vector<2x960xbf16>, vector<960x512xbf16>, vector<2x512xf32> -> vector<2x512xf32>
    %c0_818 = arith.constant 0 : index
    %c0_819 = arith.constant 0 : index
    %495 = vector.load %arg9[%c0_818, %c0_819] : memref<1x512xf32, #tpu.memory_space<vmem>>, vector<1x512xf32>
    %496 = vector.broadcast %495 : vector<1x512xf32> to vector<2x512xf32>
    %497 = arith.addf %494, %496 : vector<2x512xf32>
    %cst_820 = arith.constant 0.000000e+00 : f32
    %498 = vector.broadcast %cst_820 : f32 to vector<2x512xf32>
    %499 = arith.maximumf %497, %498 : vector<2x512xf32>
    %500 = arith.truncf %499 : vector<2x512xf32> to vector<2x512xbf16>
    %c0_821 = arith.constant 0 : index
    %c0_822 = arith.constant 0 : index
    %501 = vector.load %arg10[%c0_821, %c0_822] : memref<512x128xbf16, #tpu.memory_space<vmem>>, vector<512x128xbf16>
    %cst_823 = arith.constant dense<0.000000e+00> : vector<2x128xf32>
    %502 = tpu.matmul %500, %501, %cst_823 {dimension_numbers = #tpu.dot_dimension_numbers<[1], [0], [0], [1], [0, 0, 1, 1], [], []>} : vector<2x512xbf16>, vector<512x128xbf16>, vector<2x128xf32> -> vector<2x128xf32>
    %c0_824 = arith.constant 0 : index
    %c0_825 = arith.constant 0 : index
    %503 = vector.load %arg11[%c0_824, %c0_825] : memref<1x128xf32, #tpu.memory_space<vmem>>, vector<1x128xf32>
    %504 = vector.broadcast %503 : vector<1x128xf32> to vector<2x128xf32>
    %505 = arith.addf %502, %504 : vector<2x128xf32>
    %c0_826 = arith.constant 0 : index
    %c0_827 = arith.constant 0 : index
    %506 = vector.load %arg12[%c0_826, %c0_827] : memref<2x128xf32, #tpu.memory_space<vmem>>, vector<2x128xf32>
    tpu.vector_store %arg12[%c0_826, %c0_827], %505 {strides = array<i32>} : memref<2x128xf32, #tpu.memory_space<vmem>>, vector<2x128xf32>,
    return
  }
  func.func @transform_0(%arg0: i32) -> (i32, i32) {
    %c0_i32 = arith.constant 0 : i32
    %c0_i32_0 = arith.constant 0 : i32
    %c0_i32_1 = arith.constant 0 : i32
    return %c0_i32, %c0_i32_0 : i32, i32
  }
  func.func @transform_1(%arg0: i32) -> (i32, i32) {
    %c0_i32 = arith.constant 0 : i32
    %c0_i32_0 = arith.constant 0 : i32
    %c0_i32_1 = arith.constant 0 : i32
    return %c0_i32, %c0_i32_0 : i32, i32
  }
  func.func @transform_2(%arg0: i32) -> (i32, i32) {
    %c0_i32 = arith.constant 0 : i32
    %c0_i32_0 = arith.constant 0 : i32
    %c0_i32_1 = arith.constant 0 : i32
    return %c0_i32, %c0_i32_0 : i32, i32
  }
  func.func @transform_3(%arg0: i32) -> (i32, i32) {
    %c0_i32 = arith.constant 0 : i32
    %c0_i32_0 = arith.constant 0 : i32
    %c0_i32_1 = arith.constant 0 : i32
    return %c0_i32, %c0_i32_0 : i32, i32
  }
  func.func @transform_4(%arg0: i32) -> (i32, i32) {
    %c0_i32 = arith.constant 0 : i32
    %c0_i32_0 = arith.constant 0 : i32
    %c0_i32_1 = arith.constant 0 : i32
    return %c0_i32, %c0_i32_0 : i32, i32
  }
  func.func @transform_5(%arg0: i32) -> (i32, i32) {
    %c0_i32 = arith.constant 0 : i32
    %c0_i32_0 = arith.constant 0 : i32
    %c0_i32_1 = arith.constant 0 : i32
    return %c0_i32, %c0_i32_0 : i32, i32
  }
  func.func @transform_6(%arg0: i32) -> (i32, i32) {
    %c0_i32 = arith.constant 0 : i32
    %c0_i32_0 = arith.constant 0 : i32
    %c0_i32_1 = arith.constant 0 : i32
    return %c0_i32, %c0_i32_0 : i32, i32
  }
  func.func @transform_8(%arg0: i32) -> (i32, i32) {
    %c0_i32 = arith.constant 0 : i32
    %c0_i32_0 = arith.constant 0 : i32
    %c0_i32_1 = arith.constant 0 : i32
    return %c0_i32, %c0_i32_0 : i32, i32
  }
  func.func @transform_9(%arg0: i32) -> (i32, i32) {
    %c0_i32 = arith.constant 0 : i32
    %c0_i32_0 = arith.constant 0 : i32
    %c0_i32_1 = arith.constant 0 : i32
    return %c0_i32, %c0_i32_0 : i32, i32
  }
  func.func @transform_10(%arg0: i32) -> (i32, i32) {
    %c0_i32 = arith.constant 0 : i32
    %c0_i32_0 = arith.constant 0 : i32
    %c0_i32_1 = arith.constant 0 : i32
    return %c0_i32, %c0_i32_0 : i32, i32
  }
  func.func @transform_11(%arg0: i32) -> (i32, i32) {
    %c0_i32 = arith.constant 0 : i32
    %c0_i32_0 = arith.constant 0 : i32
    %c0_i32_1 = arith.constant 0 : i32
    return %c0_i32, %c0_i32_0 : i32, i32
  }
}

</mosaic_0001>

<bundles_post_ra>
// kernel: net_forward.1
= control target key start
LH: loop header
LB: loop body
LE: loop exit
PB: predicated region body
PF: predicated region fallthrough
CT: control target
= control target key end

     0   :  { %16 = vsyncpa [#allocation11], 0  ;;  %s9202_s0 = inlined_call_operand.vmem [shape: bf16[336,256], index: 0, kind: input, shape index: {}]   ;;  %s9203_s1 = inlined_call_operand.vmem [shape: bf16[256,32], index: 1, kind: input, shape index: {}]   ;;  %s9204_s2 = inlined_call_operand.vmem [shape: f32[1,32], index: 2, kind: input, shape index: {}]   ;;  %s9205_s3 = inlined_call_operand.vmem [shape: bf16[288,64], index: 3, kind: input, shape index: {}]   ;;  %s9206_s4 = inlined_call_operand.vmem [shape: f32[1,64], index: 4, kind: input, shape index: {}]   ;;  %s9207_s5 = inlined_call_operand.vmem [shape: bf16[576,64], index: 5, kind: input, shape index: {}]   ;;  %s9208_s6 = inlined_call_operand.vmem [shape: f32[1,64], index: 6, kind: input, shape index: {}]   ;;  %s9209_s7 = inlined_call_operand.vmem [shape: bf16[960,512], index: 7, kind: input, shape index: {}]   ;;  %s9210_s8 = inlined_call_operand.vmem [shape: f32[1,512], index: 8, kind: input, shape index: {}]   ;;  %s9211_s9 = inlined_call_operand.vmem [shape: bf16[512,128], index: 9, kind: input, shape index: {}]   ;;  %s9212_s10 = inlined_call_operand.vmem [shape: f32[1,128], index: 10, kind: input, shape index: {}]   ;;  %s9213_s11 = inlined_call_operand.hbm [shape: f32[2,128], index: 11, kind: output, shape index: {}]  }
   0x1   :  { %v55_v0 = vld [vmem:[%s9209_s7] sm:$0xf]  ;;  %v57_v1 = vld [vmem:[%s9209_s7 + $0x10] sm:$0xf]  ;;  %v59_v2 = vld [vmem:[%s9209_s7 + $0x4] sm:$0xf] }
   0x2   :  { %56 = vst [vmem:[#allocation8] sm:$0xf] %v55_v0  ;;  %58 = vst [vmem:[#allocation8 + $0x4] sm:$0xf] %v57_v1  ;;  %v61_v3 = vld [vmem:[%s9209_s7 + $0x14] sm:$0xf] }
   0x3   :  { %v63_v4 = vld [vmem:[%s9209_s7 + $0x8] sm:$0xf]  ;;  %60 = vst [vmem:[#allocation8 + $0x8] sm:$0xf] %v59_v2  ;;  %62 = vst [vmem:[#allocation8 + $0xc] sm:$0xf] %v61_v3 }
   0x4   :  { %64 = vst [vmem:[#allocation8 + $0x10] sm:$0xf] %v63_v4  ;;  %v65_v5 = vld [vmem:[%s9209_s7 + $0x18] sm:$0xf]  ;;  %v67_v6 = vld [vmem:[%s9209_s7 + $0xc] sm:$0xf] }
   0x5   :  { %v69_v7 = vld [vmem:[%s9209_s7 + $0x1c] sm:$0xff]   ;;  %66 = vst [vmem:[#allocation8 + $0x14] sm:$0xf] %v65_v5  ;;  %68 = vst [vmem:[#allocation8 + $0x18] sm:$0xf] %v67_v6 }
   0x6   :  { %70 = vst [vmem:[#allocation8 + $0x1c] sm:$0xff] %v69_v7   ;;  %v73_v8 = vld [vmem:[%s9209_s7 + $0x30] sm:$0xf]  ;;  %v75_v9 = vld [vmem:[%s9209_s7 + $0x24] sm:$0xf]  ;;  %v85_v14 = vld [vmem:[%s9209_s7 + $0x3c] sm:$0xff]  }
   0x7   :  { %v77_v10 = vld [vmem:[%s9209_s7 + $0x34] sm:$0xf]  ;;  %74 = vst [vmem:[#allocation8 + $0x24] sm:$0xf] %v73_v8  ;;  %76 = vst [vmem:[#allocation8 + $0x28] sm:$0xf] %v75_v9 }
   0x8   :  { %78 = vst [vmem:[#allocation8 + $0x2c] sm:$0xf] %v77_v10  ;;  %v79_v11 = vld [vmem:[%s9209_s7 + $0x28] sm:$0xf]  ;;  %v81_v12 = vld [vmem:[%s9209_s7 + $0x38] sm:$0xf] }
   0x9   :  { %v83_v13 = vld [vmem:[%s9209_s7 + $0x2c] sm:$0xf]  ;;  %80 = vst [vmem:[#allocation8 + $0x30] sm:$0xf] %v79_v11  ;;  %82 = vst [vmem:[#allocation8 + $0x34] sm:$0xf] %v81_v12 }
   0xa   :  { %84 = vst [vmem:[#allocation8 + $0x38] sm:$0xf] %v83_v13  ;;  %v89_v15 = vld [vmem:[%s9209_s7 + $0x50] sm:$0xf]  ;;  %v91_v16 = vld [vmem:[%s9209_s7 + $0x44] sm:$0xf] }
   0xb   :  { %86 = vst [vmem:[#allocation8 + $0x3c] sm:$0xff] %v85_v14   ;;  %90 = vst [vmem:[#allocation8 + $0x44] sm:$0xf] %v89_v15  ;;  %v93_v17 = vld [vmem:[%s9209_s7 + $0x54] sm:$0xf]  ;;  %v101_v21 = vld [vmem:[%s9209_s7 + $0x5c] sm:$0xff]  }
   0xc   :  { %92 = vst [vmem:[#allocation8 + $0x48] sm:$0xf] %v91_v16  ;;  %v95_v18 = vld [vmem:[%s9209_s7 + $0x48] sm:$0xf]  ;;  %v97_v19 = vld [vmem:[%s9209_s7 + $0x58] sm:$0xf] }
   0xd   :  { %94 = vst [vmem:[#allocation8 + $0x4c] sm:$0xf] %v93_v17  ;;  %96 = vst [vmem:[#allocation8 + $0x50] sm:$0xf] %v95_v18  ;;  %v99_v20 = vld [vmem:[%s9209_s7 + $0x4c] sm:$0xf] }
   0xe   :  { %98 = vst [vmem:[#allocation8 + $0x54] sm:$0xf] %v97_v19  ;;  %v105_v22 = vld [vmem:[%s9209_s7 + $0x70] sm:$0xf]  ;;  %100 = vst [vmem:[#allocation8 + $0x58] sm:$0xf] %v99_v20 }
   0xf   :  { %102 = vst [vmem:[#allocation8 + $0x5c] sm:$0xff] %v101_v21   ;;  %106 = vst [vmem:[#allocation8 + $0x64] sm:$0xf] %v105_v22  ;;  %v107_v23 = vld [vmem:[%s9209_s7 + $0x64] sm:$0xf]  ;;  %v117_v28 = vld [vmem:[%s9209_s7 + $0x7c] sm:$0xff]  }
  0x10   :  { %v109_v24 = vld [vmem:[%s9209_s7 + $0x74] sm:$0xf]  ;;  %v111_v25 = vld [vmem:[%s9209_s7 + $0x68] sm:$0xf]  ;;  %108 = vst [vmem:[#allocation8 + $0x68] sm:$0xf] %v107_v23 }
  0x11   :  { %110 = vst [vmem:[#allocation8 + $0x6c] sm:$0xf] %v109_v24  ;;  %112 = vst [vmem:[#allocation8 + $0x70] sm:$0xf] %v111_v25  ;;  %v113_v26 = vld [vmem:[%s9209_s7 + $0x78] sm:$0xf] }
  0x12   :  { %v115_v27 = vld [vmem:[%s9209_s7 + $0x6c] sm:$0xf]  ;;  %114 = vst [vmem:[#allocation8 + $0x74] sm:$0xf] %v113_v26  ;;  %118 = vst [vmem:[#allocation8 + $0x7c] sm:$0xff] %v117_v28   ;;  %v133_v35 = vld [vmem:[%s9209_s7 + $0x9c] sm:$0xff]  }
  0x13   :  { %116 = vst [vmem:[#allocation8 + $0x78] sm:$0xf] %v115_v27  ;;  %v121_v29 = vld [vmem:[%s9209_s7 + $0x90] sm:$0xf]  ;;  %v123_v30 = vld [vmem:[%s9209_s7 + $0x84] sm:$0xf] }
  0x14   :  { %v125_v31 = vld [vmem:[%s9209_s7 + $0x94] sm:$0xf]  ;;  %122 = vst [vmem:[#allocation8 + $0x84] sm:$0xf] %v121_v29  ;;  %124 = vst [vmem:[#allocation8 + $0x88] sm:$0xf] %v123_v30 }
  0x15   :  { %126 = vst [vmem:[#allocation8 + $0x8c] sm:$0xf] %v125_v31  ;;  %v127_v32 = vld [vmem:[%s9209_s7 + $0x88] sm:$0xf]  ;;  %v129_v33 = vld [vmem:[%s9209_s7 + $0x98] sm:$0xf] }
  0x16   :  { %v131_v34 = vld [vmem:[%s9209_s7 + $0x8c] sm:$0xf]  ;;  %128 = vst [vmem:[#allocation8 + $0x90] sm:$0xf] %v127_v32  ;;  %130 = vst [vmem:[#allocation8 + $0x94] sm:$0xf] %v129_v33 }
  0x17   :  { %132 = vst [vmem:[#allocation8 + $0x98] sm:$0xf] %v131_v34  ;;  %v137_v36 = vld [vmem:[%s9209_s7 + $0xb0] sm:$0xf]  ;;  %v139_v37 = vld [vmem:[%s9209_s7 + $0xa4] sm:$0xf] }
  0x18   :  { %134 = vst [vmem:[#allocation8 + $0x9c] sm:$0xff] %v133_v35   ;;  %138 = vst [vmem:[#allocation8 + $0xa4] sm:$0xf] %v137_v36  ;;  %v141_v38 = vld [vmem:[%s9209_s7 + $0xb4] sm:$0xf]  ;;  %v149_v42 = vld [vmem:[%s9209_s7 + $0xbc] sm:$0xff]  }
  0x19   :  { %140 = vst [vmem:[#allocation8 + $0xa8] sm:$0xf] %v139_v37  ;;  %v143_v39 = vld [vmem:[%s9209_s7 + $0xa8] sm:$0xf]  ;;  %v145_v40 = vld [vmem:[%s9209_s7 + $0xb8] sm:$0xf] }
  0x1a   :  { %142 = vst [vmem:[#allocation8 + $0xac] sm:$0xf] %v141_v38  ;;  %144 = vst [vmem:[#allocation8 + $0xb0] sm:$0xf] %v143_v39  ;;  %v147_v41 = vld [vmem:[%s9209_s7 + $0xac] sm:$0xf] }
  0x1b   :  { %146 = vst [vmem:[#allocation8 + $0xb4] sm:$0xf] %v145_v40  ;;  %v153_v43 = vld [vmem:[%s9209_s7 + $0xd0] sm:$0xf]  ;;  %148 = vst [vmem:[#allocation8 + $0xb8] sm:$0xf] %v147_v41 }
  0x1c   :  { %150 = vst [vmem:[#allocation8 + $0xbc] sm:$0xff] %v149_v42   ;;  %154 = vst [vmem:[#allocation8 + $0xc4] sm:$0xf] %v153_v43  ;;  %v155_v44 = vld [vmem:[%s9209_s7 + $0xc4] sm:$0xf]  ;;  %v165_v49 = vld [vmem:[%s9209_s7 + $0xdc] sm:$0xff]  }
  0x1d   :  { %v157_v45 = vld [vmem:[%s9209_s7 + $0xd4] sm:$0xf]  ;;  %v159_v46 = vld [vmem:[%s9209_s7 + $0xc8] sm:$0xf]  ;;  %156 = vst [vmem:[#allocation8 + $0xc8] sm:$0xf] %v155_v44 }
  0x1e   :  { %158 = vst [vmem:[#allocation8 + $0xcc] sm:$0xf] %v157_v45  ;;  %160 = vst [vmem:[#allocation8 + $0xd0] sm:$0xf] %v159_v46  ;;  %v161_v47 = vld [vmem:[%s9209_s7 + $0xd8] sm:$0xf] }
  0x1f   :  { %v163_v48 = vld [vmem:[%s9209_s7 + $0xcc] sm:$0xf]  ;;  %162 = vst [vmem:[#allocation8 + $0xd4] sm:$0xf] %v161_v47  ;;  %166 = vst [vmem:[#allocation8 + $0xdc] sm:$0xff] %v165_v49   ;;  %v181_v56 = vld [vmem:[%s9209_s7 + $0xfc] sm:$0xff]  }
  0x20   :  { %164 = vst [vmem:[#allocation8 + $0xd8] sm:$0xf] %v163_v48  ;;  %v169_v50 = vld [vmem:[%s9209_s7 + $0xf0] sm:$0xf]  ;;  %v171_v51 = vld [vmem:[%s9209_s7 + $0xe4] sm:$0xf] }
  0x21   :  { %v173_v52 = vld [vmem:[%s9209_s7 + $0xf4] sm:$0xf]  ;;  %170 = vst [vmem:[#allocation8 + $0xe4] sm:$0xf] %v169_v50  ;;  %172 = vst [vmem:[#allocation8 + $0xe8] sm:$0xf] %v171_v51 }
  0x22   :  { %174 = vst [vmem:[#allocation8 + $0xec] sm:$0xf] %v173_v52  ;;  %v175_v53 = vld [vmem:[%s9209_s7 + $0xe8] sm:$0xf]  ;;  %v177_v54 = vld [vmem:[%s9209_s7 + $0xf8] sm:$0xf] }
  0x23   :  { %v179_v55 = vld [vmem:[%s9209_s7 + $0xec] sm:$0xf]  ;;  %176 = vst [vmem:[#allocation8 + $0xf0] sm:$0xf] %v175_v53  ;;  %178 = vst [vmem:[#allocation8 + $0xf4] sm:$0xf] %v177_v54 }
  0x24   :  { %180 = vst [vmem:[#allocation8 + $0xf8] sm:$0xf] %v179_v55  ;;  %v185_v57 = vld [vmem:[%s9209_s7 + $0x110] sm:$0xf]  ;;  %v187_v58 = vld [vmem:[%s9209_s7 + $0x104] sm:$0xf] }
  0x25   :  { %182 = vst [vmem:[#allocation8 + $0xfc] sm:$0xff] %v181_v56   ;;  %186 = vst [vmem:[#allocation8 + $0x104] sm:$0xf] %v185_v57  ;;  %v189_v59 = vld [vmem:[%s9209_s7 + $0x114] sm:$0xf]  ;;  %v197_v63 = vld [vmem:[%s9209_s7 + $0x11c] sm:$0xff]  }
  0x26   :  { %188 = vst [vmem:[#allocation8 + $0x108] sm:$0xf] %v187_v58  ;;  %v191_v60 = vld [vmem:[%s9209_s7 + $0x108] sm:$0xf]  ;;  %v193_v61 = vld [vmem:[%s9209_s7 + $0x118] sm:$0xf] }
  0x27   :  { %190 = vst [vmem:[#allocation8 + $0x10c] sm:$0xf] %v189_v59  ;;  %192 = vst [vmem:[#allocation8 + $0x110] sm:$0xf] %v191_v60  ;;  %v195_v62 = vld [vmem:[%s9209_s7 + $0x10c] sm:$0xf] }
  0x28   :  { %194 = vst [vmem:[#allocation8 + $0x114] sm:$0xf] %v193_v61  ;;  %v201_v0 = vld [vmem:[%s9209_s7 + $0x130] sm:$0xf]  ;;  %196 = vst [vmem:[#allocation8 + $0x118] sm:$0xf] %v195_v62 }
  0x29   :  { %198 = vst [vmem:[#allocation8 + $0x11c] sm:$0xff] %v197_v63   ;;  %202 = vst [vmem:[#allocation8 + $0x124] sm:$0xf] %v201_v0  ;;  %v203_v1 = vld [vmem:[%s9209_s7 + $0x124] sm:$0xf]  ;;  %v213_v6 = vld [vmem:[%s9209_s7 + $0x13c] sm:$0xff]  }
  0x2a   :  { %v205_v2 = vld [vmem:[%s9209_s7 + $0x134] sm:$0xf]  ;;  %v207_v3 = vld [vmem:[%s9209_s7 + $0x128] sm:$0xf]  ;;  %204 = vst [vmem:[#allocation8 + $0x128] sm:$0xf] %v203_v1 }
  0x2b   :  { %206 = vst [vmem:[#allocation8 + $0x12c] sm:$0xf] %v205_v2  ;;  %208 = vst [vmem:[#allocation8 + $0x130] sm:$0xf] %v207_v3  ;;  %v209_v4 = vld [vmem:[%s9209_s7 + $0x138] sm:$0xf] }
  0x2c   :  { %v211_v5 = vld [vmem:[%s9209_s7 + $0x12c] sm:$0xf]  ;;  %210 = vst [vmem:[#allocation8 + $0x134] sm:$0xf] %v209_v4  ;;  %214 = vst [vmem:[#allocation8 + $0x13c] sm:$0xff] %v213_v6   ;;  %v229_v13 = vld [vmem:[%s9209_s7 + $0x15c] sm:$0xff]  }
  0x2d   :  { %212 = vst [vmem:[#allocation8 + $0x138] sm:$0xf] %v211_v5  ;;  %v217_v7 = vld [vmem:[%s9209_s7 + $0x150] sm:$0xf]  ;;  %v219_v8 = vld [vmem:[%s9209_s7 + $0x144] sm:$0xf] }
  0x2e   :  { %v221_v9 = vld [vmem:[%s9209_s7 + $0x154] sm:$0xf]  ;;  %218 = vst [vmem:[#allocation8 + $0x144] sm:$0xf] %v217_v7  ;;  %220 = vst [vmem:[#allocation8 + $0x148] sm:$0xf] %v219_v8 }
  0x2f   :  { %222 = vst [vmem:[#allocation8 + $0x14c] sm:$0xf] %v221_v9  ;;  %v223_v10 = vld [vmem:[%s9209_s7 + $0x148] sm:$0xf]  ;;  %v225_v11 = vld [vmem:[%s9209_s7 + $0x158] sm:$0xf] }
  0x30   :  { %v227_v12 = vld [vmem:[%s9209_s7 + $0x14c] sm:$0xf]  ;;  %224 = vst [vmem:[#allocation8 + $0x150] sm:$0xf] %v223_v10  ;;  %226 = vst [vmem:[#allocation8 + $0x154] sm:$0xf] %v225_v11 }
  0x31   :  { %228 = vst [vmem:[#allocation8 + $0x158] sm:$0xf] %v227_v12  ;;  %v233_v14 = vld [vmem:[%s9209_s7 + $0x170] sm:$0xf]  ;;  %v235_v15 = vld [vmem:[%s9209_s7 + $0x164] sm:$0xf] }
  0x32   :  { %230 = vst [vmem:[#allocation8 + $0x15c] sm:$0xff] %v229_v13   ;;  %234 = vst [vmem:[#allocation8 + $0x164] sm:$0xf] %v233_v14  ;;  %v237_v16 = vld [vmem:[%s9209_s7 + $0x174] sm:$0xf]  ;;  %v245_v20 = vld [vmem:[%s9209_s7 + $0x17c] sm:$0xff]  }
  0x33   :  { %236 = vst [vmem:[#allocation8 + $0x168] sm:$0xf] %v235_v15  ;;  %v239_v17 = vld [vmem:[%s9209_s7 + $0x168] sm:$0xf]  ;;  %v241_v18 = vld [vmem:[%s9209_s7 + $0x178] sm:$0xf] }
  0x34   :  { %238 = vst [vmem:[#allocation8 + $0x16c] sm:$0xf] %v237_v16  ;;  %240 = vst [vmem:[#allocation8 + $0x170] sm:$0xf] %v239_v17  ;;  %v243_v19 = vld [vmem:[%s9209_s7 + $0x16c] sm:$0xf] }
  0x35   :  { %242 = vst [vmem:[#allocation8 + $0x174] sm:$0xf] %v241_v18  ;;  %v249_v21 = vld [vmem:[%s9209_s7 + $0x190] sm:$0xf]  ;;  %244 = vst [vmem:[#allocation8 + $0x178] sm:$0xf] %v243_v19 }
  0x36   :  { %246 = vst [vmem:[#allocation8 + $0x17c] sm:$0xff] %v245_v20   ;;  %250 = vst [vmem:[#allocation8 + $0x184] sm:$0xf] %v249_v21  ;;  %v251_v22 = vld [vmem:[%s9209_s7 + $0x184] sm:$0xf]  ;;  %v261_v27 = vld [vmem:[%s9209_s7 + $0x19c] sm:$0xff]  }
  0x37   :  { %v253_v23 = vld [vmem:[%s9209_s7 + $0x194] sm:$0xf]  ;;  %v255_v24 = vld [vmem:[%s9209_s7 + $0x188] sm:$0xf]  ;;  %252 = vst [vmem:[#allocation8 + $0x188] sm:$0xf] %v251_v22 }
  0x38   :  { %254 = vst [vmem:[#allocation8 + $0x18c] sm:$0xf] %v253_v23  ;;  %256 = vst [vmem:[#allocation8 + $0x190] sm:$0xf] %v255_v24  ;;  %v257_v25 = vld [vmem:[%s9209_s7 + $0x198] sm:$0xf] }
  0x39   :  { %v259_v26 = vld [vmem:[%s9209_s7 + $0x18c] sm:$0xf]  ;;  %258 = vst [vmem:[#allocation8 + $0x194] sm:$0xf] %v257_v25  ;;  %262 = vst [vmem:[#allocation8 + $0x19c] sm:$0xff] %v261_v27   ;;  %v277_v34 = vld [vmem:[%s9209_s7 + $0x1bc] sm:$0xff]  }
  0x3a   :  { %260 = vst [vmem:[#allocation8 + $0x198] sm:$0xf] %v259_v26  ;;  %v265_v28 = vld [vmem:[%s9209_s7 + $0x1b0] sm:$0xf]  ;;  %v267_v29 = vld [vmem:[%s9209_s7 + $0x1a4] sm:$0xf] }
  0x3b   :  { %v269_v30 = vld [vmem:[%s9209_s7 + $0x1b4] sm:$0xf]  ;;  %266 = vst [vmem:[#allocation8 + $0x1a4] sm:$0xf] %v265_v28  ;;  %268 = vst [vmem:[#allocation8 + $0x1a8] sm:$0xf] %v267_v29 }
  0x3c   :  { %270 = vst [vmem:[#allocation8 + $0x1ac] sm:$0xf] %v269_v30  ;;  %v271_v31 = vld [vmem:[%s9209_s7 + $0x1a8] sm:$0xf]  ;;  %v273_v32 = vld [vmem:[%s9209_s7 + $0x1b8] sm:$0xf] }
  0x3d   :  { %v275_v33 = vld [vmem:[%s9209_s7 + $0x1ac] sm:$0xf]  ;;  %272 = vst [vmem:[#allocation8 + $0x1b0] sm:$0xf] %v271_v31  ;;  %274 = vst [vmem:[#allocation8 + $0x1b4] sm:$0xf] %v273_v32 }
  0x3e   :  { %276 = vst [vmem:[#allocation8 + $0x1b8] sm:$0xf] %v275_v33  ;;  %v281_v35 = vld [vmem:[%s9209_s7 + $0x1d0] sm:$0xf]  ;;  %v283_v36 = vld [vmem:[%s9209_s7 + $0x1c4] sm:$0xf] }
  0x3f   :  { %278 = vst [vmem:[#allocation8 + $0x1bc] sm:$0xff] %v277_v34   ;;  %282 = vst [vmem:[#allocation8 + $0x1c4] sm:$0xf] %v281_v35  ;;  %v285_v37 = vld [vmem:[%s9209_s7 + $0x1d4] sm:$0xf]  ;;  %v293_v41 = vld [vmem:[%s9209_s7 + $0x1dc] sm:$0xff]  }
  0x40   :  { %284 = vst [vmem:[#allocation8 + $0x1c8] sm:$0xf] %v283_v36  ;;  %v287_v38 = vld [vmem:[%s9209_s7 + $0x1c8] sm:$0xf]  ;;  %v289_v39 = vld [vmem:[%s9209_s7 + $0x1d8] sm:$0xf] }
  0x41   :  { %286 = vst [vmem:[#allocation8 + $0x1cc] sm:$0xf] %v285_v37  ;;  %288 = vst [vmem:[#allocation8 + $0x1d0] sm:$0xf] %v287_v38  ;;  %v291_v40 = vld [vmem:[%s9209_s7 + $0x1cc] sm:$0xf] }
  0x42   :  { %290 = vst [vmem:[#allocation8 + $0x1d4] sm:$0xf] %v289_v39  ;;  %v297_v42 = vld [vmem:[%s9209_s7 + $0x1f0] sm:$0xf]  ;;  %292 = vst [vmem:[#allocation8 + $0x1d8] sm:$0xf] %v291_v40 }
  0x43   :  { %294 = vst [vmem:[#allocation8 + $0x1dc] sm:$0xff] %v293_v41   ;;  %298 = vst [vmem:[#allocation8 + $0x1e4] sm:$0xf] %v297_v42  ;;  %v299_v43 = vld [vmem:[%s9209_s7 + $0x1e4] sm:$0xf]  ;;  %v309_v48 = vld [vmem:[%s9209_s7 + $0x1fc] sm:$0xff]  }
  0x44   :  { %v301_v44 = vld [vmem:[%s9209_s7 + $0x1f4] sm:$0xf]  ;;  %v303_v45 = vld [vmem:[%s9209_s7 + $0x1e8] sm:$0xf]  ;;  %300 = vst [vmem:[#allocation8 + $0x1e8] sm:$0xf] %v299_v43 }
  0x45   :  { %302 = vst [vmem:[#allocation8 + $0x1ec] sm:$0xf] %v301_v44  ;;  %304 = vst [vmem:[#allocation8 + $0x1f0] sm:$0xf] %v303_v45  ;;  %v305_v46 = vld [vmem:[%s9209_s7 + $0x1f8] sm:$0xf] }
  0x46   :  { %v307_v47 = vld [vmem:[%s9209_s7 + $0x1ec] sm:$0xf]  ;;  %306 = vst [vmem:[#allocation8 + $0x1f4] sm:$0xf] %v305_v46  ;;  %310 = vst [vmem:[#allocation8 + $0x1fc] sm:$0xff] %v309_v48   ;;  %v325_v55 = vld [vmem:[%s9209_s7 + $0x21c] sm:$0xff]  }
  0x47   :  { %308 = vst [vmem:[#allocation8 + $0x1f8] sm:$0xf] %v307_v47  ;;  %v313_v49 = vld [vmem:[%s9209_s7 + $0x210] sm:$0xf]  ;;  %v315_v50 = vld [vmem:[%s9209_s7 + $0x204] sm:$0xf] }
  0x48   :  { %v317_v51 = vld [vmem:[%s9209_s7 + $0x214] sm:$0xf]  ;;  %314 = vst [vmem:[#allocation8 + $0x204] sm:$0xf] %v313_v49  ;;  %316 = vst [vmem:[#allocation8 + $0x208] sm:$0xf] %v315_v50 }
  0x49   :  { %318 = vst [vmem:[#allocation8 + $0x20c] sm:$0xf] %v317_v51  ;;  %v319_v52 = vld [vmem:[%s9209_s7 + $0x208] sm:$0xf]  ;;  %v321_v53 = vld [vmem:[%s9209_s7 + $0x218] sm:$0xf] }
  0x4a   :  { %v323_v54 = vld [vmem:[%s9209_s7 + $0x20c] sm:$0xf]  ;;  %320 = vst [vmem:[#allocation8 + $0x210] sm:$0xf] %v319_v52  ;;  %322 = vst [vmem:[#allocation8 + $0x214] sm:$0xf] %v321_v53 }
  0x4b   :  { %324 = vst [vmem:[#allocation8 + $0x218] sm:$0xf] %v323_v54  ;;  %v329_v56 = vld [vmem:[%s9209_s7 + $0x230] sm:$0xf]  ;;  %v331_v57 = vld [vmem:[%s9209_s7 + $0x224] sm:$0xf] }
  0x4c   :  { %326 = vst [vmem:[#allocation8 + $0x21c] sm:$0xff] %v325_v55   ;;  %330 = vst [vmem:[#allocation8 + $0x224] sm:$0xf] %v329_v56  ;;  %v333_v58 = vld [vmem:[%s9209_s7 + $0x234] sm:$0xf]  ;;  %v341_v62 = vld [vmem:[%s9209_s7 + $0x23c] sm:$0xff]  }
  0x4d   :  { %332 = vst [vmem:[#allocation8 + $0x228] sm:$0xf] %v331_v57  ;;  %v335_v59 = vld [vmem:[%s9209_s7 + $0x228] sm:$0xf]  ;;  %v337_v60 = vld [vmem:[%s9209_s7 + $0x238] sm:$0xf] }
  0x4e   :  { %334 = vst [vmem:[#allocation8 + $0x22c] sm:$0xf] %v333_v58  ;;  %336 = vst [vmem:[#allocation8 + $0x230] sm:$0xf] %v335_v59  ;;  %v339_v61 = vld [vmem:[%s9209_s7 + $0x22c] sm:$0xf] }
  0x4f   :  { %338 = vst [vmem:[#allocation8 + $0x234] sm:$0xf] %v337_v60  ;;  %v345_v63 = vld [vmem:[%s9209_s7 + $0x250] sm:$0xf]  ;;  %340 = vst [vmem:[#allocation8 + $0x238] sm:$0xf] %v339_v61 }
  0x50   :  { %342 = vst [vmem:[#allocation8 + $0x23c] sm:$0xff] %v341_v62   ;;  %346 = vst [vmem:[#allocation8 + $0x244] sm:$0xf] %v345_v63  ;;  %v347_v0 = vld [vmem:[%s9209_s7 + $0x244] sm:$0xf]  ;;  %v357_v5 = vld [vmem:[%s9209_s7 + $0x25c] sm:$0xff]  }
  0x51   :  { %v349_v1 = vld [vmem:[%s9209_s7 + $0x254] sm:$0xf]  ;;  %v351_v2 = vld [vmem:[%s9209_s7 + $0x248] sm:$0xf]  ;;  %348 = vst [vmem:[#allocation8 + $0x248] sm:$0xf] %v347_v0 }
  0x52   :  { %350 = vst [vmem:[#allocation8 + $0x24c] sm:$0xf] %v349_v1  ;;  %352 = vst [vmem:[#allocation8 + $0x250] sm:$0xf] %v351_v2  ;;  %v353_v3 = vld [vmem:[%s9209_s7 + $0x258] sm:$0xf] }
  0x53   :  { %v355_v4 = vld [vmem:[%s9209_s7 + $0x24c] sm:$0xf]  ;;  %354 = vst [vmem:[#allocation8 + $0x254] sm:$0xf] %v353_v3  ;;  %358 = vst [vmem:[#allocation8 + $0x25c] sm:$0xff] %v357_v5   ;;  %v373_v12 = vld [vmem:[%s9209_s7 + $0x27c] sm:$0xff]  }
  0x54   :  { %356 = vst [vmem:[#allocation8 + $0x258] sm:$0xf] %v355_v4  ;;  %v361_v6 = vld [vmem:[%s9209_s7 + $0x270] sm:$0xf]  ;;  %v363_v7 = vld [vmem:[%s9209_s7 + $0x264] sm:$0xf] }
  0x55   :  { %v365_v8 = vld [vmem:[%s9209_s7 + $0x274] sm:$0xf]  ;;  %362 = vst [vmem:[#allocation8 + $0x264] sm:$0xf] %v361_v6  ;;  %364 = vst [vmem:[#allocation8 + $0x268] sm:$0xf] %v363_v7 }
  0x56   :  { %366 = vst [vmem:[#allocation8 + $0x26c] sm:$0xf] %v365_v8  ;;  %v367_v9 = vld [vmem:[%s9209_s7 + $0x268] sm:$0xf]  ;;  %v369_v10 = vld [vmem:[%s9209_s7 + $0x278] sm:$0xf] }
  0x57   :  { %v371_v11 = vld [vmem:[%s9209_s7 + $0x26c] sm:$0xf]  ;;  %368 = vst [vmem:[#allocation8 + $0x270] sm:$0xf] %v367_v9  ;;  %370 = vst [vmem:[#allocation8 + $0x274] sm:$0xf] %v369_v10 }
  0x58   :  { %372 = vst [vmem:[#allocation8 + $0x278] sm:$0xf] %v371_v11  ;;  %v377_v13 = vld [vmem:[%s9209_s7 + $0x290] sm:$0xf]  ;;  %v379_v14 = vld [vmem:[%s9209_s7 + $0x284] sm:$0xf] }
  0x59   :  { %374 = vst [vmem:[#allocation8 + $0x27c] sm:$0xff] %v373_v12   ;;  %378 = vst [vmem:[#allocation8 + $0x284] sm:$0xf] %v377_v13  ;;  %v381_v15 = vld [vmem:[%s9209_s7 + $0x294] sm:$0xf]  ;;  %v389_v19 = vld [vmem:[%s9209_s7 + $0x29c] sm:$0xff]  }
  0x5a   :  { %380 = vst [vmem:[#allocation8 + $0x288] sm:$0xf] %v379_v14  ;;  %v383_v16 = vld [vmem:[%s9209_s7 + $0x288] sm:$0xf]  ;;  %v385_v17 = vld [vmem:[%s9209_s7 + $0x298] sm:$0xf] }
  0x5b   :  { %382 = vst [vmem:[#allocation8 + $0x28c] sm:$0xf] %v381_v15  ;;  %384 = vst [vmem:[#allocation8 + $0x290] sm:$0xf] %v383_v16  ;;  %v387_v18 = vld [vmem:[%s9209_s7 + $0x28c] sm:$0xf] }
  0x5c   :  { %386 = vst [vmem:[#allocation8 + $0x294] sm:$0xf] %v385_v17  ;;  %v393_v20 = vld [vmem:[%s9209_s7 + $0x2b0] sm:$0xf]  ;;  %388 = vst [vmem:[#allocation8 + $0x298] sm:$0xf] %v387_v18 }
  0x5d   :  { %390 = vst [vmem:[#allocation8 + $0x29c] sm:$0xff] %v389_v19   ;;  %394 = vst [vmem:[#allocation8 + $0x2a4] sm:$0xf] %v393_v20  ;;  %v395_v21 = vld [vmem:[%s9209_s7 + $0x2a4] sm:$0xf]  ;;  %v405_v26 = vld [vmem:[%s9209_s7 + $0x2bc] sm:$0xff]  }
  0x5e   :  { %v397_v22 = vld [vmem:[%s9209_s7 + $0x2b4] sm:$0xf]  ;;  %v399_v23 = vld [vmem:[%s9209_s7 + $0x2a8] sm:$0xf]  ;;  %396 = vst [vmem:[#allocation8 + $0x2a8] sm:$0xf] %v395_v21 }
  0x5f   :  { %398 = vst [vmem:[#allocation8 + $0x2ac] sm:$0xf] %v397_v22  ;;  %400 = vst [vmem:[#allocation8 + $0x2b0] sm:$0xf] %v399_v23  ;;  %v401_v24 = vld [vmem:[%s9209_s7 + $0x2b8] sm:$0xf] }
  0x60   :  { %v403_v25 = vld [vmem:[%s9209_s7 + $0x2ac] sm:$0xf]  ;;  %402 = vst [vmem:[#allocation8 + $0x2b4] sm:$0xf] %v401_v24  ;;  %406 = vst [vmem:[#allocation8 + $0x2bc] sm:$0xff] %v405_v26   ;;  %v421_v33 = vld [vmem:[%s9209_s7 + $0x2dc] sm:$0xff]  }
  0x61   :  { %404 = vst [vmem:[#allocation8 + $0x2b8] sm:$0xf] %v403_v25  ;;  %v409_v27 = vld [vmem:[%s9209_s7 + $0x2d0] sm:$0xf]  ;;  %v411_v28 = vld [vmem:[%s9209_s7 + $0x2c4] sm:$0xf] }
  0x62   :  { %v413_v29 = vld [vmem:[%s9209_s7 + $0x2d4] sm:$0xf]  ;;  %410 = vst [vmem:[#allocation8 + $0x2c4] sm:$0xf] %v409_v27  ;;  %412 = vst [vmem:[#allocation8 + $0x2c8] sm:$0xf] %v411_v28 }
  0x63   :  { %414 = vst [vmem:[#allocation8 + $0x2cc] sm:$0xf] %v413_v29  ;;  %v415_v30 = vld [vmem:[%s9209_s7 + $0x2c8] sm:$0xf]  ;;  %v417_v31 = vld [vmem:[%s9209_s7 + $0x2d8] sm:$0xf] }
  0x64   :  { %v419_v32 = vld [vmem:[%s9209_s7 + $0x2cc] sm:$0xf]  ;;  %416 = vst [vmem:[#allocation8 + $0x2d0] sm:$0xf] %v415_v30  ;;  %418 = vst [vmem:[#allocation8 + $0x2d4] sm:$0xf] %v417_v31 }
  0x65   :  { %420 = vst [vmem:[#allocation8 + $0x2d8] sm:$0xf] %v419_v32  ;;  %v425_v34 = vld [vmem:[%s9209_s7 + $0x2f0] sm:$0xf]  ;;  %v427_v35 = vld [vmem:[%s9209_s7 + $0x2e4] sm:$0xf] }
  0x66   :  { %422 = vst [vmem:[#allocation8 + $0x2dc] sm:$0xff] %v421_v33   ;;  %426 = vst [vmem:[#allocation8 + $0x2e4] sm:$0xf] %v425_v34  ;;  %v429_v36 = vld [vmem:[%s9209_s7 + $0x2f4] sm:$0xf]  ;;  %v437_v40 = vld [vmem:[%s9209_s7 + $0x2fc] sm:$0xff]  }
  0x67   :  { %428 = vst [vmem:[#allocation8 + $0x2e8] sm:$0xf] %v427_v35  ;;  %v431_v37 = vld [vmem:[%s9209_s7 + $0x2e8] sm:$0xf]  ;;  %v433_v38 = vld [vmem:[%s9209_s7 + $0x2f8] sm:$0xf] }
  0x68   :  { %430 = vst [vmem:[#allocation8 + $0x2ec] sm:$0xf] %v429_v36  ;;  %432 = vst [vmem:[#allocation8 + $0x2f0] sm:$0xf] %v431_v37  ;;  %v435_v39 = vld [vmem:[%s9209_s7 + $0x2ec] sm:$0xf] }
  0x69   :  { %434 = vst [vmem:[#allocation8 + $0x2f4] sm:$0xf] %v433_v38  ;;  %v441_v41 = vld [vmem:[%s9209_s7 + $0x310] sm:$0xf]  ;;  %436 = vst [vmem:[#allocation8 + $0x2f8] sm:$0xf] %v435_v39 }
  0x6a   :  { %438 = vst [vmem:[#allocation8 + $0x2fc] sm:$0xff] %v437_v40   ;;  %442 = vst [vmem:[#allocation8 + $0x304] sm:$0xf] %v441_v41  ;;  %v443_v42 = vld [vmem:[%s9209_s7 + $0x304] sm:$0xf]  ;;  %v453_v47 = vld [vmem:[%s9209_s7 + $0x31c] sm:$0xff]  }
  0x6b   :  { %v445_v43 = vld [vmem:[%s9209_s7 + $0x314] sm:$0xf]  ;;  %v447_v44 = vld [vmem:[%s9209_s7 + $0x308] sm:$0xf]  ;;  %444 = vst [vmem:[#allocation8 + $0x308] sm:$0xf] %v443_v42 }
  0x6c   :  { %446 = vst [vmem:[#allocation8 + $0x30c] sm:$0xf] %v445_v43  ;;  %448 = vst [vmem:[#allocation8 + $0x310] sm:$0xf] %v447_v44  ;;  %v449_v45 = vld [vmem:[%s9209_s7 + $0x318] sm:$0xf] }
  0x6d   :  { %v451_v46 = vld [vmem:[%s9209_s7 + $0x30c] sm:$0xf]  ;;  %450 = vst [vmem:[#allocation8 + $0x314] sm:$0xf] %v449_v45  ;;  %454 = vst [vmem:[#allocation8 + $0x31c] sm:$0xff] %v453_v47   ;;  %v469_v54 = vld [vmem:[%s9209_s7 + $0x33c] sm:$0xff]  }
  0x6e   :  { %452 = vst [vmem:[#allocation8 + $0x318] sm:$0xf] %v451_v46  ;;  %v457_v48 = vld [vmem:[%s9209_s7 + $0x330] sm:$0xf]  ;;  %v459_v49 = vld [vmem:[%s9209_s7 + $0x324] sm:$0xf] }
  0x6f   :  { %v461_v50 = vld [vmem:[%s9209_s7 + $0x334] sm:$0xf]  ;;  %458 = vst [vmem:[#allocation8 + $0x324] sm:$0xf] %v457_v48  ;;  %460 = vst [vmem:[#allocation8 + $0x328] sm:$0xf] %v459_v49 }
  0x70   :  { %462 = vst [vmem:[#allocation8 + $0x32c] sm:$0xf] %v461_v50  ;;  %v463_v51 = vld [vmem:[%s9209_s7 + $0x328] sm:$0xf]  ;;  %v465_v52 = vld [vmem:[%s9209_s7 + $0x338] sm:$0xf] }
  0x71   :  { %v467_v53 = vld [vmem:[%s9209_s7 + $0x32c] sm:$0xf]  ;;  %464 = vst [vmem:[#allocation8 + $0x330] sm:$0xf] %v463_v51  ;;  %466 = vst [vmem:[#allocation8 + $0x334] sm:$0xf] %v465_v52 }
  0x72   :  { %468 = vst [vmem:[#allocation8 + $0x338] sm:$0xf] %v467_v53  ;;  %v473_v55 = vld [vmem:[%s9209_s7 + $0x350] sm:$0xf]  ;;  %v475_v56 = vld [vmem:[%s9209_s7 + $0x344] sm:$0xf] }
  0x73   :  { %470 = vst [vmem:[#allocation8 + $0x33c] sm:$0xff] %v469_v54   ;;  %474 = vst [vmem:[#allocation8 + $0x344] sm:$0xf] %v473_v55  ;;  %v477_v57 = vld [vmem:[%s9209_s7 + $0x354] sm:$0xf]  ;;  %v485_v61 = vld [vmem:[%s9209_s7 + $0x35c] sm:$0xff]  }
  0x74   :  { %476 = vst [vmem:[#allocation8 + $0x348] sm:$0xf] %v475_v56  ;;  %v479_v58 = vld [vmem:[%s9209_s7 + $0x348] sm:$0xf]  ;;  %v481_v59 = vld [vmem:[%s9209_s7 + $0x358] sm:$0xf] }
  0x75   :  { %478 = vst [vmem:[#allocation8 + $0x34c] sm:$0xf] %v477_v57  ;;  %480 = vst [vmem:[#allocation8 + $0x350] sm:$0xf] %v479_v58  ;;  %v483_v60 = vld [vmem:[%s9209_s7 + $0x34c] sm:$0xf] }
  0x76   :  { %482 = vst [vmem:[#allocation8 + $0x354] sm:$0xf] %v481_v59  ;;  %v489_v62 = vld [vmem:[%s9209_s7 + $0x370] sm:$0xf]  ;;  %484 = vst [vmem:[#allocation8 + $0x358] sm:$0xf] %v483_v60 }
  0x77   :  { %486 = vst [vmem:[#allocation8 + $0x35c] sm:$0xff] %v485_v61   ;;  %490 = vst [vmem:[#allocation8 + $0x364] sm:$0xf] %v489_v62  ;;  %v491_v63 = vld [vmem:[%s9209_s7 + $0x364] sm:$0xf]  ;;  %v501_v4 = vld [vmem:[%s9209_s7 + $0x37c] sm:$0xff]  }
  0x78   :  { %v493_v0 = vld [vmem:[%s9209_s7 + $0x374] sm:$0xf]  ;;  %v495_v1 = vld [vmem:[%s9209_s7 + $0x368] sm:$0xf]  ;;  %492 = vst [vmem:[#allocation8 + $0x368] sm:$0xf] %v491_v63 }
  0x79   :  { %494 = vst [vmem:[#allocation8 + $0x36c] sm:$0xf] %v493_v0  ;;  %496 = vst [vmem:[#allocation8 + $0x370] sm:$0xf] %v495_v1  ;;  %v497_v2 = vld [vmem:[%s9209_s7 + $0x378] sm:$0xf] }
  0x7a   :  { %v499_v3 = vld [vmem:[%s9209_s7 + $0x36c] sm:$0xf]  ;;  %498 = vst [vmem:[#allocation8 + $0x374] sm:$0xf] %v497_v2  ;;  %502 = vst [vmem:[#allocation8 + $0x37c] sm:$0xff] %v501_v4   ;;  %v517_v11 = vld [vmem:[%s9209_s7 + $0x39c] sm:$0xff]  }
  0x7b   :  { %500 = vst [vmem:[#allocation8 + $0x378] sm:$0xf] %v499_v3  ;;  %v505_v5 = vld [vmem:[%s9209_s7 + $0x390] sm:$0xf]  ;;  %v507_v6 = vld [vmem:[%s9209_s7 + $0x384] sm:$0xf] }
  0x7c   :  { %v509_v7 = vld [vmem:[%s9209_s7 + $0x394] sm:$0xf]  ;;  %506 = vst [vmem:[#allocation8 + $0x384] sm:$0xf] %v505_v5  ;;  %508 = vst [vmem:[#allocation8 + $0x388] sm:$0xf] %v507_v6 }
  0x7d   :  { %510 = vst [vmem:[#allocation8 + $0x38c] sm:$0xf] %v509_v7  ;;  %v511_v8 = vld [vmem:[%s9209_s7 + $0x388] sm:$0xf]  ;;  %v513_v9 = vld [vmem:[%s9209_s7 + $0x398] sm:$0xf] }
  0x7e   :  { %v515_v10 = vld [vmem:[%s9209_s7 + $0x38c] sm:$0xf]  ;;  %512 = vst [vmem:[#allocation8 + $0x390] sm:$0xf] %v511_v8  ;;  %514 = vst [vmem:[#allocation8 + $0x394] sm:$0xf] %v513_v9 }
  0x7f   :  { %516 = vst [vmem:[#allocation8 + $0x398] sm:$0xf] %v515_v10  ;;  %v521_v12 = vld [vmem:[%s9209_s7 + $0x3b0] sm:$0xf]  ;;  %v523_v13 = vld [vmem:[%s9209_s7 + $0x3a4] sm:$0xf] }
  0x80   :  { %518 = vst [vmem:[#allocation8 + $0x39c] sm:$0xff] %v517_v11   ;;  %522 = vst [vmem:[#allocation8 + $0x3a4] sm:$0xf] %v521_v12  ;;  %v525_v14 = vld [vmem:[%s9209_s7 + $0x3b4] sm:$0xf]  ;;  %v533_v18 = vld [vmem:[%s9209_s7 + $0x3bc] sm:$0xff]  }
  0x81   :  { %524 = vst [vmem:[#allocation8 + $0x3a8] sm:$0xf] %v523_v13  ;;  %v527_v15 = vld [vmem:[%s9209_s7 + $0x3a8] sm:$0xf]  ;;  %v529_v16 = vld [vmem:[%s9209_s7 + $0x3b8] sm:$0xf] }
  0x82   :  { %526 = vst [vmem:[#allocation8 + $0x3ac] sm:$0xf] %v525_v14  ;;  %528 = vst [vmem:[#allocation8 + $0x3b0] sm:$0xf] %v527_v15  ;;  %v531_v17 = vld [vmem:[%s9209_s7 + $0x3ac] sm:$0xf] }
  0x83   :  { %530 = vst [vmem:[#allocation8 + $0x3b4] sm:$0xf] %v529_v16  ;;  %v537_v19 = vld [vmem:[%s9209_s7 + $0x3d0] sm:$0xf]  ;;  %532 = vst [vmem:[#allocation8 + $0x3b8] sm:$0xf] %v531_v17 }
  0x84   :  { %534 = vst [vmem:[#allocation8 + $0x3bc] sm:$0xff] %v533_v18   ;;  %538 = vst [vmem:[#allocation8 + $0x3c4] sm:$0xf] %v537_v19  ;;  %v539_v20 = vld [vmem:[%s9209_s7 + $0x3c4] sm:$0xf]  ;;  %v549_v25 = vld [vmem:[%s9209_s7 + $0x3dc] sm:$0xff]  }
  0x85   :  { %v541_v21 = vld [vmem:[%s9209_s7 + $0x3d4] sm:$0xf]  ;;  %v543_v22 = vld [vmem:[%s9209_s7 + $0x3c8] sm:$0xf]  ;;  %540 = vst [vmem:[#allocation8 + $0x3c8] sm:$0xf] %v539_v20 }
  0x86   :  { %542 = vst [vmem:[#allocation8 + $0x3cc] sm:$0xf] %v541_v21  ;;  %544 = vst [vmem:[#allocation8 + $0x3d0] sm:$0xf] %v543_v22  ;;  %v545_v23 = vld [vmem:[%s9209_s7 + $0x3d8] sm:$0xf] }
  0x87   :  { %v547_v24 = vld [vmem:[%s9209_s7 + $0x3cc] sm:$0xf]  ;;  %546 = vst [vmem:[#allocation8 + $0x3d4] sm:$0xf] %v545_v23  ;;  %550 = vst [vmem:[#allocation8 + $0x3dc] sm:$0xff] %v549_v25   ;;  %v565_v32 = vld [vmem:[%s9209_s7 + $0x3fc] sm:$0xff]  }
  0x88   :  { %548 = vst [vmem:[#allocation8 + $0x3d8] sm:$0xf] %v547_v24  ;;  %v553_v26 = vld [vmem:[%s9209_s7 + $0x3f0] sm:$0xf]  ;;  %v555_v27 = vld [vmem:[%s9209_s7 + $0x3e4] sm:$0xf] }
  0x89   :  { %v557_v28 = vld [vmem:[%s9209_s7 + $0x3f4] sm:$0xf]  ;;  %554 = vst [vmem:[#allocation8 + $0x3e4] sm:$0xf] %v553_v26  ;;  %556 = vst [vmem:[#allocation8 + $0x3e8] sm:$0xf] %v555_v27 }
  0x8a   :  { %558 = vst [vmem:[#allocation8 + $0x3ec] sm:$0xf] %v557_v28  ;;  %v559_v29 = vld [vmem:[%s9209_s7 + $0x3e8] sm:$0xf]  ;;  %v561_v30 = vld [vmem:[%s9209_s7 + $0x3f8] sm:$0xf] }
  0x8b   :  { %v563_v31 = vld [vmem:[%s9209_s7 + $0x3ec] sm:$0xf]  ;;  %560 = vst [vmem:[#allocation8 + $0x3f0] sm:$0xf] %v559_v29  ;;  %562 = vst [vmem:[#allocation8 + $0x3f4] sm:$0xf] %v561_v30 }
  0x8c   :  { %564 = vst [vmem:[#allocation8 + $0x3f8] sm:$0xf] %v563_v31  ;;  %v569_v33 = vld [vmem:[%s9209_s7 + $0x410] sm:$0xf]  ;;  %v571_v34 = vld [vmem:[%s9209_s7 + $0x404] sm:$0xf] }
  0x8d   :  { %566 = vst [vmem:[#allocation8 + $0x3fc] sm:$0xff] %v565_v32   ;;  %570 = vst [vmem:[#allocation8 + $0x404] sm:$0xf] %v569_v33  ;;  %v573_v35 = vld [vmem:[%s9209_s7 + $0x414] sm:$0xf]  ;;  %v581_v39 = vld [vmem:[%s9209_s7 + $0x41c] sm:$0xff]  }
  0x8e   :  { %572 = vst [vmem:[#allocation8 + $0x408] sm:$0xf] %v571_v34  ;;  %v575_v36 = vld [vmem:[%s9209_s7 + $0x408] sm:$0xf]  ;;  %v577_v37 = vld [vmem:[%s9209_s7 + $0x418] sm:$0xf] }
  0x8f   :  { %574 = vst [vmem:[#allocation8 + $0x40c] sm:$0xf] %v573_v35  ;;  %576 = vst [vmem:[#allocation8 + $0x410] sm:$0xf] %v575_v36  ;;  %v579_v38 = vld [vmem:[%s9209_s7 + $0x40c] sm:$0xf] }
  0x90   :  { %578 = vst [vmem:[#allocation8 + $0x414] sm:$0xf] %v577_v37  ;;  %v585_v40 = vld [vmem:[%s9209_s7 + $0x430] sm:$0xf]  ;;  %580 = vst [vmem:[#allocation8 + $0x418] sm:$0xf] %v579_v38 }
  0x91   :  { %582 = vst [vmem:[#allocation8 + $0x41c] sm:$0xff] %v581_v39   ;;  %586 = vst [vmem:[#allocation8 + $0x424] sm:$0xf] %v585_v40  ;;  %v587_v41 = vld [vmem:[%s9209_s7 + $0x424] sm:$0xf]  ;;  %v597_v46 = vld [vmem:[%s9209_s7 + $0x43c] sm:$0xff]  }
  0x92   :  { %v589_v42 = vld [vmem:[%s9209_s7 + $0x434] sm:$0xf]  ;;  %v591_v43 = vld [vmem:[%s9209_s7 + $0x428] sm:$0xf]  ;;  %588 = vst [vmem:[#allocation8 + $0x428] sm:$0xf] %v587_v41 }
  0x93   :  { %590 = vst [vmem:[#allocation8 + $0x42c] sm:$0xf] %v589_v42  ;;  %592 = vst [vmem:[#allocation8 + $0x430] sm:$0xf] %v591_v43  ;;  %v593_v44 = vld [vmem:[%s9209_s7 + $0x438] sm:$0xf] }
  0x94   :  { %v595_v45 = vld [vmem:[%s9209_s7 + $0x42c] sm:$0xf]  ;;  %594 = vst [vmem:[#allocation8 + $0x434] sm:$0xf] %v593_v44  ;;  %598 = vst [vmem:[#allocation8 + $0x43c] sm:$0xff] %v597_v46   ;;  %v613_v53 = vld [vmem:[%s9209_s7 + $0x45c] sm:$0xff]  }
  0x95   :  { %596 = vst [vmem:[#allocation8 + $0x438] sm:$0xf] %v595_v45  ;;  %v601_v47 = vld [vmem:[%s9209_s7 + $0x450] sm:$0xf]  ;;  %v603_v48 = vld [vmem:[%s9209_s7 + $0x444] sm:$0xf] }
  0x96   :  { %v605_v49 = vld [vmem:[%s9209_s7 + $0x454] sm:$0xf]  ;;  %602 = vst [vmem:[#allocation8 + $0x444] sm:$0xf] %v601_v47  ;;  %604 = vst [vmem:[#allocation8 + $0x448] sm:$0xf] %v603_v48 }
  0x97   :  { %606 = vst [vmem:[#allocation8 + $0x44c] sm:$0xf] %v605_v49  ;;  %v607_v50 = vld [vmem:[%s9209_s7 + $0x448] sm:$0xf]  ;;  %v609_v51 = vld [vmem:[%s9209_s7 + $0x458] sm:$0xf] }
  0x98   :  { %v611_v52 = vld [vmem:[%s9209_s7 + $0x44c] sm:$0xf]  ;;  %608 = vst [vmem:[#allocation8 + $0x450] sm:$0xf] %v607_v50  ;;  %610 = vst [vmem:[#allocation8 + $0x454] sm:$0xf] %v609_v51 }
  0x99   :  { %612 = vst [vmem:[#allocation8 + $0x458] sm:$0xf] %v611_v52  ;;  %v617_v54 = vld [vmem:[%s9209_s7 + $0x470] sm:$0xf]  ;;  %v619_v55 = vld [vmem:[%s9209_s7 + $0x464] sm:$0xf] }
  0x9a   :  { %614 = vst [vmem:[#allocation8 + $0x45c] sm:$0xff] %v613_v53   ;;  %618 = vst [vmem:[#allocation8 + $0x464] sm:$0xf] %v617_v54  ;;  %v621_v56 = vld [vmem:[%s9209_s7 + $0x474] sm:$0xf]  ;;  %v629_v60 = vld [vmem:[%s9209_s7 + $0x47c] sm:$0xff]  }
  0x9b   :  { %620 = vst [vmem:[#allocation8 + $0x468] sm:$0xf] %v619_v55  ;;  %v623_v57 = vld [vmem:[%s9209_s7 + $0x468] sm:$0xf]  ;;  %v625_v58 = vld [vmem:[%s9209_s7 + $0x478] sm:$0xf] }
  0x9c   :  { %622 = vst [vmem:[#allocation8 + $0x46c] sm:$0xf] %v621_v56  ;;  %624 = vst [vmem:[#allocation8 + $0x470] sm:$0xf] %v623_v57  ;;  %v627_v59 = vld [vmem:[%s9209_s7 + $0x46c] sm:$0xf] }
  0x9d   :  { %626 = vst [vmem:[#allocation8 + $0x474] sm:$0xf] %v625_v58  ;;  %v633_v61 = vld [vmem:[%s9209_s7 + $0x490] sm:$0xf]  ;;  %628 = vst [vmem:[#allocation8 + $0x478] sm:$0xf] %v627_v59 }
  0x9e   :  { %630 = vst [vmem:[#allocation8 + $0x47c] sm:$0xff] %v629_v60   ;;  %634 = vst [vmem:[#allocation8 + $0x484] sm:$0xf] %v633_v61  ;;  %v635_v62 = vld [vmem:[%s9209_s7 + $0x484] sm:$0xf]  ;;  %v645_v3 = vld [vmem:[%s9209_s7 + $0x49c] sm:$0xff]  }
  0x9f   :  { %v637_v63 = vld [vmem:[%s9209_s7 + $0x494] sm:$0xf]  ;;  %v639_v0 = vld [vmem:[%s9209_s7 + $0x488] sm:$0xf]  ;;  %636 = vst [vmem:[#allocation8 + $0x488] sm:$0xf] %v635_v62 }
  0xa0   :  { %638 = vst [vmem:[#allocation8 + $0x48c] sm:$0xf] %v637_v63  ;;  %640 = vst [vmem:[#allocation8 + $0x490] sm:$0xf] %v639_v0  ;;  %v641_v1 = vld [vmem:[%s9209_s7 + $0x498] sm:$0xf] }
  0xa1   :  { %v643_v2 = vld [vmem:[%s9209_s7 + $0x48c] sm:$0xf]  ;;  %642 = vst [vmem:[#allocation8 + $0x494] sm:$0xf] %v641_v1  ;;  %646 = vst [vmem:[#allocation8 + $0x49c] sm:$0xff] %v645_v3   ;;  %v661_v10 = vld [vmem:[%s9209_s7 + $0x4bc] sm:$0xff]  }
  0xa2   :  { %644 = vst [vmem:[#allocation8 + $0x498] sm:$0xf] %v643_v2  ;;  %v649_v4 = vld [vmem:[%s9209_s7 + $0x4b0] sm:$0xf]  ;;  %v651_v5 = vld [vmem:[%s9209_s7 + $0x4a4] sm:$0xf] }
  0xa3   :  { %v653_v6 = vld [vmem:[%s9209_s7 + $0x4b4] sm:$0xf]  ;;  %650 = vst [vmem:[#allocation8 + $0x4a4] sm:$0xf] %v649_v4  ;;  %652 = vst [vmem:[#allocation8 + $0x4a8] sm:$0xf] %v651_v5 }
  0xa4   :  { %654 = vst [vmem:[#allocation8 + $0x4ac] sm:$0xf] %v653_v6  ;;  %v655_v7 = vld [vmem:[%s9209_s7 + $0x4a8] sm:$0xf]  ;;  %v657_v8 = vld [vmem:[%s9209_s7 + $0x4b8] sm:$0xf] }
  0xa5   :  { %v659_v9 = vld [vmem:[%s9209_s7 + $0x4ac] sm:$0xf]  ;;  %656 = vst [vmem:[#allocation8 + $0x4b0] sm:$0xf] %v655_v7  ;;  %658 = vst [vmem:[#allocation8 + $0x4b4] sm:$0xf] %v657_v8 }
  0xa6   :  { %660 = vst [vmem:[#allocation8 + $0x4b8] sm:$0xf] %v659_v9  ;;  %v665_v11 = vld [vmem:[%s9209_s7 + $0x4d0] sm:$0xf]  ;;  %v667_v12 = vld [vmem:[%s9209_s7 + $0x4c4] sm:$0xf] }
  0xa7   :  { %662 = vst [vmem:[#allocation8 + $0x4bc] sm:$0xff] %v661_v10   ;;  %666 = vst [vmem:[#allocation8 + $0x4c4] sm:$0xf] %v665_v11  ;;  %v669_v13 = vld [vmem:[%s9209_s7 + $0x4d4] sm:$0xf]  ;;  %v677_v17 = vld [vmem:[%s9209_s7 + $0x4dc] sm:$0xff]  }
  0xa8   :  { %668 = vst [vmem:[#allocation8 + $0x4c8] sm:$0xf] %v667_v12  ;;  %v671_v14 = vld [vmem:[%s9209_s7 + $0x4c8] sm:$0xf]  ;;  %v673_v15 = vld [vmem:[%s9209_s7 + $0x4d8] sm:$0xf] }
  0xa9   :  { %670 = vst [vmem:[#allocation8 + $0x4cc] sm:$0xf] %v669_v13  ;;  %672 = vst [vmem:[#allocation8 + $0x4d0] sm:$0xf] %v671_v14  ;;  %v675_v16 = vld [vmem:[%s9209_s7 + $0x4cc] sm:$0xf] }
  0xaa   :  { %674 = vst [vmem:[#allocation8 + $0x4d4] sm:$0xf] %v673_v15  ;;  %v681_v18 = vld [vmem:[%s9209_s7 + $0x4f0] sm:$0xf]  ;;  %676 = vst [vmem:[#allocation8 + $0x4d8] sm:$0xf] %v675_v16 }
  0xab   :  { %678 = vst [vmem:[#allocation8 + $0x4dc] sm:$0xff] %v677_v17   ;;  %682 = vst [vmem:[#allocation8 + $0x4e4] sm:$0xf] %v681_v18  ;;  %v683_v19 = vld [vmem:[%s9209_s7 + $0x4e4] sm:$0xf]  ;;  %v693_v24 = vld [vmem:[%s9209_s7 + $0x4fc] sm:$0xff]  }
  0xac   :  { %v685_v20 = vld [vmem:[%s9209_s7 + $0x4f4] sm:$0xf]  ;;  %v687_v21 = vld [vmem:[%s9209_s7 + $0x4e8] sm:$0xf]  ;;  %684 = vst [vmem:[#allocation8 + $0x4e8] sm:$0xf] %v683_v19 }
  0xad   :  { %686 = vst [vmem:[#allocation8 + $0x4ec] sm:$0xf] %v685_v20  ;;  %688 = vst [vmem:[#allocation8 + $0x4f0] sm:$0xf] %v687_v21  ;;  %v689_v22 = vld [vmem:[%s9209_s7 + $0x4f8] sm:$0xf] }
  0xae   :  { %v691_v23 = vld [vmem:[%s9209_s7 + $0x4ec] sm:$0xf]  ;;  %690 = vst [vmem:[#allocation8 + $0x4f4] sm:$0xf] %v689_v22  ;;  %694 = vst [vmem:[#allocation8 + $0x4fc] sm:$0xff] %v693_v24   ;;  %v709_v31 = vld [vmem:[%s9209_s7 + $0x51c] sm:$0xff]  }
  0xaf   :  { %692 = vst [vmem:[#allocation8 + $0x4f8] sm:$0xf] %v691_v23  ;;  %v697_v25 = vld [vmem:[%s9209_s7 + $0x510] sm:$0xf]  ;;  %v699_v26 = vld [vmem:[%s9209_s7 + $0x504] sm:$0xf] }
  0xb0   :  { %v701_v27 = vld [vmem:[%s9209_s7 + $0x514] sm:$0xf]  ;;  %698 = vst [vmem:[#allocation8 + $0x504] sm:$0xf] %v697_v25  ;;  %700 = vst [vmem:[#allocation8 + $0x508] sm:$0xf] %v699_v26 }
  0xb1   :  { %702 = vst [vmem:[#allocation8 + $0x50c] sm:$0xf] %v701_v27  ;;  %v703_v28 = vld [vmem:[%s9209_s7 + $0x508] sm:$0xf]  ;;  %v705_v29 = vld [vmem:[%s9209_s7 + $0x518] sm:$0xf] }
  0xb2   :  { %v707_v30 = vld [vmem:[%s9209_s7 + $0x50c] sm:$0xf]  ;;  %704 = vst [vmem:[#allocation8 + $0x510] sm:$0xf] %v703_v28  ;;  %706 = vst [vmem:[#allocation8 + $0x514] sm:$0xf] %v705_v29 }
  0xb3   :  { %708 = vst [vmem:[#allocation8 + $0x518] sm:$0xf] %v707_v30  ;;  %v713_v32 = vld [vmem:[%s9209_s7 + $0x530] sm:$0xf]  ;;  %v715_v33 = vld [vmem:[%s9209_s7 + $0x524] sm:$0xf] }
  0xb4   :  { %710 = vst [vmem:[#allocation8 + $0x51c] sm:$0xff] %v709_v31   ;;  %714 = vst [vmem:[#allocation8 + $0x524] sm:$0xf] %v713_v32  ;;  %v717_v34 = vld [vmem:[%s9209_s7 + $0x534] sm:$0xf]  ;;  %v725_v38 = vld [vmem:[%s9209_s7 + $0x53c] sm:$0xff]  }
  0xb5   :  { %716 = vst [vmem:[#allocation8 + $0x528] sm:$0xf] %v715_v33  ;;  %v719_v35 = vld [vmem:[%s9209_s7 + $0x528] sm:$0xf]  ;;  %v721_v36 = vld [vmem:[%s9209_s7 + $0x538] sm:$0xf] }
  0xb6   :  { %718 = vst [vmem:[#allocation8 + $0x52c] sm:$0xf] %v717_v34  ;;  %720 = vst [vmem:[#allocation8 + $0x530] sm:$0xf] %v719_v35  ;;  %v723_v37 = vld [vmem:[%s9209_s7 + $0x52c] sm:$0xf] }
  0xb7   :  { %722 = vst [vmem:[#allocation8 + $0x534] sm:$0xf] %v721_v36  ;;  %v729_v39 = vld [vmem:[%s9209_s7 + $0x550] sm:$0xf]  ;;  %724 = vst [vmem:[#allocation8 + $0x538] sm:$0xf] %v723_v37 }
  0xb8   :  { %726 = vst [vmem:[#allocation8 + $0x53c] sm:$0xff] %v725_v38   ;;  %730 = vst [vmem:[#allocation8 + $0x544] sm:$0xf] %v729_v39  ;;  %v731_v40 = vld [vmem:[%s9209_s7 + $0x544] sm:$0xf]  ;;  %v741_v45 = vld [vmem:[%s9209_s7 + $0x55c] sm:$0xff]  }
  0xb9   :  { %v733_v41 = vld [vmem:[%s9209_s7 + $0x554] sm:$0xf]  ;;  %v735_v42 = vld [vmem:[%s9209_s7 + $0x548] sm:$0xf]  ;;  %732 = vst [vmem:[#allocation8 + $0x548] sm:$0xf] %v731_v40 }
  0xba   :  { %734 = vst [vmem:[#allocation8 + $0x54c] sm:$0xf] %v733_v41  ;;  %736 = vst [vmem:[#allocation8 + $0x550] sm:$0xf] %v735_v42  ;;  %v737_v43 = vld [vmem:[%s9209_s7 + $0x558] sm:$0xf] }
  0xbb   :  { %v739_v44 = vld [vmem:[%s9209_s7 + $0x54c] sm:$0xf]  ;;  %738 = vst [vmem:[#allocation8 + $0x554] sm:$0xf] %v737_v43  ;;  %742 = vst [vmem:[#allocation8 + $0x55c] sm:$0xff] %v741_v45   ;;  %v757_v52 = vld [vmem:[%s9209_s7 + $0x57c] sm:$0xff]  }
  0xbc   :  { %740 = vst [vmem:[#allocation8 + $0x558] sm:$0xf] %v739_v44  ;;  %v745_v46 = vld [vmem:[%s9209_s7 + $0x570] sm:$0xf]  ;;  %v747_v47 = vld [vmem:[%s9209_s7 + $0x564] sm:$0xf] }
  0xbd   :  { %v749_v48 = vld [vmem:[%s9209_s7 + $0x574] sm:$0xf]  ;;  %746 = vst [vmem:[#allocation8 + $0x564] sm:$0xf] %v745_v46  ;;  %748 = vst [vmem:[#allocation8 + $0x568] sm:$0xf] %v747_v47 }
  0xbe   :  { %750 = vst [vmem:[#allocation8 + $0x56c] sm:$0xf] %v749_v48  ;;  %v751_v49 = vld [vmem:[%s9209_s7 + $0x568] sm:$0xf]  ;;  %v753_v50 = vld [vmem:[%s9209_s7 + $0x578] sm:$0xf] }
  0xbf   :  { %v755_v51 = vld [vmem:[%s9209_s7 + $0x56c] sm:$0xf]  ;;  %752 = vst [vmem:[#allocation8 + $0x570] sm:$0xf] %v751_v49  ;;  %754 = vst [vmem:[#allocation8 + $0x574] sm:$0xf] %v753_v50 }
  0xc0   :  { %756 = vst [vmem:[#allocation8 + $0x578] sm:$0xf] %v755_v51  ;;  %v761_v53 = vld [vmem:[%s9209_s7 + $0x590] sm:$0xf]  ;;  %v763_v54 = vld [vmem:[%s9209_s7 + $0x584] sm:$0xf] }
  0xc1   :  { %758 = vst [vmem:[#allocation8 + $0x57c] sm:$0xff] %v757_v52   ;;  %762 = vst [vmem:[#allocation8 + $0x584] sm:$0xf] %v761_v53  ;;  %v765_v55 = vld [vmem:[%s9209_s7 + $0x594] sm:$0xf]  ;;  %v773_v59 = vld [vmem:[%s9209_s7 + $0x59c] sm:$0xff]  }
  0xc2   :  { %764 = vst [vmem:[#allocation8 + $0x588] sm:$0xf] %v763_v54  ;;  %v767_v56 = vld [vmem:[%s9209_s7 + $0x588] sm:$0xf]  ;;  %v769_v57 = vld [vmem:[%s9209_s7 + $0x598] sm:$0xf] }
  0xc3   :  { %766 = vst [vmem:[#allocation8 + $0x58c] sm:$0xf] %v765_v55  ;;  %768 = vst [vmem:[#allocation8 + $0x590] sm:$0xf] %v767_v56  ;;  %v771_v58 = vld [vmem:[%s9209_s7 + $0x58c] sm:$0xf] }
  0xc4   :  { %770 = vst [vmem:[#allocation8 + $0x594] sm:$0xf] %v769_v57  ;;  %v777_v60 = vld [vmem:[%s9209_s7 + $0x5b0] sm:$0xf]  ;;  %772 = vst [vmem:[#allocation8 + $0x598] sm:$0xf] %v771_v58 }
  0xc5   :  { %774 = vst [vmem:[#allocation8 + $0x59c] sm:$0xff] %v773_v59   ;;  %778 = vst [vmem:[#allocation8 + $0x5a4] sm:$0xf] %v777_v60  ;;  %v779_v61 = vld [vmem:[%s9209_s7 + $0x5a4] sm:$0xf]  ;;  %v789_v2 = vld [vmem:[%s9209_s7 + $0x5bc] sm:$0xff]  }
  0xc6   :  { %v781_v62 = vld [vmem:[%s9209_s7 + $0x5b4] sm:$0xf]  ;;  %v783_v63 = vld [vmem:[%s9209_s7 + $0x5a8] sm:$0xf]  ;;  %780 = vst [vmem:[#allocation8 + $0x5a8] sm:$0xf] %v779_v61 }
  0xc7   :  { %782 = vst [vmem:[#allocation8 + $0x5ac] sm:$0xf] %v781_v62  ;;  %784 = vst [vmem:[#allocation8 + $0x5b0] sm:$0xf] %v783_v63  ;;  %v785_v0 = vld [vmem:[%s9209_s7 + $0x5b8] sm:$0xf] }
  0xc8   :  { %v787_v1 = vld [vmem:[%s9209_s7 + $0x5ac] sm:$0xf]  ;;  %786 = vst [vmem:[#allocation8 + $0x5b4] sm:$0xf] %v785_v0  ;;  %790 = vst [vmem:[#allocation8 + $0x5bc] sm:$0xff] %v789_v2   ;;  %v805_v9 = vld [vmem:[%s9209_s7 + $0x5dc] sm:$0xff]  }
  0xc9   :  { %788 = vst [vmem:[#allocation8 + $0x5b8] sm:$0xf] %v787_v1  ;;  %v793_v3 = vld [vmem:[%s9209_s7 + $0x5d0] sm:$0xf]  ;;  %v795_v4 = vld [vmem:[%s9209_s7 + $0x5c4] sm:$0xf] }
  0xca   :  { %v797_v5 = vld [vmem:[%s9209_s7 + $0x5d4] sm:$0xf]  ;;  %794 = vst [vmem:[#allocation8 + $0x5c4] sm:$0xf] %v793_v3  ;;  %796 = vst [vmem:[#allocation8 + $0x5c8] sm:$0xf] %v795_v4 }
  0xcb   :  { %798 = vst [vmem:[#allocation8 + $0x5cc] sm:$0xf] %v797_v5  ;;  %v799_v6 = vld [vmem:[%s9209_s7 + $0x5c8] sm:$0xf]  ;;  %v801_v7 = vld [vmem:[%s9209_s7 + $0x5d8] sm:$0xf] }
  0xcc   :  { %v803_v8 = vld [vmem:[%s9209_s7 + $0x5cc] sm:$0xf]  ;;  %800 = vst [vmem:[#allocation8 + $0x5d0] sm:$0xf] %v799_v6  ;;  %802 = vst [vmem:[#allocation8 + $0x5d4] sm:$0xf] %v801_v7 }
  0xcd   :  { %804 = vst [vmem:[#allocation8 + $0x5d8] sm:$0xf] %v803_v8  ;;  %v809_v10 = vld [vmem:[%s9209_s7 + $0x5f0] sm:$0xf]  ;;  %v811_v11 = vld [vmem:[%s9209_s7 + $0x5e4] sm:$0xf] }
  0xce   :  { %806 = vst [vmem:[#allocation8 + $0x5dc] sm:$0xff] %v805_v9   ;;  %810 = vst [vmem:[#allocation8 + $0x5e4] sm:$0xf] %v809_v10  ;;  %v813_v12 = vld [vmem:[%s9209_s7 + $0x5f4] sm:$0xf]  ;;  %v821_v16 = vld [vmem:[%s9209_s7 + $0x5fc] sm:$0xff]  }
  0xcf   :  { %812 = vst [vmem:[#allocation8 + $0x5e8] sm:$0xf] %v811_v11  ;;  %v815_v13 = vld [vmem:[%s9209_s7 + $0x5e8] sm:$0xf]  ;;  %v817_v14 = vld [vmem:[%s9209_s7 + $0x5f8] sm:$0xf] }
  0xd0   :  { %814 = vst [vmem:[#allocation8 + $0x5ec] sm:$0xf] %v813_v12  ;;  %816 = vst [vmem:[#allocation8 + $0x5f0] sm:$0xf] %v815_v13  ;;  %v819_v15 = vld [vmem:[%s9209_s7 + $0x5ec] sm:$0xf] }
  0xd1   :  { %818 = vst [vmem:[#allocation8 + $0x5f4] sm:$0xf] %v817_v14  ;;  %v825_v17 = vld [vmem:[%s9209_s7 + $0x610] sm:$0xf]  ;;  %820 = vst [vmem:[#allocation8 + $0x5f8] sm:$0xf] %v819_v15 }
  0xd2   :  { %822 = vst [vmem:[#allocation8 + $0x5fc] sm:$0xff] %v821_v16   ;;  %826 = vst [vmem:[#allocation8 + $0x604] sm:$0xf] %v825_v17  ;;  %v827_v18 = vld [vmem:[%s9209_s7 + $0x604] sm:$0xf]  ;;  %v837_v23 = vld [vmem:[%s9209_s7 + $0x61c] sm:$0xff]  }
  0xd3   :  { %v829_v19 = vld [vmem:[%s9209_s7 + $0x614] sm:$0xf]  ;;  %v831_v20 = vld [vmem:[%s9209_s7 + $0x608] sm:$0xf]  ;;  %828 = vst [vmem:[#allocation8 + $0x608] sm:$0xf] %v827_v18 }
  0xd4   :  { %830 = vst [vmem:[#allocation8 + $0x60c] sm:$0xf] %v829_v19  ;;  %832 = vst [vmem:[#allocation8 + $0x610] sm:$0xf] %v831_v20  ;;  %v833_v21 = vld [vmem:[%s9209_s7 + $0x618] sm:$0xf] }
  0xd5   :  { %v835_v22 = vld [vmem:[%s9209_s7 + $0x60c] sm:$0xf]  ;;  %834 = vst [vmem:[#allocation8 + $0x614] sm:$0xf] %v833_v21  ;;  %838 = vst [vmem:[#allocation8 + $0x61c] sm:$0xff] %v837_v23   ;;  %v853_v30 = vld [vmem:[%s9209_s7 + $0x63c] sm:$0xff]  }
  0xd6   :  { %836 = vst [vmem:[#allocation8 + $0x618] sm:$0xf] %v835_v22  ;;  %v841_v24 = vld [vmem:[%s9209_s7 + $0x630] sm:$0xf]  ;;  %v843_v25 = vld [vmem:[%s9209_s7 + $0x624] sm:$0xf] }
  0xd7   :  { %v845_v26 = vld [vmem:[%s9209_s7 + $0x634] sm:$0xf]  ;;  %842 = vst [vmem:[#allocation8 + $0x624] sm:$0xf] %v841_v24  ;;  %844 = vst [vmem:[#allocation8 + $0x628] sm:$0xf] %v843_v25 }
  0xd8   :  { %846 = vst [vmem:[#allocation8 + $0x62c] sm:$0xf] %v845_v26  ;;  %v847_v27 = vld [vmem:[%s9209_s7 + $0x628] sm:$0xf]  ;;  %v849_v28 = vld [vmem:[%s9209_s7 + $0x638] sm:$0xf] }
  0xd9   :  { %v851_v29 = vld [vmem:[%s9209_s7 + $0x62c] sm:$0xf]  ;;  %848 = vst [vmem:[#allocation8 + $0x630] sm:$0xf] %v847_v27  ;;  %850 = vst [vmem:[#allocation8 + $0x634] sm:$0xf] %v849_v28 }
  0xda   :  { %852 = vst [vmem:[#allocation8 + $0x638] sm:$0xf] %v851_v29  ;;  %v857_v31 = vld [vmem:[%s9209_s7 + $0x650] sm:$0xf]  ;;  %v859_v32 = vld [vmem:[%s9209_s7 + $0x644] sm:$0xf] }
  0xdb   :  { %854 = vst [vmem:[#allocation8 + $0x63c] sm:$0xff] %v853_v30   ;;  %858 = vst [vmem:[#allocation8 + $0x644] sm:$0xf] %v857_v31  ;;  %v861_v33 = vld [vmem:[%s9209_s7 + $0x654] sm:$0xf]  ;;  %v869_v37 = vld [vmem:[%s9209_s7 + $0x65c] sm:$0xff]  }
  0xdc   :  { %860 = vst [vmem:[#allocation8 + $0x648] sm:$0xf] %v859_v32  ;;  %v863_v34 = vld [vmem:[%s9209_s7 + $0x648] sm:$0xf]  ;;  %v865_v35 = vld [vmem:[%s9209_s7 + $0x658] sm:$0xf] }
  0xdd   :  { %862 = vst [vmem:[#allocation8 + $0x64c] sm:$0xf] %v861_v33  ;;  %864 = vst [vmem:[#allocation8 + $0x650] sm:$0xf] %v863_v34  ;;  %v867_v36 = vld [vmem:[%s9209_s7 + $0x64c] sm:$0xf] }
  0xde   :  { %866 = vst [vmem:[#allocation8 + $0x654] sm:$0xf] %v865_v35  ;;  %v873_v38 = vld [vmem:[%s9209_s7 + $0x670] sm:$0xf]  ;;  %868 = vst [vmem:[#allocation8 + $0x658] sm:$0xf] %v867_v36 }
  0xdf   :  { %870 = vst [vmem:[#allocation8 + $0x65c] sm:$0xff] %v869_v37   ;;  %874 = vst [vmem:[#allocation8 + $0x664] sm:$0xf] %v873_v38  ;;  %v875_v39 = vld [vmem:[%s9209_s7 + $0x664] sm:$0xf]  ;;  %v885_v44 = vld [vmem:[%s9209_s7 + $0x67c] sm:$0xff]  }
  0xe0   :  { %v877_v40 = vld [vmem:[%s9209_s7 + $0x674] sm:$0xf]  ;;  %v879_v41 = vld [vmem:[%s9209_s7 + $0x668] sm:$0xf]  ;;  %876 = vst [vmem:[#allocation8 + $0x668] sm:$0xf] %v875_v39 }
  0xe1   :  { %878 = vst [vmem:[#allocation8 + $0x66c] sm:$0xf] %v877_v40  ;;  %880 = vst [vmem:[#allocation8 + $0x670] sm:$0xf] %v879_v41  ;;  %v881_v42 = vld [vmem:[%s9209_s7 + $0x678] sm:$0xf] }
  0xe2   :  { %v883_v43 = vld [vmem:[%s9209_s7 + $0x66c] sm:$0xf]  ;;  %882 = vst [vmem:[#allocation8 + $0x674] sm:$0xf] %v881_v42  ;;  %886 = vst [vmem:[#allocation8 + $0x67c] sm:$0xff] %v885_v44   ;;  %v901_v51 = vld [vmem:[%s9209_s7 + $0x69c] sm:$0xff]  }
  0xe3   :  { %884 = vst [vmem:[#allocation8 + $0x678] sm:$0xf] %v883_v43  ;;  %v889_v45 = vld [vmem:[%s9209_s7 + $0x690] sm:$0xf]  ;;  %v891_v46 = vld [vmem:[%s9209_s7 + $0x684] sm:$0xf] }
  0xe4   :  { %v893_v47 = vld [vmem:[%s9209_s7 + $0x694] sm:$0xf]  ;;  %890 = vst [vmem:[#allocation8 + $0x684] sm:$0xf] %v889_v45  ;;  %892 = vst [vmem:[#allocation8 + $0x688] sm:$0xf] %v891_v46 }
  0xe5   :  { %894 = vst [vmem:[#allocation8 + $0x68c] sm:$0xf] %v893_v47  ;;  %v895_v48 = vld [vmem:[%s9209_s7 + $0x688] sm:$0xf]  ;;  %v897_v49 = vld [vmem:[%s9209_s7 + $0x698] sm:$0xf] }
  0xe6   :  { %v899_v50 = vld [vmem:[%s9209_s7 + $0x68c] sm:$0xf]  ;;  %896 = vst [vmem:[#allocation8 + $0x690] sm:$0xf] %v895_v48  ;;  %898 = vst [vmem:[#allocation8 + $0x694] sm:$0xf] %v897_v49 }
  0xe7   :  { %900 = vst [vmem:[#allocation8 + $0x698] sm:$0xf] %v899_v50  ;;  %v905_v52 = vld [vmem:[%s9209_s7 + $0x6b0] sm:$0xf]  ;;  %v907_v53 = vld [vmem:[%s9209_s7 + $0x6a4] sm:$0xf] }
  0xe8   :  { %902 = vst [vmem:[#allocation8 + $0x69c] sm:$0xff] %v901_v51   ;;  %906 = vst [vmem:[#allocation8 + $0x6a4] sm:$0xf] %v905_v52  ;;  %v909_v54 = vld [vmem:[%s9209_s7 + $0x6b4] sm:$0xf]  ;;  %v917_v58 = vld [vmem:[%s9209_s7 + $0x6bc] sm:$0xff]  }
  0xe9   :  { %908 = vst [vmem:[#allocation8 + $0x6a8] sm:$0xf] %v907_v53  ;;  %v911_v55 = vld [vmem:[%s9209_s7 + $0x6a8] sm:$0xf]  ;;  %v913_v56 = vld [vmem:[%s9209_s7 + $0x6b8] sm:$0xf] }
  0xea   :  { %910 = vst [vmem:[#allocation8 + $0x6ac] sm:$0xf] %v909_v54  ;;  %912 = vst [vmem:[#allocation8 + $0x6b0] sm:$0xf] %v911_v55  ;;  %v915_v57 = vld [vmem:[%s9209_s7 + $0x6ac] sm:$0xf] }
  0xeb   :  { %914 = vst [vmem:[#allocation8 + $0x6b4] sm:$0xf] %v913_v56  ;;  %v921_v59 = vld [vmem:[%s9209_s7 + $0x6d0] sm:$0xf]  ;;  %916 = vst [vmem:[#allocation8 + $0x6b8] sm:$0xf] %v915_v57 }
  0xec   :  { %918 = vst [vmem:[#allocation8 + $0x6bc] sm:$0xff] %v917_v58   ;;  %922 = vst [vmem:[#allocation8 + $0x6c4] sm:$0xf] %v921_v59  ;;  %v923_v60 = vld [vmem:[%s9209_s7 + $0x6c4] sm:$0xf]  ;;  %v933_v1 = vld [vmem:[%s9209_s7 + $0x6dc] sm:$0xff]  }
  0xed   :  { %v925_v61 = vld [vmem:[%s9209_s7 + $0x6d4] sm:$0xf]  ;;  %v927_v62 = vld [vmem:[%s9209_s7 + $0x6c8] sm:$0xf]  ;;  %924 = vst [vmem:[#allocation8 + $0x6c8] sm:$0xf] %v923_v60 }
  0xee   :  { %926 = vst [vmem:[#allocation8 + $0x6cc] sm:$0xf] %v925_v61  ;;  %928 = vst [vmem:[#allocation8 + $0x6d0] sm:$0xf] %v927_v62  ;;  %v929_v63 = vld [vmem:[%s9209_s7 + $0x6d8] sm:$0xf] }
  0xef   :  { %v931_v0 = vld [vmem:[%s9209_s7 + $0x6cc] sm:$0xf]  ;;  %930 = vst [vmem:[#allocation8 + $0x6d4] sm:$0xf] %v929_v63  ;;  %934 = vst [vmem:[#allocation8 + $0x6dc] sm:$0xff] %v933_v1   ;;  %v949_v8 = vld [vmem:[%s9209_s7 + $0x6fc] sm:$0xff]  }
  0xf0   :  { %932 = vst [vmem:[#allocation8 + $0x6d8] sm:$0xf] %v931_v0  ;;  %v937_v2 = vld [vmem:[%s9209_s7 + $0x6f0] sm:$0xf]  ;;  %v939_v3 = vld [vmem:[%s9209_s7 + $0x6e4] sm:$0xf] }
  0xf1   :  { %v941_v4 = vld [vmem:[%s9209_s7 + $0x6f4] sm:$0xf]  ;;  %938 = vst [vmem:[#allocation8 + $0x6e4] sm:$0xf] %v937_v2  ;;  %940 = vst [vmem:[#allocation8 + $0x6e8] sm:$0xf] %v939_v3 }
  0xf2   :  { %942 = vst [vmem:[#allocation8 + $0x6ec] sm:$0xf] %v941_v4  ;;  %v943_v5 = vld [vmem:[%s9209_s7 + $0x6e8] sm:$0xf]  ;;  %v945_v6 = vld [vmem:[%s9209_s7 + $0x6f8] sm:$0xf] }
  0xf3   :  { %v947_v7 = vld [vmem:[%s9209_s7 + $0x6ec] sm:$0xf]  ;;  %944 = vst [vmem:[#allocation8 + $0x6f0] sm:$0xf] %v943_v5  ;;  %946 = vst [vmem:[#allocation8 + $0x6f4] sm:$0xf] %v945_v6 }
  0xf4   :  { %948 = vst [vmem:[#allocation8 + $0x6f8] sm:$0xf] %v947_v7  ;;  %v953_v9 = vld [vmem:[%s9209_s7 + $0x710] sm:$0xf]  ;;  %v955_v10 = vld [vmem:[%s9209_s7 + $0x704] sm:$0xf] }
  0xf5   :  { %950 = vst [vmem:[#allocation8 + $0x6fc] sm:$0xff] %v949_v8   ;;  %954 = vst [vmem:[#allocation8 + $0x704] sm:$0xf] %v953_v9  ;;  %v957_v11 = vld [vmem:[%s9209_s7 + $0x714] sm:$0xf]  ;;  %v965_v15 = vld [vmem:[%s9209_s7 + $0x71c] sm:$0xff]  }
  0xf6   :  { %956 = vst [vmem:[#allocation8 + $0x708] sm:$0xf] %v955_v10  ;;  %v959_v12 = vld [vmem:[%s9209_s7 + $0x708] sm:$0xf]  ;;  %v961_v13 = vld [vmem:[%s9209_s7 + $0x718] sm:$0xf] }
  0xf7   :  { %958 = vst [vmem:[#allocation8 + $0x70c] sm:$0xf] %v957_v11  ;;  %960 = vst [vmem:[#allocation8 + $0x710] sm:$0xf] %v959_v12  ;;  %v963_v14 = vld [vmem:[%s9209_s7 + $0x70c] sm:$0xf] }
  0xf8   :  { %962 = vst [vmem:[#allocation8 + $0x714] sm:$0xf] %v961_v13  ;;  %v969_v16 = vld [vmem:[%s9209_s7 + $0x730] sm:$0xf]  ;;  %964 = vst [vmem:[#allocation8 + $0x718] sm:$0xf] %v963_v14 }
  0xf9   :  { %966 = vst [vmem:[#allocation8 + $0x71c] sm:$0xff] %v965_v15   ;;  %970 = vst [vmem:[#allocation8 + $0x724] sm:$0xf] %v969_v16  ;;  %v971_v17 = vld [vmem:[%s9209_s7 + $0x724] sm:$0xf]  ;;  %v981_v22 = vld [vmem:[%s9209_s7 + $0x73c] sm:$0xff]  }
  0xfa   :  { %v973_v18 = vld [vmem:[%s9209_s7 + $0x734] sm:$0xf]  ;;  %v975_v19 = vld [vmem:[%s9209_s7 + $0x728] sm:$0xf]  ;;  %972 = vst [vmem:[#allocation8 + $0x728] sm:$0xf] %v971_v17 }
  0xfb   :  { %974 = vst [vmem:[#allocation8 + $0x72c] sm:$0xf] %v973_v18  ;;  %976 = vst [vmem:[#allocation8 + $0x730] sm:$0xf] %v975_v19  ;;  %v977_v20 = vld [vmem:[%s9209_s7 + $0x738] sm:$0xf] }
  0xfc   :  { %v979_v21 = vld [vmem:[%s9209_s7 + $0x72c] sm:$0xf]  ;;  %978 = vst [vmem:[#allocation8 + $0x734] sm:$0xf] %v977_v20  ;;  %982 = vst [vmem:[#allocation8 + $0x73c] sm:$0xff] %v981_v22   ;;  %v997_v29 = vld [vmem:[%s9209_s7 + $0x75c] sm:$0xff]  }
  0xfd   :  { %980 = vst [vmem:[#allocation8 + $0x738] sm:$0xf] %v979_v21  ;;  %v985_v23 = vld [vmem:[%s9209_s7 + $0x750] sm:$0xf]  ;;  %v987_v24 = vld [vmem:[%s9209_s7 + $0x744] sm:$0xf] }
  0xfe   :  { %v989_v25 = vld [vmem:[%s9209_s7 + $0x754] sm:$0xf]  ;;  %986 = vst [vmem:[#allocation8 + $0x744] sm:$0xf] %v985_v23  ;;  %988 = vst [vmem:[#allocation8 + $0x748] sm:$0xf] %v987_v24 }
  0xff   :  { %990 = vst [vmem:[#allocation8 + $0x74c] sm:$0xf] %v989_v25  ;;  %v991_v26 = vld [vmem:[%s9209_s7 + $0x748] sm:$0xf]  ;;  %v993_v27 = vld [vmem:[%s9209_s7 + $0x758] sm:$0xf] }
 0x100   :  { %v995_v28 = vld [vmem:[%s9209_s7 + $0x74c] sm:$0xf]  ;;  %992 = vst [vmem:[#allocation8 + $0x750] sm:$0xf] %v991_v26  ;;  %994 = vst [vmem:[#allocation8 + $0x754] sm:$0xf] %v993_v27 }
 0x101   :  { %996 = vst [vmem:[#allocation8 + $0x758] sm:$0xf] %v995_v28  ;;  %v1001_v30 = vld [vmem:[%s9209_s7 + $0x770] sm:$0xf]  ;;  %v1003_v31 = vld [vmem:[%s9209_s7 + $0x764] sm:$0xf] }
 0x102   :  { %998 = vst [vmem:[#allocation8 + $0x75c] sm:$0xff] %v997_v29   ;;  %1002 = vst [vmem:[#allocation8 + $0x764] sm:$0xf] %v1001_v30  ;;  %v1005_v32 = vld [vmem:[%s9209_s7 + $0x774] sm:$0xf] }
 0x103   :  { %1004 = vst [vmem:[#allocation8 + $0x768] sm:$0xf] %v1003_v31  ;;  %v1007_v33 = vld [vmem:[%s9209_s7 + $0x768] sm:$0xf]  ;;  %v1009_v34 = vld [vmem:[%s9209_s7 + $0x778] sm:$0xf] }
 0x104   :  { %1006 = vst [vmem:[#allocation8 + $0x76c] sm:$0xf] %v1005_v32  ;;  %1008 = vst [vmem:[#allocation8 + $0x770] sm:$0xf] %v1007_v33  ;;  %v1011_v35 = vld [vmem:[%s9209_s7 + $0x76c] sm:$0xf] }
 0x105   :  { %1010 = vst [vmem:[#allocation8 + $0x774] sm:$0xf] %v1009_v34  ;;  %v1013_v36 = vld [vmem:[%s9209_s7 + $0x77c] sm:$0xf]  ;;  %1012 = vst [vmem:[#allocation8 + $0x778] sm:$0xf] %v1011_v35 }
 0x106   :  { %1014 = vst [vmem:[#allocation8 + $0x77c] sm:$0xf] %v1013_v36 }
 0x107   :  { %2005 = vsyncadd [#allocation9], 30720  ;;  %v6582_v37 = vld [vmem:[%s9203_s1] sm:$0xff]   ;;  %v6776_v38 = vmov 0   ;;  %v6583_v39 = vld [vmem:[%s9203_s1 + $0x8] sm:$0xff]   ;;  %vm9218_vm0 = vcmask 261120  }
 0x108   :  { %2393 = vmatprep.subr.bf16.mxu0 %v6776_v38  ;;  %v6584_v40 = vld [vmem:[%s9203_s1 + $0x10] sm:$0xff]   ;;  %v6585_v41 = vld [vmem:[%s9203_s1 + $0x18] sm:$0xff]   ;;  %v6586_v42 = vld [vmem:[%s9203_s1 + $0x20] sm:$0xff]   ;;  %vm2680_vm1 = vcmask 258048   ;;  %s6778_s17 = smov 64   ;;  %vm2687_vm2 = vcmask 261125  }
 0x109   :  { %2394 = vmatpush1.bf16.msra.mxu0 %v6582_v37  ;;  %v6600_v43 = vld [vmem:[%s9202_s0 + $0x4] ss:$8 sps:$4 sm:$0xff]   ;;  %v6588_v45 = vld [vmem:[%s9203_s1 + $0x30] sm:$0xff]   ;;  %v6589_v46 = vld [vmem:[%s9203_s1 + $0x38] sm:$0xff]   ;;  %vm2689_vm3 = vcmask 254976   ;;  %s6779_s18 = smov 96  }
 0x10a   :  { %2395 = vmatprep.subr.bf16.mxu0 %v6776_v38  ;;  %v6587_v44 = vld [vmem:[%s9203_s1 + $0x28] sm:$0xff]   ;;  %2425 = vmatprep.mubr.bf16.mxu0 %v6600_v43  ;;  %v6590_v47 = vld [vmem:[%s9203_s1 + $0x40] sm:$0xff]   ;;  %v6592_v49 = vld [vmem:[%s9203_s1 + $0x50] sm:$0xff]   ;;  %vm2696_vm4 = vcmask 260098   ;;  %vm2703_vm5 = vcmask 261127   ;;  %vm2705_vm6 = vcmask 257024  }
 0x10b   :  { %v6591_v48 = vld [vmem:[%s9203_s1 + $0x48] sm:$0xff]   ;;  %v6593_v50 = vld [vmem:[%s9203_s1 + $0x58] sm:$0xff]   ;;  %v6594_v51 = vld [vmem:[%s9203_s1 + $0x60] sm:$0xff]   ;;  %vm2712_vm7 = vcmask 261124   ;;  %vm2714_vm8 = vcmask 253952   ;;  %vm2721_vm9 = vcmask 259073  }
 0x10c   :  { %v6595_v52 = vld [vmem:[%s9203_s1 + $0x68] sm:$0xff]   ;;  %v6596_v53 = vld [vmem:[%s9203_s1 + $0x70] sm:$0xff]   ;;  %v6597_v54 = vld [vmem:[%s9203_s1 + $0x78] sm:$0xff]   ;;  %vm2728_vm10 = vcmask 261126   ;;  %vm2730_vm11 = vcmask 256000   ;;  %vm2737_vm12 = vcmask 261123  }
 0x10d   :  { %2396 = vmatpush1.bf16.msra.mxu0 %v6583_v39  ;;  %v6598_v55 = vld [vmem:[%s9202_s0] ss:$8 sps:$4 sm:$0xff]   ;;  %v6601_v56 = vld [vmem:[%s9202_s0 + $0x14] ss:$8 sps:$4 sm:$0xff]   ;;  %v6603_v57 = vld [vmem:[%s9202_s0 + $0x10] ss:$8 sps:$4 sm:$0xff]  }
 0x10e   :  { %2397 = vmatprep.subr.bf16.mxu0 %v6776_v38  ;;  %v6604_v58 = vld [vmem:[%s9202_s0 + $0x24] ss:$8 sps:$4 sm:$0xff]   ;;  %v6606_v59 = vld [vmem:[%s9202_s0 + $0x20] ss:$8 sps:$4 sm:$0xff]   ;;  %v6607_v60 = vld [vmem:[%s9202_s0 + $0x34] ss:$8 sps:$4 sm:$0xff]  }
 0x10f   :  { %v6609_v61 = vld [vmem:[%s9202_s0 + $0x30] ss:$8 sps:$4 sm:$0xff]   ;;  %v6610_v62 = vld [vmem:[%s9202_s0 + $0x44] ss:$8 sps:$4 sm:$0xff]   ;;  %v6612_v63 = vld [vmem:[%s9202_s0 + $0x40] ss:$8 sps:$4 sm:$0xff]  }
 0x110   :  { %v6613_v0 = vld [vmem:[%s9202_s0 + $0x54] ss:$8 sps:$4 sm:$0xff]   ;;  %v6615_v1 = vld [vmem:[%s9202_s0 + $0x50] ss:$8 sps:$4 sm:$0xff]   ;;  %v6616_v2 = vld [vmem:[%s9202_s0 + $0x64] ss:$8 sps:$4 sm:$0xff]  }
 0x111   :  { %2398 = vmatpush1.bf16.msra.mxu0 %v6584_v40  ;;  %v6618_v3 = vld [vmem:[%s9202_s0 + $0x60] ss:$8 sps:$4 sm:$0xff]   ;;  %v6619_v4 = vld [vmem:[%s9202_s0 + $0x74] ss:$8 sps:$4 sm:$0xff]   ;;  %v6621_v5 = vld [vmem:[%s9202_s0 + $0x70] ss:$8 sps:$4 sm:$0xff]  }
 0x112   :  { %2399 = vmatprep.subr.bf16.mxu0 %v6776_v38  ;;  %v6622_v6 = vld [vmem:[%s9202_s0 + $0x84] ss:$8 sps:$4 sm:$0xff]   ;;  %v6624_v7 = vld [vmem:[%s9202_s0 + $0x80] ss:$8 sps:$4 sm:$0xff]   ;;  %v6625_v8 = vld [vmem:[%s9202_s0 + $0x94] ss:$8 sps:$4 sm:$0xff]  }
 0x113   :  { %v6627_v9 = vld [vmem:[%s9202_s0 + $0x90] ss:$8 sps:$4 sm:$0xff]   ;;  %v6628_v10 = vld [vmem:[%s9202_s0 + $0xa4] ss:$8 sps:$4 sm:$0xff]   ;;  %v6630_v11 = vld [vmem:[%s9202_s0 + $0xa0] ss:$8 sps:$4 sm:$0xff]  }
 0x114   :  { %v6631_v12 = vld [vmem:[%s9202_s0 + $0xb4] ss:$8 sps:$4 sm:$0xff]   ;;  %v6633_v13 = vld [vmem:[%s9202_s0 + $0xb0] ss:$8 sps:$4 sm:$0xff]   ;;  %v6634_v14 = vld [vmem:[%s9202_s0 + $0xc4] ss:$8 sps:$4 sm:$0xff]  }
 0x115   :  { %2400 = vmatpush1.bf16.msra.mxu0 %v6585_v41  ;;  %v6636_v15 = vld [vmem:[%s9202_s0 + $0xc0] ss:$8 sps:$4 sm:$0xff]   ;;  %v6637_v16 = vld [vmem:[%s9202_s0 + $0xd4] ss:$8 sps:$4 sm:$0xff]   ;;  %v6639_v17 = vld [vmem:[%s9202_s0 + $0xd0] ss:$8 sps:$4 sm:$0xff]  }
 0x116   :  { %2401 = vmatprep.subr.bf16.mxu0 %v6776_v38  ;;  %v6640_v18 = vld [vmem:[%s9202_s0 + $0xe4] ss:$8 sps:$4 sm:$0xff]   ;;  %v6642_v19 = vld [vmem:[%s9202_s0 + $0xe0] ss:$8 sps:$4 sm:$0xff]   ;;  %v6643_v20 = vld [vmem:[%s9202_s0 + $0xf4] ss:$8 sps:$4 sm:$0xff]  }
 0x117   :  { %v6645_v21 = vld [vmem:[%s9202_s0 + $0xf0] ss:$8 sps:$4 sm:$0xff]   ;;  %v6646_v22 = vld [vmem:[%s9202_s0 + $0x104] ss:$8 sps:$4 sm:$0xff]   ;;  %v6648_v23 = vld [vmem:[%s9202_s0 + $0x100] ss:$8 sps:$4 sm:$0xff]  }
 0x118   :  { %v6649_v24 = vld [vmem:[%s9202_s0 + $0x114] ss:$8 sps:$4 sm:$0xff]   ;;  %v6651_v25 = vld [vmem:[%s9202_s0 + $0x110] ss:$8 sps:$4 sm:$0xff]   ;;  %v6652_v26 = vld [vmem:[%s9202_s0 + $0x124] ss:$8 sps:$4 sm:$0xff]  }
 0x119   :  { %2402 = vmatpush1.bf16.msra.mxu0 %v6586_v42  ;;  %v6654_v27 = vld [vmem:[%s9202_s0 + $0x120] ss:$8 sps:$4 sm:$0xff]   ;;  %v6655_v28 = vld [vmem:[%s9202_s0 + $0x134] ss:$8 sps:$4 sm:$0xff]   ;;  %v6657_v29 = vld [vmem:[%s9202_s0 + $0x130] ss:$8 sps:$4 sm:$0xff]  }
 0x11a   :  { %2403 = vmatprep.subr.bf16.mxu0 %v6776_v38  ;;  %v6658_v30 = vld [vmem:[%s9202_s0 + $0x144] ss:$8 sps:$4 sm:$0xff]   ;;  %v6660_v31 = vld [vmem:[%s9202_s0 + $0x140] ss:$8 sps:$4 sm:$0xff]   ;;  %s6777_s0 = smov 32   ;;  %vm2781_vm13 = vcmask 520448  }
 0x11b   :  { %v8284_v32 = vld [vmem:[%s9204_s2] ss:$0 sm:$0xff]  ;;  %vm2910_vm14 = vcmask 782848   ;;  %vm2790_vm15 = vcmask 523525  }
 0x11d   :  { %2404 = vmatpush1.bf16.msra.mxu0 %v6587_v44 }
 0x11e   :  { %2405 = vmatprep.subr.bf16.mxu0 %v6776_v38 }
 0x121   :  { %2406 = vmatpush1.bf16.msra.mxu0 %v6588_v45 }
 0x122   :  { %2407 = vmatprep.subr.bf16.mxu0 %v6776_v38 }
 0x125   :  { %2408 = vmatpush1.bf16.msra.mxu0 %v6589_v46 }
 0x126   :  { %2409 = vmatprep.subr.bf16.mxu0 %v6776_v38 }
 0x129   :  { %2410 = vmatpush1.bf16.msra.mxu0 %v6590_v47 }
 0x12a   :  { %2411 = vmatprep.subr.bf16.mxu0 %v6776_v38 }
 0x12d   :  { %2412 = vmatpush1.bf16.msra.mxu0 %v6591_v48 }
 0x12e   :  { %2413 = vmatprep.subr.bf16.mxu0 %v6776_v38 }
 0x131   :  { %2414 = vmatpush1.bf16.msra.mxu0 %v6592_v49 }
 0x132   :  { %2415 = vmatprep.subr.bf16.mxu0 %v6776_v38 }
 0x135   :  { %2416 = vmatpush1.bf16.msra.mxu0 %v6593_v50 }
 0x136   :  { %2417 = vmatprep.subr.bf16.mxu0 %v6776_v38 }
 0x139   :  { %2418 = vmatpush1.bf16.msra.mxu0 %v6594_v51 }
 0x13a   :  { %2419 = vmatprep.subr.bf16.mxu0 %v6776_v38 }
 0x13d   :  { %2420 = vmatpush1.bf16.msra.mxu0 %v6595_v52 }
 0x13e   :  { %2421 = vmatprep.subr.bf16.mxu0 %v6776_v38 }
 0x141   :  { %2422 = vmatpush1.bf16.msra.mxu0 %v6596_v53 }
 0x142   :  { %2423 = vmatprep.subr.bf16.mxu0 %v6776_v38 }
 0x145   :  { %2424 = vmatpush1.bf16.msra.mxu0 %v6597_v54 }
 0x148   :  { %2426 = vmatmul.mubr.bf16.vlgmr.msra.gmra.mrb[0].mxu0 %v6598_v55 }
 0x149   :  { %2433 = vmatprep.mubr.bf16.mxu0 %v6601_v56 }
 0x150   :  { %2434 = vmatmul.mubr.bf16.gmra.mrb[4].mxu0 %v6603_v57 }
 0x151   :  { %2441 = vmatprep.mubr.bf16.mxu0 %v6604_v58 }
 0x158   :  { %2442 = vmatmul.mubr.bf16.gmra.mrb[8].mxu0 %v6606_v59 }
 0x159   :  { %2449 = vmatprep.mubr.bf16.mxu0 %v6607_v60 }
 0x160   :  { %2450 = vmatmul.mubr.bf16.gmra.mrb[12].mxu0 %v6609_v61 }
 0x161   :  { %2457 = vmatprep.mubr.bf16.mxu0 %v6610_v62 }
 0x168   :  { %2458 = vmatmul.mubr.bf16.gmra.mrb[16].mxu0 %v6612_v63 }
 0x169   :  { %2465 = vmatprep.mubr.bf16.mxu0 %v6613_v0 }
 0x170   :  { %2466 = vmatmul.mubr.bf16.gmra.mrb[20].mxu0 %v6615_v1 }
 0x171   :  { %2473 = vmatprep.mubr.bf16.mxu0 %v6616_v2 }
 0x178   :  { %2474 = vmatmul.mubr.bf16.gmra.mrb[24].mxu0 %v6618_v3 }
 0x179   :  { %2481 = vmatprep.mubr.bf16.mxu0 %v6619_v4 }
 0x180   :  { %2482 = vmatmul.mubr.bf16.gmra.mrb[28].mxu0 %v6621_v5 }
 0x181   :  { %2489 = vmatprep.mubr.bf16.mxu0 %v6622_v6 }
 0x188   :  { %2490 = vmatmul.mubr.bf16.gmra.mrb[32].mxu0 %v6624_v7 }
 0x189   :  { %2497 = vmatprep.mubr.bf16.mxu0 %v6625_v8 }
 0x190   :  { %2498 = vmatmul.mubr.bf16.gmra.mrb[36].mxu0 %v6627_v9 }
 0x191   :  { %2505 = vmatprep.mubr.bf16.mxu0 %v6628_v10 }
 0x198   :  { %2506 = vmatmul.mubr.bf16.gmra.mrb[40].mxu0 %v6630_v11 }
 0x199   :  { %2513 = vmatprep.mubr.bf16.mxu0 %v6631_v12 }
 0x1a0   :  { %2514 = vmatmul.mubr.bf16.gmra.mrb[44].mxu0 %v6633_v13 }
 0x1a1   :  { %2521 = vmatprep.mubr.bf16.mxu0 %v6634_v14 }
 0x1a8   :  { %2522 = vmatmul.mubr.bf16.gmra.mrb[48].mxu0 %v6636_v15 }
 0x1a9   :  { %2529 = vmatprep.mubr.bf16.mxu0 %v6637_v16 }
 0x1b0   :  { %2530 = vmatmul.mubr.bf16.gmra.mrb[52].mxu0 %v6639_v17 }
 0x1b1   :  { %2537 = vmatprep.mubr.bf16.mxu0 %v6640_v18 }
 0x1b8   :  { %2538 = vmatmul.mubr.bf16.gmra.mrb[56].mxu0 %v6642_v19 }
 0x1b9   :  { %2545 = vmatprep.mubr.bf16.mxu0 %v6643_v20 }
 0x1c0   :  { %2546 = vmatmul.mubr.bf16.gmra.mrb[60].mxu0 %v6645_v21 }
 0x1c1   :  { %2553 = vmatprep.mubr.bf16.mxu0 %v6646_v22 }
 0x1c8   :  { %2554 = vmatmul.mubr.bf16.gmra.mrb[64].mxu0 %v6648_v23 }
 0x1c9   :  { %2561 = vmatprep.mubr.bf16.mxu0 %v6649_v24 }
 0x1d0   :  { %2562 = vmatmul.mubr.bf16.gmra.mrb[68].mxu0 %v6651_v25 }
 0x1d1   :  { %2569 = vmatprep.mubr.bf16.mxu0 %v6652_v26 }
 0x1d8   :  { %2570 = vmatmul.mubr.bf16.gmra.mrb[72].mxu0 %v6654_v27 }
 0x1d9   :  { %2577 = vmatprep.mubr.bf16.mxu0 %v6655_v28 }
 0x1e0   :  { %2578 = vmatmul.mubr.bf16.gmra.mrb[76].mxu0 %v6657_v29 }
 0x1e1   :  { %2585 = vmatprep.mubr.bf16.mxu0 %v6658_v30 }
 0x1e8   :  { %2586 = vmatmul.mubr.bf16.gmra.mrb[80].mxu0 %v6660_v31 }
 0x21b   :  { %v2427_v33 = vpop.f32.mrb[0].mxu0 }
 0x21c   :  { %v2428_v34 = vadd.f32 %v8284_v32, %v2427_v33  ;;  %v2429_v35 = vpop.f32.mrb[1].mxu0 }
 0x21d   :  { %v2430_v36 = vpop.f32.mrb[2].mxu0  ;;  %v6661_v35 = vld [vmem:[%s9205_s3 + $0x40] sm:$0xff]  }
 0x21e   :  { %v2594_v37 = vmax.f32 %v2428_v34, 0.0  ;;  %v2431_v38 = vadd.f32 %v8284_v32, %v2430_v36  ;;  %v2432_v39 = vpop.f32.mrb[3].mxu0  ;;  %6351 = vmatprep.subr.bf16.mxu1 %v6661_v35 }
 0x220   :  { %2637 = vst.msk [vmem:[#allocation2] sm:$0xff] %vm9218_vm0, %v2594_v37  ;;  %v2595_v40 = vmax.f32 %v2431_v38, 0.0 }
 0x222   :  { %2638 = vst.msk [vmem:[#allocation2 + $0x8] sm:$0xff] %vm9218_vm0, %v2595_v40 }
 0x223   :  { %v2435_v41 = vpop.f32.mrb[4].mxu0 }
 0x224   :  { %v2436_v42 = vadd.f32 %v8284_v32, %v2435_v41  ;;  %v2437_v43 = vpop.f32.mrb[5].mxu0 }
 0x225   :  { %v2438_v44 = vpop.f32.mrb[6].mxu0 }
 0x226   :  { %v2596_v45 = vmax.f32 %v2436_v42, 0.0  ;;  %v2439_v46 = vadd.f32 %v8284_v32, %v2438_v44  ;;  %v2440_v47 = vpop.f32.mrb[7].mxu0 }
 0x227   :  { %v6662_v47 = vld [vmem:[%s9205_s3] sm:$0xff]  }
 0x228   :  { %2639 = vst.msk [vmem:[#allocation2 + $0x10] sm:$0xff] %vm9218_vm0, %v2596_v45  ;;  %v2597_v48 = vmax.f32 %v2439_v46, 0.0  ;;  %6352 = vmatpush3.bf16.msra.mxu1 %v6662_v47 }
 0x229   :  { %v2776_v49 = vld [vmem:[#allocation2 + $0x1] ss:$2 sm:$0x1f]  ;;  %v2679_v50 = vld [vmem:[#allocation2] ss:$2 sm:$0x1f] }
 0x22a   :  { %2640 = vst.msk [vmem:[#allocation2 + $0x18] sm:$0xff] %vm9218_vm0, %v2597_v48  ;;  %2778 = vrot.lane.b32.xlu0 %v2776_v49, %s6777_s0  ;;  %v2905_v55 = vld [vmem:[#allocation2 + $0x2] ss:$2 sm:$0x1f] }
 0x22b   :  { %v2443_v51 = vpop.f32.mrb[8].mxu0  ;;  %2681 = vst.msk [vmem:[#allocation3] sm:$0x1f] %vm2680_vm1, %v2679_v50  ;;  %v6663_v48 = vld [vmem:[%s9205_s3 + $0x48] sm:$0xff]  }
 0x22c   :  { %v2444_v52 = vadd.f32 %v8284_v32, %v2443_v51  ;;  %v2445_v53 = vpop.f32.mrb[9].mxu0  ;;  %6353 = vmatprep.subr.bf16.mxu1 %v6663_v48 }
 0x22d   :  { %v2446_v54 = vpop.f32.mrb[10].mxu0  ;;  %v6664_v53 = vld [vmem:[%s9205_s3 + $0x8] sm:$0xff]  }
 0x22e   :  { %v2598_v56 = vmax.f32 %v2444_v52, 0.0  ;;  %v2447_v57 = vadd.f32 %v8284_v32, %v2446_v54  ;;  %v2448_v58 = vpop.f32.mrb[11].mxu0  ;;  %2907 = vrot.lane.b32.xlu0 %v2905_v55, %s6778_s17  ;;  %6354 = vmatpush3.bf16.msra.mxu1 %v6664_v53 }
 0x22f   :  { %v3163_v60 = vld [vmem:[#allocation2 + $0xc] ss:$2 sm:$0x1f]  ;;  %v3248_v61 = vld [vmem:[#allocation2 + $0xd] ss:$2 sm:$0x1f] }
 0x230   :  { %2641 = vst.msk [vmem:[#allocation2 + $0x20] sm:$0xff] %vm9218_vm0, %v2598_v56  ;;  %v2599_v59 = vmax.f32 %v2447_v57, 0.0  ;;  %v3034_v6 = vld [vmem:[#allocation2 + $0xb] ss:$2 sm:$0x1f] }
 0x231   :  { %v2784_v62 = vld [vmem:[#allocation2 + $0x17] ss:$2 sm:$0x1f]  ;;  %3164 = vst.msk [vmem:[#allocation3 + $0x8] sm:$0x1f] %vm2680_vm1, %v3163_v60 }
 0x232   :  { %2642 = vst.msk [vmem:[#allocation2 + $0x28] sm:$0xff] %vm9218_vm0, %v2599_v59  ;;  %3250 = vrot.lane.b32.xlu0 %v3248_v61, %s6777_s0  ;;  %v2786_v63 = vrot.slane %v2784_v62, 3  ;;  %v2683_v1 = vld [vmem:[#allocation2 + $0x16] ss:$2 sm:$0x1f] }
 0x233   :  { %v2451_v0 = vpop.f32.mrb[12].mxu0  ;;  %v2685_v4 = vrot.slane %v2683_v1, 3  ;;  %v3364_v14 = vld [vmem:[#allocation2 + $0x16] ss:$2 sm:$0x1f] }
 0x234   :  { %v2452_v2 = vadd.f32 %v8284_v32, %v2451_v0  ;;  %v2453_v3 = vpop.f32.mrb[13].mxu0  ;;  %2787 = vrot.lane.b32.xlu1 %v2786_v63, %s6777_s0  ;;  %v3469_v22 = vld [vmem:[#allocation2 + $0x17] ss:$2 sm:$0x1f] }
 0x235   :  { %v2454_v5 = vpop.f32.mrb[14].mxu0  ;;  %2688 = vst.msk [vmem:[#allocation3] sm:$0xe0] %vm2687_vm2, %v2685_v4  ;;  %v6665_v60 = vld [vmem:[%s9205_s3 + $0x50] sm:$0xff]  }
 0x236   :  { %v2600_v7 = vmax.f32 %v2452_v2, 0.0  ;;  %v2455_v8 = vadd.f32 %v8284_v32, %v2454_v5  ;;  %v2456_v9 = vpop.f32.mrb[15].mxu0  ;;  %3036 = vrot.lane.b32.xlu0 %v3034_v6, %s6779_s18  ;;  %2690 = vst.msk [vmem:[#allocation3 + $0x18] sm:$0x3] %vm2689_vm3, %v2685_v4  ;;  %v6666_v2 = vld [vmem:[%s9205_s3 + $0x10] sm:$0xff]   ;;  %6355 = vmatprep.subr.bf16.mxu1 %v6665_v60 }
 0x237   :  { %v2913_v10 = vld [vmem:[#allocation2 + $0x18] ss:$2 sm:$0x1f]  ;;  %6356 = vmatpush3.bf16.msra.mxu1 %v6666_v2 }
 0x238   :  { %v3574_v11 = vld [vmem:[#allocation2 + $0x18] ss:$2 sm:$0x1f]  ;;  %2643 = vst.msk [vmem:[#allocation2 + $0x30] sm:$0xff] %vm9218_vm0, %v2600_v7  ;;  %v2601_v12 = vmax.f32 %v2455_v8, 0.0  ;;  %v2915_v13 = vrot.slane %v2913_v10, 3 }
 0x239   :  { %3575 = vst.msk [vmem:[#allocation3 + $0x10] sm:$0x1f] %vm2680_vm1, %v3574_v11  ;;  %v3042_v15 = vld [vmem:[#allocation2 + $0x21] ss:$2 sm:$0x1f]  ;;  %v6667_v7 = vld [vmem:[%s9205_s3 + $0x58] sm:$0xff]  }
 0x23a   :  { %2644 = vst.msk [vmem:[#allocation2 + $0x38] sm:$0xff] %vm9218_vm0, %v2601_v12  ;;  %2916 = vrot.lane.b32.xlu1 %v2915_v13, %s6778_s17  ;;  %3366 = vrot.lane.b32.xlu0 %v3364_v14, %s6778_s17  ;;  %v3166_v16 = vld [vmem:[#allocation2 + $0x22] ss:$2 sm:$0x1f]  ;;  %v3044_v21 = vrot.slane %v3042_v15, 3 }
 0x23b   :  { %v2459_v17 = vpop.f32.mrb[16].mxu0  ;;  %v3168_v18 = vrot.slane %v3166_v16, 3  ;;  %v3255_v24 = vld [vmem:[#allocation2 + $0x23] ss:$2 sm:$0x1f]  ;;  %6357 = vmatprep.subr.bf16.mxu1 %v6667_v7 }
 0x23c   :  { %v2460_v19 = vadd.f32 %v8284_v32, %v2459_v17  ;;  %v2461_v20 = vpop.f32.mrb[17].mxu0  ;;  %v3257_v31 = vrot.slane %v3255_v24, 3  ;;  %v6668_v17 = vld [vmem:[%s9205_s3 + $0x18] sm:$0xff]  }
 0x23d   :  { %v2462_v23 = vpop.f32.mrb[18].mxu0  ;;  %3170 = vst.msk [vmem:[#allocation3 + $0x8] sm:$0xe0] %vm2687_vm2, %v3168_v18  ;;  %6358 = vmatpush3.bf16.msra.mxu1 %v6668_v17 }
 0x23e   :  { %3171 = vst.msk [vmem:[#allocation3 + $0x20] sm:$0x3] %vm2689_vm3, %v3168_v18  ;;  %v2602_v25 = vmax.f32 %v2460_v19, 0.0  ;;  %v2463_v26 = vadd.f32 %v8284_v32, %v2462_v23  ;;  %v2464_v27 = vpop.f32.mrb[19].mxu0  ;;  %3045 = vrot.lane.b32.xlu1 %v3044_v21, %s6779_s18  ;;  %3471 = vrot.lane.b32.xlu0 %v3469_v22, %s6779_s18  ;;  %v6669_v21 = vld [vmem:[%s9205_s3 + $0x60] sm:$0xff]  }
 0x23f   :  { %v3370_v28 = vld [vmem:[#allocation2 + $0x2c] ss:$2 sm:$0x1f]  ;;  %v3475_v33 = vld [vmem:[#allocation2 + $0x2d] ss:$2 sm:$0x1f]  ;;  %6359 = vmatprep.subr.bf16.mxu1 %v6669_v21 }
 0x240   :  { %2645 = vst.msk [vmem:[#allocation2 + $0x40] sm:$0xff] %vm9218_vm0, %v2602_v25  ;;  %v2603_v29 = vmax.f32 %v2463_v26, 0.0  ;;  %v3372_v30 = vrot.slane %v3370_v28, 3  ;;  %v2795_v34 = vld [vmem:[#allocation2 + $0x2d] ss:$2 sm:$0x1f] }
 0x241   :  { %v3477_v37 = vrot.slane %v3475_v33, 3  ;;  %v2924_v38 = vld [vmem:[#allocation2 + $0x2e] ss:$2 sm:$0x1f]  ;;  %v2797_v42 = vrot.slane %v2795_v34, 6  ;;  %v6670_v25 = vld [vmem:[%s9205_s3 + $0x20] sm:$0xff]  }
 0x242   :  { %2646 = vst.msk [vmem:[#allocation2 + $0x48] sm:$0xff] %vm9218_vm0, %v2603_v29  ;;  %3373 = vrot.lane.b32.xlu1 %v3372_v30, %s6778_s17  ;;  %3258 = vrot.lane.b32.xlu0 %v3257_v31, %s6777_s0  ;;  %v3576_v39 = vld [vmem:[#allocation2 + $0x2e] ss:$2 sm:$0x1f]  ;;  %v2926_v58 = vrot.slane %v2924_v38, 6 }
 0x243   :  { %v2467_v36 = vpop.f32.mrb[20].mxu0  ;;  %v3578_v43 = vrot.slane %v3576_v39, 3  ;;  %v2692_v44 = vld [vmem:[#allocation2 + $0x2c] ss:$2 sm:$0x1f]  ;;  %6360 = vmatpush3.bf16.msra.mxu1 %v6670_v25 }
 0x244   :  { %v2468_v40 = vadd.f32 %v8284_v32, %v2467_v36  ;;  %v2469_v41 = vpop.f32.mrb[21].mxu0  ;;  %v2694_v46 = vrot.slane %v2692_v44, 6  ;;  %v3053_v52 = vld [vmem:[#allocation2 + $0x37] ss:$2 sm:$0x1f]  ;;  %v6671_v30 = vld [vmem:[%s9205_s3 + $0x68] sm:$0xff]  }
 0x245   :  { %v2470_v45 = vpop.f32.mrb[22].mxu0  ;;  %3580 = vst.msk [vmem:[#allocation3 + $0x10] sm:$0xe0] %vm2687_vm2, %v3578_v43  ;;  %v3055_v0 = vrot.slane %v3053_v52, 6  ;;  %6361 = vmatprep.subr.bf16.mxu1 %v6671_v30 }
 0x246   :  { %v2604_v49 = vmax.f32 %v2468_v40, 0.0  ;;  %v2471_v50 = vadd.f32 %v8284_v32, %v2470_v45  ;;  %3478 = vrot.lane.b32.xlu1 %v3477_v37, %s6779_s18  ;;  %2798 = vrot.lane.b32.xlu0 %v2797_v42, %s6777_s0  ;;  %v2472_v51 = vpop.f32.mrb[23].mxu0  ;;  %3581 = vst.msk [vmem:[#allocation3 + $0x28] sm:$0x3] %vm2689_vm3, %v3578_v43  ;;  %v6672_v37 = vld [vmem:[%s9205_s3 + $0x28] sm:$0xff]   ;;  %v6673_v40 = vld [vmem:[%s9205_s3 + $0x70] sm:$0xff]  }
 0x247   :  { %v3264_v54 = vld [vmem:[#allocation2 + $0x39] ss:$2 sm:$0x1f]  ;;  %2697 = vst.msk [vmem:[#allocation3 + $0x18] sm:$0x7c] %vm2696_vm4, %v2694_v46  ;;  %6362 = vmatpush3.bf16.msra.mxu1 %v6672_v37  ;;  %v6674_v46 = vld [vmem:[%s9205_s3 + $0x30] sm:$0xff]  }
 0x248   :  { %v3173_v55 = vld [vmem:[#allocation2 + $0x38] ss:$2 sm:$0x1f]  ;;  %2647 = vst.msk [vmem:[#allocation2 + $0x50] sm:$0xff] %vm9218_vm0, %v2604_v49  ;;  %v2605_v56 = vmax.f32 %v2471_v50, 0.0  ;;  %v3266_v57 = vrot.slane %v3264_v54, 6  ;;  %6363 = vmatprep.subr.bf16.mxu1 %v6673_v40 }
 0x249   :  { %v3175_v59 = vrot.slane %v3173_v55, 6  ;;  %v2804_v61 = vld [vmem:[#allocation2 + $0x43] ss:$2 sm:$0x1f]  ;;  %v6675_v51 = vld [vmem:[%s9205_s3 + $0x78] sm:$0xff]  }
 0x24a   :  { %2648 = vst.msk [vmem:[#allocation2 + $0x58] sm:$0xff] %vm9218_vm0, %v2605_v56  ;;  %3267 = vrot.lane.b32.xlu1 %v3266_v57, %s6777_s0  ;;  %2927 = vrot.lane.b32.xlu0 %v2926_v58, %s6778_s17  ;;  %v2933_v62 = vld [vmem:[#allocation2 + $0x44] ss:$2 sm:$0x1f]  ;;  %v2806_v5 = vrot.slane %v2804_v61, 1 }
 0x24b   :  { %3177 = vst.msk [vmem:[#allocation3 + $0x20] sm:$0x7c] %vm2696_vm4, %v3175_v59  ;;  %v2475_v63 = vpop.f32.mrb[24].mxu0  ;;  %v3378_v1 = vld [vmem:[#allocation2 + $0x42] ss:$2 sm:$0x1f]  ;;  %6364 = vmatpush3.bf16.msra.mxu1 %v6674_v46 }
 0x24c   :  { %v2476_v3 = vadd.f32 %v8284_v32, %v2475_v63  ;;  %v2477_v4 = vpop.f32.mrb[25].mxu0  ;;  %v3582_v6 = vld [vmem:[#allocation2 + $0x44] ss:$2 sm:$0x1f]  ;;  %v2935_v15 = vrot.slane %v2933_v62, 1  ;;  %v3380_v19 = vrot.slane %v3378_v1, 6  ;;  %6365 = vmatprep.subr.bf16.mxu1 %v6675_v51 }
 0x24d   :  { %v2478_v8 = vpop.f32.mrb[26].mxu0  ;;  %v3584_v9 = vrot.slane %v3582_v6, 6  ;;  %v2699_v10 = vld [vmem:[#allocation2 + $0x42] ss:$2 sm:$0x1f]  ;;  %v6676_v4 = vld [vmem:[%s9205_s3 + $0x38] sm:$0xff]  }
 0x24e   :  { %v2606_v11 = vmax.f32 %v2476_v3, 0.0  ;;  %v2479_v12 = vadd.f32 %v8284_v32, %v2478_v8  ;;  %2807 = vrot.lane.b32.xlu1 %v2806_v5, %s6777_s0  ;;  %3056 = vrot.lane.b32.xlu0 %v3055_v0, %s6779_s18  ;;  %v2480_v13 = vpop.f32.mrb[27].mxu0  ;;  %v2701_v14 = vrot.slane %v2699_v10, 1  ;;  %v3483_v16 = vld [vmem:[#allocation2 + $0x43] ss:$2 sm:$0x1f] }
 0x24f   :  { %3586 = vst.msk [vmem:[#allocation3 + $0x28] sm:$0x7c] %vm2696_vm4, %v3584_v9  ;;  %v3179_v20 = vld [vmem:[#allocation2 + $0x4e] ss:$2 sm:$0x1f]  ;;  %v3485_v29 = vrot.slane %v3483_v16, 6  ;;  %6366 = vmatpush3.bf16.msra.mxu1 %v6676_v4 }
 0x250   :  { %2649 = vst.msk [vmem:[#allocation2 + $0x60] sm:$0xff] %vm9218_vm0, %v2606_v11  ;;  %v2607_v18 = vmax.f32 %v2479_v12, 0.0  ;;  %v3272_v22 = vld [vmem:[#allocation2 + $0x4f] ss:$2 sm:$0x1f]  ;;  %v3181_v23 = vrot.slane %v3179_v20, 1 }
 0x251   :  { %2704 = vst.msk [vmem:[#allocation3 + $0x18] sm:$0x80] %vm2703_vm5, %v2701_v14  ;;  %v3274_v28 = vrot.slane %v3272_v22, 1  ;;  %v3062_v33 = vld [vmem:[#allocation2 + $0x4d] ss:$2 sm:$0x1f] }
 0x252   :  { %2706 = vst.msk [vmem:[#allocation3 + $0x30] sm:$0xf] %vm2705_vm6, %v2701_v14  ;;  %2936 = vrot.lane.b32.xlu1 %v2935_v15, %s6778_s17  ;;  %3381 = vrot.lane.b32.xlu0 %v3380_v19, %s6778_s17  ;;  %3184 = vst.msk [vmem:[#allocation3 + $0x38] sm:$0xf] %vm2705_vm6, %v3181_v23  ;;  %v3064_v39 = vrot.slane %v3062_v33, 1 }
 0x253   :  { %2650 = vst.msk [vmem:[#allocation2 + $0x68] sm:$0xff] %vm9218_vm0, %v2607_v18  ;;  %v2483_v24 = vpop.f32.mrb[28].mxu0 }
 0x254   :  { %3183 = vst.msk [vmem:[#allocation3 + $0x20] sm:$0x80] %vm2703_vm5, %v3181_v23  ;;  %v2484_v26 = vadd.f32 %v8284_v32, %v2483_v24  ;;  %v2485_v27 = vpop.f32.mrb[29].mxu0 }
 0x255   :  { %v2486_v31 = vpop.f32.mrb[30].mxu0 }
 0x256   :  { %v2608_v34 = vmax.f32 %v2484_v26, 0.0  ;;  %v2487_v35 = vadd.f32 %v8284_v32, %v2486_v31  ;;  %3275 = vrot.lane.b32.xlu1 %v3274_v28, %s6777_s0  ;;  %3486 = vrot.lane.b32.xlu0 %v3485_v29, %s6779_s18  ;;  %v2488_v36 = vpop.f32.mrb[31].mxu0 }
 0x257   :  { %v3385_v41 = vld [vmem:[#allocation2 + $0x58] ss:$2 sm:$0x1f]  ;;  %v3490_v45 = vld [vmem:[#allocation2 + $0x59] ss:$2 sm:$0x1f] }
 0x258   :  { %2651 = vst.msk [vmem:[#allocation2 + $0x70] sm:$0xff] %vm9218_vm0, %v2608_v34  ;;  %v2609_v38 = vmax.f32 %v2487_v35, 0.0  ;;  %v3387_v49 = vrot.slane %v3385_v41, 1  ;;  %v3587_v50 = vld [vmem:[#allocation2 + $0x5a] ss:$2 sm:$0x1f] }
 0x259   :  { %v3589_v53 = vrot.slane %v3587_v50, 1  ;;  %v2708_v59 = vld [vmem:[#allocation2 + $0x58] ss:$2 sm:$0x1f]  ;;  %v3492_v62 = vrot.slane %v3490_v45, 1 }
 0x25a   :  { %v3281_v42 = vld [vmem:[#allocation2 + $0x65] ss:$2 sm:$0x1f]  ;;  %2652 = vst.msk [vmem:[#allocation2 + $0x78] sm:$0xff] %vm9218_vm0, %v2609_v38  ;;  %3065 = vrot.lane.b32.xlu1 %v3064_v39, %s6779_s18  ;;  %v2710_v2 = vrot.slane %v2708_v59, 4 }
 0x25b   :  { %v3283_v43 = vrot.slane %v3281_v42, 4  ;;  %v2491_v44 = vpop.f32.mrb[32].mxu0  ;;  %v3186_v54 = vld [vmem:[#allocation2 + $0x64] ss:$2 sm:$0x1f] }
 0x25c   :  { %v2492_v47 = vadd.f32 %v8284_v32, %v2491_v44  ;;  %v2493_v48 = vpop.f32.mrb[33].mxu0  ;;  %v3188_v58 = vrot.slane %v3186_v54, 4  ;;  %3591 = vst.msk [vmem:[#allocation3 + $0x28] sm:$0x80] %vm2703_vm5, %v3589_v53 }
 0x25d   :  { %3284 = vrot.lane.b32.xlu0 %v3283_v43, %s6777_s0  ;;  %v2494_v52 = vpop.f32.mrb[34].mxu0  ;;  %3592 = vst.msk [vmem:[#allocation3 + $0x40] sm:$0xf] %vm2705_vm6, %v3589_v53  ;;  %v2815_v0 = vld [vmem:[#allocation2 + $0x59] ss:$2 sm:$0x1f] }
 0x25e   :  { %v2610_v55 = vmax.f32 %v2492_v47, 0.0  ;;  %3388 = vrot.lane.b32.xlu1 %v3387_v49, %s6778_s17  ;;  %v2495_v56 = vadd.f32 %v8284_v32, %v2494_v52  ;;  %v2496_v57 = vpop.f32.mrb[35].mxu0  ;;  %3190 = vst.msk [vmem:[#allocation3 + $0x38] sm:$0xf0] %vm2712_vm7, %v3188_v58  ;;  %v2817_v6 = vrot.slane %v2815_v0, 4 }
 0x25f   :  { %v2826_v60 = vld [vmem:[#allocation2 + $0x6f] ss:$2 sm:$0x1f]  ;;  %3191 = vst.msk [vmem:[#allocation3 + $0x50] sm:$0x1] %vm2714_vm8, %v3188_v58 }
 0x260   :  { %2653 = vst.msk [vmem:[#allocation2 + $0x80] sm:$0xff] %vm9218_vm0, %v2610_v55  ;;  %v2611_v61 = vmax.f32 %v2495_v56, 0.0  ;;  %v2828_v63 = vrot.slane %v2826_v60, 7  ;;  %v3393_v1 = vld [vmem:[#allocation2 + $0x6e] ss:$2 sm:$0x1f] }
 0x261   :  { %v3593_v3 = vld [vmem:[#allocation2 + $0x70] ss:$2 sm:$0x1f]  ;;  %2713 = vst.msk [vmem:[#allocation3 + $0x30] sm:$0xf0] %vm2712_vm7, %v2710_v2  ;;  %v3395_v11 = vrot.slane %v3393_v1, 4 }
 0x262   :  { %2654 = vst.msk [vmem:[#allocation2 + $0x88] sm:$0xff] %vm9218_vm0, %v2611_v61  ;;  %3493 = vrot.lane.b32.xlu1 %v3492_v62, %s6779_s18  ;;  %2829 = vrot.lane.b32.xlu0 %v2828_v63, %s6777_s0  ;;  %v3595_v7 = vrot.slane %v3593_v3, 4  ;;  %v2717_v8 = vld [vmem:[#allocation2 + $0x6e] ss:$2 sm:$0x1f] }
 0x263   :  { %v2499_v5 = vpop.f32.mrb[36].mxu0  ;;  %2715 = vst.msk [vmem:[#allocation3 + $0x48] sm:$0x1] %vm2714_vm8, %v2710_v2  ;;  %v2944_v12 = vld [vmem:[#allocation2 + $0x5a] ss:$2 sm:$0x1f] }
 0x264   :  { %v2500_v9 = vadd.f32 %v8284_v32, %v2499_v5  ;;  %v2501_v10 = vpop.f32.mrb[37].mxu0  ;;  %v2719_v13 = vrot.slane %v2717_v8, 7  ;;  %v3498_v15 = vld [vmem:[#allocation2 + $0x6f] ss:$2 sm:$0x1f]  ;;  %v2946_v20 = vrot.slane %v2944_v12, 4 }
 0x265   :  { %v2502_v14 = vpop.f32.mrb[38].mxu0  ;;  %3597 = vst.msk [vmem:[#allocation3 + $0x40] sm:$0xf0] %vm2712_vm7, %v3595_v7  ;;  %v3500_v21 = vrot.slane %v3498_v15, 4 }
 0x266   :  { %3598 = vst.msk [vmem:[#allocation3 + $0x58] sm:$0x1] %vm2714_vm8, %v3595_v7  ;;  %v2612_v16 = vmax.f32 %v2500_v9, 0.0  ;;  %2818 = vrot.lane.b32.xlu1 %v2817_v6, %s6777_s0  ;;  %3396 = vrot.lane.b32.xlu0 %v3395_v11, %s6778_s17  ;;  %v2503_v17 = vadd.f32 %v8284_v32, %v2502_v14  ;;  %v2504_v18 = vpop.f32.mrb[39].mxu0 }
 0x267   :  { %2722 = vst.msk [vmem:[#allocation3 + $0x48] sm:$0x3e] %vm2721_vm9, %v2719_v13  ;;  %v3193_v22 = vld [vmem:[#allocation2 + $0x7a] ss:$2 sm:$0x1f] }
 0x268   :  { %2655 = vst.msk [vmem:[#allocation2 + $0x90] sm:$0xff] %vm9218_vm0, %v2612_v16  ;;  %v2613_v19 = vmax.f32 %v2503_v17, 0.0  ;;  %v3073_v23 = vld [vmem:[#allocation2 + $0x63] ss:$2 sm:$0x1f]  ;;  %v3195_v25 = vrot.slane %v3193_v22, 7 }
 0x269   :  { %v2955_v24 = vld [vmem:[#allocation2 + $0x70] ss:$2 sm:$0x1f]  ;;  %v3290_v27 = vld [vmem:[#allocation2 + $0x7b] ss:$2 sm:$0x1f] }
 0x26a   :  { %2656 = vst.msk [vmem:[#allocation2 + $0x98] sm:$0xff] %vm9218_vm0, %v2613_v19  ;;  %2947 = vrot.lane.b32.xlu1 %v2946_v20, %s6778_s17  ;;  %3501 = vrot.lane.b32.xlu0 %v3500_v21, %s6779_s18  ;;  %v3084_v28 = vld [vmem:[#allocation2 + $0x79] ss:$2 sm:$0x1f]  ;;  %v3075_v31 = vrot.slane %v3073_v23, 4  ;;  %v2957_v33 = vrot.slane %v2955_v24, 7 }
 0x26b   :  { %v2507_v26 = vpop.f32.mrb[40].mxu0  ;;  %v3599_v34 = vld [vmem:[#allocation2 + $0x86] ss:$2 sm:$0x1f]  ;;  %3197 = vst.msk [vmem:[#allocation3 + $0x50] sm:$0x3e] %vm2721_vm9, %v3195_v25 }
 0x26c   :  { %v2508_v29 = vadd.f32 %v8284_v32, %v2507_v26  ;;  %v2509_v30 = vpop.f32.mrb[41].mxu0  ;;  %v3601_v36 = vrot.slane %v3599_v34, 7  ;;  %v2724_v37 = vld [vmem:[#allocation2 + $0x84] ss:$2 sm:$0x1f]  ;;  %v3292_v43 = vrot.slane %v3290_v27, 7 }
 0x26d   :  { %v2510_v35 = vpop.f32.mrb[42].mxu0  ;;  %v2726_v41 = vrot.slane %v2724_v37, 2  ;;  %v3086_v44 = vrot.slane %v3084_v28, 7  ;;  %v2835_v45 = vld [vmem:[#allocation2 + $0x85] ss:$2 sm:$0x1f] }
 0x26e   :  { %v2614_v38 = vmax.f32 %v2508_v29, 0.0  ;;  %3076 = vrot.lane.b32.xlu1 %v3075_v31, %s6779_s18  ;;  %2958 = vrot.lane.b32.xlu0 %v2957_v33, %s6778_s17  ;;  %v2511_v39 = vadd.f32 %v8284_v32, %v2510_v35  ;;  %v2512_v40 = vpop.f32.mrb[43].mxu0  ;;  %3603 = vst.msk [vmem:[#allocation3 + $0x58] sm:$0x3e] %vm2721_vm9, %v3601_v36  ;;  %v2837_v53 = vrot.slane %v2835_v45, 2 }
 0x26f   :  { %2729 = vst.msk [vmem:[#allocation3 + $0x48] sm:$0xc0] %vm2728_vm10, %v2726_v41  ;;  %v3401_v55 = vld [vmem:[#allocation2 + $0x84] ss:$2 sm:$0x1f] }
 0x270   :  { %2657 = vst.msk [vmem:[#allocation2 + $0xa0] sm:$0xff] %vm9218_vm0, %v2614_v38  ;;  %v2615_v42 = vmax.f32 %v2511_v39, 0.0  ;;  %v3403_v61 = vrot.slane %v3401_v55, 7  ;;  %v2964_v0 = vld [vmem:[#allocation2 + $0x86] ss:$2 sm:$0x1f] }
 0x271   :  { %2731 = vst.msk [vmem:[#allocation3 + $0x60] sm:$0x7] %vm2730_vm11, %v2726_v41  ;;  %v3298_v46 = vld [vmem:[#allocation2 + $0x91] ss:$2 sm:$0x1f]  ;;  %v2966_v8 = vrot.slane %v2964_v0, 2 }
 0x272   :  { %v3199_v47 = vld [vmem:[#allocation2 + $0x90] ss:$2 sm:$0x1f]  ;;  %2658 = vst.msk [vmem:[#allocation2 + $0xa8] sm:$0xff] %vm9218_vm0, %v2615_v42  ;;  %3293 = vrot.lane.b32.xlu1 %v3292_v43, %s6777_s0  ;;  %3087 = vrot.lane.b32.xlu0 %v3086_v44, %s6779_s18  ;;  %v3300_v48 = vrot.slane %v3298_v46, 2 }
 0x273   :  { %v3201_v49 = vrot.slane %v3199_v47, 2  ;;  %v2515_v50 = vpop.f32.mrb[44].mxu0  ;;  %v3506_v11 = vld [vmem:[#allocation2 + $0x85] ss:$2 sm:$0x1f] }
 0x274   :  { %v2516_v51 = vadd.f32 %v8284_v32, %v2515_v50  ;;  %v2517_v52 = vpop.f32.mrb[45].mxu0  ;;  %v3508_v16 = vrot.slane %v3506_v11, 7  ;;  %v3093_v18 = vld [vmem:[#allocation2 + $0x8f] ss:$2 sm:$0x1f] }
 0x275   :  { %3203 = vst.msk [vmem:[#allocation3 + $0x50] sm:$0xc0] %vm2728_vm10, %v3201_v49  ;;  %v2518_v54 = vpop.f32.mrb[46].mxu0  ;;  %v3095_v24 = vrot.slane %v3093_v18, 2 }
 0x276   :  { %3204 = vst.msk [vmem:[#allocation3 + $0x68] sm:$0x7] %vm2730_vm11, %v3201_v49  ;;  %v2616_v56 = vmax.f32 %v2516_v51, 0.0  ;;  %v2519_v57 = vadd.f32 %v8284_v32, %v2518_v54  ;;  %2838 = vrot.lane.b32.xlu1 %v2837_v53, %s6777_s0  ;;  %3301 = vrot.lane.b32.xlu0 %v3300_v48, %s6777_s0  ;;  %v2520_v58 = vpop.f32.mrb[47].mxu0 }
 0x277   :  { %v3409_v59 = vld [vmem:[#allocation2 + $0x9a] ss:$2 sm:$0x1f]  ;;  %v3514_v1 = vld [vmem:[#allocation2 + $0x9b] ss:$2 sm:$0x1f] }
 0x278   :  { %2659 = vst.msk [vmem:[#allocation2 + $0xb0] sm:$0xff] %vm9218_vm0, %v2616_v56  ;;  %v2617_v60 = vmax.f32 %v2519_v57, 0.0  ;;  %v3411_v62 = vrot.slane %v3409_v59, 2  ;;  %v3605_v63 = vld [vmem:[#allocation2 + $0x9c] ss:$2 sm:$0x1f] }
 0x279   :  { %v3607_v2 = vrot.slane %v3605_v63, 2  ;;  %v2733_v3 = vld [vmem:[#allocation2 + $0xa5] ss:$2 sm:$0x1f]  ;;  %v3516_v9 = vrot.slane %v3514_v1, 2 }
 0x27a   :  { %2660 = vst.msk [vmem:[#allocation2 + $0xb8] sm:$0xff] %vm9218_vm0, %v2617_v60  ;;  %3404 = vrot.lane.b32.xlu1 %v3403_v61, %s6778_s17  ;;  %3412 = vrot.lane.b32.xlu0 %v3411_v62, %s6778_s17  ;;  %v2735_v5 = vrot.slane %v2733_v3, 5  ;;  %v2846_v27 = vld [vmem:[#allocation2 + $0xa6] ss:$2 sm:$0x1f] }
 0x27b   :  { %v2523_v4 = vpop.f32.mrb[48].mxu0  ;;  %3609 = vst.msk [vmem:[#allocation3 + $0x58] sm:$0xc0] %vm2728_vm10, %v3607_v2  ;;  %v2848_v34 = vrot.slane %v2846_v27, 5  ;;  %vm9217_vm10 = vcmask 779776  }
 0x27c   :  { %v2524_v6 = vadd.f32 %v8284_v32, %v2523_v4  ;;  %v2525_v7 = vpop.f32.mrb[49].mxu0  ;;  %3610 = vst.msk [vmem:[#allocation3 + $0x70] sm:$0x7] %vm2730_vm11, %v3607_v2  ;;  %v2975_v35 = vld [vmem:[#allocation2 + $0xa7] ss:$2 sm:$0x1f] }
 0x27d   :  { %v2526_v10 = vpop.f32.mrb[50].mxu0  ;;  %2738 = vst.msk [vmem:[#allocation3 + $0x60] sm:$0xf8] %vm2737_vm12, %v2735_v5  ;;  %v2977_v42 = vrot.slane %v2975_v35, 5  ;;  %vm9214_vm11 = vcmask 1048325  }
 0x27e   :  { %v2618_v12 = vmax.f32 %v2524_v6, 0.0  ;;  %2967 = vrot.lane.b32.xlu1 %v2966_v8, %s6778_s17  ;;  %3517 = vrot.lane.b32.xlu0 %v3516_v9, %s6779_s18  ;;  %v2527_v13 = vadd.f32 %v8284_v32, %v2526_v10  ;;  %v2528_v14 = vpop.f32.mrb[51].mxu0 }
 0x280   :  { %2661 = vst.msk [vmem:[#allocation2 + $0xc0] sm:$0xff] %vm9218_vm0, %v2618_v12  ;;  %v2619_v15 = vmax.f32 %v2527_v13, 0.0 }
 0x281   :  { %v3307_v17 = vld [vmem:[#allocation2 + $0xb2] ss:$2 sm:$0x1f]  ;;  %v3206_v20 = vld [vmem:[#allocation2 + $0xb1] ss:$2 sm:$0x1f] }
 0x282   :  { %2662 = vst.msk [vmem:[#allocation2 + $0xc8] sm:$0xff] %vm9218_vm0, %v2619_v15  ;;  %3509 = vrot.lane.b32.xlu1 %v3508_v16, %s6779_s18  ;;  %v3309_v19 = vrot.slane %v3307_v17, 5  ;;  %v3208_v22 = vrot.slane %v3206_v20, 5  ;;  %v3104_v39 = vld [vmem:[#allocation2 + $0xb0] ss:$2 sm:$0x1f] }
 0x283   :  { %v2531_v21 = vpop.f32.mrb[52].mxu0  ;;  %v3106_v54 = vrot.slane %v3104_v39, 5 }
 0x284   :  { %v2532_v23 = vadd.f32 %v8284_v32, %v2531_v21  ;;  %3310 = vrot.lane.b32.xlu0 %v3309_v19, %s6777_s0  ;;  %v2533_v25 = vpop.f32.mrb[53].mxu0  ;;  %3210 = vst.msk [vmem:[#allocation3 + $0x68] sm:$0xf8] %vm2737_vm12, %v3208_v22 }
 0x285   :  { %v2534_v26 = vpop.f32.mrb[54].mxu0 }
 0x286   :  { %v2620_v28 = vmax.f32 %v2532_v23, 0.0  ;;  %3096 = vrot.lane.b32.xlu1 %v3095_v24, %s6779_s18  ;;  %v2535_v29 = vadd.f32 %v8284_v32, %v2534_v26  ;;  %v2536_v30 = vpop.f32.mrb[55].mxu0 }
 0x287   :  { %v2855_v31 = vld [vmem:[#allocation2 + $0xbc] ss:$2 sm:$0x1f]  ;;  %v2984_v36 = vld [vmem:[#allocation2 + $0xbd] ss:$2 sm:$0x1f] }
 0x288   :  { %2663 = vst.msk [vmem:[#allocation2 + $0xd0] sm:$0xff] %vm9218_vm0, %v2620_v28  ;;  %v2621_v33 = vmax.f32 %v2535_v29, 0.0  ;;  %2857 = vrot.lane.b32.xlu0 %v2855_v31, %s6777_s0  ;;  %v3417_v37 = vld [vmem:[#allocation2 + $0xbb] ss:$2 sm:$0x1f] }
 0x289   :  { %v3611_v40 = vld [vmem:[#allocation2 + $0xbd] ss:$2 sm:$0x1f]  ;;  %v3212_v47 = vld [vmem:[#allocation2 + $0xc7] ss:$2 sm:$0x1f] }
 0x28a   :  { %2664 = vst.msk [vmem:[#allocation2 + $0xd8] sm:$0xff] %vm9218_vm0, %v2621_v33  ;;  %2849 = vrot.lane.b32.xlu1 %v2848_v34, %s6777_s0  ;;  %v3613_v44 = vrot.slane %v3611_v40, 5  ;;  %v2740_v45 = vld [vmem:[#allocation2 + $0xbb] ss:$2 sm:$0x1f]  ;;  %v3419_v49 = vrot.slane %v3417_v37, 5 }
 0x28b   :  { %v2539_v38 = vpop.f32.mrb[56].mxu0  ;;  %2741 = vst.msk [vmem:[#allocation3 + $0x78] sm:$0x1f] %vm2680_vm1, %v2740_v45  ;;  %3213 = vst.msk [vmem:[#allocation3 + $0x80] sm:$0x1f] %vm2680_vm1, %v3212_v47 }
 0x28c   :  { %v2540_v41 = vadd.f32 %v8284_v32, %v2539_v38  ;;  %2986 = vrot.lane.b32.xlu0 %v2984_v36, %s6778_s17  ;;  %v2541_v43 = vpop.f32.mrb[57].mxu0  ;;  %3615 = vst.msk [vmem:[#allocation3 + $0x70] sm:$0xf8] %vm2737_vm12, %v3613_v44  ;;  %v3522_v52 = vld [vmem:[#allocation2 + $0xbc] ss:$2 sm:$0x1f] }
 0x28d   :  { %v2542_v46 = vpop.f32.mrb[58].mxu0  ;;  %v3524_v56 = vrot.slane %v3522_v52, 5  ;;  %v3113_v1 = vld [vmem:[#allocation2 + $0xc6] ss:$2 sm:$0x1f]  ;;  %vm9215_vm12 = vcmask 1042176  }
 0x28e   :  { %v2622_v48 = vmax.f32 %v2540_v41, 0.0  ;;  %2978 = vrot.lane.b32.xlu1 %v2977_v42, %s6778_s17  ;;  %v2543_v50 = vadd.f32 %v8284_v32, %v2542_v46  ;;  %v2544_v51 = vpop.f32.mrb[59].mxu0 }
 0x28f   :  { %v3315_v61 = vld [vmem:[#allocation2 + $0xc8] ss:$2 sm:$0x1f] }
 0x290   :  { %2665 = vst.msk [vmem:[#allocation2 + $0xe0] sm:$0xff] %vm9218_vm0, %v2622_v48  ;;  %3420 = vrot.lane.b32.xlu0 %v3419_v49, %s6778_s17  ;;  %v2623_v53 = vmax.f32 %v2543_v50, 0.0 }
 0x291   :  { %v3616_v55 = vld [vmem:[#allocation2 + $0xd3] ss:$2 sm:$0x1f]  ;;  %v3529_v16 = vld [vmem:[#allocation2 + $0xd2] ss:$2 sm:$0x1f] }
 0x292   :  { %2666 = vst.msk [vmem:[#allocation2 + $0xe8] sm:$0xff] %vm9218_vm0, %v2623_v53  ;;  %3107 = vrot.lane.b32.xlu1 %v3106_v54, %s6779_s18  ;;  %v2743_v60 = vld [vmem:[#allocation2 + $0xd1] ss:$2 sm:$0x1f] }
 0x293   :  { %3617 = vst.msk [vmem:[#allocation3 + $0x88] sm:$0x1f] %vm2680_vm1, %v3616_v55  ;;  %v2547_v57 = vpop.f32.mrb[60].mxu0  ;;  %v2745_v63 = vrot.slane %v2743_v60, 3  ;;  %vm2792_vm1 = vcmask 517376  }
 0x294   :  { %v2548_v58 = vadd.f32 %v8284_v32, %v2547_v57  ;;  %3525 = vrot.lane.b32.xlu0 %v3524_v56, %s6779_s18  ;;  %v2549_v59 = vpop.f32.mrb[61].mxu0  ;;  %v3424_v4 = vld [vmem:[#allocation2 + $0xd1] ss:$2 sm:$0x1f] }
 0x295   :  { %v2550_v62 = vpop.f32.mrb[62].mxu0  ;;  %2747 = vst.msk [vmem:[#allocation3 + $0x78] sm:$0xe0] %vm2687_vm2, %v2745_v63  ;;  %v2862_v20 = vld [vmem:[#allocation2 + $0xd2] ss:$2 sm:$0x1f] }
 0x296   :  { %v2624_v0 = vmax.f32 %v2548_v58, 0.0  ;;  %3317 = vrot.lane.b32.xlu1 %v3315_v61, %s6777_s0  ;;  %v2551_v2 = vadd.f32 %v8284_v32, %v2550_v62  ;;  %v2552_v3 = vpop.f32.mrb[63].mxu0  ;;  %2748 = vst.msk [vmem:[#allocation3 + $0x90] sm:$0x3] %vm2689_vm3, %v2745_v63  ;;  %v2864_v28 = vrot.slane %v2862_v20, 3 }
 0x297   :  { %v3322_v5 = vld [vmem:[#allocation2 + $0xde] ss:$2 sm:$0x1f]  ;;  %v3215_v7 = vld [vmem:[#allocation2 + $0xdd] ss:$2 sm:$0x1f] }
 0x298   :  { %2667 = vst.msk [vmem:[#allocation2 + $0xf0] sm:$0xff] %vm9218_vm0, %v2624_v0  ;;  %3115 = vrot.lane.b32.xlu0 %v3113_v1, %s6779_s18  ;;  %v2625_v6 = vmax.f32 %v2551_v2, 0.0  ;;  %v3217_v9 = vrot.slane %v3215_v7, 3  ;;  %v3324_v10 = vrot.slane %v3322_v5, 3  ;;  %v8523_v58 = vld [vmem:[%s9204_s2] ss:$0 sm:$0xff] }
 0x299   :  { %v3430_v8 = vld [vmem:[#allocation2 + $0xe7] ss:$2 sm:$0x1f]  ;;  %v2991_v30 = vld [vmem:[#allocation2 + $0xd3] ss:$2 sm:$0x1f] }
 0x29a   :  { %2668 = vst.msk [vmem:[#allocation2 + $0xf8] sm:$0xff] %vm9218_vm0, %v2625_v6  ;;  %3426 = vrot.lane.b32.xlu1 %v3424_v4, %s6778_s17  ;;  %v2750_v11 = vld [vmem:[#allocation2 + $0xe7] ss:$2 sm:$0x1f]  ;;  %v3432_v18 = vrot.slane %v3430_v8, 3  ;;  %v2993_v38 = vrot.slane %v2991_v30, 3 }
 0x29b   :  { %v2555_v12 = vpop.f32.mrb[64].mxu0  ;;  %3219 = vst.msk [vmem:[#allocation3 + $0x80] sm:$0xe0] %vm2687_vm2, %v3217_v9  ;;  %v2752_v13 = vrot.slane %v2750_v11, 6 }
 0x29c   :  { %3220 = vst.msk [vmem:[#allocation3 + $0x98] sm:$0x3] %vm2689_vm3, %v3217_v9  ;;  %v2556_v14 = vadd.f32 %v8284_v32, %v2555_v12  ;;  %3325 = vrot.lane.b32.xlu0 %v3324_v10, %s6777_s0  ;;  %v2779_v15 = vpop.permute.xlu0 %2778  ;;  %v2557_v17 = vpop.f32.mrb[65].mxu0  ;;  %v3120_v42 = vld [vmem:[#allocation2 + $0xdc] ss:$2 sm:$0x1f] }
 0x29d   :  { %2782 = vst.msk [vmem:[#allocation3] sm:$0x1f] %vm2781_vm13, %v2779_v15  ;;  %v2558_v19 = vpop.f32.mrb[66].mxu0  ;;  %v3122_v51 = vrot.slane %v3120_v42, 3 }
 0x29e   :  { %2754 = vst.msk [vmem:[#allocation3 + $0x90] sm:$0x7c] %vm2696_vm4, %v2752_v13  ;;  %v2626_v21 = vmax.f32 %v2556_v14, 0.0  ;;  %3531 = vrot.lane.b32.xlu1 %v3529_v16, %s6779_s18  ;;  %v2559_v22 = vadd.f32 %v8284_v32, %v2558_v19  ;;  %v2560_v23 = vpop.f32.mrb[67].mxu0 }
 0x29f   :  { %v3535_v24 = vld [vmem:[#allocation2 + $0xe8] ss:$2 sm:$0x1f]  ;;  %v3618_v25 = vld [vmem:[#allocation2 + $0xe9] ss:$2 sm:$0x1f] }
 0x2a0   :  { %2669 = vst.msk [vmem:[#allocation2 + $0x100] sm:$0xff] %vm9218_vm0, %v2626_v21  ;;  %3433 = vrot.lane.b32.xlu0 %v3432_v18, %s6778_s17  ;;  %v2908_v26 = vpop.permute.xlu0 %2907  ;;  %v2627_v27 = vmax.f32 %v2559_v22, 0.0  ;;  %v3620_v29 = vrot.slane %v3618_v25, 3  ;;  %v3537_v33 = vrot.slane %v3535_v24, 3 }
 0x2a1   :  { %2911 = vst.msk [vmem:[#allocation3] sm:$0x1f] %vm2910_vm14, %v2908_v26  ;;  %v3331_v31 = vld [vmem:[#allocation2 + $0xf4] ss:$2 sm:$0x1f] }
 0x2a2   :  { %2670 = vst.msk [vmem:[#allocation2 + $0x108] sm:$0xff] %vm9218_vm0, %v2627_v27  ;;  %2865 = vrot.lane.b32.xlu1 %v2864_v28, %s6777_s0  ;;  %v3333_v39 = vrot.slane %v3331_v31, 6  ;;  %v3222_v40 = vld [vmem:[#allocation2 + $0xf3] ss:$2 sm:$0x1f] }
 0x2a3   :  { %3622 = vst.msk [vmem:[#allocation3 + $0x88] sm:$0xe0] %vm2687_vm2, %v3620_v29  ;;  %v2563_v34 = vpop.f32.mrb[68].mxu0  ;;  %v3224_v43 = vrot.slane %v3222_v40, 6  ;;  %vm3039_vm2 = vcmask 1045248  }
 0x2a4   :  { %3623 = vst.msk [vmem:[#allocation3 + $0xa0] sm:$0x3] %vm2689_vm3, %v3620_v29  ;;  %v2564_v35 = vadd.f32 %v8284_v32, %v2563_v34  ;;  %v2565_v36 = vpop.f32.mrb[69].mxu0  ;;  %3538 = vrot.lane.b32.xlu0 %v3537_v33, %s6779_s18  ;;  %v3251_v37 = vpop.permute.xlu0 %3250  ;;  %vm2919_vm3 = vcmask 785925  }
 0x2a5   :  { %3253 = vst.msk [vmem:[#allocation3 + $0x8] sm:$0x1f] %vm2781_vm13, %v3251_v37  ;;  %v2566_v41 = vpop.f32.mrb[70].mxu0  ;;  %v3000_v1 = vld [vmem:[#allocation2 + $0xe9] ss:$2 sm:$0x1f] }
 0x2a6   :  { %v2628_v44 = vmax.f32 %v2564_v35, 0.0  ;;  %v2567_v45 = vadd.f32 %v8284_v32, %v2566_v41  ;;  %2994 = vrot.lane.b32.xlu1 %v2993_v38, %s6778_s17  ;;  %v2788_v46 = vpop.permute.xlu1 %2787  ;;  %v2568_v47 = vpop.f32.mrb[71].mxu0  ;;  %3226 = vst.msk [vmem:[#allocation3 + $0x98] sm:$0x7c] %vm2696_vm4, %v3224_v43  ;;  %v3002_v10 = vrot.slane %v3000_v1, 6  ;;  %v6780_v38 = vmov 0.0  }
 0x2a7   :  { %2791 = vst.msk [vmem:[#allocation3] sm:$0xe0] %vm2790_vm15, %v2788_v46  ;;  %v2879_v48 = vld [vmem:[#allocation2 + $0xfe] ss:$2 sm:$0x1f]  ;;  %6510 = vmatprep.subr.bf16.mxu1 %v6780_v38 }
 0x2a8   :  { %2793 = vst.msk [vmem:[#allocation3 + $0x18] sm:$0x3] %vm2792_vm1, %v2788_v46  ;;  %v2629_v49 = vmax.f32 %v2567_v45, 0.0  ;;  %3334 = vrot.lane.b32.xlu0 %v3333_v39, %s6777_s0  ;;  %v3037_v50 = vpop.permute.xlu0 %3036  ;;  %v2871_v32 = vld [vmem:[#allocation2 + $0xe8] ss:$2 sm:$0x1f] }
 0x2a9   :  { %2671 = vst.msk [vmem:[#allocation2 + $0x110] sm:$0xff] %vm9218_vm0, %v2628_v44  ;;  %v3438_v52 = vld [vmem:[#allocation2 + $0xfd] ss:$2 sm:$0x1f]  ;;  %v2881_v53 = vrot.slane %v2879_v48, 1  ;;  %v2873_v62 = vrot.slane %v2871_v32, 6 }
 0x2aa   :  { %3040 = vst.msk [vmem:[#allocation3] sm:$0x1f] %vm3039_vm2, %v3037_v50  ;;  %3123 = vrot.lane.b32.xlu1 %v3122_v51, %s6779_s18  ;;  %v3624_v54 = vld [vmem:[#allocation2 + $0xff] ss:$2 sm:$0x1f]  ;;  %v3440_v3 = vrot.slane %v3438_v52, 6 }
 0x2ab   :  { %2672 = vst.msk [vmem:[#allocation2 + $0x118] sm:$0xff] %vm9218_vm0, %v2629_v49  ;;  %v2571_v55 = vpop.f32.mrb[72].mxu0  ;;  %v3626_v56 = vrot.slane %v3624_v54, 6  ;;  %v2756_v57 = vld [vmem:[#allocation2 + $0xfd] ss:$2 sm:$0x1f] }
 0x2ac   :  { %v2572_v59 = vadd.f32 %v8523_v58, %v2571_v55  ;;  %v2917_v60 = vpop.permute.xlu1 %2916  ;;  %2882 = vrot.lane.b32.xlu0 %v2881_v53, %s6777_s0  ;;  %v3367_v61 = vpop.permute.xlu0 %3366  ;;  %v2758_v63 = vrot.slane %v2756_v57, 1  ;;  %v3008_v5 = vld [vmem:[#allocation2 + $0xff] ss:$2 sm:$0x1f] }
 0x2ad   :  { %2920 = vst.msk [vmem:[#allocation3] sm:$0xe0] %vm2919_vm3, %v2917_v60  ;;  %v2573_v0 = vpop.f32.mrb[73].mxu0  ;;  %v3010_v12 = vrot.slane %v3008_v5, 1 }
 0x2ae   :  { %2922 = vst.msk [vmem:[#allocation3 + $0x18] sm:$0x3] %vm9217_vm10, %v2917_v60  ;;  %v2630_v2 = vmax.f32 %v2572_v59, 0.0  ;;  %2874 = vrot.lane.b32.xlu1 %v2873_v62, %s6777_s0  ;;  %v2574_v4 = vpop.f32.mrb[74].mxu0 }
 0x2af   :  { %3369 = vst.msk [vmem:[#allocation3 + $0x8] sm:$0x1f] %vm2910_vm14, %v3367_v61  ;;  %v2575_v6 = vadd.f32 %v8523_v58, %v2574_v4  ;;  %v2576_v7 = vpop.f32.mrb[75].mxu0  ;;  %v3129_v13 = vld [vmem:[#allocation2 + $0xf2] ss:$2 sm:$0x1f] }
 0x2b0   :  { %3628 = vst.msk [vmem:[#allocation3 + $0xa0] sm:$0x7c] %vm2696_vm4, %v3626_v56  ;;  %v3046_v8 = vpop.permute.xlu1 %3045  ;;  %3441 = vrot.lane.b32.xlu0 %v3440_v3, %s6778_s17  ;;  %v3472_v9 = vpop.permute.xlu0 %3471  ;;  %v3543_v14 = vld [vmem:[#allocation2 + $0xfe] ss:$2 sm:$0x1f]  ;;  %v3131_v22 = vrot.slane %v3129_v13, 6 }
 0x2b1   :  { %2760 = vst.msk [vmem:[#allocation3 + $0x90] sm:$0x80] %vm2703_vm5, %v2758_v63  ;;  %v2631_v11 = vmax.f32 %v2575_v6, 0.0  ;;  %v3339_v17 = vld [vmem:[#allocation2 + $0x10a] ss:$2 sm:$0x1f] }
 0x2b2   :  { %2761 = vst.msk [vmem:[#allocation3 + $0xa8] sm:$0xf] %vm2705_vm6, %v2758_v63  ;;  %3003 = vrot.lane.b32.xlu1 %v3002_v10, %s6778_s17  ;;  %v3629_v15 = vld [vmem:[#allocation2 + $0x115] ss:$2 sm:$0x1f]  ;;  %v3545_v24 = vrot.slane %v3543_v14, 6 }
 0x2b3   :  { %2673 = vst.msk [vmem:[#allocation2 + $0x120] sm:$0xff] %vm9218_vm0, %v2630_v2  ;;  %2674 = vst.msk [vmem:[#allocation2 + $0x128] sm:$0xff] %vm9218_vm0, %v2631_v11  ;;  %v2579_v16 = vpop.f32.mrb[76].mxu0  ;;  %v3631_v18 = vrot.slane %v3629_v15, 1  ;;  %vm9216_vm4 = vcmask 522498   ;;  %v3341_v27 = vrot.slane %v3339_v17, 1 }
 0x2b4   :  { %3049 = vst.msk [vmem:[#allocation3] sm:$0xe0] %vm9214_vm11, %v3046_v8  ;;  %v2580_v19 = vadd.f32 %v8523_v58, %v2579_v16  ;;  %v3374_v20 = vpop.permute.xlu1 %3373  ;;  %3011 = vrot.lane.b32.xlu0 %v3010_v12, %s6778_s17  ;;  %v3259_v21 = vpop.permute.xlu0 %3258  ;;  %v3228_v28 = vld [vmem:[#allocation2 + $0x109] ss:$2 sm:$0x1f] }
 0x2b5   :  { %3051 = vst.msk [vmem:[#allocation3 + $0x18] sm:$0x3] %vm9215_vm12, %v3046_v8  ;;  %v2581_v23 = vpop.f32.mrb[77].mxu0  ;;  %v3137_v31 = vld [vmem:[#allocation2 + $0x108] ss:$2 sm:$0x1f] }
 0x2b6   :  { %3474 = vst.msk [vmem:[#allocation3 + $0x8] sm:$0x1f] %vm3039_vm2, %v3472_v9  ;;  %v2632_v25 = vmax.f32 %v2580_v19, 0.0  ;;  %3132 = vrot.lane.b32.xlu1 %v3131_v22, %s6779_s18  ;;  %v2582_v26 = vpop.f32.mrb[78].mxu0  ;;  %v3230_v33 = vrot.slane %v3228_v28, 1  ;;  %v3139_v42 = vrot.slane %v3137_v31, 1 }
 0x2b7   :  { %3261 = vst.msk [vmem:[#allocation3 + $0x8] sm:$0xe0] %vm2790_vm15, %v3259_v21  ;;  %v2583_v29 = vadd.f32 %v8523_v58, %v2582_v26  ;;  %v2584_v30 = vpop.f32.mrb[79].mxu0  ;;  %v2888_v36 = vld [vmem:[#allocation2 + $0x114] ss:$2 sm:$0x1f] }
 0x2b8   :  { %3262 = vst.msk [vmem:[#allocation3 + $0x20] sm:$0x3] %vm2792_vm1, %v3259_v21  ;;  %v3479_v34 = vpop.permute.xlu1 %3478  ;;  %3546 = vrot.lane.b32.xlu0 %v3545_v24, %s6779_s18  ;;  %v2799_v35 = vpop.permute.xlu0 %2798  ;;  %v2763_v37 = vld [vmem:[#allocation2 + $0x113] ss:$2 sm:$0x1f]  ;;  %v2890_v49 = vrot.slane %v2888_v36, 4 }
 0x2b9   :  { %3633 = vst.msk [vmem:[#allocation3 + $0xa0] sm:$0x80] %vm2703_vm5, %v3631_v18  ;;  %v2633_v39 = vmax.f32 %v2583_v29, 0.0  ;;  %3232 = vst.msk [vmem:[#allocation3 + $0x98] sm:$0x80] %vm2703_vm5, %v3230_v33  ;;  %v2765_v40 = vrot.slane %v2763_v37, 4 }
 0x2ba   :  { %3634 = vst.msk [vmem:[#allocation3 + $0xb8] sm:$0xf] %vm2705_vm6, %v3631_v18  ;;  %3233 = vst.msk [vmem:[#allocation3 + $0xb0] sm:$0xf] %vm2705_vm6, %v3230_v33  ;;  %3342 = vrot.lane.b32.xlu1 %v3341_v27, %s6777_s0  ;;  %vm2810_vm5 = vcmask 523527   ;;  %vm9232_vm6 = vcmask 519424  }
 0x2bb   :  { %3376 = vst.msk [vmem:[#allocation3 + $0x8] sm:$0xe0] %vm2919_vm3, %v3374_v20  ;;  %v3235_v41 = vld [vmem:[#allocation2 + $0x11f] ss:$2 sm:$0x1f]  ;;  %v2587_v45 = vpop.f32.mrb[80].mxu0 }
 0x2bc   :  { %3377 = vst.msk [vmem:[#allocation3 + $0x20] sm:$0x3] %vm9217_vm10, %v3374_v20  ;;  %v3348_v43 = vld [vmem:[#allocation2 + $0x120] ss:$2 sm:$0x1f]  ;;  %v3237_v44 = vrot.slane %v3235_v41, 4  ;;  %v2588_v46 = vadd.f32 %v8523_v58, %v2587_v45  ;;  %v3268_v48 = vpop.permute.xlu1 %3267  ;;  %3140 = vrot.lane.b32.xlu0 %v3139_v42, %s6779_s18  ;;  %v2928_v51 = vpop.permute.xlu0 %2927 }
 0x2bd   :  { %2675 = vst.msk [vmem:[#allocation2 + $0x130] sm:$0xff] %vm9218_vm0, %v2632_v25  ;;  %2676 = vst.msk [vmem:[#allocation2 + $0x138] sm:$0xff] %vm9218_vm0, %v2633_v39  ;;  %v2589_v47 = vpop.f32.mrb[81].mxu0  ;;  %v3350_v50 = vrot.slane %v3348_v43, 4  ;;  %vm9221_vm10 = vcmask 781824   ;;  %v3647_v45 = vld [vmem:[#allocation3] sm:$0xff] }
 0x2be   :  { %3481 = vst.msk [vmem:[#allocation3 + $0x8] sm:$0xe0] %vm9214_vm11, %v3479_v34  ;;  %vm9219_vm11 = vcmask 784898   ;;  %v2590_v32 = vpop.f32.mrb[82].mxu0  ;;  %v2634_v53 = vmax.f32 %v2588_v46, 0.0  ;;  %2891 = vrot.lane.b32.xlu1 %v2890_v49, %s6777_s0  ;;  %v6677_v46 = vld [vmem:[%s9205_s3 + $0x80] sm:$0xff]  }
 0x2bf   :  { %3482 = vst.msk [vmem:[#allocation3 + $0x20] sm:$0x3] %vm9215_vm12, %v3479_v34  ;;  %v3445_v52 = vld [vmem:[#allocation2 + $0x113] ss:$2 sm:$0x1f]  ;;  %v2591_v54 = vadd.f32 %v8523_v58, %v2590_v32  ;;  %v2592_v55 = vpop.f32.mrb[83].mxu0 }
 0x2c0   :  { %2802 = vst.msk [vmem:[#allocation3 + $0x18] sm:$0x7c] %vm9216_vm4, %v2799_v35  ;;  %3270 = vst.msk [vmem:[#allocation3 + $0x20] sm:$0x7c] %vm9216_vm4, %v3268_v48  ;;  %vm9220_vm12 = vcmask 1047298   ;;  %v2808_v59 = vpop.permute.xlu1 %2807  ;;  %3351 = vrot.lane.b32.xlu0 %v3350_v50, %s6777_s0  ;;  %v3447_v60 = vrot.slane %v3445_v52, 1  ;;  %v3057_v58 = vpop.permute.xlu0 %3056 }
 0x2c1   :  { %2767 = vst.msk [vmem:[#allocation3 + $0xa8] sm:$0xf0] %vm2712_vm7, %v2765_v40  ;;  %3239 = vst.msk [vmem:[#allocation3 + $0xb0] sm:$0xf0] %vm2712_vm7, %v3237_v44  ;;  %v2635_v57 = vmax.f32 %v2591_v54, 0.0  ;;  %vm9231_vm4 = vcmask 785927  }
 0x2c2   :  { %2768 = vst.msk [vmem:[#allocation3 + $0xc0] sm:$0x1] %vm2714_vm8, %v2765_v40  ;;  %3240 = vst.msk [vmem:[#allocation3 + $0xc8] sm:$0x1] %vm2714_vm8, %v3237_v44  ;;  %3448 = vrot.lane.b32.xlu1 %v3447_v60, %s6778_s17  ;;  %v6678_v50 = vld [vmem:[%s9205_s3 + $0x88] sm:$0xff]  }
 0x2c3   :  { %2931 = vst.msk [vmem:[#allocation3 + $0x18] sm:$0x7c] %vm9219_vm11, %v2928_v51  ;;  %v3017_v62 = vld [vmem:[#allocation2 + $0x115] ss:$2 sm:$0x1f] }
 0x2c4   :  { %v3453_v56 = vld [vmem:[#allocation2 + $0x129] ss:$2 sm:$0x1f]  ;;  %2677 = vst.msk [vmem:[#allocation2 + $0x140] sm:$0xff] %vm9218_vm0, %v2634_v53  ;;  %2678 = vst.msk [vmem:[#allocation2 + $0x148] sm:$0xff] %vm9218_vm0, %v2635_v57  ;;  %v2937_v2 = vpop.permute.xlu1 %2936  ;;  %v3019_v3 = vrot.slane %v3017_v62, 4  ;;  %v3382_v4 = vpop.permute.xlu0 %3381 }
 0x2c5   :  { %v3635_v61 = vld [vmem:[#allocation2 + $0x12b] ss:$2 sm:$0x1f]  ;;  %2811 = vst.msk [vmem:[#allocation3 + $0x18] sm:$0x80] %vm2810_vm5, %v2808_v59  ;;  %v3455_v0 = vrot.slane %v3453_v56, 4 }
 0x2c6   :  { %2813 = vst.msk [vmem:[#allocation3 + $0x30] sm:$0xf] %vm9232_vm6, %v2808_v59  ;;  %v3637_v63 = vrot.slane %v3635_v61, 4  ;;  %v3558_v1 = vld [vmem:[#allocation2 + $0x12a] ss:$2 sm:$0x1f]  ;;  %3020 = vrot.lane.b32.xlu1 %v3019_v3, %s6778_s17 }
 0x2c7   :  { %3060 = vst.msk [vmem:[#allocation3 + $0x18] sm:$0x7c] %vm9220_vm12, %v3057_v58  ;;  %3456 = vrot.lane.b32.xlu0 %v3455_v0, %s6778_s17  ;;  %v3550_v5 = vld [vmem:[#allocation2 + $0x114] ss:$2 sm:$0x1f]  ;;  %v3560_v7 = vrot.slane %v3558_v1, 4 }
 0x2c8   :  { %3639 = vst.msk [vmem:[#allocation3 + $0xb8] sm:$0xf0] %vm2712_vm7, %v3637_v63  ;;  %v3242_v6 = vld [vmem:[#allocation2 + $0x135] ss:$2 sm:$0x1f]  ;;  %v3276_v12 = vpop.permute.xlu1 %3275  ;;  %v3552_v13 = vrot.slane %v3550_v5, 1  ;;  %v3487_v14 = vpop.permute.xlu0 %3486 }
 0x2c9   :  { %3640 = vst.msk [vmem:[#allocation3 + $0xd0] sm:$0x1] %vm2714_vm8, %v3637_v63  ;;  %v3244_v8 = vrot.slane %v3242_v6, 7  ;;  %v2770_v9 = vld [vmem:[#allocation2 + $0x129] ss:$2 sm:$0x1f] }
 0x2ca   :  { %2940 = vst.msk [vmem:[#allocation3 + $0x18] sm:$0x80] %vm9231_vm4, %v2937_v2  ;;  %v3357_v10 = vld [vmem:[#allocation2 + $0x136] ss:$2 sm:$0x1f]  ;;  %v2772_v11 = vrot.slane %v2770_v9, 7  ;;  %3553 = vrot.lane.b32.xlu1 %v3552_v13, %s6779_s18 }
 0x2cb   :  { %2942 = vst.msk [vmem:[#allocation3 + $0x30] sm:$0xf] %vm9221_vm10, %v2937_v2  ;;  %3561 = vrot.lane.b32.xlu0 %v3560_v7, %s6779_s18  ;;  %v3146_v15 = vld [vmem:[#allocation2 + $0x11e] ss:$2 sm:$0x1f]  ;;  %vm9223_vm7 = vcmask 1048327  }
 0x2cc   :  { %3384 = vst.msk [vmem:[#allocation3 + $0x20] sm:$0x7c] %vm9219_vm11, %v3382_v4  ;;  %v3642_v16 = vld [vmem:[#allocation2 + $0x141] ss:$2 sm:$0x1f]  ;;  %vm9222_vm8 = vcmask 1044224   ;;  %v3066_v20 = vpop.permute.xlu1 %3065 }
 0x2cd   :  { %3246 = vst.msk [vmem:[#allocation3 + $0xc8] sm:$0x3e] %vm2721_vm9, %v3244_v8  ;;  %2774 = vst.msk [vmem:[#allocation3 + $0xc0] sm:$0x3e] %vm2721_vm9, %v2772_v11  ;;  %v3359_v17 = vrot.slane %v3357_v10, 7  ;;  %v3644_v18 = vrot.slane %v3642_v16, 7 }
 0x2ce   :  { %3278 = vst.msk [vmem:[#allocation3 + $0x20] sm:$0x80] %vm2810_vm5, %v3276_v12  ;;  %v3462_v19 = vld [vmem:[#allocation2 + $0x13f] ss:$2 sm:$0x1f]  ;;  %v3148_v21 = vrot.slane %v3146_v15, 4 }
 0x2cf   :  { %3279 = vst.msk [vmem:[#allocation3 + $0x38] sm:$0xf] %vm9232_vm6, %v3276_v12  ;;  %3360 = vrot.lane.b32.xlu0 %v3359_v17, %s6777_s0  ;;  %vm9229_vm0 = vcmask 523524   ;;  %vm9224_vm11 = vcmask 516352   ;;  %v3464_v24 = vrot.slane %v3462_v19, 7  ;;  %v3285_v25 = vpop.permute.xlu0 %3284  ;;  %v3648_v42 = vld [vmem:[#allocation3 + $0x8] sm:$0xff] }
 0x2d0   :  { %3489 = vst.msk [vmem:[#allocation3 + $0x20] sm:$0x7c] %vm9220_vm12, %v3487_v14  ;;  %v2897_v22 = vld [vmem:[#allocation2 + $0x12a] ss:$2 sm:$0x1f]  ;;  %3149 = vrot.lane.b32.xlu1 %v3148_v21, %s6779_s18  ;;  %v3389_v26 = vpop.permute.xlu1 %3388  ;;  %vm9227_vm12 = vcmask 785924  }
 0x2d1   :  { %3646 = vst.msk [vmem:[#allocation3 + $0xd0] sm:$0x3e] %vm2721_vm9, %v3644_v18  ;;  %v3567_v23 = vld [vmem:[#allocation2 + $0x140] ss:$2 sm:$0x1f]  ;;  %v2899_v27 = vrot.slane %v2897_v22, 7 }
 0x2d2   :  { %3069 = vst.msk [vmem:[#allocation3 + $0x18] sm:$0x80] %vm9223_vm7, %v3066_v20  ;;  %v3569_v28 = vrot.slane %v3567_v23, 7  ;;  %v3026_v29 = vld [vmem:[#allocation2 + $0x12b] ss:$2 sm:$0x1f] }
 0x2d3   :  { %3071 = vst.msk [vmem:[#allocation3 + $0x30] sm:$0xf] %vm9222_vm8, %v3066_v20  ;;  %3465 = vrot.lane.b32.xlu0 %v3464_v24, %s6778_s17  ;;  %vm9230_vm9 = vcmask 521473   ;;  %v3028_v33 = vrot.slane %v3026_v29, 7  ;;  %vm2852_vm6 = vcmask 523523  }
 0x2d4   :  { %3287 = vst.msk [vmem:[#allocation3 + $0x38] sm:$0xf0] %vm9229_vm0, %v3285_v25  ;;  %2900 = vrot.lane.b32.xlu1 %v2899_v27, %s6777_s0  ;;  %v3494_v30 = vpop.permute.xlu1 %3493  ;;  %v2830_v31 = vpop.permute.xlu0 %2829  ;;  %v3155_v34 = vld [vmem:[#allocation2 + $0x134] ss:$2 sm:$0x1f] }
 0x2d5   :  { %3288 = vst.msk [vmem:[#allocation3 + $0x50] sm:$0x1] %vm9224_vm11, %v3285_v25  ;;  %v3157_v37 = vrot.slane %v3155_v34, 7 }
 0x2d6   :  { %3391 = vst.msk [vmem:[#allocation3 + $0x20] sm:$0x80] %vm9231_vm4, %v3389_v26  ;;  %vm3101_vm4 = vcmask 1043200  }
 0x2d7   :  { %3392 = vst.msk [vmem:[#allocation3 + $0x38] sm:$0xf] %vm9221_vm10, %v3389_v26  ;;  %3570 = vrot.lane.b32.xlu0 %v3569_v28, %s6779_s18  ;;  %vm9225_vm10 = vcmask 778752  }
 0x2d8   :  { %3496 = vst.msk [vmem:[#allocation3 + $0x20] sm:$0x80] %vm9223_vm7, %v3494_v30  ;;  %3029 = vrot.lane.b32.xlu1 %v3028_v33, %s6778_s17  ;;  %v2819_v35 = vpop.permute.xlu1 %2818  ;;  %v3397_v36 = vpop.permute.xlu0 %3396  ;;  %vm9228_vm7 = vcmask 1041152  }
 0x2d9   :  { %3497 = vst.msk [vmem:[#allocation3 + $0x38] sm:$0xf] %vm9222_vm8, %v3494_v30  ;;  %vm9226_vm8 = vcmask 1048324   ;;  %v3650_v39 = vld [vmem:[#allocation3 + $0x18] sm:$0xff] }
 0x2da   :  { %2833 = vst.msk [vmem:[#allocation3 + $0x48] sm:$0x3e] %vm9230_vm9, %v2830_v31  ;;  %v3674_v47 = vpack.c.bf16 %v3650_v39, %v3647_v45 }
 0x2db   :  { %2822 = vst.msk [vmem:[#allocation3 + $0x30] sm:$0xf0] %vm9229_vm0, %v2819_v35  ;;  %vm2972_vm0 = vcmask 780800  }
 0x2dc   :  { %2824 = vst.msk [vmem:[#allocation3 + $0x48] sm:$0x1] %vm9224_vm11, %v2819_v35  ;;  %3158 = vrot.lane.b32.xlu1 %v3157_v37, %s6779_s18  ;;  %v2948_v40 = vpop.permute.xlu1 %2947  ;;  %v3502_v41 = vpop.permute.xlu0 %3501  ;;  %vm2961_vm11 = vcmask 783873  }
 0x2dd   :  { %3399 = vst.msk [vmem:[#allocation3 + $0x38] sm:$0xf0] %vm9227_vm12, %v3397_v36  ;;  %2951 = vst.msk [vmem:[#allocation3 + $0x30] sm:$0xf0] %vm9227_vm12, %v2948_v40  ;;  %vm2843_vm12 = vcmask 518400  }
 0x2de   :  { %3400 = vst.msk [vmem:[#allocation3 + $0x50] sm:$0x1] %vm9225_vm10, %v3397_v36  ;;  %2953 = vst.msk [vmem:[#allocation3 + $0x48] sm:$0x1] %vm9225_vm10, %v2948_v40  ;;  %vm3090_vm10 = vcmask 1046273  }
 0x2df   :  { %v3651_v43 = vld [vmem:[#allocation3 + $0x20] sm:$0xff]  ;;  %3504 = vst.msk [vmem:[#allocation3 + $0x38] sm:$0xf0] %vm9226_vm8, %v3502_v41 }
 0x2e0   :  { %3505 = vst.msk [vmem:[#allocation3 + $0x50] sm:$0x1] %vm9228_vm7, %v3502_v41  ;;  %v3675_v44 = vpack.c.bf16 %v3651_v43, %v3648_v42  ;;  %v3077_v48 = vpop.permute.xlu1 %3076  ;;  %v2959_v49 = vpop.permute.xlu0 %2958 }
 0x2e1   :  { %3080 = vst.msk [vmem:[#allocation3 + $0x30] sm:$0xf0] %vm9226_vm8, %v3077_v48  ;;  %vm2841_vm8 = vcmask 523526  }
 0x2e2   :  { %3887 = vmatprep.mubr.bf16.mxu1 %v3675_v44  ;;  %3082 = vst.msk [vmem:[#allocation3 + $0x48] sm:$0x1] %vm9228_vm7, %v3077_v48  ;;  %vm2970_vm7 = vcmask 785926  }
 0x2e3   :  { %3888 = vmatmul.mubr.bf16.vlgmr.msra.gmra.mrb[0].mxu1 %v3674_v47  ;;  %2962 = vst.msk [vmem:[#allocation3 + $0x48] sm:$0x3e] %vm2961_vm11, %v2959_v49 }
 0x2e4   :  { %6511 = vmatpush3.bf16.msra.mxu1 %v6677_v46  ;;  %v3294_v51 = vpop.permute.xlu1 %3293  ;;  %v3088_v32 = vpop.permute.xlu0 %3087 }
 0x2e5   :  { %6512 = vmatprep.subr.bf16.mxu1 %v6780_v38  ;;  %3296 = vst.msk [vmem:[#allocation3 + $0x50] sm:$0x3e] %vm9230_vm9, %v3294_v51  ;;  %vm3099_vm9 = vcmask 1048326  }
 0x2e6   :  { %3091 = vst.msk [vmem:[#allocation3 + $0x48] sm:$0x3e] %vm3090_vm10, %v3088_v32  ;;  %v3654_v63 = vld [vmem:[#allocation3 + $0x38] sm:$0xff] }
 0x2e8   :  { %6513 = vmatpush3.bf16.msra.mxu1 %v6678_v50  ;;  %v2839_v52 = vpop.permute.xlu1 %2838  ;;  %v3302_v53 = vpop.permute.xlu0 %3301  ;;  %v3653_v4 = vld [vmem:[#allocation3 + $0x30] sm:$0xff] }
 0x2e9   :  { %2842 = vst.msk [vmem:[#allocation3 + $0x48] sm:$0xc0] %vm2841_vm8, %v2839_v52  ;;  %3304 = vst.msk [vmem:[#allocation3 + $0x50] sm:$0xc0] %vm2841_vm8, %v3302_v53 }
 0x2ea   :  { %2844 = vst.msk [vmem:[#allocation3 + $0x60] sm:$0x7] %vm2843_vm12, %v2839_v52  ;;  %3305 = vst.msk [vmem:[#allocation3 + $0x68] sm:$0x7] %vm2843_vm12, %v3302_v53  ;;  %vm3110_vm12 = vcmask 1048323  }
 0x2ec   :  { %v3405_v54 = vpop.permute.xlu1 %3404  ;;  %v3413_v55 = vpop.permute.xlu0 %3412 }
 0x2ed   :  { %3407 = vst.msk [vmem:[#allocation3 + $0x50] sm:$0x3e] %vm2961_vm11, %v3405_v54 }
 0x2ee   :  { %3415 = vst.msk [vmem:[#allocation3 + $0x50] sm:$0xc0] %vm2970_vm7, %v3413_v55 }
 0x2ef   :  { %3416 = vst.msk [vmem:[#allocation3 + $0x68] sm:$0x7] %vm2972_vm0, %v3413_v55 }
 0x2f0   :  { %v2968_v56 = vpop.permute.xlu1 %2967  ;;  %v3518_v57 = vpop.permute.xlu0 %3517 }
 0x2f1   :  { %2971 = vst.msk [vmem:[#allocation3 + $0x48] sm:$0xc0] %vm2970_vm7, %v2968_v56 }
 0x2f2   :  { %2973 = vst.msk [vmem:[#allocation3 + $0x60] sm:$0x7] %vm2972_vm0, %v2968_v56  ;;  %vm2981_vm0 = vcmask 785923  }
 0x2f3   :  { %3520 = vst.msk [vmem:[#allocation3 + $0x50] sm:$0xc0] %vm3099_vm9, %v3518_v57 }
 0x2f4   :  { %3521 = vst.msk [vmem:[#allocation3 + $0x68] sm:$0x7] %vm3101_vm4, %v3518_v57  ;;  %v3510_v59 = vpop.permute.xlu1 %3509 }
 0x2f5   :  { %3512 = vst.msk [vmem:[#allocation3 + $0x50] sm:$0x3e] %vm3090_vm10, %v3510_v59 }
 0x2f6   :  { %v3311_v60 = vpop.permute.xlu0 %3310 }
 0x2f7   :  { %3313 = vst.msk [vmem:[#allocation3 + $0x68] sm:$0xf8] %vm2852_vm6, %v3311_v60 }
 0x2f8   :  { %v3097_v61 = vpop.permute.xlu1 %3096 }
 0x2f9   :  { %3100 = vst.msk [vmem:[#allocation3 + $0x48] sm:$0xc0] %vm3099_vm9, %v3097_v61 }
 0x2fa   :  { %3102 = vst.msk [vmem:[#allocation3 + $0x60] sm:$0x7] %vm3101_vm4, %v3097_v61  ;;  %v2858_v58 = vpop.permute.xlu0 %2857  ;;  %vm9233_vm4 = vcmask 779776  }
 0x2fb   :  { %2860 = vst.msk [vmem:[#allocation3 + $0x78] sm:$0x1f] %vm2781_vm13, %v2858_v58  ;;  %v3652_v58 = vld [vmem:[#allocation3 + $0x28] sm:$0xff] }
 0x2fc   :  { %v2850_v62 = vpop.permute.xlu1 %2849  ;;  %v3657_v0 = vld [vmem:[#allocation3 + $0x50] sm:$0xff] }
 0x2fd   :  { %2853 = vst.msk [vmem:[#allocation3 + $0x60] sm:$0xf8] %vm2852_vm6, %v2850_v62  ;;  %v3678_v1 = vpack.c.bf16 %v3657_v0, %v3654_v63  ;;  %vm9236_vm6 = vmmov %vm9233_vm4  ;;  %v3649_v62 = vld [vmem:[#allocation3 + $0x10] sm:$0xff]  ;;  %v3658_v0 = vld [vmem:[#allocation3 + $0x58] sm:$0xff] }
 0x2fe   :  { %v2987_v2 = vpop.permute.xlu0 %2986  ;;  %v3676_v63 = vpack.c.bf16 %v3652_v58, %v3649_v62 }
 0x2ff   :  { %2989 = vst.msk [vmem:[#allocation3 + $0x78] sm:$0x1f] %vm2910_vm14, %v2987_v2  ;;  %3895 = vmatprep.mubr.bf16.mxu1 %v3678_v1  ;;  %v3655_v1 = vld [vmem:[#allocation3 + $0x40] sm:$0xff] }
 0x300   :  { %v2979_v3 = vpop.permute.xlu1 %2978  ;;  %v3656_v5 = vld [vmem:[#allocation3 + $0x48] sm:$0xff]  ;;  %v3679_v2 = vpack.c.bf16 %v3658_v0, %v3655_v1  ;;  %v6680_v1 = vld [vmem:[%s9207_s5] sm:$0xff]  }
 0x301   :  { %2982 = vst.msk [vmem:[#allocation3 + $0x60] sm:$0xf8] %vm2981_vm0, %v2979_v3  ;;  %v3677_v6 = vpack.c.bf16 %v3656_v5, %v3653_v4  ;;  %v3664_v3 = vld [vmem:[#allocation3 + $0x88] sm:$0xff]  ;;  %v3661_v4 = vld [vmem:[#allocation3 + $0x70] sm:$0xff] }
 0x302   :  { %v3421_v7 = vpop.permute.xlu0 %3420  ;;  %v3682_v5 = vpack.c.bf16 %v3664_v3, %v3661_v4 }
 0x303   :  { %3423 = vst.msk [vmem:[#allocation3 + $0x68] sm:$0xf8] %vm2981_vm0, %v3421_v7  ;;  %3896 = vmatmul.mubr.bf16.gmra.mrb[4].mxu1 %v3677_v6  ;;  %vm9244_vm0 = vcmask 785927   ;;  %v3670_v6 = vld [vmem:[#allocation3 + $0xb8] sm:$0xff]  ;;  %v3667_v7 = vld [vmem:[#allocation3 + $0xa0] sm:$0xff] }
 0x304   :  { %v3108_v8 = vpop.permute.xlu1 %3107 }
 0x305   :  { %3111 = vst.msk [vmem:[#allocation3 + $0x60] sm:$0xf8] %vm3110_vm12, %v3108_v8  ;;  %v3685_v8 = vpack.c.bf16 %v3670_v6, %v3667_v7 }
 0x306   :  { %v3526_v9 = vpop.permute.xlu0 %3525 }
 0x307   :  { %3528 = vst.msk [vmem:[#allocation3 + $0x68] sm:$0xf8] %vm3110_vm12, %v3526_v9  ;;  %vm9245_vm12 = vcmask 781824   ;;  %v3673_v9 = vld [vmem:[#allocation3 + $0xd0] sm:$0x3f] }
 0x308   :  { %v3318_v10 = vpop.permute.xlu1 %3317 }
 0x309   :  { %3320 = vst.msk [vmem:[#allocation3 + $0x80] sm:$0x1f] %vm2781_vm13, %v3318_v10  ;;  %vm9234_vm13 = vcmask 1048325   ;;  %v3688_v10 = vpack.c.bf16 %v3673_v9, %v3673_v9 }
 0x30a   :  { %v3116_v11 = vpop.permute.xlu0 %3115  ;;  %vm9238_vm7 = vmmov %vm9234_vm13 }
 0x30b   :  { %3118 = vst.msk [vmem:[#allocation3 + $0x78] sm:$0x1f] %vm3039_vm2, %v3116_v11 }
 0x30c   :  { %v3427_v12 = vpop.permute.xlu1 %3426  ;;  %v3659_v28 = vld [vmem:[#allocation3 + $0x60] sm:$0xff] }
 0x30d   :  { %3429 = vst.msk [vmem:[#allocation3 + $0x80] sm:$0x1f] %vm2910_vm14, %v3427_v12  ;;  %vm9235_vm14 = vcmask 1042176  }
 0x30e   :  { %v3326_v13 = vpop.permute.xlu0 %3325  ;;  %vm9239_vm8 = vmmov %vm9235_vm14  ;;  %v3660_v22 = vld [vmem:[#allocation3 + $0x68] sm:$0xff] }
 0x30f   :  { %3328 = vst.msk [vmem:[#allocation3 + $0x80] sm:$0xe0] %vm2790_vm15, %v3326_v13 }
 0x310   :  { %3329 = vst.msk [vmem:[#allocation3 + $0x98] sm:$0x3] %vm2792_vm1, %v3326_v13  ;;  %v3532_v14 = vpop.permute.xlu1 %3531 }
 0x311   :  { %3534 = vst.msk [vmem:[#allocation3 + $0x80] sm:$0x1f] %vm3039_vm2, %v3532_v14  ;;  %vm9237_vm2 = vcmask 522498  }
 0x312   :  { %v3434_v15 = vpop.permute.xlu0 %3433 }
 0x313   :  { %3436 = vst.msk [vmem:[#allocation3 + $0x80] sm:$0xe0] %vm2919_vm3, %v3434_v15 }
 0x314   :  { %3437 = vst.msk [vmem:[#allocation3 + $0x98] sm:$0x3] %vm9233_vm4, %v3434_v15  ;;  %v2866_v16 = vpop.permute.xlu1 %2865  ;;  %vm9246_vm4 = vcmask 1047298  }
 0x315   :  { %2868 = vst.msk [vmem:[#allocation3 + $0x78] sm:$0xe0] %vm2790_vm15, %v2866_v16  ;;  %vm9240_vm15 = vcmask 519424  }
 0x316   :  { %2869 = vst.msk [vmem:[#allocation3 + $0x90] sm:$0x3] %vm2792_vm1, %v2866_v16  ;;  %v3539_v17 = vpop.permute.xlu0 %3538  ;;  %vm9241_vm1 = vmmov %vm9237_vm2 }
 0x317   :  { %3541 = vst.msk [vmem:[#allocation3 + $0x80] sm:$0xe0] %vm9234_vm13, %v3539_v17  ;;  %vm9247_vm13 = vmmov %vm9246_vm4 }
 0x318   :  { %3542 = vst.msk [vmem:[#allocation3 + $0x98] sm:$0x3] %vm9235_vm14, %v3539_v17  ;;  %v2995_v18 = vpop.permute.xlu1 %2994  ;;  %vm9248_vm14 = vmmov %vm9240_vm15 }
 0x319   :  { %2997 = vst.msk [vmem:[#allocation3 + $0x78] sm:$0xe0] %vm2919_vm3, %v2995_v18  ;;  %vm9242_vm3 = vcmask 784898  }
 0x31a   :  { %2998 = vst.msk [vmem:[#allocation3 + $0x90] sm:$0x3] %vm9236_vm6, %v2995_v18  ;;  %v3335_v19 = vpop.permute.xlu0 %3334  ;;  %vm9243_vm9 = vmmov %vm9242_vm3  ;;  %vm9249_vm6 = vcmask 1048327  }
 0x31b   :  { %3337 = vst.msk [vmem:[#allocation3 + $0x98] sm:$0x7c] %vm9237_vm2, %v3335_v19  ;;  %vm9250_vm2 = vcmask 1044224  }
 0x31c   :  { %v3124_v20 = vpop.permute.xlu1 %3123 }
 0x31d   :  { %3126 = vst.msk [vmem:[#allocation3 + $0x78] sm:$0xe0] %vm9238_vm7, %v3124_v20  ;;  %vm9251_vm7 = vcmask 523524  }
 0x31e   :  { %3127 = vst.msk [vmem:[#allocation3 + $0x90] sm:$0x3] %vm9239_vm8, %v3124_v20  ;;  %v2883_v21 = vpop.permute.xlu0 %2882  ;;  %v3663_v23 = vld [vmem:[#allocation3 + $0x80] sm:$0xff]  ;;  %vm9252_vm8 = vcmask 516352  }
 0x31f   :  { %2885 = vst.msk [vmem:[#allocation3 + $0x90] sm:$0x80] %vm2810_vm5, %v2883_v21  ;;  %v3681_v24 = vpack.c.bf16 %v3663_v23, %v3660_v22 }
 0x320   :  { %2886 = vst.msk [vmem:[#allocation3 + $0xa8] sm:$0xf] %vm9240_vm15, %v2883_v21  ;;  %v2875_v25 = vpop.permute.xlu1 %2874  ;;  %vm9253_vm15 = vmmov %vm9251_vm7 }
 0x321   :  { %2877 = vst.msk [vmem:[#allocation3 + $0x90] sm:$0x7c] %vm9241_vm1, %v2875_v25  ;;  %3903 = vmatprep.mubr.bf16.mxu1 %v3681_v24  ;;  %vm9254_vm1 = vmmov %vm9252_vm8 }
 0x322   :  { %v3442_v26 = vpop.permute.xlu0 %3441 }
 0x323   :  { %3444 = vst.msk [vmem:[#allocation3 + $0x98] sm:$0x7c] %vm9242_vm3, %v3442_v26  ;;  %vm9255_vm3 = vmmov %vm9244_vm0 }
 0x324   :  { %v3004_v27 = vpop.permute.xlu1 %3003  ;;  %v3662_v29 = vld [vmem:[#allocation3 + $0x78] sm:$0xff] }
 0x325   :  { %3006 = vst.msk [vmem:[#allocation3 + $0x90] sm:$0x7c] %vm9243_vm9, %v3004_v27  ;;  %v3680_v30 = vpack.c.bf16 %v3662_v29, %v3659_v28  ;;  %vm9257_vm9 = vcmask 785924  }
 0x326   :  { %v3012_v31 = vpop.permute.xlu0 %3011 }
 0x327   :  { %3014 = vst.msk [vmem:[#allocation3 + $0x90] sm:$0x80] %vm9244_vm0, %v3012_v31  ;;  %3904 = vmatmul.mubr.bf16.gmra.mrb[8].mxu1 %v3680_v30  ;;  %vm9258_vm0 = vcmask 778752  }
 0x328   :  { %3015 = vst.msk [vmem:[#allocation3 + $0xa8] sm:$0xf] %vm9245_vm12, %v3012_v31  ;;  %v3133_v33 = vpop.permute.xlu1 %3132 }
 0x329   :  { %3135 = vst.msk [vmem:[#allocation3 + $0x90] sm:$0x7c] %vm9246_vm4, %v3133_v33  ;;  %vm9260_vm4 = vmmov %vm9258_vm0 }
 0x32a   :  { %v3547_v34 = vpop.permute.xlu0 %3546 }
 0x32b   :  { %3549 = vst.msk [vmem:[#allocation3 + $0x98] sm:$0x7c] %vm9247_vm13, %v3547_v34  ;;  %vm9261_vm13 = vcmask 1048324  }
 0x32c   :  { %v3343_v35 = vpop.permute.xlu1 %3342 }
 0x32d   :  { %3345 = vst.msk [vmem:[#allocation3 + $0x98] sm:$0x80] %vm2810_vm5, %v3343_v35  ;;  %vm9256_vm5 = vmmov %vm9245_vm12 }
 0x32e   :  { %3346 = vst.msk [vmem:[#allocation3 + $0xb0] sm:$0xf] %vm9248_vm14, %v3343_v35  ;;  %v3141_v36 = vpop.permute.xlu0 %3140  ;;  %vm9259_vm12 = vmmov %vm9257_vm9  ;;  %vm9262_vm14 = vcmask 1041152  }
 0x32f   :  { %3143 = vst.msk [vmem:[#allocation3 + $0x90] sm:$0x80] %vm9249_vm6, %v3141_v36 }
 0x330   :  { %3144 = vst.msk [vmem:[#allocation3 + $0xa8] sm:$0xf] %vm9250_vm2, %v3141_v36  ;;  %v2892_v37 = vpop.permute.xlu1 %2891 }
 0x331   :  { %2894 = vst.msk [vmem:[#allocation3 + $0xa8] sm:$0xf0] %vm9251_vm7, %v2892_v37  ;;  %vm9263_vm7 = vcmask 521473  }
 0x332   :  { %2895 = vst.msk [vmem:[#allocation3 + $0xc0] sm:$0x1] %vm9252_vm8, %v2892_v37  ;;  %v3352_v39 = vpop.permute.xlu0 %3351  ;;  %vm9264_vm8 = vmmov %vm9261_vm13 }
 0x333   :  { %3354 = vst.msk [vmem:[#allocation3 + $0xb0] sm:$0xf0] %vm9253_vm15, %v3352_v39  ;;  %vm9265_vm15 = vmmov %vm9262_vm14 }
 0x334   :  { %3355 = vst.msk [vmem:[#allocation3 + $0xc8] sm:$0x1] %vm9254_vm1, %v3352_v39  ;;  %v3449_v40 = vpop.permute.xlu1 %3448  ;;  %vm9266_vm1 = vmmov %vm9263_vm7 }
 0x335   :  { %3451 = vst.msk [vmem:[#allocation3 + $0x98] sm:$0x80] %vm9255_vm3, %v3449_v40  ;;  %vm6781_vm3 = vmmov 0  }
 0x336   :  { %3452 = vst.msk [vmem:[#allocation3 + $0xb0] sm:$0xf] %vm9256_vm5, %v3449_v40  ;;  %v3665_v53 = vld [vmem:[#allocation3 + $0x90] sm:$0xff]  ;;  %vm9267_vm5 = vcmask 261120  }
 0x338   :  { %v3021_v42 = vpop.permute.xlu1 %3020 }
 0x339   :  { %v3457_v41 = vpop.permute.xlu0 %3456  ;;  %3023 = vst.msk [vmem:[#allocation3 + $0xa8] sm:$0xf0] %vm9259_vm12, %v3021_v42  ;;  %vm4008_vm12 = vcmask 523264  }
 0x33a   :  { %3459 = vst.msk [vmem:[#allocation3 + $0xb0] sm:$0xf0] %vm9257_vm9, %v3457_v41  ;;  %vm9270_vm9 = vmmov %vm9267_vm5 }
 0x33b   :  { %3460 = vst.msk [vmem:[#allocation3 + $0xc8] sm:$0x1] %vm9258_vm0, %v3457_v41  ;;  %vm9271_vm0 = vmmov %vm9267_vm5  ;;  %v8712_v41 = vld [vmem:[%s9206_s4] ss:$0 sm:$0xff] }
 0x33c   :  { %3024 = vst.msk [vmem:[#allocation3 + $0xc0] sm:$0x1] %vm9260_vm4, %v3021_v42  ;;  %v3554_v44 = vpop.permute.xlu1 %3553  ;;  %vm4020_vm4 = vcmask 518144  }
 0x33d   :  { %v3562_v43 = vpop.permute.xlu0 %3561  ;;  %3556 = vst.msk [vmem:[#allocation3 + $0x98] sm:$0x80] %vm9249_vm6, %v3554_v44  ;;  %vm4017_vm6 = vcmask 521216  }
 0x33e   :  { %3564 = vst.msk [vmem:[#allocation3 + $0xb0] sm:$0xf0] %vm9261_vm13, %v3562_v43  ;;  %vm4026_vm13 = vcmask 521219  }
 0x33f   :  { %3565 = vst.msk [vmem:[#allocation3 + $0xc8] sm:$0x1] %vm9262_vm14, %v3562_v43  ;;  %vm4040_vm14 = vcmask 519169  }
 0x340   :  { %3557 = vst.msk [vmem:[#allocation3 + $0xb0] sm:$0xf] %vm9250_vm2, %v3554_v44  ;;  %vm4032_vm2 = vcmask 523270  }
 0x341   :  { %v3361_v45 = vpop.permute.xlu0 %3360 }
 0x342   :  { %3363 = vst.msk [vmem:[#allocation3 + $0xc8] sm:$0x3e] %vm9263_vm7, %v3361_v45  ;;  %v3150_v46 = vpop.permute.xlu1 %3149  ;;  %vm4034_vm7 = vcmask 516096  }
 0x343   :  { %3152 = vst.msk [vmem:[#allocation3 + $0xa8] sm:$0xf0] %vm9264_vm8, %v3150_v46  ;;  %vm4046_vm8 = vcmask 522244  }
 0x344   :  { %3153 = vst.msk [vmem:[#allocation3 + $0xc0] sm:$0x1] %vm9265_vm15, %v3150_v46  ;;  %v3666_v49 = vld [vmem:[#allocation3 + $0x98] sm:$0xff]  ;;  %vm4052_vm15 = vcmask 523271  }
 0x345   :  { %v3466_v47 = vpop.permute.xlu0 %3465 }
 0x346   :  { %3468 = vst.msk [vmem:[#allocation3 + $0xc8] sm:$0x3e] %vm2961_vm11, %v3466_v47  ;;  %v2901_v48 = vpop.permute.xlu1 %2900 }
 0x347   :  { %v3669_v50 = vld [vmem:[#allocation3 + $0xb0] sm:$0xff]  ;;  %2903 = vst.msk [vmem:[#allocation3 + $0xc0] sm:$0x3e] %vm9266_vm1, %v2901_v48  ;;  %vm4054_vm1 = vcmask 517120  }
 0x348   :  { %v3684_v51 = vpack.c.bf16 %v3669_v50, %v3666_v49 }
 0x349   :  { %v3571_v32 = vpop.permute.xlu0 %3570 }
 0x34a   :  { %3573 = vst.msk [vmem:[#allocation3 + $0xc8] sm:$0x3e] %vm3090_vm10, %v3571_v32  ;;  %3911 = vmatprep.mubr.bf16.mxu1 %v3684_v51  ;;  %v3030_v52 = vpop.permute.xlu1 %3029  ;;  %v3668_v54 = vld [vmem:[#allocation3 + $0xa8] sm:$0xff] }
 0x34b   :  { %3032 = vst.msk [vmem:[#allocation3 + $0xc0] sm:$0x3e] %vm2961_vm11, %v3030_v52  ;;  %v3683_v55 = vpack.c.bf16 %v3668_v54, %v3665_v53  ;;  %vm9269_vm11 = vmmov %vm9267_vm5  ;;  %v6679_v53 = vld [vmem:[%s9207_s5 + $0x40] sm:$0xff]  }
 0x34c   :  { %6404 = vmatprep.subr.bf16.mxu1 %v6679_v53 }
 0x34d   :  { %3912 = vmatmul.mubr.bf16.gmra.mrb[12].mxu1 %v3683_v55 }
 0x34e   :  { %v3159_v56 = vpop.permute.xlu1 %3158 }
 0x34f   :  { %3161 = vst.msk [vmem:[#allocation3 + $0xc0] sm:$0x3e] %vm3090_vm10, %v3159_v56  ;;  %vm9268_vm10 = vmmov %vm9267_vm5 }
 0x351   :  { %v3672_v57 = vld [vmem:[#allocation3 + $0xc8] sm:$0x3f] }
 0x352   :  { %v3687_v59 = vpack.c.bf16 %v3672_v57, %v3672_v57 }
 0x354   :  { %3919 = vmatprep.mubr.bf16.mxu1 %v3687_v59 }
 0x356   :  { %v3671_v60 = vld [vmem:[#allocation3 + $0xc0] sm:$0x3f] }
 0x357   :  { %v3686_v61 = vpack.c.bf16 %v3671_v60, %v3671_v60 }
 0x359   :  { %3920 = vmatmul.mubr.bf16.gmra.mrb[16].mxu1 %v3686_v61 }
 0x35a   :  { %6514 = vmatprep.mubr.msk.bf16.mxu1 %vm6781_vm3, %v6780_v38 }
 0x361   :  { %6515 = vmatmul.mubr.msk.bf16.vlgmr.msra.gmra.mrb[20].mxu1 %vm9267_vm5, %v3676_v63  ;;  %vm4060_vm5 = vcmask 520194  }
 0x362   :  { %6518 = vmatprep.mubr.msk.bf16.mxu1 %vm6781_vm3, %v6780_v38  ;;  %6405 = vmatpush3.bf16.msra.mxu1 %v6680_v1 }
 0x369   :  { %6519 = vmatmul.mubr.msk.bf16.gmra.mrb[24].mxu1 %vm9268_vm10, %v3679_v2  ;;  %vm4080_vm10 = vcmask 1042944  }
 0x36a   :  { %6522 = vmatprep.mubr.msk.bf16.mxu1 %vm6781_vm3, %v6780_v38 }
 0x371   :  { %6523 = vmatmul.mubr.msk.bf16.gmra.mrb[28].mxu1 %vm9269_vm11, %v3682_v5  ;;  %vm4088_vm11 = vcmask 1046019  }
 0x372   :  { %6526 = vmatprep.mubr.msk.bf16.mxu1 %vm6781_vm3, %v6780_v38 }
 0x379   :  { %6527 = vmatmul.mubr.msk.bf16.gmra.mrb[32].mxu1 %vm9270_vm9, %v3685_v8  ;;  %vm4106_vm9 = vcmask 1043969  }
 0x37a   :  { %6530 = vmatprep.mubr.msk.bf16.mxu1 %vm6781_vm3, %v6780_v38  ;;  %vm4066_vm3 = vcmask 523269  }
 0x381   :  { %6531 = vmatmul.mubr.msk.bf16.gmra.mrb[36].mxu1 %vm9271_vm0, %v3688_v10  ;;  %vm4096_vm0 = vcmask 1048070  }
 0x3b6   :  { %v6367_v11 = vpop.f32.mrb[0].mxu1 }
 0x3b7   :  { %v6368_v12 = vpop.f32.mrb[1].mxu1 }
 0x3b8   :  { %v6369_v13 = vadd.f32 %v6368_v12, %v6367_v11  ;;  %v6370_v14 = vpop.f32.mrb[2].mxu1 }
 0x3b9   :  { %v6371_v15 = vpop.f32.mrb[3].mxu1 }
 0x3ba   :  { %v6372_v16 = vadd.f32 %v6371_v15, %v6370_v14  ;;  %v3890_v42 = vadd.f32 %v6369_v13, %v8712_v41 }
 0x3bc   :  { %v3893_v46 = vadd.f32 %v6372_v16, %v8712_v41 }
 0x3d6   :  { %v6373_v17 = vpop.f32.mrb[4].mxu1 }
 0x3d7   :  { %v6374_v18 = vpop.f32.mrb[5].mxu1 }
 0x3d8   :  { %v6375_v19 = vadd.f32 %v6374_v18, %v6373_v17  ;;  %v6376_v20 = vpop.f32.mrb[6].mxu1 }
 0x3d9   :  { %v6377_v21 = vpop.f32.mrb[7].mxu1 }
 0x3da   :  { %v6378_v22 = vadd.f32 %v6377_v21, %v6376_v20  ;;  %v3898_v32 = vadd.f32 %v6375_v19, %v8712_v41 }
 0x3dc   :  { %v3901_v56 = vadd.f32 %v6378_v22, %v8712_v41 }
 0x3fa   :  { %v6379_v23 = vpop.f32.mrb[8].mxu1 }
 0x3fb   :  { %v6380_v24 = vpop.f32.mrb[9].mxu1 }
 0x3fc   :  { %v6381_v25 = vadd.f32 %v6380_v24, %v6379_v23  ;;  %v6382_v38 = vpop.f32.mrb[10].mxu1 }
 0x3fd   :  { %v6383_v26 = vpop.f32.mrb[11].mxu1 }
 0x3fe   :  { %v8701_v27 = vadd.f32 %v6383_v26, %v6382_v38  ;;  %v3906_v5 = vadd.f32 %v6381_v25, %v8712_v41 }
 0x400   :  { %v3909_v12 = vadd.f32 %v8701_v27, %v8712_v41 }
 0x420   :  { %v6385_v28 = vpop.f32.mrb[12].mxu1 }
 0x421   :  { %v6386_v29 = vpop.f32.mrb[13].mxu1 }
 0x422   :  { %v8703_v30 = vadd.f32 %v6386_v29, %v6385_v28  ;;  %v6388_v31 = vpop.f32.mrb[14].mxu1 }
 0x423   :  { %v6389_v33 = vpop.f32.mrb[15].mxu1 }
 0x424   :  { %v8705_v34 = vadd.f32 %v6389_v33, %v6388_v31  ;;  %v3914_v29 = vadd.f32 %v8703_v30, %v8712_v41 }
 0x426   :  { %v3917_v30 = vadd.f32 %v8705_v34, %v8712_v41 }
 0x42c   :  { %v6391_v35 = vpop.f32.mrb[16].mxu1 }
 0x42d   :  { %v6392_v36 = vpop.f32.mrb[17].mxu1 }
 0x42e   :  { %v8707_v37 = vadd.f32 %v6392_v36, %v6391_v35  ;;  %v6394_v39 = vpop.f32.mrb[18].mxu1 }
 0x42f   :  { %v6395_v40 = vpop.f32.mrb[19].mxu1 }
 0x430   :  { %v6681_v40 = vld [vmem:[%s9207_s5 + $0x48] sm:$0xff]  }
 0x431   :  { %6406 = vmatprep.subr.bf16.mxu1 %v6681_v40 }
 0x434   :  { %v3961_v43 = vpop.f32.mrb[20].mxu1 }
 0x435   :  { %v3962_v44 = vadd.f32 %v3961_v43, %v3890_v42  ;;  %v6516_v45 = vpop.f32.mrb[21].mxu1 }
 0x436   :  { %v3964_v47 = vpop.f32.mrb[22].mxu1 }
 0x437   :  { %v3999_v48 = vmax.f32 %v3962_v44, 0.0  ;;  %v3965_v49 = vadd.f32 %v3964_v47, %v3893_v46  ;;  %v6517_v50 = vpop.f32.mrb[23].mxu1  ;;  %v6682_v46 = vld [vmem:[%s9207_s5 + $0x8] sm:$0xff]  }
 0x438   :  { %6407 = vmatpush3.bf16.msra.mxu1 %v6682_v46 }
 0x439   :  { %4009 = vst.msk [vmem:[#allocation4] sm:$0xff] %vm4008_vm12, %v3999_v48  ;;  %v4000_v51 = vmax.f32 %v3965_v49, 0.0 }
 0x43b   :  { %4010 = vst.msk [vmem:[#allocation4 + $0x8] sm:$0xff] %vm4008_vm12, %v4000_v51 }
 0x43c   :  { %v3969_v52 = vpop.f32.mrb[24].mxu1 }
 0x43d   :  { %v3970_v54 = vadd.f32 %v3969_v52, %v3898_v32  ;;  %v6520_v55 = vpop.f32.mrb[25].mxu1  ;;  %v6683_v32 = vld [vmem:[%s9207_s5 + $0x50] sm:$0xff]  }
 0x43e   :  { %v3972_v57 = vpop.f32.mrb[26].mxu1  ;;  %6408 = vmatprep.subr.bf16.mxu1 %v6683_v32 }
 0x43f   :  { %v4001_v59 = vmax.f32 %v3970_v54, 0.0  ;;  %v3973_v60 = vadd.f32 %v3972_v57, %v3901_v56  ;;  %v6521_v61 = vpop.f32.mrb[27].mxu1  ;;  %v6684_v54 = vld [vmem:[%s9207_s5 + $0x10] sm:$0xff]  }
 0x440   :  { %v4201_v58 = vld [vmem:[#allocation4 + $0x5] sm:$0x7]  ;;  %v4155_v62 = vld [vmem:[#allocation4 + $0x2] sm:$0x7]  ;;  %6409 = vmatpush3.bf16.msra.mxu1 %v6684_v54 }
 0x441   :  { %4011 = vst.msk [vmem:[#allocation4 + $0x10] sm:$0xff] %vm4008_vm12, %v4001_v59  ;;  %v4002_v63 = vmax.f32 %v3973_v60, 0.0  ;;  %4203 = vrot.lane.b32.xlu0 %v4201_v58, %s6778_s17  ;;  %v4019_v0 = vld [vmem:[#allocation4] sm:$0x7]  ;;  %v4022_v4 = vld [vmem:[#allocation4 + $0x5] sm:$0x7]  ;;  %v3922_v59 = vadd.f32 %v8707_v37, %v8712_v41 }
 0x442   :  { %4156 = vst.msk [vmem:[#allocation5 + $0x8] sm:$0x7] %vm4020_vm4, %v4155_v62  ;;  %v4503_v2 = vld [vmem:[#allocation4 + $0xc] sm:$0x7]  ;;  %4021 = vst.msk [vmem:[#allocation5] sm:$0x7] %vm4020_vm4, %v4019_v0 }
 0x443   :  { %v4207_v3 = vld [vmem:[#allocation4 + $0xa] sm:$0x7]  ;;  %4012 = vst.msk [vmem:[#allocation4 + $0x18] sm:$0xff] %vm4008_vm12, %v4002_v63  ;;  %v4075_v8 = vld [vmem:[#allocation4 + $0x1] sm:$0x7]  ;;  %v4024_v14 = vrot.slane %v4022_v4, 5 }
 0x444   :  { %v4209_v6 = vrot.slane %v4207_v3, 5  ;;  %4504 = vst.msk [vmem:[#allocation5 + $0x20] sm:$0x7] %vm4020_vm4, %v4503_v2  ;;  %v3977_v7 = vpop.f32.mrb[28].mxu1  ;;  %v4082_v9 = vld [vmem:[#allocation4 + $0x6] sm:$0x7] }
 0x445   :  { %v3978_v10 = vadd.f32 %v3977_v7, %v3906_v5  ;;  %v6524_v11 = vpop.f32.mrb[29].mxu1  ;;  %4077 = vrot.lane.b32.xlu0 %v4075_v8, %s6778_s17  ;;  %v4157_v13 = vld [vmem:[#allocation4 + $0x7] sm:$0x7]  ;;  %v4387_v17 = vld [vmem:[#allocation4 + $0xa] sm:$0x7]  ;;  %v4084_v22 = vrot.slane %v4082_v9, 5 }
 0x446   :  { %4210 = vrot.lane.b32.xlu1 %v4209_v6, %s6778_s17  ;;  %v3980_v15 = vpop.f32.mrb[30].mxu1  ;;  %v4159_v16 = vrot.slane %v4157_v13, 5  ;;  %v4273_v18 = vld [vmem:[#allocation4 + $0xb] sm:$0x7]  ;;  %4027 = vst.msk [vmem:[#allocation5] sm:$0x38] %vm4026_vm13, %v4024_v14 }
 0x447   :  { %v4003_v19 = vmax.f32 %v3978_v10, 0.0  ;;  %v3981_v20 = vadd.f32 %v3980_v15, %v3909_v12  ;;  %v6525_v21 = vpop.f32.mrb[31].mxu1  ;;  %4388 = vst.msk [vmem:[#allocation5 + $0x18] sm:$0x7] %vm4020_vm4, %v4387_v17  ;;  %v4275_v23 = vrot.slane %v4273_v18, 5  ;;  %v6685_v41 = vld [vmem:[%s9207_s5 + $0x58] sm:$0xff]  }
 0x448   :  { %v4271_v24 = vld [vmem:[#allocation4 + $0x6] sm:$0x7]  ;;  %v4505_v25 = vld [vmem:[#allocation4 + $0x11] sm:$0x7]  ;;  %v4433_v38 = vld [vmem:[#allocation4 + $0xb] sm:$0x7]  ;;  %6410 = vmatprep.subr.bf16.mxu1 %v6685_v41 }
 0x449   :  { %v4323_v26 = vld [vmem:[#allocation4 + $0xc] sm:$0x7]  ;;  %4161 = vst.msk [vmem:[#allocation5 + $0x8] sm:$0x38] %vm4026_vm13, %v4159_v16  ;;  %v4507_v27 = vrot.slane %v4505_v25, 5  ;;  %v4004_v28 = vmax.f32 %v3981_v20, 0.0  ;;  %4435 = vrot.lane.b32.xlu0 %v4433_v38, %s6778_s17 }
 0x44a   :  { %4272 = vst.msk [vmem:[#allocation5 + $0x10] sm:$0x7] %vm4020_vm4, %v4271_v24  ;;  %4085 = vrot.lane.b32.xlu1 %v4084_v22, %s6778_s17  ;;  %v4325_v31 = vrot.slane %v4323_v26, 5  ;;  %v4090_v33 = vld [vmem:[#allocation4 + $0xb] sm:$0x7]  ;;  %v6686_v26 = vld [vmem:[%s9207_s5 + $0x18] sm:$0xff]  }
 0x44b   :  { %4013 = vst.msk [vmem:[#allocation4 + $0x20] sm:$0xff] %vm4008_vm12, %v4003_v19  ;;  %4014 = vst.msk [vmem:[#allocation4 + $0x28] sm:$0xff] %vm4008_vm12, %v4004_v28  ;;  %v4317_v36 = vld [vmem:[#allocation4 + $0x7] sm:$0x7]  ;;  %v4222_v39 = vld [vmem:[#allocation4 + $0x14] sm:$0x7]  ;;  %6411 = vmatpush3.bf16.msra.mxu1 %v6686_v26 }
 0x44c   :  { %4277 = vst.msk [vmem:[#allocation5 + $0x10] sm:$0x38] %vm4026_vm13, %v4275_v23  ;;  %4509 = vst.msk [vmem:[#allocation5 + $0x20] sm:$0x38] %vm4026_vm13, %v4507_v27  ;;  %v3985_v35 = vpop.f32.mrb[32].mxu1  ;;  %v4092_v45 = vrot.slane %v4090_v33, 2 }
 0x44d   :  { %v3986_v42 = vadd.f32 %v3985_v35, %v3914_v29  ;;  %v6528_v43 = vpop.f32.mrb[33].mxu1  ;;  %4319 = vrot.lane.b32.xlu0 %v4317_v36, %s6778_s17  ;;  %v4224_v50 = vrot.slane %v4222_v39, 7  ;;  %v4168_v51 = vld [vmem:[#allocation4 + $0x11] sm:$0x7]  ;;  %v4516_v57 = vld [vmem:[#allocation4 + $0x1b] sm:$0x7] }
 0x44e   :  { %4326 = vrot.lane.b32.xlu1 %v4325_v31, %s6778_s17  ;;  %v3988_v44 = vpop.f32.mrb[34].mxu1  ;;  %v4100_v52 = vld [vmem:[#allocation4 + $0x10] sm:$0x7]  ;;  %v4170_v34 = vrot.slane %v4168_v51, 7  ;;  %v4108_v58 = vld [vmem:[#allocation4 + $0x15] sm:$0x7] }
 0x44f   :  { %v4005_v47 = vmax.f32 %v3986_v42, 0.0  ;;  %v3989_v48 = vadd.f32 %v3988_v44, %v3917_v30  ;;  %v6529_v49 = vpop.f32.mrb[35].mxu1  ;;  %v4214_v53 = vld [vmem:[#allocation4 + $0xf] sm:$0x7]  ;;  %v4102_v60 = vrot.slane %v4100_v52, 7  ;;  %v4518_v62 = vrot.slane %v4516_v57, 7 }
 0x450   :  { %v4439_v56 = vld [vmem:[#allocation4 + $0x10] sm:$0x7]  ;;  %4172 = vst.msk [vmem:[#allocation5 + $0x30] sm:$0xe] %vm4040_vm14, %v4170_v34  ;;  %v4216_v61 = vrot.slane %v4214_v53, 2  ;;  %v4110_v13 = vrot.slane %v4108_v58, 4 }
 0x451   :  { %4015 = vst.msk [vmem:[#allocation4 + $0x30] sm:$0xff] %vm4008_vm12, %v4005_v47  ;;  %v4006_v55 = vmax.f32 %v3989_v48, 0.0  ;;  %4093 = vrot.lane.b32.xlu0 %v4092_v45, %s6778_s17  ;;  %v4441_v0 = vrot.slane %v4439_v56, 5  ;;  %v4028_v1 = vld [vmem:[#allocation4 + $0xa] sm:$0x7]  ;;  %v6687_v31 = vld [vmem:[%s9207_s5 + $0x60] sm:$0xff]  }
 0x452   :  { %4225 = vrot.lane.b32.xlu1 %v4224_v50, %s6778_s17  ;;  %v4510_v2 = vld [vmem:[#allocation4 + $0x16] sm:$0x7]  ;;  %4520 = vst.msk [vmem:[#allocation5 + $0x48] sm:$0xe] %vm4040_vm14, %v4518_v62  ;;  %v4030_v5 = vrot.slane %v4028_v1, 2  ;;  %6412 = vmatprep.subr.bf16.mxu1 %v6687_v31  ;;  %v6689_v56 = vld [vmem:[%s9207_s5 + $0x68] sm:$0xff]  }
 0x453   :  { %4016 = vst.msk [vmem:[#allocation4 + $0x38] sm:$0xff] %vm4008_vm12, %v4006_v55  ;;  %v4512_v6 = vrot.slane %v4510_v2, 2  ;;  %v4036_v37 = vld [vmem:[#allocation4 + $0xf] sm:$0x7]  ;;  %v4162_v9 = vld [vmem:[#allocation4 + $0xc] sm:$0x7] }
 0x454   :  { %v3993_v63 = vpop.f32.mrb[36].mxu1  ;;  %v4038_v8 = vrot.slane %v4036_v37, 7  ;;  %v4389_v10 = vld [vmem:[#allocation4 + $0xf] sm:$0x7]  ;;  %4033 = vst.msk [vmem:[#allocation5] sm:$0xc0] %vm4032_vm2, %v4030_v5 }
 0x455   :  { %v3994_v3 = vadd.f32 %v3993_v63, %v3922_v59  ;;  %v6532_v4 = vpop.f32.mrb[37].mxu1  ;;  %4217 = vrot.lane.b32.xlu0 %v4216_v61, %s6778_s17  ;;  %4035 = vst.msk [vmem:[#allocation5 + $0x28] sm:$0x1] %vm4034_vm7, %v4030_v5  ;;  %4515 = vst.msk [vmem:[#allocation5 + $0x48] sm:$0x1] %vm4034_vm7, %v4512_v6  ;;  %v4164_v14 = vrot.slane %v4162_v9, 2 }
 0x456   :  { %4103 = vrot.lane.b32.xlu1 %v4102_v60, %s6778_s17  ;;  %v3996_v7 = vpop.f32.mrb[38].mxu1  ;;  %4514 = vst.msk [vmem:[#allocation5 + $0x20] sm:$0xc0] %vm4032_vm2, %v4512_v6  ;;  %v4391_v15 = vrot.slane %v4389_v10, 5  ;;  %v4454_v16 = vld [vmem:[#allocation4 + $0x1a] sm:$0x7] }
 0x457   :  { %v4007_v11 = vmax.f32 %v3994_v3, 0.0  ;;  %v6533_v12 = vpop.f32.mrb[39].mxu1  ;;  %v4446_v17 = vld [vmem:[#allocation4 + $0x15] sm:$0x7]  ;;  %4041 = vst.msk [vmem:[#allocation5 + $0x28] sm:$0xe] %vm4040_vm14, %v4038_v8 }
 0x458   :  { %v4042_v18 = vld [vmem:[#allocation4 + $0x14] sm:$0x7]  ;;  %4166 = vst.msk [vmem:[#allocation5 + $0x8] sm:$0xc0] %vm4032_vm2, %v4164_v14  ;;  %v4456_v20 = vrot.slane %v4454_v16, 7  ;;  %v4448_v21 = vrot.slane %v4446_v17, 2 }
 0x459   :  { %4018 = vst.msk [vmem:[#allocation4 + $0x40] sm:$0x3f] %vm4017_vm6, %v4007_v11  ;;  %4111 = vrot.lane.b32.xlu0 %v4110_v13, %s6778_s17  ;;  %v4338_v19 = vld [vmem:[#allocation4 + $0x16] sm:$0x7]  ;;  %v4330_v22 = vld [vmem:[#allocation4 + $0x11] sm:$0x7] }
 0x45a   :  { %4442 = vrot.lane.b32.xlu1 %v4441_v0, %s6778_s17  ;;  %4167 = vst.msk [vmem:[#allocation5 + $0x30] sm:$0x1] %vm4034_vm7, %v4164_v14  ;;  %v4044_v23 = vrot.slane %v4042_v18, 4  ;;  %v4340_v24 = vrot.slane %v4338_v19, 7  ;;  %v4116_v25 = vld [vmem:[#allocation4 + $0x24] sm:$0x7] }
 0x45b   :  { %4393 = vst.msk [vmem:[#allocation5 + $0x18] sm:$0x38] %vm4026_vm13, %v4391_v15  ;;  %v4229_v38 = vld [vmem:[#allocation4 + $0x19] sm:$0x7]  ;;  %v4332_v27 = vrot.slane %v4330_v22, 2  ;;  %v4118_v47 = vrot.slane %v4116_v25, 1 }
 0x45c   :  { %4047 = vst.msk [vmem:[#allocation5 + $0x28] sm:$0x70] %vm4046_vm8, %v4044_v23  ;;  %v4521_v28 = vld [vmem:[#allocation4 + $0x20] sm:$0x7]  ;;  %v4400_v29 = vld [vmem:[#allocation4 + $0x19] sm:$0x7] }
 0x45d   :  { %4449 = vrot.lane.b32.xlu0 %v4448_v21, %s6778_s17  ;;  %v4523_v33 = vrot.slane %v4521_v28, 4  ;;  %v4402_v35 = vrot.slane %v4400_v29, 7  ;;  %v4394_v36 = vld [vmem:[#allocation4 + $0x14] sm:$0x7]  ;;  %v4231_v30 = vrot.slane %v4229_v38, 4  ;;  %v6688_v50 = vld [vmem:[%s9207_s5 + $0x20] sm:$0xff]  }
 0x45e   :  { %4457 = vrot.lane.b32.xlu1 %v4456_v20, %s6778_s17  ;;  %v4284_v39 = vld [vmem:[#allocation4 + $0x15] sm:$0x7]  ;;  %v4461_v44 = vld [vmem:[#allocation4 + $0x1f] sm:$0x7]  ;;  %v4396_v45 = vrot.slane %v4394_v36, 2  ;;  %6413 = vmatpush3.bf16.msra.mxu1 %v6688_v50  ;;  %v6691_v1 = vld [vmem:[%s9207_s5 + $0x70] sm:$0xff]  }
 0x45f   :  { %4525 = vst.msk [vmem:[#allocation5 + $0x48] sm:$0x70] %vm4046_vm8, %v4523_v33  ;;  %v4286_v46 = vrot.slane %v4284_v39, 7  ;;  %v4236_v48 = vld [vmem:[#allocation4 + $0x28] sm:$0x7]  ;;  %v6690_v57 = vld [vmem:[%s9207_s5 + $0x28] sm:$0xff]   ;;  %6414 = vmatprep.subr.bf16.mxu1 %v6689_v56 }
 0x460   :  { %v4542_v40 = vld [vmem:[#allocation4 + $0x3e] sm:$0x7]  ;;  %v4544_v42 = vld [vmem:[#allocation4 + $0x43] sm:$0x7]  ;;  %4404 = vst.msk [vmem:[#allocation5 + $0x40] sm:$0xe] %vm4040_vm14, %v4402_v35 }
 0x461   :  { %v4546_v43 = vrot.slane %v4544_v42, 5  ;;  %4333 = vrot.lane.b32.xlu0 %v4332_v27, %s6778_s17  ;;  %4543 = vst.msk [vmem:[#allocation5 + $0x98] sm:$0x7] %vm4020_vm4, %v4542_v40  ;;  %v4278_v49 = vld [vmem:[#allocation4 + $0x10] sm:$0x7]  ;;  %v4463_v58 = vrot.slane %v4461_v44, 4 }
 0x462   :  { %4341 = vrot.lane.b32.xlu1 %v4340_v24, %s6778_s17  ;;  %v4048_v51 = vld [vmem:[#allocation4 + $0x23] sm:$0x7]  ;;  %v8806_v32 = vld [vmem:[#allocation4 + $0x2d] sm:$0x7]  ;;  %4398 = vst.msk [vmem:[#allocation5 + $0x18] sm:$0xc0] %vm4032_vm2, %v4396_v45  ;;  %6415 = vmatpush3.bf16.msra.mxu1 %v6690_v57 }
 0x463   :  { %4548 = vst.msk [vmem:[#allocation5 + $0x98] sm:$0x38] %vm4026_vm13, %v4546_v43  ;;  %v4280_v52 = vrot.slane %v4278_v49, 2  ;;  %v4050_v53 = vrot.slane %v4048_v51, 1  ;;  %v4526_v34 = vld [vmem:[#allocation4 + $0x2f] sm:$0x7]  ;;  %6416 = vmatprep.subr.bf16.mxu1 %v6691_v1 }
 0x464   :  { %4399 = vst.msk [vmem:[#allocation5 + $0x40] sm:$0x1] %vm4034_vm7, %v4396_v45  ;;  %v4528_v54 = vrot.slane %v4526_v34, 1  ;;  %v4173_v55 = vld [vmem:[#allocation4 + $0x16] sm:$0x7]  ;;  %v4238_v3 = vrot.slane %v4236_v48, 1 }
 0x465   :  { %4288 = vst.msk [vmem:[#allocation5 + $0x38] sm:$0xe] %vm4040_vm14, %v4286_v46  ;;  %4232 = vrot.lane.b32.xlu0 %v4231_v30, %s6778_s17  ;;  %v4175_v59 = vrot.slane %v4173_v55, 4  ;;  %v4178_v60 = vld [vmem:[#allocation4 + $0x25] sm:$0x7]  ;;  %v4246_v7 = vrot.slane %v8806_v32, 6 }
 0x466   :  { %4119 = vrot.lane.b32.xlu1 %v4118_v47, %s6778_s17  ;;  %4282 = vst.msk [vmem:[#allocation5 + $0x10] sm:$0xc0] %vm4032_vm2, %v4280_v52  ;;  %v4405_v61 = vld [vmem:[#allocation4 + $0x1e] sm:$0x7]  ;;  %v4251_v62 = vld [vmem:[#allocation4 + $0x32] sm:$0x7] }
 0x467   :  { %4283 = vst.msk [vmem:[#allocation5 + $0x38] sm:$0x1] %vm4034_vm7, %v4280_v52  ;;  %v4180_v63 = vrot.slane %v4178_v60, 1  ;;  %v4407_v0 = vrot.slane %v4405_v61, 4  ;;  %v4189_v2 = vld [vmem:[#allocation4 + $0x2f] sm:$0x7] }
 0x468   :  { %4053 = vst.msk [vmem:[#allocation5 + $0x28] sm:$0x80] %vm4052_vm15, %v4050_v53  ;;  %4530 = vst.msk [vmem:[#allocation5 + $0x48] sm:$0x80] %vm4052_vm15, %v4528_v54  ;;  %v8829_v4 = vld [vmem:[#allocation4 + $0x2a] sm:$0x7] }
 0x469   :  { %4055 = vst.msk [vmem:[#allocation5 + $0x50] sm:$0x3] %vm4054_vm1, %v4050_v53  ;;  %4531 = vst.msk [vmem:[#allocation5 + $0x70] sm:$0x3] %vm4054_vm1, %v4528_v54  ;;  %v8831_v5 = vld [vmem:[#allocation4 + $0x29] sm:$0x7]  ;;  %4464 = vrot.lane.b32.xlu0 %v4463_v58, %s6778_s17 }
 0x46a   :  { %4177 = vst.msk [vmem:[#allocation5 + $0x30] sm:$0x70] %vm4046_vm8, %v4175_v59  ;;  %v4191_v6 = vrot.slane %v4189_v2, 3  ;;  %v4537_v37 = vld [vmem:[#allocation4 + $0x39] sm:$0x7]  ;;  %v6692_v8 = vld [vmem:[%s9207_s5 + $0x30] sm:$0xff]   ;;  %4239 = vrot.lane.b32.xlu1 %v4238_v3, %s6778_s17 }
 0x46b   :  { %v4184_v41 = vld [vmem:[#allocation4 + $0x2a] sm:$0x7]  ;;  %4182 = vst.msk [vmem:[#allocation5 + $0x30] sm:$0x80] %vm4052_vm15, %v4180_v63  ;;  %v4539_v9 = vrot.slane %v4537_v37, 3  ;;  %v6693_v13 = vld [vmem:[%s9207_s5 + $0x78] sm:$0xff]   ;;  %6417 = vmatpush3.bf16.msra.mxu1 %v6692_v8 }
 0x46c   :  { %4183 = vst.msk [vmem:[#allocation5 + $0x58] sm:$0x3] %vm4054_vm1, %v4180_v63  ;;  %v4186_v10 = vrot.slane %v4184_v41, 6  ;;  %v4532_v11 = vld [vmem:[#allocation4 + $0x34] sm:$0x7]  ;;  %v4253_v20 = vrot.slane %v4251_v62, 3  ;;  %6418 = vmatprep.subr.bf16.mxu1 %v6693_v13 }
 0x46d   :  { %4409 = vst.msk [vmem:[#allocation5 + $0x40] sm:$0x70] %vm4046_vm8, %v4407_v0  ;;  %v4534_v12 = vrot.slane %v4532_v11, 6  ;;  %v4294_v14 = vld [vmem:[#allocation4 + $0x29] sm:$0x7]  ;;  %v4354_v24 = vrot.slane %v8829_v4, 1  ;;  %4247 = vrot.lane.b32.xlu0 %v4246_v7, %s6778_s17 }
 0x46e   :  { %4193 = vst.msk [vmem:[#allocation5 + $0x58] sm:$0xe0] %vm4066_vm3, %v4191_v6  ;;  %v4056_v15 = vld [vmem:[#allocation4 + $0x28] sm:$0x7]  ;;  %4541 = vst.msk [vmem:[#allocation5 + $0x70] sm:$0xe0] %vm4066_vm3, %v4539_v9  ;;  %4254 = vrot.lane.b32.xlu1 %v4253_v20, %s6778_s17 }
 0x46f   :  { %4188 = vst.msk [vmem:[#allocation5 + $0x58] sm:$0x1c] %vm4060_vm5, %v4186_v10  ;;  %v4296_v16 = vrot.slane %v4294_v14, 1  ;;  %v4058_v17 = vrot.slane %v4056_v15, 6  ;;  %v4062_v18 = vld [vmem:[#allocation4 + $0x2d] sm:$0x7] }
 0x470   :  { %v4068_v19 = vld [vmem:[#allocation4 + $0x32] sm:$0x7]  ;;  %4536 = vst.msk [vmem:[#allocation5 + $0x70] sm:$0x1c] %vm4060_vm5, %v4534_v12  ;;  %v4064_v21 = vrot.slane %v4062_v18, 3  ;;  %v4128_v25 = vrot.slane %v8831_v5, 6 }
 0x471   :  { %4069 = vst.msk [vmem:[#allocation5 + $0x78] sm:$0x7] %vm4020_vm4, %v4068_v19  ;;  %v4410_v22 = vld [vmem:[#allocation4 + $0x2d] sm:$0x7]  ;;  %v4194_v23 = vld [vmem:[#allocation4 + $0x34] sm:$0x7] }
 0x472   :  { %v6694_v38 = vld [vmem:[%s9207_s5 + $0x38] sm:$0xff]   ;;  %4298 = vst.msk [vmem:[#allocation5 + $0x38] sm:$0x80] %vm4052_vm15, %v4296_v16  ;;  %v4412_v26 = vrot.slane %v4410_v22, 1  ;;  %v4196_v27 = vld [vmem:[#allocation4 + $0x39] sm:$0x7]  ;;  %4355 = vrot.lane.b32.xlu1 %v4354_v24, %s6778_s17  ;;  %4129 = vrot.lane.b32.xlu0 %v4128_v25, %s6778_s17 }
 0x473   :  { %4299 = vst.msk [vmem:[#allocation5 + $0x60] sm:$0x3] %vm4054_vm1, %v4296_v16  ;;  %v6695_v28 = vld [vmem:[%s9207_s5 + $0xc0] sm:$0xff]   ;;  %v4198_v29 = vrot.slane %v4196_v27, 5  ;;  %v4416_v39 = vld [vmem:[#allocation4 + $0x32] sm:$0x7]  ;;  %6419 = vmatpush3.bf16.msra.mxu1 %v6694_v38 }
 0x474   :  { %4061 = vst.msk [vmem:[#allocation5 + $0x50] sm:$0x1c] %vm4060_vm5, %v4058_v17  ;;  %v4289_v31 = vld [vmem:[#allocation4 + $0x1a] sm:$0x7]  ;;  %v4070_v33 = vld [vmem:[#allocation4 + $0x37] sm:$0x7]  ;;  %6432 = vmatprep.subr.bf16.mxu1 %v6695_v28 }
 0x475   :  { %4195 = vst.msk [vmem:[#allocation5 + $0x80] sm:$0x7] %vm4020_vm4, %v4194_v23  ;;  %v4291_v35 = vrot.slane %v4289_v31, 4  ;;  %v4072_v36 = vrot.slane %v4070_v33, 5  ;;  %v4305_v40 = vld [vmem:[#allocation4 + $0x33] sm:$0x7] }
 0x476   :  { %4067 = vst.msk [vmem:[#allocation5 + $0x50] sm:$0xe0] %vm4066_vm3, %v4064_v21  ;;  %v4418_v42 = vrot.slane %v4416_v39, 6  ;;  %v4307_v43 = vrot.slane %v4305_v40, 3  ;;  %v4426_v30 = vld [vmem:[#allocation4 + $0x3c] sm:$0x7] }
 0x477   :  { %4414 = vst.msk [vmem:[#allocation5 + $0x40] sm:$0x80] %vm4052_vm15, %v4412_v26  ;;  %v4421_v44 = vld [vmem:[#allocation4 + $0x37] sm:$0x7]  ;;  %v4134_v45 = vld [vmem:[#allocation4 + $0x2e] sm:$0x7] }
 0x478   :  { %4415 = vst.msk [vmem:[#allocation5 + $0x68] sm:$0x3] %vm4054_vm1, %v4412_v26  ;;  %v4423_v46 = vrot.slane %v4421_v44, 3  ;;  %v4300_v47 = vld [vmem:[#allocation4 + $0x2e] sm:$0x7]  ;;  %v4136_v52 = vrot.slane %v4134_v45, 3 }
 0x479   :  { %4200 = vst.msk [vmem:[#allocation5 + $0x80] sm:$0x38] %vm4026_vm13, %v4198_v29  ;;  %4074 = vst.msk [vmem:[#allocation5 + $0x78] sm:$0x38] %vm4026_vm13, %v4072_v36  ;;  %v4302_v48 = vrot.slane %v4300_v47, 6  ;;  %vm4122_vm14 = vcmask 1048071  }
 0x47a   :  { %4293 = vst.msk [vmem:[#allocation5 + $0x38] sm:$0x70] %vm4046_vm8, %v4291_v35  ;;  %v4428_v49 = vld [vmem:[#allocation4 + $0x41] sm:$0x7]  ;;  %v4310_v50 = vld [vmem:[#allocation4 + $0x38] sm:$0x7]  ;;  %4137 = vrot.lane.b32.xlu1 %v4136_v52, %s6778_s17 }
 0x47b   :  { %4427 = vst.msk [vmem:[#allocation5 + $0x90] sm:$0x7] %vm4020_vm4, %v4426_v30  ;;  %v4430_v51 = vrot.slane %v4428_v49, 5  ;;  %4311 = vst.msk [vmem:[#allocation5 + $0x88] sm:$0x7] %vm4020_vm4, %v4310_v50  ;;  %vm4098_vm4 = vcmask 1040896  }
 0x47c   :  { %4420 = vst.msk [vmem:[#allocation5 + $0x68] sm:$0x1c] %vm4060_vm5, %v4418_v42  ;;  %v4312_v32 = vld [vmem:[#allocation4 + $0x3d] sm:$0x7]  ;;  %4304 = vst.msk [vmem:[#allocation5 + $0x60] sm:$0x1c] %vm4060_vm5, %v4302_v48 }
 0x47d   :  { %4309 = vst.msk [vmem:[#allocation5 + $0x60] sm:$0xe0] %vm4066_vm3, %v4307_v43  ;;  %4425 = vst.msk [vmem:[#allocation5 + $0x68] sm:$0xe0] %vm4066_vm3, %v4423_v46  ;;  %v4314_v53 = vrot.slane %v4312_v32, 5  ;;  %vm4124_vm2 = vcmask 1041920  }
 0x47e   :  { %v4142_v34 = vld [vmem:[#allocation4 + $0x33] sm:$0x7]  ;;  %v4468_v54 = vld [vmem:[#allocation4 + $0x2e] sm:$0x7]  ;;  %4432 = vst.msk [vmem:[#allocation5 + $0x90] sm:$0x38] %vm4026_vm13, %v4430_v51 }
 0x47f   :  { %4144 = vrot.lane.b32.xlu0 %v4142_v34, %s6778_s17  ;;  %4316 = vst.msk [vmem:[#allocation5 + $0x88] sm:$0x38] %vm4026_vm13, %v4314_v53  ;;  %v4470_v55 = vrot.slane %v4468_v54, 1  ;;  %v4258_v56 = vld [vmem:[#allocation4 + $0x37] sm:$0x7]  ;;  %vm4114_vm13 = vcmask 1047044  }
 0x480   :  { %v4264_v57 = vld [vmem:[#allocation4 + $0x3c] sm:$0x7]  ;;  %v4148_v58 = vld [vmem:[#allocation4 + $0x38] sm:$0x7]  ;;  %v4476_v62 = vld [vmem:[#allocation4 + $0x33] sm:$0x7] }
 0x481   :  { %v4345_v59 = vld [vmem:[#allocation4 + $0x1b] sm:$0x7]  ;;  %4471 = vrot.lane.b32.xlu1 %v4470_v55, %s6778_s17  ;;  %v4266_v60 = vrot.slane %v4264_v57, 5  ;;  %v4150_v63 = vrot.slane %v4148_v58, 5  ;;  %v4478_v0 = vrot.slane %v4476_v62, 6  ;;  %vm4140_vm7 = vcmask 1048069  }
 0x482   :  { %v4347_v61 = vrot.slane %v4345_v59, 4  ;;  %v4367_v1 = vld [vmem:[#allocation4 + $0x34] sm:$0x7]  ;;  %v4490_v3 = vld [vmem:[#allocation4 + $0x3d] sm:$0x7]  ;;  %vm4132_vm8 = vcmask 1044994  }
 0x483   :  { %4260 = vrot.lane.b32.xlu0 %v4258_v56, %s6778_s17  ;;  %v4369_v2 = vrot.slane %v4367_v1, 3  ;;  %v4483_v4 = vld [vmem:[#allocation4 + $0x38] sm:$0x7]  ;;  %v4360_v5 = vld [vmem:[#allocation4 + $0x2f] sm:$0x7]  ;;  %v6697_v47 = vld [vmem:[%s9207_s5 + $0xc8] sm:$0xff]  }
 0x484   :  { %v4485_v6 = vrot.slane %v4483_v4, 3  ;;  %v4362_v37 = vrot.slane %v4360_v5, 6  ;;  %v4496_v41 = vld [vmem:[#allocation4 + $0x42] sm:$0x7]  ;;  %v4374_v8 = vld [vmem:[#allocation4 + $0x39] sm:$0x7] }
 0x485   :  { %4267 = vrot.lane.b32.xlu1 %v4266_v60, %s6778_s17  ;;  %v4498_v7 = vrot.slane %v4496_v41, 5  ;;  %v4380_v9 = vld [vmem:[#allocation4 + $0x3e] sm:$0x7]  ;;  %v6699_v51 = vld [vmem:[%s9207_s5 + $0xd0] sm:$0xff]   ;;  %v6701_v34 = vld [vmem:[%s9207_s5 + $0xd8] sm:$0xff]  }
 0x486   :  { %v4382_v10 = vrot.slane %v4380_v9, 5  ;;  %v6696_v45 = vld [vmem:[%s9207_s5 + $0x80] sm:$0xff]   ;;  %v6698_v50 = vld [vmem:[%s9207_s5 + $0x88] sm:$0xff]   ;;  %v6700_v53 = vld [vmem:[%s9207_s5 + $0x90] sm:$0xff]  }
 0x487   :  { %4348 = vrot.lane.b32.xlu0 %v4347_v61, %s6778_s17  ;;  %v6702_v56 = vld [vmem:[%s9207_s5 + $0x98] sm:$0xff]   ;;  %v6703_v57 = vld [vmem:[%s9207_s5 + $0xe0] sm:$0xff]   ;;  %v6705_v58 = vld [vmem:[%s9207_s5 + $0xe8] sm:$0xff]  }
 0x488   :  { %v6704_v61 = vld [vmem:[%s9207_s5 + $0xa0] sm:$0xff]   ;;  %v6707_v4 = vld [vmem:[%s9207_s5 + $0xf0] sm:$0xff]  }
 0x489   :  { %4151 = vrot.lane.b32.xlu1 %v4150_v63, %s6778_s17  ;;  %v6708_v9 = vld [vmem:[%s9207_s5 + $0xb0] sm:$0xff]  }
 0x48b   :  { %4479 = vrot.lane.b32.xlu0 %v4478_v0, %s6778_s17 }
 0x48d   :  { %4370 = vrot.lane.b32.xlu1 %v4369_v2, %s6778_s17 }
 0x48f   :  { %4492 = vrot.lane.b32.xlu0 %v4490_v3, %s6778_s17  ;;  %v6706_v3 = vld [vmem:[%s9207_s5 + $0xa8] sm:$0xff]  }
 0x491   :  { %4486 = vrot.lane.b32.xlu1 %v4485_v6, %s6778_s17 }
 0x493   :  { %4363 = vrot.lane.b32.xlu0 %v4362_v37, %s6778_s17 }
 0x495   :  { %4499 = vrot.lane.b32.xlu1 %v4498_v7, %s6778_s17 }
 0x497   :  { %4376 = vrot.lane.b32.xlu0 %v4374_v8, %s6778_s17 }
 0x499   :  { %4383 = vrot.lane.b32.xlu1 %v4382_v10, %s6778_s17 }
 0x4b3   :  { %v4204_v11 = vpop.permute.xlu0 %4203 }
 0x4b4   :  { %4206 = vst.msk [vmem:[#allocation5 + $0x8] sm:$0x7] %vm4080_vm10, %v4204_v11 }
 0x4b7   :  { %v4078_v13 = vpop.permute.xlu0 %4077 }
 0x4b8   :  { %v4211_v12 = vpop.permute.xlu1 %4210  ;;  %4081 = vst.msk [vmem:[#allocation5] sm:$0x7] %vm4080_vm10, %v4078_v13 }
 0x4b9   :  { %4213 = vst.msk [vmem:[#allocation5 + $0x8] sm:$0x38] %vm4088_vm11, %v4211_v12  ;;  %v6709_v12 = vld [vmem:[%s9207_s5 + $0xf8] sm:$0xff]  }
 0x4bb   :  { %v4436_v15 = vpop.permute.xlu0 %4435 }
 0x4bc   :  { %v4086_v14 = vpop.permute.xlu1 %4085  ;;  %4438 = vst.msk [vmem:[#allocation5 + $0x18] sm:$0x7] %vm4080_vm10, %v4436_v15  ;;  %v6710_v15 = vld [vmem:[%s9207_s5 + $0xb8] sm:$0xff]  }
 0x4bd   :  { %4089 = vst.msk [vmem:[#allocation5] sm:$0x38] %vm4088_vm11, %v4086_v14 }
 0x4bf   :  { %v4320_v17 = vpop.permute.xlu0 %4319 }
 0x4c0   :  { %v4327_v16 = vpop.permute.xlu1 %4326  ;;  %4322 = vst.msk [vmem:[#allocation5 + $0x10] sm:$0x7] %vm4080_vm10, %v4320_v17 }
 0x4c1   :  { %4329 = vst.msk [vmem:[#allocation5 + $0x10] sm:$0x38] %vm4088_vm11, %v4327_v16  ;;  %v6711_v16 = vld [vmem:[%s9207_s5 + $0x100] sm:$0xff]  }
 0x4c3   :  { %v4094_v19 = vpop.permute.xlu0 %4093 }
 0x4c4   :  { %v4226_v18 = vpop.permute.xlu1 %4225  ;;  %4097 = vst.msk [vmem:[#allocation5] sm:$0xc0] %vm4096_vm0, %v4094_v19 }
 0x4c5   :  { %4228 = vst.msk [vmem:[#allocation5 + $0x30] sm:$0xe] %vm4106_vm9, %v4226_v18 }
 0x4c6   :  { %4099 = vst.msk [vmem:[#allocation5 + $0x28] sm:$0x1] %vm4098_vm4, %v4094_v19 }
 0x4c7   :  { %v4218_v21 = vpop.permute.xlu0 %4217 }
 0x4c8   :  { %v4104_v20 = vpop.permute.xlu1 %4103  ;;  %4220 = vst.msk [vmem:[#allocation5 + $0x8] sm:$0xc0] %vm4096_vm0, %v4218_v21 }
 0x4c9   :  { %4107 = vst.msk [vmem:[#allocation5 + $0x28] sm:$0xe] %vm4106_vm9, %v4104_v20 }
 0x4ca   :  { %4221 = vst.msk [vmem:[#allocation5 + $0x30] sm:$0x1] %vm4098_vm4, %v4218_v21  ;;  %v6712_v21 = vld [vmem:[%s9207_s5 + $0x108] sm:$0xff]  }
 0x4cb   :  { %v4112_v23 = vpop.permute.xlu0 %4111  ;;  %v4549_v44 = vld [vmem:[#allocation5] sm:$0xff] }
 0x4cc   :  { %v4443_v22 = vpop.permute.xlu1 %4442  ;;  %4115 = vst.msk [vmem:[#allocation5 + $0x28] sm:$0x70] %vm4114_vm13, %v4112_v23 }
 0x4cd   :  { %4445 = vst.msk [vmem:[#allocation5 + $0x18] sm:$0x38] %vm4088_vm11, %v4443_v22 }
 0x4cf   :  { %v4450_v25 = vpop.permute.xlu0 %4449  ;;  %v4550_v42 = vld [vmem:[#allocation5 + $0x8] sm:$0xff] }
 0x4d0   :  { %v4458_v24 = vpop.permute.xlu1 %4457  ;;  %4452 = vst.msk [vmem:[#allocation5 + $0x18] sm:$0xc0] %vm4096_vm0, %v4450_v25 }
 0x4d1   :  { %4460 = vst.msk [vmem:[#allocation5 + $0x40] sm:$0xe] %vm4106_vm9, %v4458_v24 }
 0x4d2   :  { %4453 = vst.msk [vmem:[#allocation5 + $0x40] sm:$0x1] %vm4098_vm4, %v4450_v25  ;;  %v6713_v25 = vld [vmem:[%s9207_s5 + $0x110] sm:$0xff]  }
 0x4d3   :  { %v4334_v26 = vpop.permute.xlu0 %4333 }
 0x4d4   :  { %v4342_v38 = vpop.permute.xlu1 %4341  ;;  %4336 = vst.msk [vmem:[#allocation5 + $0x10] sm:$0xc0] %vm4096_vm0, %v4334_v26 }
 0x4d5   :  { %4344 = vst.msk [vmem:[#allocation5 + $0x38] sm:$0xe] %vm4106_vm9, %v4342_v38 }
 0x4d6   :  { %4337 = vst.msk [vmem:[#allocation5 + $0x38] sm:$0x1] %vm4098_vm4, %v4334_v26 }
 0x4d7   :  { %v4233_v28 = vpop.permute.xlu0 %4232  ;;  %v4552_v10 = vld [vmem:[#allocation5 + $0x18] sm:$0xff] }
 0x4d8   :  { %v4120_v27 = vpop.permute.xlu1 %4119  ;;  %4235 = vst.msk [vmem:[#allocation5 + $0x30] sm:$0x70] %vm4114_vm13, %v4233_v28 }
 0x4d9   :  { %4123 = vst.msk [vmem:[#allocation5 + $0x28] sm:$0x80] %vm4122_vm14, %v4120_v27 }
 0x4da   :  { %4125 = vst.msk [vmem:[#allocation5 + $0x50] sm:$0x3] %vm4124_vm2, %v4120_v27  ;;  %v4558_v27 = vld [vmem:[#allocation5 + $0x48] sm:$0xff] }
 0x4db   :  { %v4465_v31 = vpop.permute.xlu0 %4464  ;;  %v4551_v19 = vld [vmem:[#allocation5 + $0x10] sm:$0xff] }
 0x4dc   :  { %v4240_v29 = vpop.permute.xlu1 %4239  ;;  %4467 = vst.msk [vmem:[#allocation5 + $0x40] sm:$0x70] %vm4114_vm13, %v4465_v31  ;;  %v6714_v31 = vld [vmem:[%s9207_s5 + $0x118] sm:$0xff]  }
 0x4dd   :  { %4242 = vst.msk [vmem:[#allocation5 + $0x30] sm:$0x80] %vm4122_vm14, %v4240_v29 }
 0x4de   :  { %4243 = vst.msk [vmem:[#allocation5 + $0x58] sm:$0x3] %vm4124_vm2, %v4240_v29  ;;  %v4553_v29 = vld [vmem:[#allocation5 + $0x20] sm:$0xff] }
 0x4df   :  { %v4248_v35 = vpop.permute.xlu0 %4247 }
 0x4e0   :  { %v4255_v33 = vpop.permute.xlu1 %4254  ;;  %4250 = vst.msk [vmem:[#allocation5 + $0x58] sm:$0x1c] %vm4132_vm8, %v4248_v35  ;;  %v4554_v36 = vld [vmem:[#allocation5 + $0x28] sm:$0xff]  ;;  %v4568_v35 = vld [vmem:[#allocation5 + $0x98] sm:$0x3f] }
 0x4e1   :  { %4257 = vst.msk [vmem:[#allocation5 + $0x58] sm:$0xe0] %vm4140_vm7, %v4255_v33  ;;  %v4569_v46 = vpack.c.bf16 %v4554_v36, %v4549_v44  ;;  %v4573_v33 = vpack.c.bf16 %v4558_v27, %v4553_v29  ;;  %v4563_v36 = vld [vmem:[#allocation5 + $0x70] sm:$0xff] }
 0x4e4   :  { %v4356_v39 = vpop.permute.xlu1 %4355  ;;  %v4130_v40 = vpop.permute.xlu0 %4129  ;;  %v4555_v43 = vld [vmem:[#allocation5 + $0x30] sm:$0xff] }
 0x4e5   :  { %4358 = vst.msk [vmem:[#allocation5 + $0x38] sm:$0x80] %vm4122_vm14, %v4356_v39  ;;  %v4570_v30 = vpack.c.bf16 %v4555_v43, %v4550_v42 }
 0x4e6   :  { %4359 = vst.msk [vmem:[#allocation5 + $0x60] sm:$0x3] %vm4124_vm2, %v4356_v39  ;;  %v4578_v39 = vpack.c.bf16 %v4568_v35, %v4563_v36 }
 0x4e7   :  { %4133 = vst.msk [vmem:[#allocation5 + $0x50] sm:$0x1c] %vm4132_vm8, %v4130_v40  ;;  %4912 = vmatprep.mubr.bf16.mxu1 %v4570_v30 }
 0x4e8   :  { %4913 = vmatmul.mubr.bf16.vlgmr.msra.gmra.mrb[40].mxu1 %v4569_v46  ;;  %v4560_v0 = vld [vmem:[#allocation5 + $0x58] sm:$0xff] }
 0x4e9   :  { %6433 = vmatpush3.bf16.msra.mxu1 %v6696_v45 }
 0x4ea   :  { %6434 = vmatprep.subr.bf16.mxu1 %v6697_v47 }
 0x4ec   :  { %v4138_v48 = vpop.permute.xlu1 %4137 }
 0x4ed   :  { %4141 = vst.msk [vmem:[#allocation5 + $0x50] sm:$0xe0] %vm4140_vm7, %v4138_v48  ;;  %6435 = vmatpush3.bf16.msra.mxu1 %v6698_v50 }
 0x4ee   :  { %6436 = vmatprep.subr.bf16.mxu1 %v6699_v51 }
 0x4f1   :  { %v4145_v49 = vpop.permute.xlu0 %4144  ;;  %6437 = vmatpush3.bf16.msra.mxu1 %v6700_v53 }
 0x4f2   :  { %4147 = vst.msk [vmem:[#allocation5 + $0x78] sm:$0x7] %vm4080_vm10, %v4145_v49  ;;  %6438 = vmatprep.subr.bf16.mxu1 %v6701_v34 }
 0x4f3   :  { %v4472_v32 = vpop.permute.xlu1 %4471 }
 0x4f4   :  { %4474 = vst.msk [vmem:[#allocation5 + $0x40] sm:$0x80] %vm4122_vm14, %v4472_v32  ;;  %v4559_v41 = vld [vmem:[#allocation5 + $0x50] sm:$0xff] }
 0x4f5   :  { %v4261_v52 = vpop.permute.xlu0 %4260  ;;  %4475 = vst.msk [vmem:[#allocation5 + $0x68] sm:$0x3] %vm4124_vm2, %v4472_v32  ;;  %6439 = vmatpush3.bf16.msra.mxu1 %v6702_v56  ;;  %v6276_v32 = vld [vmem:[%s9208_s6] ss:$0 sm:$0xff] }
 0x4f6   :  { %4263 = vst.msk [vmem:[#allocation5 + $0x80] sm:$0x7] %vm4080_vm10, %v4261_v52  ;;  %6440 = vmatprep.subr.bf16.mxu1 %v6703_v57 }
 0x4f7   :  { %v4268_v54 = vpop.permute.xlu1 %4267 }
 0x4f8   :  { %4270 = vst.msk [vmem:[#allocation5 + $0x80] sm:$0x38] %vm4088_vm11, %v4268_v54 }
 0x4f9   :  { %v4349_v55 = vpop.permute.xlu0 %4348  ;;  %6441 = vmatpush3.bf16.msra.mxu1 %v6704_v61 }
 0x4fa   :  { %4351 = vst.msk [vmem:[#allocation5 + $0x38] sm:$0x70] %vm4114_vm13, %v4349_v55  ;;  %6442 = vmatprep.subr.bf16.mxu1 %v6705_v58 }
 0x4fb   :  { %v4152_v59 = vpop.permute.xlu1 %4151  ;;  %v4557_v5 = vld [vmem:[#allocation5 + $0x40] sm:$0xff] }
 0x4fc   :  { %4154 = vst.msk [vmem:[#allocation5 + $0x78] sm:$0x38] %vm4088_vm11, %v4152_v59  ;;  %v4572_v11 = vpack.c.bf16 %v4557_v5, %v4552_v10  ;;  %v6782_v10 = vmov 1983009808  }
 0x4fd   :  { %v4480_v60 = vpop.permute.xlu0 %4479  ;;  %6443 = vmatpush3.bf16.msra.mxu1 %v6706_v3 }
 0x4fe   :  { %4482 = vst.msk [vmem:[#allocation5 + $0x68] sm:$0x1c] %vm4132_vm8, %v4480_v60  ;;  %6444 = vmatprep.subr.bf16.mxu1 %v6707_v4 }
 0x4ff   :  { %v4371_v62 = vpop.permute.xlu1 %4370  ;;  %v4565_v1 = vld [vmem:[#allocation5 + $0x80] sm:$0x3f] }
 0x500   :  { %4373 = vst.msk [vmem:[#allocation5 + $0x60] sm:$0xe0] %vm4140_vm7, %v4371_v62  ;;  %v4575_v2 = vpack.c.bf16 %v4565_v1, %v4560_v0 }
 0x501   :  { %v4493_v63 = vpop.permute.xlu0 %4492  ;;  %6445 = vmatpush3.bf16.msra.mxu1 %v6708_v9  ;;  %v4556_v17 = vld [vmem:[#allocation5 + $0x38] sm:$0xff] }
 0x502   :  { %4495 = vst.msk [vmem:[#allocation5 + $0x90] sm:$0x7] %vm4080_vm10, %v4493_v63  ;;  %4920 = vmatprep.mubr.bf16.mxu1 %v4575_v2  ;;  %6446 = vmatprep.subr.bf16.mxu1 %v6709_v12  ;;  %v4571_v20 = vpack.c.bf16 %v4556_v17, %v4551_v19  ;;  %v5043_v12 = vlaneseq }
 0x503   :  { %v4487_v6 = vpop.permute.xlu1 %4486  ;;  %v4564_v7 = vld [vmem:[#allocation5 + $0x78] sm:$0x3f] }
 0x504   :  { %4489 = vst.msk [vmem:[#allocation5 + $0x68] sm:$0xe0] %vm4140_vm7, %v4487_v6  ;;  %v4574_v8 = vpack.c.bf16 %v4564_v7, %v4559_v41 }
 0x505   :  { %v4364_v37 = vpop.permute.xlu0 %4363  ;;  %6447 = vmatpush3.bf16.msra.mxu1 %v6710_v15 }
 0x506   :  { %4366 = vst.msk [vmem:[#allocation5 + $0x60] sm:$0x1c] %vm4132_vm8, %v4364_v37  ;;  %4921 = vmatmul.mubr.bf16.gmra.mrb[44].mxu1 %v4574_v8  ;;  %6534 = vmatprep.subr.bf16.mxu1 %v6711_v16 }
 0x507   :  { %v4500_v13 = vpop.permute.xlu1 %4499  ;;  %4961 = vmatprep.mubr.bf16.mxu1 %v4572_v11  ;;  %v5041_v11 = vunpack.c.l.s4 %v6782_v10 }
 0x508   :  { %4502 = vst.msk [vmem:[#allocation5 + $0x90] sm:$0x38] %vm4088_vm11, %v4500_v13 }
 0x509   :  { %v4377_v14 = vpop.permute.xlu0 %4376 }
 0x50a   :  { %4379 = vst.msk [vmem:[#allocation5 + $0x88] sm:$0x7] %vm4080_vm10, %v4377_v14 }
 0x50b   :  { %v4384_v18 = vpop.permute.xlu1 %4383  ;;  %v4562_v22 = vld [vmem:[#allocation5 + $0x68] sm:$0xff] }
 0x50c   :  { %4386 = vst.msk [vmem:[#allocation5 + $0x88] sm:$0x38] %vm4088_vm11, %v4384_v18 }
 0x50d   :  { %v4561_v38 = vld [vmem:[#allocation5 + $0x60] sm:$0xff] }
 0x50e   :  { %4962 = vmatmul.mubr.bf16.vlgmr.msra.gmra.mrb[48].mxu1 %v4571_v20  ;;  %v5042_v20 = vunpack.c.0.s8 %v5041_v11 }
 0x50f   :  { %v4567_v23 = vld [vmem:[#allocation5 + $0x90] sm:$0x3f]  ;;  %6535 = vmatpush3.bf16.msra.mxu1 %v6711_v16 }
 0x510   :  { %v4577_v24 = vpack.c.bf16 %v4567_v23, %v4562_v22  ;;  %6536 = vmatprep.subr.bf16.mxu1 %v6712_v21 }
 0x512   :  { %4969 = vmatprep.mubr.bf16.mxu1 %v4577_v24 }
 0x513   :  { %v4566_v26 = vld [vmem:[#allocation5 + $0x88] sm:$0x3f]  ;;  %6537 = vmatpush3.bf16.msra.mxu1 %v6712_v21  ;;  %v9008_v21 = vshrl.u32 %v5043_v12, 7 }
 0x514   :  { %v4576_v28 = vpack.c.bf16 %v4566_v26, %v4561_v38  ;;  %6538 = vmatprep.subr.bf16.mxu1 %v6713_v25 }
 0x515   :  { %v9013_v22 = vsub.s32 %v5042_v20, %v9008_v21 }
 0x516   :  { %4970 = vmatmul.mubr.bf16.gmra.mrb[52].mxu1 %v4576_v28 }
 0x517   :  { %6539 = vmatpush3.bf16.msra.mxu1 %v6713_v25  ;;  %6542 = vmatprep.mubr.msk.bf16.mxu1 %vm4008_vm12, %v4573_v33 }
 0x518   :  { %6540 = vmatprep.subr.bf16.mxu1 %v6714_v31 }
 0x51b   :  { %6541 = vmatpush3.bf16.msra.mxu1 %v6714_v31 }
 0x51e   :  { %6543 = vmatmul.mubr.msk.bf16.vlgmr.msra.gmra.mrb[56].mxu1 %vm4008_vm12, %v4578_v39 }
 0x5bb   :  { %v6420_v40 = vpop.f32.mrb[40].mxu1 }
 0x5bc   :  { %v6421_v42 = vpop.f32.mrb[41].mxu1 }
 0x5bd   :  { %v6422_v43 = vadd.f32 %v6421_v42, %v6420_v40  ;;  %v6423_v30 = vpop.f32.mrb[42].mxu1 }
 0x5be   :  { %v6424_v44 = vpop.f32.mrb[43].mxu1 }
 0x5bf   :  { %v6425_v45 = vadd.f32 %v6424_v44, %v6423_v30  ;;  %v4915_v34 = vadd.f32 %v6422_v43, %v6276_v32 }
 0x5c1   :  { %v4918_v57 = vadd.f32 %v6425_v45, %v6276_v32 }
 0x5d9   :  { %v6426_v46 = vpop.f32.mrb[44].mxu1 }
 0x5da   :  { %v6427_v47 = vpop.f32.mrb[45].mxu1 }
 0x5db   :  { %v6428_v48 = vadd.f32 %v6427_v47, %v6426_v46  ;;  %v6429_v49 = vpop.f32.mrb[46].mxu1 }
 0x5dc   :  { %v6430_v50 = vpop.f32.mrb[47].mxu1 }
 0x5dd   :  { %v6431_v51 = vadd.f32 %v6430_v50, %v6429_v49  ;;  %v4923_v63 = vadd.f32 %v6428_v48, %v6276_v32 }
 0x5df   :  { %v4926_v3 = vadd.f32 %v6431_v51, %v6276_v32 }
 0x5e1   :  { %v6448_v52 = vpop.f32.mrb[48].mxu1 }
 0x5e2   :  { %v6449_v53 = vpop.f32.mrb[49].mxu1 }
 0x5e3   :  { %v6450_v54 = vadd.f32 %v6449_v53, %v6448_v52  ;;  %v6451_v55 = vpop.f32.mrb[50].mxu1 }
 0x5e4   :  { %v6452_v56 = vpop.f32.mrb[51].mxu1 }
 0x5e5   :  { %v6453_v59 = vadd.f32 %v6452_v56, %v6451_v55  ;;  %v4964_v60 = vadd.f32 %v6450_v54, %v4915_v34 }
 0x5e7   :  { %v4967_v61 = vadd.f32 %v6453_v59, %v4918_v57 }
 0x5e9   :  { %v6454_v58 = vpop.f32.mrb[52].mxu1 }
 0x5ea   :  { %v6455_v62 = vpop.f32.mrb[53].mxu1 }
 0x5eb   :  { %v6456_v0 = vadd.f32 %v6455_v62, %v6454_v58  ;;  %v6457_v1 = vpop.f32.mrb[54].mxu1 }
 0x5ec   :  { %v6458_v2 = vpop.f32.mrb[55].mxu1 }
 0x5ed   :  { %v6459_v4 = vadd.f32 %v6458_v2, %v6457_v1  ;;  %v4972_v5 = vadd.f32 %v6456_v0, %v4923_v63 }
 0x5ef   :  { %v4975_v6 = vadd.f32 %v6459_v4, %v4926_v3 }
 0x5f1   :  { %v6544_v37 = vpop.f32.mrb[56].mxu1 }
 0x5f2   :  { %v5021_v41 = vadd.f32 %v6544_v37, %v4972_v5  ;;  %v5012_v7 = vpop.f32.mrb[57].mxu1 }
 0x5f3   :  { %v5013_v8 = vadd.f32 %v5012_v7, %v4964_v60  ;;  %v6545_v9 = vpop.f32.mrb[58].mxu1 }
 0x5f4   :  { %v5029_v13 = vmax.f32 %v5021_v41, 0.0  ;;  %v5024_v14 = vadd.f32 %v6545_v9, %v4975_v6  ;;  %v5015_v15 = vpop.f32.mrb[59].mxu1 }
 0x5f5   :  { %v5027_v16 = vmax.f32 %v5013_v8, 0.0  ;;  %v5016_v17 = vadd.f32 %v5015_v15, %v4967_v61 }
 0x5f6   :  { %5033 = vst.msk [vmem:[#allocation6 + $0x10] sm:$0xff] %vm4008_vm12, %v5029_v13  ;;  %v5030_v18 = vmax.f32 %v5024_v14, 0.0 }
 0x5f7   :  { %5031 = vst.msk [vmem:[#allocation6] sm:$0xff] %vm4008_vm12, %v5027_v16  ;;  %v5028_v19 = vmax.f32 %v5016_v17, 0.0 }
 0x5f8   :  { %5034 = vst.msk [vmem:[#allocation6 + $0x18] sm:$0x3f] %vm4017_vm6, %v5030_v18 }
 0x5f9   :  { %5032 = vst.msk [vmem:[#allocation6 + $0x8] sm:$0xff] %vm4008_vm12, %v5028_v19 }
 0x5fe   :  { %v5055_v23 = vld [vmem:[#allocation6 + $0x3] ss:$15 sm:$0x3]  ;;  %v5038_v24 = vld [vmem:[#allocation6 + $0x1] ss:$15 sm:$0x3] }
 0x5ff   :  { %v5063_v25 = vrot.slane %v5055_v23, %v9013_v22  ;;  %v5046_v38 = vrot.slane %v5038_v24, %v9013_v22  ;;  %v5089_v26 = vld [vmem:[#allocation6 + $0x7] ss:$15 sm:$0x3]  ;;  %v5072_v28 = vld [vmem:[#allocation6 + $0x5] ss:$15 sm:$0x3] }
 0x600   :  { %v5154_v27 = vld [vmem:[#allocation6 + $0xe] ss:$15 sm:$0x3]  ;;  %v5123_v29 = vld [vmem:[#allocation6 + $0xb] ss:$15 sm:$0x3]  ;;  %v5097_v36 = vrot.slane %v5089_v26, %v9013_v22  ;;  %v5080_v39 = vrot.slane %v5072_v28, %v9013_v22 }
 0x601   :  { %5155 = vst.msk [vmem:[#allocation7 + $0xe] sm:$0x3] %vm4054_vm1, %v5154_v27  ;;  %5064 = vrot.lane.b32.xlu1 %v5063_v25, %s6778_s17  ;;  %5047 = vrot.lane.b32.xlu0 %v5046_v38, %s6778_s17  ;;  %v5106_v31 = vld [vmem:[#allocation6 + $0x9] ss:$15 sm:$0x3]  ;;  %v5131_v45 = vrot.slane %v5123_v29, %v9013_v22 }
 0x602   :  { %v5052_v33 = vld [vmem:[#allocation6 + $0x2] ss:$15 sm:$0x3]  ;;  %v5035_v35 = vld [vmem:[#allocation6] ss:$15 sm:$0x3]  ;;  %v5114_v46 = vrot.slane %v5106_v31, %v9013_v22 }
 0x603   :  { %5053 = vst.msk [vmem:[#allocation7 + $0x2] sm:$0x3] %vm4054_vm1, %v5052_v33  ;;  %5036 = vst.msk [vmem:[#allocation7] sm:$0x3] %vm4054_vm1, %v5035_v35 }
 0x604   :  { %v5086_v40 = vld [vmem:[#allocation6 + $0x6] ss:$15 sm:$0x3]  ;;  %v5069_v42 = vld [vmem:[#allocation6 + $0x4] ss:$15 sm:$0x3] }
 0x605   :  { %5087 = vst.msk [vmem:[#allocation7 + $0x6] sm:$0x3] %vm4054_vm1, %v5086_v40  ;;  %5070 = vst.msk [vmem:[#allocation7 + $0x4] sm:$0x3] %vm4054_vm1, %v5069_v42  ;;  %5098 = vrot.lane.b32.xlu1 %v5097_v36, %s6778_s17  ;;  %5081 = vrot.lane.b32.xlu0 %v5080_v39, %s6778_s17 }
 0x606   :  { %v5120_v43 = vld [vmem:[#allocation6 + $0xa] ss:$15 sm:$0x3]  ;;  %v5103_v30 = vld [vmem:[#allocation6 + $0x8] ss:$15 sm:$0x3] }
 0x607   :  { %5121 = vst.msk [vmem:[#allocation7 + $0xa] sm:$0x3] %vm4054_vm1, %v5120_v43  ;;  %5104 = vst.msk [vmem:[#allocation7 + $0x8] sm:$0x3] %vm4054_vm1, %v5103_v30 }
 0x608   :  { %v5137_v44 = vld [vmem:[#allocation6 + $0xc] ss:$15 sm:$0x3]  ;;  %v5140_v47 = vld [vmem:[#allocation6 + $0xd] ss:$15 sm:$0x3] }
 0x609   :  { %5138 = vst.msk [vmem:[#allocation7 + $0xc] sm:$0x3] %vm4054_vm1, %v5137_v44  ;;  %5132 = vrot.lane.b32.xlu1 %v5131_v45, %s6778_s17  ;;  %5115 = vrot.lane.b32.xlu0 %v5114_v46, %s6778_s17  ;;  %v5148_v48 = vrot.slane %v5140_v47, %v9013_v22 }
 0x60d   :  { %5149 = vrot.lane.b32.xlu0 %v5148_v48, %s6778_s17 }
 0x673   :  { %v5065_v49 = vpop.permute.xlu1 %5064  ;;  %v5048_v50 = vpop.permute.xlu0 %5047 }
 0x674   :  { %5067 = vst.msk [vmem:[#allocation7 + $0x2] sm:$0x3] %vm4124_vm2, %v5065_v49  ;;  %5050 = vst.msk [vmem:[#allocation7] sm:$0x3] %vm4124_vm2, %v5048_v50 }
 0x677   :  { %v5099_v51 = vpop.permute.xlu1 %5098  ;;  %v5082_v32 = vpop.permute.xlu0 %5081 }
 0x678   :  { %5101 = vst.msk [vmem:[#allocation7 + $0x6] sm:$0x3] %vm4124_vm2, %v5099_v51  ;;  %5084 = vst.msk [vmem:[#allocation7 + $0x4] sm:$0x3] %vm4124_vm2, %v5082_v32 }
 0x67b   :  { %v5133_v52 = vpop.permute.xlu1 %5132  ;;  %v5116_v53 = vpop.permute.xlu0 %5115 }
 0x67c   :  { %5135 = vst.msk [vmem:[#allocation7 + $0xa] sm:$0x3] %vm4124_vm2, %v5133_v52  ;;  %5118 = vst.msk [vmem:[#allocation7 + $0x8] sm:$0x3] %vm4124_vm2, %v5116_v53 }
 0x67f   :  { %v5150_v34 = vpop.permute.xlu0 %5149 }
 0x680   :  { %5152 = vst.msk [vmem:[#allocation7 + $0xc] sm:$0x3] %vm4124_vm2, %v5150_v34 }
 0x681   :  { %6772 = dma.done.wait [#allocation9], 30720 }
 0x682   :  { %6773 = vsyncadd [#allocation9], 4294936576  ;;  %v5215_v54 = vld [vmem:[#allocation8 + $0x8] sm:$0xff]  ;;  %v5217_v55 = vld [vmem:[#allocation8 + $0x18] sm:$0xff]  ;;  %s6783_s26 = smov [#allocation10]  }
 0x683   :  { %v5214_v56 = vld [vmem:[#allocation8] sm:$0xff]  ;;  %5479 = vmatprep.subr.bf16.mxu1 %v5215_v54  ;;  %5643 = vmatprep.subr.bf16.mxu0 %v5217_v55  ;;  %v5216_v57 = vld [vmem:[#allocation8 + $0x10] sm:$0xff]  ;;  %v5219_v59 = vld [vmem:[#allocation8 + $0x28] sm:$0xff]  ;;  %s6165_s27 = sshll.u32 %s6783_s26, 4  ;;  %s6166_s27 = int_to_ptr.vmem [resolvable:$true] %s6165_s27 }
 0x684   :  { %v5221_v60 = vld [vmem:[#allocation8 + $0x38] sm:$0xff]  ;;  %5480 = vmatpush1.bf16.msra.mxu1 %v5214_v56  ;;  %5644 = vmatpush1.bf16.msra.mxu0 %v5216_v57  ;;  %v5218_v61 = vld [vmem:[#allocation8 + $0x20] sm:$0xff]  ;;  %v5220_v58 = vld [vmem:[#allocation8 + $0x30] sm:$0xff]  ;;  %s6750_s28 = scalar_lea.vmem %s6166_s27, 32  ;;  %p6755_p1 = scmp.lt.s32.totalorder %s6166_s27, %s6166_s27 }
 0x685   :  { %5481 = vmatprep.subr.bf16.mxu1 %v5219_v59  ;;  %5645 = vmatprep.subr.bf16.mxu0 %v5221_v60  ;;  %v5223_v62 = vld [vmem:[#allocation8 + $0x48] sm:$0xff]  ;;  %v5225_v63 = vld [vmem:[#allocation8 + $0x58] sm:$0xff]  ;;  %v5222_v0 = vld [vmem:[#allocation8 + $0x40] sm:$0xff]  ;;  %p6751_p0 = scmp.ne.s32.totalorder %s6166_s27, %s6750_s28  ;;  %p6756_p2 = scmp.lt.s32.totalorder %s6750_s28, %s6750_s28 }
 0x686   :  { %v5224_v1 = vld [vmem:[#allocation8 + $0x50] sm:$0xff]  ;;  %v5227_v2 = vld [vmem:[#allocation8 + $0x68] sm:$0xff]  ;;  %v5229_v3 = vld [vmem:[#allocation8 + $0x78] sm:$0xff] }
 0x687   :  { %v5226_v4 = vld [vmem:[#allocation8 + $0x60] sm:$0xff]  ;;  %v5228_v5 = vld [vmem:[#allocation8 + $0x70] sm:$0xff]  ;;  %v5231_v6 = vld [vmem:[#allocation8 + $0x88] sm:$0xff]  ;;  %p6757_p3 = por %p6756_p2, %p6755_p1 }
 0x688   :  { %5482 = vmatpush1.bf16.msra.mxu1 %v5218_v61  ;;  %5646 = vmatpush1.bf16.msra.mxu0 %v5220_v58  ;;  %v5233_v37 = vld [vmem:[#allocation8 + $0x98] sm:$0xff]  ;;  %v5230_v41 = vld [vmem:[#allocation8 + $0x80] sm:$0xff]  ;;  %v5232_v7 = vld [vmem:[#allocation8 + $0x90] sm:$0xff] }
 0x689   :  { %5483 = vmatprep.subr.bf16.mxu1 %v5223_v62  ;;  %5647 = vmatprep.subr.bf16.mxu0 %v5225_v63  ;;  %v5235_v8 = vld [vmem:[#allocation8 + $0xa8] sm:$0xff]  ;;  %v5237_v9 = vld [vmem:[#allocation8 + $0xb8] sm:$0xff]  ;;  %v5234_v10 = vld [vmem:[#allocation8 + $0xa0] sm:$0xff]  ;;  %p6758_p4 = pnand %p6757_p3, %p6751_p0 }
 0x68a   :  { %v5236_v11 = vld [vmem:[#allocation8 + $0xb0] sm:$0xff]  ;;  %v5239_v12 = vld [vmem:[#allocation8 + $0xc8] sm:$0xff]  ;;  %v5241_v13 = vld [vmem:[#allocation8 + $0xd8] sm:$0xff] }
 0x68b   :  { %v9044_v14 = vld [vmem:[#allocation7] sm:$0xff]  ;;  %v5238_v16 = vld [vmem:[#allocation8 + $0xc0] sm:$0xff]  ;;  %v5243_v18 = vld [vmem:[#allocation8 + $0xe8] sm:$0xff] }
 0x68c   :  { %5484 = vmatpush1.bf16.msra.mxu1 %v5222_v0  ;;  %5648 = vmatpush1.bf16.msra.mxu0 %v5224_v1  ;;  %v9048_v15 = vrot.slane %v9044_v14, %v9013_v22  ;;  %v5240_v17 = vld [vmem:[#allocation8 + $0xd0] sm:$0xff]  ;;  %v5245_v19 = vld [vmem:[#allocation8 + $0xf8] sm:$0xff]  ;;  %v5242_v24 = vld [vmem:[#allocation8 + $0xe0] sm:$0xff]  ;;  %v5164_v54 = vcombine.high %v9044_v14, %v9044_v14 }
 0x68d   :  { %5485 = vmatprep.subr.bf16.mxu1 %v5227_v2  ;;  %5649 = vmatprep.subr.bf16.mxu0 %v5229_v3  ;;  %v5244_v25 = vld [vmem:[#allocation8 + $0xf0] sm:$0xff]  ;;  %v5247_v38 = vld [vmem:[#allocation8 + $0x108] sm:$0xff]  ;;  %v5249_v26 = vld [vmem:[#allocation8 + $0x118] sm:$0xff] }
 0x68e   :  { %v5179_v20 = vcombine.high %v9048_v15, %v9048_v15  ;;  %v5246_v27 = vld [vmem:[#allocation8 + $0x100] sm:$0xff]  ;;  %v5248_v28 = vld [vmem:[#allocation8 + $0x110] sm:$0xff]  ;;  %v5251_v29 = vld [vmem:[#allocation8 + $0x128] sm:$0xff]  ;;  %v9055_v60 = vrot.slane %v5164_v54, %v9013_v22  ;;  %v5206_v1 = vpack.c.bf16 %v9048_v15, %v9048_v15 }
 0x68f   :  { %v5253_v31 = vld [vmem:[#allocation8 + $0x138] sm:$0xff]  ;;  %v5250_v33 = vld [vmem:[#allocation8 + $0x120] sm:$0xff]  ;;  %v5252_v35 = vld [vmem:[#allocation8 + $0x130] sm:$0xff] }
 0x690   :  { %5486 = vmatpush1.bf16.msra.mxu1 %v5226_v4  ;;  %5650 = vmatpush1.bf16.msra.mxu0 %v5228_v5  ;;  %v5207_v23 = vpack.c.bf16 %v5179_v20, %v5179_v20  ;;  %v5255_v36 = vld [vmem:[#allocation8 + $0x148] sm:$0xff]  ;;  %v5257_v39 = vld [vmem:[#allocation8 + $0x158] sm:$0xff]  ;;  %v5254_v40 = vld [vmem:[#allocation8 + $0x140] sm:$0xff]  ;;  %v5180_v0 = vcombine.high %v9055_v60, %v9055_v60 }
 0x691   :  { %5487 = vmatprep.subr.bf16.mxu1 %v5231_v6  ;;  %5651 = vmatprep.subr.bf16.mxu0 %v5233_v37  ;;  %v5256_v42 = vld [vmem:[#allocation8 + $0x150] sm:$0xff]  ;;  %v5259_v43 = vld [vmem:[#allocation8 + $0x168] sm:$0xff]  ;;  %v5261_v30 = vld [vmem:[#allocation8 + $0x178] sm:$0xff] }
 0x692   :  { %5511 = vmatprep.mubr.bf16.mxu1 %v5207_v23  ;;  %5675 = vmatprep.mubr.bf16.mxu0 %v5207_v23  ;;  %v5258_v44 = vld [vmem:[#allocation8 + $0x160] sm:$0xff]  ;;  %v5260_v45 = vld [vmem:[#allocation8 + $0x170] sm:$0xff]  ;;  %v5263_v46 = vld [vmem:[#allocation8 + $0x188] sm:$0xff]  ;;  %v5209_v6 = vpack.c.bf16 %v5180_v0, %v5180_v0 }
 0x693   :  { %v5265_v47 = vld [vmem:[#allocation8 + $0x198] sm:$0xff]  ;;  %v5262_v48 = vld [vmem:[#allocation8 + $0x180] sm:$0xff]  ;;  %v5264_v49 = vld [vmem:[#allocation8 + $0x190] sm:$0xff] }
 0x694   :  { %5488 = vmatpush1.bf16.msra.mxu1 %v5230_v41  ;;  %5652 = vmatpush1.bf16.msra.mxu0 %v5232_v7  ;;  %v5267_v50 = vld [vmem:[#allocation8 + $0x1a8] sm:$0xff]  ;;  %v5269_v51 = vld [vmem:[#allocation8 + $0x1b8] sm:$0xff]  ;;  %v5266_v32 = vld [vmem:[#allocation8 + $0x1a0] sm:$0xff] }
 0x695   :  { %5489 = vmatprep.subr.bf16.mxu1 %v5235_v8  ;;  %5653 = vmatprep.subr.bf16.mxu0 %v5237_v9  ;;  %v5268_v52 = vld [vmem:[#allocation8 + $0x1b0] sm:$0xff]  ;;  %v5271_v53 = vld [vmem:[#allocation8 + $0x1c8] sm:$0xff]  ;;  %v5273_v34 = vld [vmem:[#allocation8 + $0x1d8] sm:$0xff] }
 0x696   :  { %v5270_v55 = vld [vmem:[#allocation8 + $0x1c0] sm:$0xff]  ;;  %v5272_v56 = vld [vmem:[#allocation8 + $0x1d0] sm:$0xff]  ;;  %v5275_v57 = vld [vmem:[#allocation8 + $0x1e8] sm:$0xff] }
 0x697   :  { %v5277_v59 = vld [vmem:[#allocation8 + $0x1f8] sm:$0xff]  ;;  %v5274_v61 = vld [vmem:[#allocation8 + $0x1e0] sm:$0xff]  ;;  %v5276_v58 = vld [vmem:[#allocation8 + $0x1f0] sm:$0xff] }
 0x698   :  { %5490 = vmatpush1.bf16.msra.mxu1 %v5234_v10  ;;  %5654 = vmatpush1.bf16.msra.mxu0 %v5236_v11  ;;  %v5279_v62 = vld [vmem:[#allocation8 + $0x208] sm:$0xff]  ;;  %v5281_v63 = vld [vmem:[#allocation8 + $0x218] sm:$0xff]  ;;  %v5278_v2 = vld [vmem:[#allocation8 + $0x200] sm:$0xff] }
 0x699   :  { %5491 = vmatprep.subr.bf16.mxu1 %v5239_v12  ;;  %5655 = vmatprep.subr.bf16.mxu0 %v5241_v13  ;;  %v5280_v3 = vld [vmem:[#allocation8 + $0x210] sm:$0xff]  ;;  %v5283_v4 = vld [vmem:[#allocation8 + $0x228] sm:$0xff]  ;;  %v5285_v5 = vld [vmem:[#allocation8 + $0x238] sm:$0xff] }
 0x69a   :  { %v5282_v37 = vld [vmem:[#allocation8 + $0x220] sm:$0xff]  ;;  %v5284_v41 = vld [vmem:[#allocation8 + $0x230] sm:$0xff]  ;;  %v5287_v7 = vld [vmem:[#allocation8 + $0x248] sm:$0xff] }
 0x69b   :  { %v5289_v8 = vld [vmem:[#allocation8 + $0x258] sm:$0xff]  ;;  %v5286_v9 = vld [vmem:[#allocation8 + $0x240] sm:$0xff]  ;;  %v5288_v10 = vld [vmem:[#allocation8 + $0x250] sm:$0xff] }
 0x69c   :  { %5492 = vmatpush1.bf16.msra.mxu1 %v5238_v16  ;;  %5656 = vmatpush1.bf16.msra.mxu0 %v5240_v17  ;;  %v5291_v11 = vld [vmem:[#allocation8 + $0x268] sm:$0xff]  ;;  %v5293_v12 = vld [vmem:[#allocation8 + $0x278] sm:$0xff]  ;;  %v5290_v13 = vld [vmem:[#allocation8 + $0x260] sm:$0xff] }
 0x69d   :  { %5493 = vmatprep.subr.bf16.mxu1 %v5243_v18  ;;  %5657 = vmatprep.subr.bf16.mxu0 %v5245_v19  ;;  %v5292_v14 = vld [vmem:[#allocation8 + $0x270] sm:$0xff]  ;;  %v5295_v15 = vld [vmem:[#allocation8 + $0x288] sm:$0xff]  ;;  %v5297_v16 = vld [vmem:[#allocation8 + $0x298] sm:$0xff] }
 0x69e   :  { %v5294_v17 = vld [vmem:[#allocation8 + $0x280] sm:$0xff]  ;;  %v5296_v18 = vld [vmem:[#allocation8 + $0x290] sm:$0xff]  ;;  %v5299_v19 = vld [vmem:[#allocation8 + $0x2a8] sm:$0xff] }
 0x69f   :  { %v5301_v20 = vld [vmem:[#allocation8 + $0x2b8] sm:$0xff]  ;;  %v5298_v23 = vld [vmem:[#allocation8 + $0x2a0] sm:$0xff]  ;;  %v5328_v54 = vld [vmem:[#allocation8 + $0x390] sm:$0xff] }
 0x6a0   :  { %5494 = vmatpush1.bf16.msra.mxu1 %v5242_v24  ;;  %5658 = vmatpush1.bf16.msra.mxu0 %v5244_v25  ;;  %v5300_v24 = vld [vmem:[#allocation8 + $0x2b0] sm:$0xff]  ;;  %v5303_v25 = vld [vmem:[#allocation8 + $0x2c8] sm:$0xff] }
 0x6a1   :  { %5495 = vmatprep.subr.bf16.mxu1 %v5247_v38  ;;  %5659 = vmatprep.subr.bf16.mxu0 %v5249_v26  ;;  %v5305_v38 = vld [vmem:[#allocation8 + $0x2d8] sm:$0xff]  ;;  %v5302_v26 = vld [vmem:[#allocation8 + $0x2c0] sm:$0xff]  ;;  %v5336_v0 = vld [vmem:[#allocation8 + $0x3d0] sm:$0xff] }
 0x6a4   :  { %5496 = vmatpush1.bf16.msra.mxu1 %v5246_v27  ;;  %5660 = vmatpush1.bf16.msra.mxu0 %v5248_v28  ;;  %v5304_v27 = vld [vmem:[#allocation8 + $0x2d0] sm:$0xff]  ;;  %v5307_v28 = vld [vmem:[#allocation8 + $0x2e8] sm:$0xff] }
 0x6a5   :  { %5497 = vmatprep.subr.bf16.mxu1 %v5251_v29  ;;  %5661 = vmatprep.subr.bf16.mxu0 %v5253_v31  ;;  %v5309_v29 = vld [vmem:[#allocation8 + $0x2f8] sm:$0xff]  ;;  %v5306_v31 = vld [vmem:[#allocation8 + $0x2e0] sm:$0xff] }
 0x6a8   :  { %5498 = vmatpush1.bf16.msra.mxu1 %v5250_v33  ;;  %5662 = vmatpush1.bf16.msra.mxu0 %v5252_v35  ;;  %v5308_v33 = vld [vmem:[#allocation8 + $0x2f0] sm:$0xff]  ;;  %v5311_v35 = vld [vmem:[#allocation8 + $0x308] sm:$0xff] }
 0x6a9   :  { %5499 = vmatprep.subr.bf16.mxu1 %v5255_v36  ;;  %5663 = vmatprep.subr.bf16.mxu0 %v5257_v39  ;;  %v5313_v36 = vld [vmem:[#allocation8 + $0x318] sm:$0xff]  ;;  %v5310_v39 = vld [vmem:[#allocation8 + $0x300] sm:$0xff] }
 0x6ac   :  { %5500 = vmatpush1.bf16.msra.mxu1 %v5254_v40  ;;  %5664 = vmatpush1.bf16.msra.mxu0 %v5256_v42  ;;  %v5312_v40 = vld [vmem:[#allocation8 + $0x310] sm:$0xff]  ;;  %v5315_v42 = vld [vmem:[#allocation8 + $0x328] sm:$0xff] }
 0x6ad   :  { %5501 = vmatprep.subr.bf16.mxu1 %v5259_v43  ;;  %5665 = vmatprep.subr.bf16.mxu0 %v5261_v30  ;;  %v5317_v43 = vld [vmem:[#allocation8 + $0x338] sm:$0xff]  ;;  %v5314_v30 = vld [vmem:[#allocation8 + $0x320] sm:$0xff] }
 0x6b0   :  { %5502 = vmatpush1.bf16.msra.mxu1 %v5258_v44  ;;  %5666 = vmatpush1.bf16.msra.mxu0 %v5260_v45  ;;  %v5316_v44 = vld [vmem:[#allocation8 + $0x330] sm:$0xff]  ;;  %v5319_v45 = vld [vmem:[#allocation8 + $0x348] sm:$0xff] }
 0x6b1   :  { %5503 = vmatprep.subr.bf16.mxu1 %v5263_v46  ;;  %5667 = vmatprep.subr.bf16.mxu0 %v5265_v47  ;;  %v5321_v46 = vld [vmem:[#allocation8 + $0x358] sm:$0xff]  ;;  %v5318_v47 = vld [vmem:[#allocation8 + $0x340] sm:$0xff] }
 0x6b4   :  { %5504 = vmatpush1.bf16.msra.mxu1 %v5262_v48  ;;  %5668 = vmatpush1.bf16.msra.mxu0 %v5264_v49  ;;  %v5320_v48 = vld [vmem:[#allocation8 + $0x350] sm:$0xff]  ;;  %v5323_v49 = vld [vmem:[#allocation8 + $0x368] sm:$0xff] }
 0x6b5   :  { %5505 = vmatprep.subr.bf16.mxu1 %v5267_v50  ;;  %5669 = vmatprep.subr.bf16.mxu0 %v5269_v51  ;;  %v5325_v50 = vld [vmem:[#allocation8 + $0x378] sm:$0xff]  ;;  %v5322_v51 = vld [vmem:[#allocation8 + $0x360] sm:$0xff] }
 0x6b8   :  { %5506 = vmatpush1.bf16.msra.mxu1 %v5266_v32  ;;  %5670 = vmatpush1.bf16.msra.mxu0 %v5268_v52  ;;  %v5324_v32 = vld [vmem:[#allocation8 + $0x370] sm:$0xff]  ;;  %v5327_v52 = vld [vmem:[#allocation8 + $0x388] sm:$0xff] }
 0x6b9   :  { %5507 = vmatprep.subr.bf16.mxu1 %v5271_v53  ;;  %5671 = vmatprep.subr.bf16.mxu0 %v5273_v34  ;;  %v5329_v53 = vld [vmem:[#allocation8 + $0x398] sm:$0xff]  ;;  %v5326_v34 = vld [vmem:[#allocation8 + $0x380] sm:$0xff] }
 0x6bc   :  { %5508 = vmatpush1.bf16.msra.mxu1 %v5270_v55  ;;  %5672 = vmatpush1.bf16.msra.mxu0 %v5272_v56  ;;  %v5331_v55 = vld [vmem:[#allocation8 + $0x3a8] sm:$0xff]  ;;  %v5333_v56 = vld [vmem:[#allocation8 + $0x3b8] sm:$0xff] }
 0x6bd   :  { %5509 = vmatprep.subr.bf16.mxu1 %v5275_v57  ;;  %5673 = vmatprep.subr.bf16.mxu0 %v5277_v59  ;;  %v5330_v57 = vld [vmem:[#allocation8 + $0x3a0] sm:$0xff]  ;;  %v5332_v59 = vld [vmem:[#allocation8 + $0x3b0] sm:$0xff] }
 0x6c0   :  { %5510 = vmatpush1.bf16.msra.mxu1 %v5274_v61  ;;  %5674 = vmatpush1.bf16.msra.mxu0 %v5276_v58  ;;  %v5335_v61 = vld [vmem:[#allocation8 + $0x3c8] sm:$0xff]  ;;  %v5337_v58 = vld [vmem:[#allocation8 + $0x3d8] sm:$0xff] }
 0x6c1   :  { %5520 = vmatprep.subr.bf16.mxu1 %v5279_v62  ;;  %5684 = vmatprep.subr.bf16.mxu0 %v5281_v63  ;;  %v9061_v62 = vld [vmem:[#allocation7 + $0x8] sm:$0xff]  ;;  %v5334_v63 = vld [vmem:[#allocation8 + $0x3c0] sm:$0xff] }
 0x6c3   :  { %5512 = vmatmul.mubr.bf16.vlgmr.msra.gmra.mrb[60].mxu1 %v5206_v1  ;;  %5676 = vmatmul.mubr.bf16.vlgmr.msra.gmra.mrb[84].mxu0 %v5206_v1  ;;  %v5339_v1 = vld [vmem:[#allocation8 + $0x3e8] sm:$0xff] }
 0x6c4   :  { %5521 = vmatpush1.bf16.msra.mxu1 %v5278_v2  ;;  %5685 = vmatpush1.bf16.msra.mxu0 %v5280_v3  ;;  %v5341_v2 = vld [vmem:[#allocation8 + $0x3f8] sm:$0xff]  ;;  %v9065_v3 = vrot.slane %v9061_v62, %v9013_v22 }
 0x6c5   :  { %5522 = vmatprep.subr.bf16.mxu1 %v5283_v4  ;;  %5686 = vmatprep.subr.bf16.mxu0 %v5285_v5  ;;  %v5338_v4 = vld [vmem:[#allocation8 + $0x3e0] sm:$0xff]  ;;  %v5340_v5 = vld [vmem:[#allocation8 + $0x3f0] sm:$0xff] }
 0x6c6   :  { %5552 = vmatprep.mubr.bf16.mxu1 %v5209_v6  ;;  %5716 = vmatprep.mubr.bf16.mxu0 %v5209_v6  ;;  %v5343_v6 = vld [vmem:[#allocation8 + $0x408] sm:$0xff] }
 0x6c8   :  { %5523 = vmatpush1.bf16.msra.mxu1 %v5282_v37  ;;  %5687 = vmatpush1.bf16.msra.mxu0 %v5284_v41  ;;  %v5345_v37 = vld [vmem:[#allocation8 + $0x418] sm:$0xff]  ;;  %v5196_v41 = vcombine.high %v9065_v3, %v9065_v3 }
 0x6c9   :  { %5524 = vmatprep.subr.bf16.mxu1 %v5287_v7  ;;  %5688 = vmatprep.subr.bf16.mxu0 %v5289_v8  ;;  %v5208_v7 = vpack.c.bf16 %v9055_v60, %v9055_v60  ;;  %v5342_v8 = vld [vmem:[#allocation8 + $0x400] sm:$0xff] }
 0x6ca   :  { %v5350_v60 = vld [vmem:[#allocation8 + $0x440] sm:$0xff] }
 0x6cc   :  { %5525 = vmatpush1.bf16.msra.mxu1 %v5286_v9  ;;  %5689 = vmatpush1.bf16.msra.mxu0 %v5288_v10  ;;  %v5344_v9 = vld [vmem:[#allocation8 + $0x410] sm:$0xff]  ;;  %v5347_v10 = vld [vmem:[#allocation8 + $0x428] sm:$0xff] }
 0x6cd   :  { %5526 = vmatprep.subr.bf16.mxu1 %v5291_v11  ;;  %5690 = vmatprep.subr.bf16.mxu0 %v5293_v12  ;;  %v5349_v11 = vld [vmem:[#allocation8 + $0x438] sm:$0xff]  ;;  %v5211_v12 = vpack.c.bf16 %v5196_v41, %v5196_v41  ;;  %v5398_v41 = vld [vmem:[#allocation8 + $0x5c0] sm:$0xff] }
 0x6d0   :  { %5527 = vmatpush1.bf16.msra.mxu1 %v5290_v13  ;;  %5691 = vmatpush1.bf16.msra.mxu0 %v5292_v14  ;;  %v5346_v13 = vld [vmem:[#allocation8 + $0x420] sm:$0xff]  ;;  %v5348_v14 = vld [vmem:[#allocation8 + $0x430] sm:$0xff] }
 0x6d1   :  { %5528 = vmatprep.subr.bf16.mxu1 %v5295_v15  ;;  %5692 = vmatprep.subr.bf16.mxu0 %v5297_v16  ;;  %v5351_v15 = vld [vmem:[#allocation8 + $0x448] sm:$0xff]  ;;  %v5353_v16 = vld [vmem:[#allocation8 + $0x458] sm:$0xff] }
 0x6d4   :  { %5529 = vmatpush1.bf16.msra.mxu1 %v5294_v17  ;;  %5693 = vmatpush1.bf16.msra.mxu0 %v5296_v18  ;;  %v5352_v17 = vld [vmem:[#allocation8 + $0x450] sm:$0xff]  ;;  %v5355_v18 = vld [vmem:[#allocation8 + $0x468] sm:$0xff] }
 0x6d5   :  { %5530 = vmatprep.subr.bf16.mxu1 %v5299_v19  ;;  %5694 = vmatprep.subr.bf16.mxu0 %v5301_v20  ;;  %v5357_v19 = vld [vmem:[#allocation8 + $0x478] sm:$0xff]  ;;  %v5354_v20 = vld [vmem:[#allocation8 + $0x460] sm:$0xff] }
 0x6d8   :  { %5531 = vmatpush1.bf16.msra.mxu1 %v5298_v23  ;;  %5695 = vmatpush1.bf16.msra.mxu0 %v5300_v24  ;;  %v5356_v23 = vld [vmem:[#allocation8 + $0x470] sm:$0xff]  ;;  %v5359_v24 = vld [vmem:[#allocation8 + $0x488] sm:$0xff] }
 0x6d9   :  { %5532 = vmatprep.subr.bf16.mxu1 %v5303_v25  ;;  %5696 = vmatprep.subr.bf16.mxu0 %v5305_v38  ;;  %v5361_v25 = vld [vmem:[#allocation8 + $0x498] sm:$0xff]  ;;  %v5358_v38 = vld [vmem:[#allocation8 + $0x480] sm:$0xff] }
 0x6dc   :  { %5533 = vmatpush1.bf16.msra.mxu1 %v5302_v26  ;;  %5697 = vmatpush1.bf16.msra.mxu0 %v5304_v27  ;;  %v5360_v26 = vld [vmem:[#allocation8 + $0x490] sm:$0xff]  ;;  %v5363_v27 = vld [vmem:[#allocation8 + $0x4a8] sm:$0xff] }
 0x6dd   :  { %5534 = vmatprep.subr.bf16.mxu1 %v5307_v28  ;;  %5698 = vmatprep.subr.bf16.mxu0 %v5309_v29  ;;  %v5365_v28 = vld [vmem:[#allocation8 + $0x4b8] sm:$0xff]  ;;  %v5362_v29 = vld [vmem:[#allocation8 + $0x4a0] sm:$0xff] }
 0x6e0   :  { %5535 = vmatpush1.bf16.msra.mxu1 %v5306_v31  ;;  %5699 = vmatpush1.bf16.msra.mxu0 %v5308_v33  ;;  %v5364_v31 = vld [vmem:[#allocation8 + $0x4b0] sm:$0xff]  ;;  %v5367_v33 = vld [vmem:[#allocation8 + $0x4c8] sm:$0xff] }
 0x6e1   :  { %5536 = vmatprep.subr.bf16.mxu1 %v5311_v35  ;;  %5700 = vmatprep.subr.bf16.mxu0 %v5313_v36  ;;  %v5369_v35 = vld [vmem:[#allocation8 + $0x4d8] sm:$0xff]  ;;  %v5366_v36 = vld [vmem:[#allocation8 + $0x4c0] sm:$0xff] }
 0x6e4   :  { %5537 = vmatpush1.bf16.msra.mxu1 %v5310_v39  ;;  %5701 = vmatpush1.bf16.msra.mxu0 %v5312_v40  ;;  %v5368_v39 = vld [vmem:[#allocation8 + $0x4d0] sm:$0xff]  ;;  %v5371_v40 = vld [vmem:[#allocation8 + $0x4e8] sm:$0xff] }
 0x6e5   :  { %5538 = vmatprep.subr.bf16.mxu1 %v5315_v42  ;;  %5702 = vmatprep.subr.bf16.mxu0 %v5317_v43  ;;  %v5373_v42 = vld [vmem:[#allocation8 + $0x4f8] sm:$0xff]  ;;  %v5370_v43 = vld [vmem:[#allocation8 + $0x4e0] sm:$0xff] }
 0x6e8   :  { %5539 = vmatpush1.bf16.msra.mxu1 %v5314_v30  ;;  %5703 = vmatpush1.bf16.msra.mxu0 %v5316_v44  ;;  %v5372_v30 = vld [vmem:[#allocation8 + $0x4f0] sm:$0xff]  ;;  %v5375_v44 = vld [vmem:[#allocation8 + $0x508] sm:$0xff] }
 0x6e9   :  { %5540 = vmatprep.subr.bf16.mxu1 %v5319_v45  ;;  %5704 = vmatprep.subr.bf16.mxu0 %v5321_v46  ;;  %v5377_v45 = vld [vmem:[#allocation8 + $0x518] sm:$0xff]  ;;  %v5374_v46 = vld [vmem:[#allocation8 + $0x500] sm:$0xff] }
 0x6ec   :  { %5541 = vmatpush1.bf16.msra.mxu1 %v5318_v47  ;;  %5705 = vmatpush1.bf16.msra.mxu0 %v5320_v48  ;;  %v5376_v47 = vld [vmem:[#allocation8 + $0x510] sm:$0xff]  ;;  %v5379_v48 = vld [vmem:[#allocation8 + $0x528] sm:$0xff] }
 0x6ed   :  { %5542 = vmatprep.subr.bf16.mxu1 %v5323_v49  ;;  %5706 = vmatprep.subr.bf16.mxu0 %v5325_v50  ;;  %v5381_v49 = vld [vmem:[#allocation8 + $0x538] sm:$0xff]  ;;  %v5378_v50 = vld [vmem:[#allocation8 + $0x520] sm:$0xff] }
 0x6f0   :  { %5543 = vmatpush1.bf16.msra.mxu1 %v5322_v51  ;;  %5707 = vmatpush1.bf16.msra.mxu0 %v5324_v32  ;;  %v5380_v51 = vld [vmem:[#allocation8 + $0x530] sm:$0xff]  ;;  %v5383_v32 = vld [vmem:[#allocation8 + $0x548] sm:$0xff] }
 0x6f1   :  { %5544 = vmatprep.subr.bf16.mxu1 %v5327_v52  ;;  %5708 = vmatprep.subr.bf16.mxu0 %v5329_v53  ;;  %v5385_v52 = vld [vmem:[#allocation8 + $0x558] sm:$0xff]  ;;  %v5382_v53 = vld [vmem:[#allocation8 + $0x540] sm:$0xff] }
 0x6f4   :  { %5545 = vmatpush1.bf16.msra.mxu1 %v5326_v34  ;;  %5709 = vmatpush1.bf16.msra.mxu0 %v5328_v54  ;;  %v5384_v34 = vld [vmem:[#allocation8 + $0x550] sm:$0xff]  ;;  %v5387_v54 = vld [vmem:[#allocation8 + $0x568] sm:$0xff] }
 0x6f5   :  { %5546 = vmatprep.subr.bf16.mxu1 %v5331_v55  ;;  %5710 = vmatprep.subr.bf16.mxu0 %v5333_v56  ;;  %v5389_v55 = vld [vmem:[#allocation8 + $0x578] sm:$0xff]  ;;  %v5386_v56 = vld [vmem:[#allocation8 + $0x560] sm:$0xff] }
 0x6f8   :  { %5547 = vmatpush1.bf16.msra.mxu1 %v5330_v57  ;;  %5711 = vmatpush1.bf16.msra.mxu0 %v5332_v59  ;;  %v5388_v57 = vld [vmem:[#allocation8 + $0x570] sm:$0xff]  ;;  %v5391_v59 = vld [vmem:[#allocation8 + $0x588] sm:$0xff] }
 0x6f9   :  { %5548 = vmatprep.subr.bf16.mxu1 %v5335_v61  ;;  %5712 = vmatprep.subr.bf16.mxu0 %v5337_v58  ;;  %v5393_v61 = vld [vmem:[#allocation8 + $0x598] sm:$0xff]  ;;  %v5390_v58 = vld [vmem:[#allocation8 + $0x580] sm:$0xff] }
 0x6fc   :  { %5549 = vmatpush1.bf16.msra.mxu1 %v5334_v63  ;;  %5713 = vmatpush1.bf16.msra.mxu0 %v5336_v0  ;;  %v5392_v63 = vld [vmem:[#allocation8 + $0x590] sm:$0xff]  ;;  %v5395_v0 = vld [vmem:[#allocation8 + $0x5a8] sm:$0xff] }
 0x6fd   :  { %5550 = vmatprep.subr.bf16.mxu1 %v5339_v1  ;;  %5714 = vmatprep.subr.bf16.mxu0 %v5341_v2  ;;  %v5397_v1 = vld [vmem:[#allocation8 + $0x5b8] sm:$0xff]  ;;  %v5394_v2 = vld [vmem:[#allocation8 + $0x5a0] sm:$0xff] }
 0x700   :  { %5551 = vmatpush1.bf16.msra.mxu1 %v5338_v4  ;;  %5715 = vmatpush1.bf16.msra.mxu0 %v5340_v5  ;;  %v5396_v4 = vld [vmem:[#allocation8 + $0x5b0] sm:$0xff]  ;;  %v5399_v5 = vld [vmem:[#allocation8 + $0x5c8] sm:$0xff] }
 0x701   :  { %5561 = vmatprep.subr.bf16.mxu1 %v5343_v6  ;;  %5725 = vmatprep.subr.bf16.mxu0 %v5345_v37  ;;  %v5401_v6 = vld [vmem:[#allocation8 + $0x5d8] sm:$0xff]  ;;  %v5181_v37 = vcombine.high %v9061_v62, %v9061_v62 }
 0x703   :  { %5553 = vmatmul.mubr.bf16.vlgmr.msra.gmra.mrb[60].mxu1 %v5208_v7  ;;  %5717 = vmatmul.mubr.bf16.vlgmr.msra.gmra.mrb[84].mxu0 %v5208_v7  ;;  %v5400_v7 = vld [vmem:[#allocation8 + $0x5d0] sm:$0xff] }
 0x704   :  { %5562 = vmatpush1.bf16.msra.mxu1 %v5342_v8  ;;  %5726 = vmatpush1.bf16.msra.mxu0 %v5344_v9  ;;  %v5403_v8 = vld [vmem:[#allocation8 + $0x5e8] sm:$0xff]  ;;  %v5405_v9 = vld [vmem:[#allocation8 + $0x5f8] sm:$0xff] }
 0x705   :  { %5563 = vmatprep.subr.bf16.mxu1 %v5347_v10  ;;  %5727 = vmatprep.subr.bf16.mxu0 %v5349_v11  ;;  %v9074_v10 = vrot.slane %v5181_v37, %v9013_v22  ;;  %v5402_v11 = vld [vmem:[#allocation8 + $0x5e0] sm:$0xff] }
 0x706   :  { %5593 = vmatprep.mubr.bf16.mxu1 %v5211_v12  ;;  %5757 = vmatprep.mubr.bf16.mxu0 %v5211_v12  ;;  %v5404_v12 = vld [vmem:[#allocation8 + $0x5f0] sm:$0xff]  ;;  %v5406_v22 = vld [vmem:[#allocation8 + $0x600] sm:$0xff] }
 0x707   :  { %v5197_v62 = vcombine.high %v9074_v10, %v9074_v10  ;;  %v6721_v37 = vld [vmem:[%s9211_s9 + $0x80] sm:$0xff]  }
 0x708   :  { %5564 = vmatpush1.bf16.msra.mxu1 %v5346_v13  ;;  %5728 = vmatpush1.bf16.msra.mxu0 %v5348_v14  ;;  %v5407_v13 = vld [vmem:[#allocation8 + $0x608] sm:$0xff]  ;;  %v5409_v14 = vld [vmem:[#allocation8 + $0x618] sm:$0xff] }
 0x709   :  { %5565 = vmatprep.subr.bf16.mxu1 %v5351_v15  ;;  %5729 = vmatprep.subr.bf16.mxu0 %v5353_v16  ;;  %v5210_v15 = vpack.c.bf16 %v9065_v3, %v9065_v3  ;;  %v5408_v16 = vld [vmem:[#allocation8 + $0x610] sm:$0xff]  ;;  %v5414_v3 = vld [vmem:[#allocation8 + $0x640] sm:$0xff] }
 0x70c   :  { %5566 = vmatpush1.bf16.msra.mxu1 %v5350_v60  ;;  %5730 = vmatpush1.bf16.msra.mxu0 %v5352_v17  ;;  %v5411_v60 = vld [vmem:[#allocation8 + $0x628] sm:$0xff]  ;;  %v5413_v17 = vld [vmem:[#allocation8 + $0x638] sm:$0xff] }
 0x70d   :  { %5567 = vmatprep.subr.bf16.mxu1 %v5355_v18  ;;  %5731 = vmatprep.subr.bf16.mxu0 %v5357_v19  ;;  %v5213_v18 = vpack.c.bf16 %v5197_v62, %v5197_v62  ;;  %v5410_v19 = vld [vmem:[#allocation8 + $0x620] sm:$0xff]  ;;  %v6731_v62 = vld [vmem:[%s9211_s9 + $0xd8] sm:$0xff]  }
 0x710   :  { %5568 = vmatpush1.bf16.msra.mxu1 %v5354_v20  ;;  %5732 = vmatpush1.bf16.msra.mxu0 %v5356_v23  ;;  %v5412_v20 = vld [vmem:[#allocation8 + $0x630] sm:$0xff]  ;;  %v5415_v23 = vld [vmem:[#allocation8 + $0x648] sm:$0xff] }
 0x711   :  { %5569 = vmatprep.subr.bf16.mxu1 %v5359_v24  ;;  %5733 = vmatprep.subr.bf16.mxu0 %v5361_v25  ;;  %v5417_v24 = vld [vmem:[#allocation8 + $0x658] sm:$0xff]  ;;  %v5416_v25 = vld [vmem:[#allocation8 + $0x650] sm:$0xff] }
 0x714   :  { %5570 = vmatpush1.bf16.msra.mxu1 %v5358_v38  ;;  %5734 = vmatpush1.bf16.msra.mxu0 %v5360_v26  ;;  %v5419_v38 = vld [vmem:[#allocation8 + $0x668] sm:$0xff]  ;;  %v5421_v26 = vld [vmem:[#allocation8 + $0x678] sm:$0xff] }
 0x715   :  { %5571 = vmatprep.subr.bf16.mxu1 %v5363_v27  ;;  %5735 = vmatprep.subr.bf16.mxu0 %v5365_v28  ;;  %v5418_v27 = vld [vmem:[#allocation8 + $0x660] sm:$0xff]  ;;  %v5420_v28 = vld [vmem:[#allocation8 + $0x670] sm:$0xff] }
 0x718   :  { %5572 = vmatpush1.bf16.msra.mxu1 %v5362_v29  ;;  %5736 = vmatpush1.bf16.msra.mxu0 %v5364_v31  ;;  %v5423_v29 = vld [vmem:[#allocation8 + $0x688] sm:$0xff]  ;;  %v5425_v31 = vld [vmem:[#allocation8 + $0x698] sm:$0xff] }
 0x719   :  { %5573 = vmatprep.subr.bf16.mxu1 %v5367_v33  ;;  %5737 = vmatprep.subr.bf16.mxu0 %v5369_v35  ;;  %v5422_v33 = vld [vmem:[#allocation8 + $0x680] sm:$0xff]  ;;  %v5424_v35 = vld [vmem:[#allocation8 + $0x690] sm:$0xff] }
 0x71c   :  { %5574 = vmatpush1.bf16.msra.mxu1 %v5366_v36  ;;  %5738 = vmatpush1.bf16.msra.mxu0 %v5368_v39  ;;  %v5427_v36 = vld [vmem:[#allocation8 + $0x6a8] sm:$0xff]  ;;  %v5429_v39 = vld [vmem:[#allocation8 + $0x6b8] sm:$0xff] }
 0x71d   :  { %5575 = vmatprep.subr.bf16.mxu1 %v5371_v40  ;;  %5739 = vmatprep.subr.bf16.mxu0 %v5373_v42  ;;  %v5426_v40 = vld [vmem:[#allocation8 + $0x6a0] sm:$0xff]  ;;  %v5428_v42 = vld [vmem:[#allocation8 + $0x6b0] sm:$0xff] }
 0x720   :  { %5576 = vmatpush1.bf16.msra.mxu1 %v5370_v43  ;;  %5740 = vmatpush1.bf16.msra.mxu0 %v5372_v30  ;;  %v5431_v43 = vld [vmem:[#allocation8 + $0x6c8] sm:$0xff]  ;;  %v5433_v30 = vld [vmem:[#allocation8 + $0x6d8] sm:$0xff] }
 0x721   :  { %5577 = vmatprep.subr.bf16.mxu1 %v5375_v44  ;;  %5741 = vmatprep.subr.bf16.mxu0 %v5377_v45  ;;  %v5430_v44 = vld [vmem:[#allocation8 + $0x6c0] sm:$0xff]  ;;  %v5432_v45 = vld [vmem:[#allocation8 + $0x6d0] sm:$0xff] }
 0x724   :  { %5578 = vmatpush1.bf16.msra.mxu1 %v5374_v46  ;;  %5742 = vmatpush1.bf16.msra.mxu0 %v5376_v47  ;;  %v5435_v46 = vld [vmem:[#allocation8 + $0x6e8] sm:$0xff]  ;;  %v5437_v47 = vld [vmem:[#allocation8 + $0x6f8] sm:$0xff] }
 0x725   :  { %5579 = vmatprep.subr.bf16.mxu1 %v5379_v48  ;;  %5743 = vmatprep.subr.bf16.mxu0 %v5381_v49  ;;  %v5434_v48 = vld [vmem:[#allocation8 + $0x6e0] sm:$0xff]  ;;  %v5436_v49 = vld [vmem:[#allocation8 + $0x6f0] sm:$0xff] }
 0x728   :  { %5580 = vmatpush1.bf16.msra.mxu1 %v5378_v50  ;;  %5744 = vmatpush1.bf16.msra.mxu0 %v5380_v51  ;;  %v5439_v50 = vld [vmem:[#allocation8 + $0x708] sm:$0xff]  ;;  %v5441_v51 = vld [vmem:[#allocation8 + $0x718] sm:$0xff] }
 0x729   :  { %5581 = vmatprep.subr.bf16.mxu1 %v5383_v32  ;;  %5745 = vmatprep.subr.bf16.mxu0 %v5385_v52  ;;  %v5438_v32 = vld [vmem:[#allocation8 + $0x700] sm:$0xff]  ;;  %v5440_v52 = vld [vmem:[#allocation8 + $0x710] sm:$0xff] }
 0x72c   :  { %5582 = vmatpush1.bf16.msra.mxu1 %v5382_v53  ;;  %5746 = vmatpush1.bf16.msra.mxu0 %v5384_v34  ;;  %v5443_v53 = vld [vmem:[#allocation8 + $0x728] sm:$0xff]  ;;  %v5445_v34 = vld [vmem:[#allocation8 + $0x738] sm:$0xff] }
 0x72d   :  { %5583 = vmatprep.subr.bf16.mxu1 %v5387_v54  ;;  %5747 = vmatprep.subr.bf16.mxu0 %v5389_v55  ;;  %v5442_v54 = vld [vmem:[#allocation8 + $0x720] sm:$0xff]  ;;  %v5444_v55 = vld [vmem:[#allocation8 + $0x730] sm:$0xff] }
 0x730   :  { %5584 = vmatpush1.bf16.msra.mxu1 %v5386_v56  ;;  %5748 = vmatpush1.bf16.msra.mxu0 %v5388_v57  ;;  %v5447_v56 = vld [vmem:[#allocation8 + $0x748] sm:$0xff]  ;;  %v5449_v57 = vld [vmem:[#allocation8 + $0x758] sm:$0xff] }
 0x731   :  { %5585 = vmatprep.subr.bf16.mxu1 %v5391_v59  ;;  %5749 = vmatprep.subr.bf16.mxu0 %v5393_v61  ;;  %v5446_v59 = vld [vmem:[#allocation8 + $0x740] sm:$0xff]  ;;  %v5448_v61 = vld [vmem:[#allocation8 + $0x750] sm:$0xff] }
 0x734   :  { %5586 = vmatpush1.bf16.msra.mxu1 %v5390_v58  ;;  %5750 = vmatpush1.bf16.msra.mxu0 %v5392_v63  ;;  %v5451_v58 = vld [vmem:[#allocation8 + $0x768] sm:$0xff]  ;;  %v5453_v63 = vld [vmem:[#allocation8 + $0x778] sm:$0xff] }
 0x735   :  { %5587 = vmatprep.subr.bf16.mxu1 %v5395_v0  ;;  %5751 = vmatprep.subr.bf16.mxu0 %v5397_v1  ;;  %v5450_v0 = vld [vmem:[#allocation8 + $0x760] sm:$0xff]  ;;  %v5452_v1 = vld [vmem:[#allocation8 + $0x770] sm:$0xff] }
 0x738   :  { %5588 = vmatpush1.bf16.msra.mxu1 %v5394_v2  ;;  %5752 = vmatpush1.bf16.msra.mxu0 %v5396_v4  ;;  %v6718_v2 = vld [vmem:[%s9211_s9 + $0x40] sm:$0xff]  }
 0x739   :  { %5589 = vmatprep.subr.bf16.mxu1 %v5399_v5  ;;  %5753 = vmatprep.subr.bf16.mxu0 %v5401_v6  ;;  %v6719_v4 = vld [vmem:[%s9211_s9 + $0xc0] sm:$0xff]   ;;  %v5212_v5 = vpack.c.bf16 %v9074_v10, %v9074_v10  ;;  %v6726_v10 = vld [vmem:[%s9211_s9 + $0x50] sm:$0xff]  }
 0x73a   :  { %v6720_v6 = vld [vmem:[%s9211_s9] sm:$0xff]  }
 0x73c   :  { %5590 = vmatpush1.bf16.msra.mxu1 %v5398_v41  ;;  %5754 = vmatpush1.bf16.msra.mxu0 %v5400_v7  ;;  %v6722_v41 = vld [vmem:[%s9211_s9 + $0x48] sm:$0xff]  }
 0x73d   :  { %5591 = vmatprep.subr.bf16.mxu1 %v5403_v8  ;;  %5755 = vmatprep.subr.bf16.mxu0 %v5405_v9  ;;  %v6723_v7 = vld [vmem:[%s9211_s9 + $0xc8] sm:$0xff]  }
 0x73e   :  { %v6724_v8 = vld [vmem:[%s9211_s9 + $0x8] sm:$0xff]  }
 0x73f   :  { %v6725_v9 = vld [vmem:[%s9211_s9 + $0x88] sm:$0xff]  }
 0x740   :  { %5592 = vmatpush1.bf16.msra.mxu1 %v5402_v11  ;;  %5756 = vmatpush1.bf16.msra.mxu0 %v5404_v12  ;;  %v6727_v11 = vld [vmem:[%s9211_s9 + $0xd0] sm:$0xff]  }
 0x741   :  { %5602 = vmatprep.subr.bf16.mxu1 %v5407_v13  ;;  %5766 = vmatprep.subr.bf16.mxu0 %v5409_v14  ;;  %v6728_v12 = vld [vmem:[%s9211_s9 + $0x10] sm:$0xff]   ;;  %v6730_v14 = vld [vmem:[%s9211_s9 + $0x58] sm:$0xff]  }
 0x742   :  { %v6729_v13 = vld [vmem:[%s9211_s9 + $0x90] sm:$0xff]  }
 0x743   :  { %5594 = vmatmul.mubr.bf16.vlgmr.msra.gmra.mrb[60].mxu1 %v5210_v15  ;;  %5758 = vmatmul.mubr.bf16.vlgmr.msra.gmra.mrb[84].mxu0 %v5210_v15  ;;  %v6732_v15 = vld [vmem:[%s9211_s9 + $0x18] sm:$0xff]  }
 0x744   :  { %5603 = vmatpush1.bf16.msra.mxu1 %v5406_v22  ;;  %5767 = vmatpush1.bf16.msra.mxu0 %v5408_v16  ;;  %v6733_v22 = vld [vmem:[%s9211_s9 + $0x98] sm:$0xff]   ;;  %v6734_v16 = vld [vmem:[%s9211_s9 + $0x60] sm:$0xff]  }
 0x745   :  { %5604 = vmatprep.subr.bf16.mxu1 %v5411_v60  ;;  %5768 = vmatprep.subr.bf16.mxu0 %v5413_v17  ;;  %v6735_v60 = vld [vmem:[%s9211_s9 + $0xe0] sm:$0xff]  }
 0x746   :  { %6315 = vmatprep.mubr.msk.bf16.mxu1 %vm4008_vm12, %v5213_v18  ;;  %6316 = vmatprep.mubr.msk.bf16.mxu0 %vm4008_vm12, %v5213_v18  ;;  %v6736_v17 = vld [vmem:[%s9211_s9 + $0x20] sm:$0xff]  }
 0x747   :  { %v6737_v18 = vld [vmem:[%s9211_s9 + $0xa0] sm:$0xff]  }
 0x748   :  { %5605 = vmatpush1.bf16.msra.mxu1 %v5410_v19  ;;  %5769 = vmatpush1.bf16.msra.mxu0 %v5412_v20  ;;  %v6738_v19 = vld [vmem:[%s9211_s9 + $0x68] sm:$0xff]  }
 0x749   :  { %5606 = vmatprep.subr.bf16.mxu1 %v5415_v23  ;;  %5770 = vmatprep.subr.bf16.mxu0 %v5417_v24  ;;  %v6739_v20 = vld [vmem:[%s9211_s9 + $0xe8] sm:$0xff]  }
 0x74a   :  { %v6740_v23 = vld [vmem:[%s9211_s9 + $0x28] sm:$0xff]  }
 0x74b   :  { %v6741_v24 = vld [vmem:[%s9211_s9 + $0xa8] sm:$0xff]  }
 0x74c   :  { %5607 = vmatpush1.bf16.msra.mxu1 %v5414_v3  ;;  %5771 = vmatpush1.bf16.msra.mxu0 %v5416_v25  ;;  %v6742_v3 = vld [vmem:[%s9211_s9 + $0x70] sm:$0xff]  }
 0x74d   :  { %5608 = vmatprep.subr.bf16.mxu1 %v5419_v38  ;;  %5772 = vmatprep.subr.bf16.mxu0 %v5421_v26  ;;  %v6743_v25 = vld [vmem:[%s9211_s9 + $0xf0] sm:$0xff]  }
 0x74e   :  { %v6744_v38 = vld [vmem:[%s9211_s9 + $0x30] sm:$0xff]  }
 0x74f   :  { %v6745_v26 = vld [vmem:[%s9211_s9 + $0xb0] sm:$0xff]  }
 0x750   :  { %5609 = vmatpush1.bf16.msra.mxu1 %v5418_v27  ;;  %5773 = vmatpush1.bf16.msra.mxu0 %v5420_v28  ;;  %v6746_v27 = vld [vmem:[%s9211_s9 + $0x78] sm:$0xff]  }
 0x751   :  { %5610 = vmatprep.subr.bf16.mxu1 %v5423_v29  ;;  %5774 = vmatprep.subr.bf16.mxu0 %v5425_v31  ;;  %v6747_v28 = vld [vmem:[%s9211_s9 + $0xf8] sm:$0xff]  }
 0x752   :  { %v6748_v29 = vld [vmem:[%s9211_s9 + $0x38] sm:$0xff]  }
 0x753   :  { %v6749_v31 = vld [vmem:[%s9211_s9 + $0xb8] sm:$0xff]  }
 0x754   :  { %5611 = vmatpush1.bf16.msra.mxu1 %v5422_v33  ;;  %5775 = vmatpush1.bf16.msra.mxu0 %v5424_v35  ;;  %v5458_v33 = vsub.s32 0, %v9008_v21  ;;  %v5466_v35 = vsub.s32 2, %v9008_v21 }
 0x755   :  { %5612 = vmatprep.subr.bf16.mxu1 %v5427_v36  ;;  %5776 = vmatprep.subr.bf16.mxu0 %v5429_v39  ;;  %v5454_v36 = vld [vmem:[%s9210_s8] sm:$0xf]  ;;  %v5462_v39 = vsub.s32 1, %v9008_v21 }
 0x758   :  { %5613 = vmatpush1.bf16.msra.mxu1 %v5426_v40  ;;  %5777 = vmatpush1.bf16.msra.mxu0 %v5428_v42  ;;  %v5470_v40 = vsub.s32 3, %v9008_v21  ;;  %v5459_v42 = vrot.slane %v5454_v36, %v5458_v33 }
 0x759   :  { %5614 = vmatprep.subr.bf16.mxu1 %v5431_v43  ;;  %5778 = vmatprep.subr.bf16.mxu0 %v5433_v30  ;;  %v5467_v43 = vrot.slane %v5454_v36, %v5466_v35  ;;  %v5463_v30 = vrot.slane %v5454_v36, %v5462_v39 }
 0x75c   :  { %5615 = vmatpush1.bf16.msra.mxu1 %v5430_v44  ;;  %5779 = vmatpush1.bf16.msra.mxu0 %v5432_v45  ;;  %v5471_v44 = vrot.slane %v5454_v36, %v5470_v40 }
 0x75d   :  { %5616 = vmatprep.subr.bf16.mxu1 %v5435_v46  ;;  %5780 = vmatprep.subr.bf16.mxu0 %v5437_v47 }
 0x760   :  { %5617 = vmatpush1.bf16.msra.mxu1 %v5434_v48  ;;  %5781 = vmatpush1.bf16.msra.mxu0 %v5436_v49 }
 0x761   :  { %5618 = vmatprep.subr.bf16.mxu1 %v5439_v50  ;;  %5782 = vmatprep.subr.bf16.mxu0 %v5441_v51 }
 0x764   :  { %5619 = vmatpush1.bf16.msra.mxu1 %v5438_v32  ;;  %5783 = vmatpush1.bf16.msra.mxu0 %v5440_v52 }
 0x765   :  { %5620 = vmatprep.subr.bf16.mxu1 %v5443_v53  ;;  %5784 = vmatprep.subr.bf16.mxu0 %v5445_v34 }
 0x768   :  { %5621 = vmatpush1.bf16.msra.mxu1 %v5442_v54  ;;  %5785 = vmatpush1.bf16.msra.mxu0 %v5444_v55 }
 0x769   :  { %5622 = vmatprep.subr.bf16.mxu1 %v5447_v56  ;;  %5786 = vmatprep.subr.bf16.mxu0 %v5449_v57 }
 0x76c   :  { %5623 = vmatpush1.bf16.msra.mxu1 %v5446_v59  ;;  %5787 = vmatpush1.bf16.msra.mxu0 %v5448_v61 }
 0x76d   :  { %5624 = vmatprep.subr.bf16.mxu1 %v5451_v58  ;;  %5788 = vmatprep.subr.bf16.mxu0 %v5453_v63 }
 0x770   :  { %5625 = vmatpush1.bf16.msra.mxu1 %v5450_v0  ;;  %5789 = vmatpush1.bf16.msra.mxu0 %v5452_v1 }
 0x771   :  { %6466 = vmatprep.subr.bf16.mxu1 %v6718_v2  ;;  %6488 = vmatprep.subr.bf16.mxu0 %v6719_v4  ;;  %v6317_v2 = vld [vmem:[%s9212_s10] ss:$0 sm:$0xff] }
 0x773   :  { %5635 = vmatmul.mubr.bf16.vlgmr.msra.gmra.mrb[60].mxu1 %v5212_v5  ;;  %5799 = vmatmul.mubr.bf16.vlgmr.msra.gmra.mrb[84].mxu0 %v5212_v5 }
 0x774   :  { %6467 = vmatpush3.bf16.msra.mxu1 %v6720_v6  ;;  %6489 = vmatpush3.bf16.msra.mxu0 %v6721_v37 }
 0x775   :  { %6468 = vmatprep.subr.bf16.mxu1 %v6722_v41  ;;  %6490 = vmatprep.subr.bf16.mxu0 %v6723_v7 }
 0x778   :  { %6469 = vmatpush3.bf16.msra.mxu1 %v6724_v8  ;;  %6491 = vmatpush3.bf16.msra.mxu0 %v6725_v9 }
 0x779   :  { %6470 = vmatprep.subr.bf16.mxu1 %v6726_v10  ;;  %6492 = vmatprep.subr.bf16.mxu0 %v6727_v11 }
 0x77c   :  { %6471 = vmatpush3.bf16.msra.mxu1 %v6728_v12  ;;  %6493 = vmatpush3.bf16.msra.mxu0 %v6729_v13 }
 0x77d   :  { %6472 = vmatprep.subr.bf16.mxu1 %v6730_v14  ;;  %6494 = vmatprep.subr.bf16.mxu0 %v6731_v62 }
 0x780   :  { %6473 = vmatpush3.bf16.msra.mxu1 %v6732_v15  ;;  %6495 = vmatpush3.bf16.msra.mxu0 %v6733_v22 }
 0x781   :  { %6474 = vmatprep.subr.bf16.mxu1 %v6734_v16  ;;  %6496 = vmatprep.subr.bf16.mxu0 %v6735_v60 }
 0x784   :  { %6475 = vmatpush3.bf16.msra.mxu1 %v6736_v17  ;;  %6497 = vmatpush3.bf16.msra.mxu0 %v6737_v18 }
 0x785   :  { %6476 = vmatprep.subr.bf16.mxu1 %v6738_v19  ;;  %6498 = vmatprep.subr.bf16.mxu0 %v6739_v20 }
 0x788   :  { %6477 = vmatpush3.bf16.msra.mxu1 %v6740_v23  ;;  %6499 = vmatpush3.bf16.msra.mxu0 %v6741_v24 }
 0x789   :  { %6478 = vmatprep.subr.bf16.mxu1 %v6742_v3  ;;  %6500 = vmatprep.subr.bf16.mxu0 %v6743_v25 }
 0x78c   :  { %6479 = vmatpush3.bf16.msra.mxu1 %v6744_v38  ;;  %6501 = vmatpush3.bf16.msra.mxu0 %v6745_v26 }
 0x78d   :  { %6480 = vmatprep.subr.bf16.mxu1 %v6746_v27  ;;  %6502 = vmatprep.subr.bf16.mxu0 %v6747_v28 }
 0x790   :  { %6481 = vmatpush3.bf16.msra.mxu1 %v6748_v29  ;;  %6503 = vmatpush3.bf16.msra.mxu0 %v6749_v31 }
 0x846   :  { %v5636_v45 = vpop.f32.mrb[60].mxu1  ;;  %v5800_v46 = vpop.f32.mrb[84].mxu0 }
 0x847   :  { %v6546_v47 = vadd.f32 %v5636_v45, %v5459_v42  ;;  %v6548_v48 = vadd.f32 %v5800_v46, %v5467_v43  ;;  %v5638_v49 = vpop.f32.mrb[61].mxu1  ;;  %v5802_v50 = vpop.f32.mrb[85].mxu0 }
 0x848   :  { %v6547_v51 = vadd.f32 %v5638_v49, %v5463_v30  ;;  %v6549_v32 = vadd.f32 %v5802_v50, %v5471_v44  ;;  %v5640_v52 = vpop.f32.mrb[62].mxu1  ;;  %v5804_v53 = vpop.f32.mrb[86].mxu0 }
 0x849   :  { %v5807_v34 = vmax.f32 %v6546_v47, 0.0  ;;  %v5809_v54 = vmax.f32 %v6548_v48, 0.0  ;;  %v5641_v55 = vpop.f32.mrb[63].mxu1  ;;  %v5805_v56 = vpop.f32.mrb[87].mxu0 }
 0x84a   :  { %v5808_v57 = vmax.f32 %v6547_v51, 0.0  ;;  %v5810_v21 = vmax.f32 %v6549_v32, 0.0 }
 0x84b   :  { %v5811_v58 = vpack.c.bf16 %v5807_v34, %v5807_v34  ;;  %v5813_v63 = vpack.c.bf16 %v5809_v54, %v5809_v54 }
 0x84c   :  { %v5812_v59 = vpack.c.bf16 %v5808_v57, %v5808_v57  ;;  %v5814_v61 = vpack.c.bf16 %v5810_v21, %v5810_v21 }
 0x84e   :  { %6110 = vmatprep.mubr.bf16.mxu1 %v5812_v59  ;;  %6150 = vmatprep.mubr.bf16.mxu0 %v5814_v61 }
 0x84f   :  { %6111 = vmatmul.mubr.bf16.vlgmr.msra.gmra.mrb[64].mxu1 %v5811_v58  ;;  %6151 = vmatmul.mubr.bf16.vlgmr.msra.gmra.mrb[88].mxu0 %v5813_v63 }
 0x922   :  { %v6482_v0 = vpop.f32.mrb[64].mxu1  ;;  %v6504_v1 = vpop.f32.mrb[88].mxu0 }
 0x923   :  { %v6483_v4 = vpop.f32.mrb[65].mxu1  ;;  %v6505_v5 = vpop.f32.mrb[89].mxu0 }
 0x924   :  { %v6484_v6 = vadd.f32 %v6483_v4, %v6482_v0  ;;  %v6506_v37 = vadd.f32 %v6505_v5, %v6504_v1  ;;  %v6485_v41 = vpop.f32.mrb[66].mxu1  ;;  %v6507_v7 = vpop.f32.mrb[90].mxu0 }
 0x925   :  { %v6486_v8 = vpop.f32.mrb[67].mxu1  ;;  %v6508_v9 = vpop.f32.mrb[91].mxu0 }
 0x926   :  { %v6113_v10 = vadd.f32 %v6484_v6, %v6317_v2 }
 0x928   :  { %v6153_v11 = vadd.f32 %v6506_v37, %v6113_v10 }
 0x92a   :  { %6158 = vst [vmem:[#allocation10] sm:$0x3] %v6153_v11 }
 0x92b   :  { %6761 = shalt.err (!%p6758_p4)
}
 0x92c   :  { %s6762_s29 = scalar_lea.hbm %s9213_s11, 32 }
 0x92d   :  { %p6763_p5 = scmp.ne.s32.totalorder %s9213_s11, %s6762_s29  ;;  %p6766_p6 = scmp.lt.u32.totalorder %s6762_s29, %s9213_s11 }
 0x92f   :  { %p6768_p7 = pnand %p6766_p6, %p6763_p5 }
 0x931   :  { %6771 = shalt.err (!%p6768_p7)
}
 0x932   :  { %6168 = dma.vmem_to_hbm [thread:$0]  %s6166_s27, 32, %s9213_s11, [#allocation11]  }
 0x933   :  { %6774 = dma.done.wait [#allocation11], 32  }
 0x934   :  { %6775 = vsyncadd [#allocation11], 4294967264 }
 0x935   :  { %6172 = vsyncpa [#allocation11], 1 }
 0x936   :  { %6173 = vsyncmov [#allocation9] }
 0x939   :  { %s6174_s3 = vpop.sfrf %6173 }
 0x93a   :  { %p6350_p8 = scmp.ne.s32.totalorder %s6174_s3, 0 }
 0x93c   :  { %6178 = shalt.err (%p6350_p8)  }

</bundles_post_ra>
